<compile_context>
chip_gen: v7x
topology: tpu7x:2x2x1
jax: 0.10.0
libtpu: 0.0.40
codegen_flags: <defaults>
</compile_context>

<pallas_src>
import functools

import jax
import jax.numpy as jnp
from jax.experimental import pallas as pl
from jax.experimental.pallas import tpu as pltpu

EPS = 1e-5
LANE = 128


def _round_up(v, m):
    return (v + m - 1) // m * m


def _vmem_limit_bytes():
    """Generation-aware scoped-VMEM limit (<= 3/4 of physical, capped at 96 MiB)."""
    try:
        cap = int(getattr(pltpu.get_tpu_info(), "vmem_capacity_bytes", 128 << 20))
    except Exception:
        cap = 128 << 20
    return int(min(max(cap * 3 // 4, 16 << 20), 96 << 20))


def _pick_images_per_block(n, h, w, cmax, vmem_limit):
    """Largest divisor of n that fits the VMEM budget and keeps >= 2 grid steps (2 TCs)."""
    budget = vmem_limit // 4                 # headroom for double buffering + weights
    per_image = 3 * h * w * cmax * 4         # input + acc + output, f32 upper bound
    nb = 1
    for cand in range(1, n + 1):
        if n % cand:
            continue
        if cand * per_image > budget:
            continue
        if n >= 2 and n // cand < 2:
            continue
        nb = cand
    return nb


# --------------------------------------------------------------------------------------
# Kernel A: conv3x3 (valid, dilated, 9-tap shift-and-accumulate) -> +bias -> ReLU,
#           plus per-block per-channel [sum, sum_sq] statistics for the following BN.
# --------------------------------------------------------------------------------------
def _conv_relu_stats_kernel(x_ref, w_ref, b_ref, a_ref, st_ref, *,
                            nb, h, w, dilation, compute_dtype):
    ho = h - 2 * dilation
    wo = w - 2 * dilation
    ci = x_ref.shape[-1]
    cp = w_ref.shape[-1]

    # (nb, h*w, ci) flat slab -> (nb, h, w, ci) spatial view (single in-kernel relayout).
    x = x_ref[...].astype(compute_dtype).reshape(nb, h, w, ci)

    acc = jnp.zeros((nb * ho * wo, cp), jnp.float32)
    for kh in range(3):
        for kw in range(3):
            r0 = kh * dilation
            c0 = kw * dilation
            tap = x[:, r0:r0 + ho, c0:c0 + wo, :].reshape(nb * ho * wo, ci)
            acc = acc + jnp.dot(tap, w_ref[kh * 3 + kw],
                                preferred_element_type=jnp.float32)

    a = jnp.maximum(acc + b_ref[...], 0.0)                  # f32 (nb*ho*wo, cp)

    # Lane-dense store (cp is a multiple of 128); trivial reshape when nb == 1.
    a_ref[...] = a.reshape(nb, ho * wo, cp).astype(a_ref.dtype)

    # BN partial statistics (f32, computed on the pre-cast activations).
    st_ref[0] = jnp.concatenate(
        [jnp.sum(a, axis=0, keepdims=True),
         jnp.sum(a * a, axis=0, keepdims=True)], axis=0)    # (2, cp)


# --------------------------------------------------------------------------------------
# Kernel B: final BatchNorm normalize (per-channel scale/shift), elementwise, lane-dense.
# --------------------------------------------------------------------------------------
def _affine_kernel(x_ref, s_ref, t_ref, o_ref):
    o_ref[...] = (x_ref[...].astype(jnp.float32) * s_ref[...]
                  + t_ref[...]).astype(o_ref.dtype)


# --------------------------------------------------------------------------------------
# Wrappers
# --------------------------------------------------------------------------------------
def _conv_relu_stats(x_flat, w_taps, bias, *, h, w, dilation, nb,
                     compute_dtype, store_dtype, vmem_limit):
    """One sublayer minus its BN normalize: relu(conv(x) + b) and [sum, sum_sq] stats."""
    n, hw, ci = x_flat.shape
    cp = w_taps.shape[-1]
    ho = h - 2 * dilation
    wo = w - 2 * dilation
    nblk = n // nb

    grid_spec = pltpu.PrefetchScalarGridSpec(
        num_scalar_prefetch=0,
        grid=(nblk,),
        in_specs=[
            pl.BlockSpec((nb, hw, ci), lambda i: (i, 0, 0)),        # activation slab
            pl.BlockSpec((9, w_taps.shape[1], cp), lambda i: (0, 0, 0)),  # taps (resident)
            pl.BlockSpec((1, cp), lambda i: (0, 0)),                # bias (resident)
        ],
        out_specs=[
            pl.BlockSpec((nb, ho * wo, cp), lambda i: (i, 0, 0)),   # lane-dense output
            pl.BlockSpec((1, 2, cp), lambda i: (i, 0, 0)),          # per-block stats
        ],
    )
    a, st = pl.pallas_call(
        functools.partial(_conv_relu_stats_kernel, nb=nb, h=h, w=w,
                          dilation=dilation, compute_dtype=compute_dtype),
        out_shape=(jax.ShapeDtypeStruct((n, ho * wo, cp), store_dtype),
                   jax.ShapeDtypeStruct((nblk, 2, cp), jnp.float32)),
        grid_spec=grid_spec,
        compiler_params=pltpu.CompilerParams(
            dimension_semantics=("parallel",),
            vmem_limit_bytes=vmem_limit),
    )(x_flat, w_taps, bias)
    return a, st


def _bn_scale_shift(st, count, gamma, beta):
    """Per-block [sum, sum_sq] partial stats -> per-channel BN (scale, shift)."""
    sums = jnp.sum(st[:, 0, :], axis=0)
    sumsq = jnp.sum(st[:, 1, :], axis=0)
    mean = sums / count
    var = jnp.maximum(sumsq / count - mean * mean, 0.0)     # biased variance (training mode)
    inv = jax.lax.rsqrt(var + EPS)
    s = gamma * inv
    t = beta - mean * s
    return s, t                                             # (cp,), (cp,)


def unet_layer_pallas_nhwc(x_nhwc, params, *, dilation=1, compute_dtype=jnp.bfloat16):
    """NHWC entry point (preferred: avoids HBM-level layout transposes)."""
    w1, b1, g1, be1, w2, b2, g2, be2 = params
    n, h, w, cin = x_nhwc.shape
    cout = int(w1.shape[0])
    cp = max(_round_up(cout, LANE), LANE)
    d = dilation
    ho1, wo1 = h - 2 * d, w - 2 * d
    ho2, wo2 = ho1 - 2 * d, wo1 - 2 * d

    store_dtype = (jnp.bfloat16 if jnp.dtype(compute_dtype) == jnp.dtype(jnp.bfloat16)
                   else jnp.float32)
    vmem_limit = _vmem_limit_bytes()
    nb = _pick_images_per_block(n, h, w, max(cin, cp), vmem_limit)

    # (Co, Ci, 3, 3) -> (9, Ci, Co), zero-padded to (9, ci_pad, cp).
    def taps(wt, ci_pad):
        co, ci = int(wt.shape[0]), int(wt.shape[1])
        t = jnp.transpose(wt, (2, 3, 1, 0)).reshape(9, ci, co).astype(jnp.float32)
        return jnp.pad(t, ((0, 0), (0, ci_pad - ci), (0, cp - co)))

    def padc(v):
        return jnp.pad(v.astype(jnp.float32), (0, cp - cout))

    w1t = taps(w1, cin)                      # (9, cin, cp)
    w2t = taps(w2, cp)                       # (9, cp,  cp)  (padded input rows are zero)
    b1p = padc(b1).reshape(1, cp)
    b2p = padc(b2)
    g1p, be1p = padc(g1), padc(be1)
    g2p, be2p = padc(g2), padc(be2)

    x_flat = x_nhwc.reshape(n, h * w, cin)   # flat NHWC rows, channels on lanes

    # Sublayer 1: conv -> ReLU (+ BN1 partial statistics).
    a1, st1 = _conv_relu_stats(x_flat, w1t.astype(compute_dtype), b1p,
                               h=h, w=w, dilation=d, nb=nb,
                               compute_dtype=compute_dtype, store_dtype=store_dtype,
                               vmem_limit=vmem_limit)
    s1, t1 = _bn_scale_shift(st1, n * ho1 * wo1, g1p, be1p)

    # Fold BN1 (y = a1*s1 + t1) into conv2's weights/bias (exact for 'valid' padding):
    #   conv2(a1*s1 + t1) = conv2_{w*s1}(a1) + sum_taps(w2 @ t1)
    w2f = w2t * s1[None, :, None]
    b2f = (b2p + jnp.einsum('tic,i->c', w2t, t1)).reshape(1, cp)

    # Sublayer 2: conv (BN1 pre-folded) -> ReLU (+ BN2 partial statistics).
    a2, st2 = _conv_relu_stats(a1, w2f.astype(compute_dtype), b2f,
                               h=ho1, w=wo1, dilation=d, nb=nb,
                               compute_dtype=compute_dtype, store_dtype=store_dtype,
                               vmem_limit=vmem_limit)
    s2, t2 = _bn_scale_shift(st2, n * ho2 * wo2, g2p, be2p)

    # Final BN2 normalize (elementwise, lane-dense blocks, parallel over batch blocks).
    nblk = n // nb
    grid_spec = pltpu.PrefetchScalarGridSpec(
        num_scalar_prefetch=0,
        grid=(nblk,),
        in_specs=[
            pl.BlockSpec((nb, ho2 * wo2, cp), lambda i: (i, 0, 0)),
            pl.BlockSpec((1, cp), lambda i: (0, 0)),
            pl.BlockSpec((1, cp), lambda i: (0, 0)),
        ],
        out_specs=pl.BlockSpec((nb, ho2 * wo2, cp), lambda i: (i, 0, 0)),
    )
    out_flat = pl.pallas_call(
        _affine_kernel,
        out_shape=jax.ShapeDtypeStruct((n, ho2 * wo2, cp), jnp.float32),
        grid_spec=grid_spec,
        compiler_params=pltpu.CompilerParams(
            dimension_semantics=("parallel",),
            vmem_limit_bytes=vmem_limit),
    )(a2, s2.reshape(1, cp), t2.reshape(1, cp))

    # Strip lane padding and restore spatial layout (cheap boundary-level XLA ops).
    return out_flat.reshape(n, ho2, wo2, cp)[:, :, :, :cout]


def unet_layer_pallas(x_nchw, params, *, dilation=1, compute_dtype=jnp.bfloat16):
    """PyTorch-layout (NCHW) wrapper. Keep the model NHWC end-to-end to skip the transposes."""
    x = jnp.transpose(x_nchw, (0, 2, 3, 1))
    out = unet_layer_pallas_nhwc(x, params, dilation=dilation, compute_dtype=compute_dtype)
    return jnp.transpose(out, (0, 3, 1, 2))


# ----------------------------- reference (pure JAX, f32) -----------------------------
def unet_layer_ref(x_nchw, params, *, dilation=1):
    w1, b1, g1, be1, w2, b2, g2, be2 = params
    x = jnp.transpose(x_nchw, (0, 2, 3, 1)).astype(jnp.float32)

    def conv(a, wt, b):
        wk = jnp.transpose(wt, (2, 3, 1, 0)).astype(jnp.float32)  # HWIO
        y = jax.lax.conv_general_dilated(
            a, wk, window_strides=(1, 1), padding='VALID',
            rhs_dilation=(dilation, dilation),
            dimension_numbers=('NHWC', 'HWIO', 'NHWC'),
            preferred_element_type=jnp.float32)
        return y + b.reshape(1, 1, 1, -1).astype(jnp.float32)

    def bn(a, gamma, beta):
        mean = jnp.mean(a, axis=(0, 1, 2), keepdims=True)
        var = jnp.mean(jnp.square(a - mean), axis=(0, 1, 2), keepdims=True)
        return (a - mean) * jax.lax.rsqrt(var + EPS) * gamma.reshape(1, 1, 1, -1) \
               + beta.reshape(1, 1, 1, -1)

    hh = bn(jnp.maximum(conv(x, w1, b1), 0.0), g1, be1)
    o = bn(jnp.maximum(conv(hh, w2, b2), 0.0), g2, be2)
    return jnp.transpose(o, (0, 3, 1, 2))


if __name__ == "__main__":
    N, Cin, Cout, H, W = 2, 4, 8, 16, 16
    dilation = 1

    key = jax.random.PRNGKey(0)
    kx, k1, k2, k3, k4 = jax.random.split(key, 5)

    x = jax.random.normal(kx, (N, Cin, H, W), jnp.float32)

    # Deterministic parameter init (PyTorch-like scales; BN affine at init values).
    w1 = jax.random.normal(k1, (Cout, Cin, 3, 3), jnp.float32) * 0.1
    b1 = jax.random.normal(k2, (Cout,), jnp.float32) * 0.1
    g1 = jnp.ones((Cout,), jnp.float32)
    be1 = jnp.zeros((Cout,), jnp.float32)
    w2 = jax.random.normal(k3, (Cout, Cout, 3, 3), jnp.float32) * 0.1
    b2 = jax.random.normal(k4, (Cout,), jnp.float32) * 0.1
    g2 = jnp.ones((Cout,), jnp.float32)
    be2 = jnp.zeros((Cout,), jnp.float32)

    params = (w1, b1, g1, be1, w2, b2, g2, be2)
    expected_shape = (N, Cout, H - 4 * dilation, W - 4 * dilation)

    ref = jax.block_until_ready(unet_layer_ref(x, params, dilation=dilation))

    # 1) f32 path: tight check against the pure-f32 reference (BN folding is exact).
    fn_f32 = jax.jit(functools.partial(unet_layer_pallas,
                                       dilation=dilation, compute_dtype=jnp.float32))
    out_f32 = jax.block_until_ready(fn_f32(x, params))
    assert out_f32.shape == expected_shape, out_f32.shape
    err_f32 = float(jnp.max(jnp.abs(out_f32 - ref)))
    assert err_f32 < 5e-4, err_f32

    # 2) bf16 fast path (bf16 MXU operands + bf16 HBM activations, f32 accumulation/BN):
    #    loose sanity check against the exact f32 reference.
    fn_bf16 = jax.jit(functools.partial(unet_layer_pallas,
                                        dilation=dilation, compute_dtype=jnp.bfloat16))
    out_bf16 = jax.block_until_ready(fn_bf16(x, params))
    assert out_bf16.shape == expected_shape, out_bf16.shape
    err_bf16 = float(jnp.max(jnp.abs(out_bf16 - ref)))
    assert err_bf16 < 1.5e-1, err_bf16

    print("KERNEL_OK")
</pallas_src>

<mosaic_0001>
module attributes {stable_mosaic.version = 11 : i64} {
  func.func @_conv_relu_stats_kernel(%arg0: i32, %arg1: memref<1x256x4xf32, #tpu.memory_space<vmem>>, %arg2: memref<9x4x128xf32, #tpu.memory_space<vmem>>, %arg3: memref<1x128xf32, #tpu.memory_space<vmem>>, %arg4: memref<1x196x128xf32, #tpu.memory_space<vmem>>, %arg5: memref<1x2x128xf32, #tpu.memory_space<vmem>>) attributes {dimension_semantics = [#tpu.dimension_semantics<parallel>], iteration_bounds = array<i64: 2>, scalar_prefetch = 0 : i64, scratch_operands = 0 : i64, tpu.core_type = #tpu.core_type<tc>, window_params = [{transform_indices = @transform_0, window_bounds = array<i64: 1, 256, 4>}, {pipeline_mode = #tpu.pipeline_mode<synchronous>, transform_indices = @transform_1, window_bounds = array<i64: 9, 4, 128>}, {pipeline_mode = #tpu.pipeline_mode<synchronous>, transform_indices = @transform_2, window_bounds = array<i64: 1, 128>}, {transform_indices = @transform_3, window_bounds = array<i64: 1, 196, 128>}, {transform_indices = @transform_4, window_bounds = array<i64: 1, 2, 128>}]} {
    %c0 = arith.constant 0 : index
    %c0_0 = arith.constant 0 : index
    %c0_1 = arith.constant 0 : index
    %0 = vector.load %arg1[%c0, %c0_0, %c0_1] : memref<1x256x4xf32, #tpu.memory_space<vmem>>, vector<1x256x4xf32>
    %1 = vector.shape_cast %0 : vector<1x256x4xf32> to vector<1x16x16x4xf32>
    %cst = arith.constant 0.000000e+00 : f32
    %2 = vector.broadcast %cst : f32 to vector<196x128xf32>
    %3 = vector.extract_strided_slice %1 {offsets = [0, 0, 0, 0], sizes = [1, 14, 14, 4], strides = [1, 1, 1, 1]} : vector<1x16x16x4xf32> to vector<1x14x14x4xf32>
    %4 = vector.shape_cast %3 : vector<1x14x14x4xf32> to vector<196x4xf32>
    %c0_2 = arith.constant 0 : index
    %c0_3 = arith.constant 0 : index
    %c0_4 = arith.constant 0 : index
    %5 = vector.load %arg2[%c0_2, %c0_3, %c0_4] : memref<9x4x128xf32, #tpu.memory_space<vmem>>, vector<1x4x128xf32>
    %6 = vector.shape_cast %5 : vector<1x4x128xf32> to vector<4x128xf32>
    %cst_5 = arith.constant dense<0.000000e+00> : vector<196x128xf32>
    %7 = tpu.matmul %4, %6, %cst_5 {dimension_numbers = #tpu.dot_dimension_numbers<[1], [0], [0], [1], [0, 0, 1, 1], [], []>} : vector<196x4xf32>, vector<4x128xf32>, vector<196x128xf32> -> vector<196x128xf32>
    %8 = arith.addf %2, %7 : vector<196x128xf32>
    %9 = vector.extract_strided_slice %1 {offsets = [0, 0, 1, 0], sizes = [1, 14, 14, 4], strides = [1, 1, 1, 1]} : vector<1x16x16x4xf32> to vector<1x14x14x4xf32>
    %10 = vector.shape_cast %9 : vector<1x14x14x4xf32> to vector<196x4xf32>
    %c1 = arith.constant 1 : index
    %c0_6 = arith.constant 0 : index
    %c0_7 = arith.constant 0 : index
    %11 = vector.load %arg2[%c1, %c0_6, %c0_7] : memref<9x4x128xf32, #tpu.memory_space<vmem>>, vector<1x4x128xf32>
    %12 = vector.shape_cast %11 : vector<1x4x128xf32> to vector<4x128xf32>
    %cst_8 = arith.constant dense<0.000000e+00> : vector<196x128xf32>
    %13 = tpu.matmul %10, %12, %cst_8 {dimension_numbers = #tpu.dot_dimension_numbers<[1], [0], [0], [1], [0, 0, 1, 1], [], []>} : vector<196x4xf32>, vector<4x128xf32>, vector<196x128xf32> -> vector<196x128xf32>
    %14 = arith.addf %8, %13 : vector<196x128xf32>
    %15 = vector.extract_strided_slice %1 {offsets = [0, 0, 2, 0], sizes = [1, 14, 14, 4], strides = [1, 1, 1, 1]} : vector<1x16x16x4xf32> to vector<1x14x14x4xf32>
    %16 = vector.shape_cast %15 : vector<1x14x14x4xf32> to vector<196x4xf32>
    %c2 = arith.constant 2 : index
    %c0_9 = arith.constant 0 : index
    %c0_10 = arith.constant 0 : index
    %17 = vector.load %arg2[%c2, %c0_9, %c0_10] : memref<9x4x128xf32, #tpu.memory_space<vmem>>, vector<1x4x128xf32>
    %18 = vector.shape_cast %17 : vector<1x4x128xf32> to vector<4x128xf32>
    %cst_11 = arith.constant dense<0.000000e+00> : vector<196x128xf32>
    %19 = tpu.matmul %16, %18, %cst_11 {dimension_numbers = #tpu.dot_dimension_numbers<[1], [0], [0], [1], [0, 0, 1, 1], [], []>} : vector<196x4xf32>, vector<4x128xf32>, vector<196x128xf32> -> vector<196x128xf32>
    %20 = arith.addf %14, %19 : vector<196x128xf32>
    %21 = vector.extract_strided_slice %1 {offsets = [0, 1, 0, 0], sizes = [1, 14, 14, 4], strides = [1, 1, 1, 1]} : vector<1x16x16x4xf32> to vector<1x14x14x4xf32>
    %22 = vector.shape_cast %21 : vector<1x14x14x4xf32> to vector<196x4xf32>
    %c3 = arith.constant 3 : index
    %c0_12 = arith.constant 0 : index
    %c0_13 = arith.constant 0 : index
    %23 = vector.load %arg2[%c3, %c0_12, %c0_13] : memref<9x4x128xf32, #tpu.memory_space<vmem>>, vector<1x4x128xf32>
    %24 = vector.shape_cast %23 : vector<1x4x128xf32> to vector<4x128xf32>
    %cst_14 = arith.constant dense<0.000000e+00> : vector<196x128xf32>
    %25 = tpu.matmul %22, %24, %cst_14 {dimension_numbers = #tpu.dot_dimension_numbers<[1], [0], [0], [1], [0, 0, 1, 1], [], []>} : vector<196x4xf32>, vector<4x128xf32>, vector<196x128xf32> -> vector<196x128xf32>
    %26 = arith.addf %20, %25 : vector<196x128xf32>
    %27 = vector.extract_strided_slice %1 {offsets = [0, 1, 1, 0], sizes = [1, 14, 14, 4], strides = [1, 1, 1, 1]} : vector<1x16x16x4xf32> to vector<1x14x14x4xf32>
    %28 = vector.shape_cast %27 : vector<1x14x14x4xf32> to vector<196x4xf32>
    %c4 = arith.constant 4 : index
    %c0_15 = arith.constant 0 : index
    %c0_16 = arith.constant 0 : index
    %29 = vector.load %arg2[%c4, %c0_15, %c0_16] : memref<9x4x128xf32, #tpu.memory_space<vmem>>, vector<1x4x128xf32>
    %30 = vector.shape_cast %29 : vector<1x4x128xf32> to vector<4x128xf32>
    %cst_17 = arith.constant dense<0.000000e+00> : vector<196x128xf32>
    %31 = tpu.matmul %28, %30, %cst_17 {dimension_numbers = #tpu.dot_dimension_numbers<[1], [0], [0], [1], [0, 0, 1, 1], [], []>} : vector<196x4xf32>, vector<4x128xf32>, vector<196x128xf32> -> vector<196x128xf32>
    %32 = arith.addf %26, %31 : vector<196x128xf32>
    %33 = vector.extract_strided_slice %1 {offsets = [0, 1, 2, 0], sizes = [1, 14, 14, 4], strides = [1, 1, 1, 1]} : vector<1x16x16x4xf32> to vector<1x14x14x4xf32>
    %34 = vector.shape_cast %33 : vector<1x14x14x4xf32> to vector<196x4xf32>
    %c5 = arith.constant 5 : index
    %c0_18 = arith.constant 0 : index
    %c0_19 = arith.constant 0 : index
    %35 = vector.load %arg2[%c5, %c0_18, %c0_19] : memref<9x4x128xf32, #tpu.memory_space<vmem>>, vector<1x4x128xf32>
    %36 = vector.shape_cast %35 : vector<1x4x128xf32> to vector<4x128xf32>
    %cst_20 = arith.constant dense<0.000000e+00> : vector<196x128xf32>
    %37 = tpu.matmul %34, %36, %cst_20 {dimension_numbers = #tpu.dot_dimension_numbers<[1], [0], [0], [1], [0, 0, 1, 1], [], []>} : vector<196x4xf32>, vector<4x128xf32>, vector<196x128xf32> -> vector<196x128xf32>
    %38 = arith.addf %32, %37 : vector<196x128xf32>
    %39 = vector.extract_strided_slice %1 {offsets = [0, 2, 0, 0], sizes = [1, 14, 14, 4], strides = [1, 1, 1, 1]} : vector<1x16x16x4xf32> to vector<1x14x14x4xf32>
    %40 = vector.shape_cast %39 : vector<1x14x14x4xf32> to vector<196x4xf32>
    %c6 = arith.constant 6 : index
    %c0_21 = arith.constant 0 : index
    %c0_22 = arith.constant 0 : index
    %41 = vector.load %arg2[%c6, %c0_21, %c0_22] : memref<9x4x128xf32, #tpu.memory_space<vmem>>, vector<1x4x128xf32>
    %42 = vector.shape_cast %41 : vector<1x4x128xf32> to vector<4x128xf32>
    %cst_23 = arith.constant dense<0.000000e+00> : vector<196x128xf32>
    %43 = tpu.matmul %40, %42, %cst_23 {dimension_numbers = #tpu.dot_dimension_numbers<[1], [0], [0], [1], [0, 0, 1, 1], [], []>} : vector<196x4xf32>, vector<4x128xf32>, vector<196x128xf32> -> vector<196x128xf32>
    %44 = arith.addf %38, %43 : vector<196x128xf32>
    %45 = vector.extract_strided_slice %1 {offsets = [0, 2, 1, 0], sizes = [1, 14, 14, 4], strides = [1, 1, 1, 1]} : vector<1x16x16x4xf32> to vector<1x14x14x4xf32>
    %46 = vector.shape_cast %45 : vector<1x14x14x4xf32> to vector<196x4xf32>
    %c7 = arith.constant 7 : index
    %c0_24 = arith.constant 0 : index
    %c0_25 = arith.constant 0 : index
    %47 = vector.load %arg2[%c7, %c0_24, %c0_25] : memref<9x4x128xf32, #tpu.memory_space<vmem>>, vector<1x4x128xf32>
    %48 = vector.shape_cast %47 : vector<1x4x128xf32> to vector<4x128xf32>
    %cst_26 = arith.constant dense<0.000000e+00> : vector<196x128xf32>
    %49 = tpu.matmul %46, %48, %cst_26 {dimension_numbers = #tpu.dot_dimension_numbers<[1], [0], [0], [1], [0, 0, 1, 1], [], []>} : vector<196x4xf32>, vector<4x128xf32>, vector<196x128xf32> -> vector<196x128xf32>
    %50 = arith.addf %44, %49 : vector<196x128xf32>
    %51 = vector.extract_strided_slice %1 {offsets = [0, 2, 2, 0], sizes = [1, 14, 14, 4], strides = [1, 1, 1, 1]} : vector<1x16x16x4xf32> to vector<1x14x14x4xf32>
    %52 = vector.shape_cast %51 : vector<1x14x14x4xf32> to vector<196x4xf32>
    %c8 = arith.constant 8 : index
    %c0_27 = arith.constant 0 : index
    %c0_28 = arith.constant 0 : index
    %53 = vector.load %arg2[%c8, %c0_27, %c0_28] : memref<9x4x128xf32, #tpu.memory_space<vmem>>, vector<1x4x128xf32>
    %54 = vector.shape_cast %53 : vector<1x4x128xf32> to vector<4x128xf32>
    %cst_29 = arith.constant dense<0.000000e+00> : vector<196x128xf32>
    %55 = tpu.matmul %52, %54, %cst_29 {dimension_numbers = #tpu.dot_dimension_numbers<[1], [0], [0], [1], [0, 0, 1, 1], [], []>} : vector<196x4xf32>, vector<4x128xf32>, vector<196x128xf32> -> vector<196x128xf32>
    %56 = arith.addf %50, %55 : vector<196x128xf32>
    %c0_30 = arith.constant 0 : index
    %c0_31 = arith.constant 0 : index
    %57 = vector.load %arg3[%c0_30, %c0_31] : memref<1x128xf32, #tpu.memory_space<vmem>>, vector<1x128xf32>
    %58 = vector.broadcast %57 : vector<1x128xf32> to vector<196x128xf32>
    %59 = arith.addf %56, %58 : vector<196x128xf32>
    %cst_32 = arith.constant 0.000000e+00 : f32
    %60 = vector.broadcast %cst_32 : f32 to vector<196x128xf32>
    %61 = arith.maximumf %59, %60 : vector<196x128xf32>
    %62 = vector.shape_cast %61 : vector<196x128xf32> to vector<1x196x128xf32>
    %c0_33 = arith.constant 0 : index
    %c0_34 = arith.constant 0 : index
    %c0_35 = arith.constant 0 : index
    %63 = vector.load %arg4[%c0_33, %c0_34, %c0_35] : memref<1x196x128xf32, #tpu.memory_space<vmem>>, vector<1x196x128xf32>
    tpu.vector_store %arg4[%c0_33, %c0_34, %c0_35], %62 {strides = array<i32>} : memref<1x196x128xf32, #tpu.memory_space<vmem>>, vector<1x196x128xf32>,
    %cst_36 = arith.constant dense<0.000000e+00> : vector<128xf32>
    %64 = vector.multi_reduction <add>, %61, %cst_36 [0] : vector<196x128xf32> to vector<128xf32>
    %65 = vector.shape_cast %64 : vector<128xf32> to vector<1x128xf32>
    %66 = arith.mulf %61, %61 : vector<196x128xf32>
    %cst_37 = arith.constant dense<0.000000e+00> : vector<128xf32>
    %67 = vector.multi_reduction <add>, %66, %cst_37 [0] : vector<196x128xf32> to vector<128xf32>
    %68 = vector.shape_cast %67 : vector<128xf32> to vector<1x128xf32>
    %69 = tpu.concatenate %65, %68 in 0 : vector<1x128xf32>, vector<1x128xf32> -> vector<2x128xf32>
    %c0_38 = arith.constant 0 : index
    %c0_39 = arith.constant 0 : index
    %c0_40 = arith.constant 0 : index
    %70 = vector.load %arg5[%c0_38, %c0_39, %c0_40] : memref<1x2x128xf32, #tpu.memory_space<vmem>>, vector<1x2x128xf32>
    %71 = vector.shape_cast %70 : vector<1x2x128xf32> to vector<2x128xf32>
    %72 = vector.shape_cast %69 : vector<2x128xf32> to vector<1x2x128xf32>
    tpu.vector_store %arg5[%c0_38, %c0_39, %c0_40], %72 {strides = array<i32>} : memref<1x2x128xf32, #tpu.memory_space<vmem>>, vector<1x2x128xf32>,
    return
  }
  func.func @transform_0(%arg0: i32) -> (i32, i32, i32) {
    %c0_i32 = arith.constant 0 : i32
    %c0_i32_0 = arith.constant 0 : i32
    %c0_i32_1 = arith.constant 0 : i32
    return %arg0, %c0_i32, %c0_i32_0 : i32, i32, i32
  }
  func.func @transform_1(%arg0: i32) -> (i32, i32, i32) {
    %c0_i32 = arith.constant 0 : i32
    %c0_i32_0 = arith.constant 0 : i32
    %c0_i32_1 = arith.constant 0 : i32
    %c0_i32_2 = arith.constant 0 : i32
    return %c0_i32, %c0_i32_0, %c0_i32_1 : i32, i32, i32
  }
  func.func @transform_2(%arg0: i32) -> (i32, i32) {
    %c0_i32 = arith.constant 0 : i32
    %c0_i32_0 = arith.constant 0 : i32
    %c0_i32_1 = arith.constant 0 : i32
    return %c0_i32, %c0_i32_0 : i32, i32
  }
  func.func @transform_3(%arg0: i32) -> (i32, i32, i32) {
    %c0_i32 = arith.constant 0 : i32
    %c0_i32_0 = arith.constant 0 : i32
    %c0_i32_1 = arith.constant 0 : i32
    return %arg0, %c0_i32, %c0_i32_0 : i32, i32, i32
  }
  func.func @transform_4(%arg0: i32) -> (i32, i32, i32) {
    %c0_i32 = arith.constant 0 : i32
    %c0_i32_0 = arith.constant 0 : i32
    %c0_i32_1 = arith.constant 0 : i32
    return %arg0, %c0_i32, %c0_i32_0 : i32, i32, i32
  }
}

module attributes {stable_mosaic.version = 11 : i64} {
  func.func @_conv_relu_stats_kernel(%arg0: i32, %arg1: memref<1x196x128xf32, #tpu.memory_space<vmem>>, %arg2: memref<9x128x128xf32, #tpu.memory_space<vmem>>, %arg3: memref<1x128xf32, #tpu.memory_space<vmem>>, %arg4: memref<1x144x128xf32, #tpu.memory_space<vmem>>, %arg5: memref<1x2x128xf32, #tpu.memory_space<vmem>>) attributes {dimension_semantics = [#tpu.dimension_semantics<parallel>], iteration_bounds = array<i64: 2>, scalar_prefetch = 0 : i64, scratch_operands = 0 : i64, tpu.core_type = #tpu.core_type<tc>, window_params = [{transform_indices = @transform_0, window_bounds = array<i64: 1, 196, 128>}, {pipeline_mode = #tpu.pipeline_mode<synchronous>, transform_indices = @transform_1, window_bounds = array<i64: 9, 128, 128>}, {pipeline_mode = #tpu.pipeline_mode<synchronous>, transform_indices = @transform_2, window_bounds = array<i64: 1, 128>}, {transform_indices = @transform_3, window_bounds = array<i64: 1, 144, 128>}, {transform_indices = @transform_4, window_bounds = array<i64: 1, 2, 128>}]} {
    %c0 = arith.constant 0 : index
    %c0_0 = arith.constant 0 : index
    %c0_1 = arith.constant 0 : index
    %0 = vector.load %arg1[%c0, %c0_0, %c0_1] : memref<1x196x128xf32, #tpu.memory_space<vmem>>, vector<1x196x128xf32>
    %1 = vector.shape_cast %0 : vector<1x196x128xf32> to vector<1x14x14x128xf32>
    %cst = arith.constant 0.000000e+00 : f32
    %2 = vector.broadcast %cst : f32 to vector<144x128xf32>
    %3 = vector.extract_strided_slice %1 {offsets = [0, 0, 0, 0], sizes = [1, 12, 12, 128], strides = [1, 1, 1, 1]} : vector<1x14x14x128xf32> to vector<1x12x12x128xf32>
    %4 = vector.shape_cast %3 : vector<1x12x12x128xf32> to vector<144x128xf32>
    %c0_2 = arith.constant 0 : index
    %c0_3 = arith.constant 0 : index
    %c0_4 = arith.constant 0 : index
    %5 = vector.load %arg2[%c0_2, %c0_3, %c0_4] : memref<9x128x128xf32, #tpu.memory_space<vmem>>, vector<1x128x128xf32>
    %6 = vector.shape_cast %5 : vector<1x128x128xf32> to vector<128x128xf32>
    %cst_5 = arith.constant dense<0.000000e+00> : vector<144x128xf32>
    %7 = tpu.matmul %4, %6, %cst_5 {dimension_numbers = #tpu.dot_dimension_numbers<[1], [0], [0], [1], [0, 0, 1, 1], [], []>} : vector<144x128xf32>, vector<128x128xf32>, vector<144x128xf32> -> vector<144x128xf32>
    %8 = arith.addf %2, %7 : vector<144x128xf32>
    %9 = vector.extract_strided_slice %1 {offsets = [0, 0, 1, 0], sizes = [1, 12, 12, 128], strides = [1, 1, 1, 1]} : vector<1x14x14x128xf32> to vector<1x12x12x128xf32>
    %10 = vector.shape_cast %9 : vector<1x12x12x128xf32> to vector<144x128xf32>
    %c1 = arith.constant 1 : index
    %c0_6 = arith.constant 0 : index
    %c0_7 = arith.constant 0 : index
    %11 = vector.load %arg2[%c1, %c0_6, %c0_7] : memref<9x128x128xf32, #tpu.memory_space<vmem>>, vector<1x128x128xf32>
    %12 = vector.shape_cast %11 : vector<1x128x128xf32> to vector<128x128xf32>
    %cst_8 = arith.constant dense<0.000000e+00> : vector<144x128xf32>
    %13 = tpu.matmul %10, %12, %cst_8 {dimension_numbers = #tpu.dot_dimension_numbers<[1], [0], [0], [1], [0, 0, 1, 1], [], []>} : vector<144x128xf32>, vector<128x128xf32>, vector<144x128xf32> -> vector<144x128xf32>
    %14 = arith.addf %8, %13 : vector<144x128xf32>
    %15 = vector.extract_strided_slice %1 {offsets = [0, 0, 2, 0], sizes = [1, 12, 12, 128], strides = [1, 1, 1, 1]} : vector<1x14x14x128xf32> to vector<1x12x12x128xf32>
    %16 = vector.shape_cast %15 : vector<1x12x12x128xf32> to vector<144x128xf32>
    %c2 = arith.constant 2 : index
    %c0_9 = arith.constant 0 : index
    %c0_10 = arith.constant 0 : index
    %17 = vector.load %arg2[%c2, %c0_9, %c0_10] : memref<9x128x128xf32, #tpu.memory_space<vmem>>, vector<1x128x128xf32>
    %18 = vector.shape_cast %17 : vector<1x128x128xf32> to vector<128x128xf32>
    %cst_11 = arith.constant dense<0.000000e+00> : vector<144x128xf32>
    %19 = tpu.matmul %16, %18, %cst_11 {dimension_numbers = #tpu.dot_dimension_numbers<[1], [0], [0], [1], [0, 0, 1, 1], [], []>} : vector<144x128xf32>, vector<128x128xf32>, vector<144x128xf32> -> vector<144x128xf32>
    %20 = arith.addf %14, %19 : vector<144x128xf32>
    %21 = vector.extract_strided_slice %1 {offsets = [0, 1, 0, 0], sizes = [1, 12, 12, 128], strides = [1, 1, 1, 1]} : vector<1x14x14x128xf32> to vector<1x12x12x128xf32>
    %22 = vector.shape_cast %21 : vector<1x12x12x128xf32> to vector<144x128xf32>
    %c3 = arith.constant 3 : index
    %c0_12 = arith.constant 0 : index
    %c0_13 = arith.constant 0 : index
    %23 = vector.load %arg2[%c3, %c0_12, %c0_13] : memref<9x128x128xf32, #tpu.memory_space<vmem>>, vector<1x128x128xf32>
    %24 = vector.shape_cast %23 : vector<1x128x128xf32> to vector<128x128xf32>
    %cst_14 = arith.constant dense<0.000000e+00> : vector<144x128xf32>
    %25 = tpu.matmul %22, %24, %cst_14 {dimension_numbers = #tpu.dot_dimension_numbers<[1], [0], [0], [1], [0, 0, 1, 1], [], []>} : vector<144x128xf32>, vector<128x128xf32>, vector<144x128xf32> -> vector<144x128xf32>
    %26 = arith.addf %20, %25 : vector<144x128xf32>
    %27 = vector.extract_strided_slice %1 {offsets = [0, 1, 1, 0], sizes = [1, 12, 12, 128], strides = [1, 1, 1, 1]} : vector<1x14x14x128xf32> to vector<1x12x12x128xf32>
    %28 = vector.shape_cast %27 : vector<1x12x12x128xf32> to vector<144x128xf32>
    %c4 = arith.constant 4 : index
    %c0_15 = arith.constant 0 : index
    %c0_16 = arith.constant 0 : index
    %29 = vector.load %arg2[%c4, %c0_15, %c0_16] : memref<9x128x128xf32, #tpu.memory_space<vmem>>, vector<1x128x128xf32>
    %30 = vector.shape_cast %29 : vector<1x128x128xf32> to vector<128x128xf32>
    %cst_17 = arith.constant dense<0.000000e+00> : vector<144x128xf32>
    %31 = tpu.matmul %28, %30, %cst_17 {dimension_numbers = #tpu.dot_dimension_numbers<[1], [0], [0], [1], [0, 0, 1, 1], [], []>} : vector<144x128xf32>, vector<128x128xf32>, vector<144x128xf32> -> vector<144x128xf32>
    %32 = arith.addf %26, %31 : vector<144x128xf32>
    %33 = vector.extract_strided_slice %1 {offsets = [0, 1, 2, 0], sizes = [1, 12, 12, 128], strides = [1, 1, 1, 1]} : vector<1x14x14x128xf32> to vector<1x12x12x128xf32>
    %34 = vector.shape_cast %33 : vector<1x12x12x128xf32> to vector<144x128xf32>
    %c5 = arith.constant 5 : index
    %c0_18 = arith.constant 0 : index
    %c0_19 = arith.constant 0 : index
    %35 = vector.load %arg2[%c5, %c0_18, %c0_19] : memref<9x128x128xf32, #tpu.memory_space<vmem>>, vector<1x128x128xf32>
    %36 = vector.shape_cast %35 : vector<1x128x128xf32> to vector<128x128xf32>
    %cst_20 = arith.constant dense<0.000000e+00> : vector<144x128xf32>
    %37 = tpu.matmul %34, %36, %cst_20 {dimension_numbers = #tpu.dot_dimension_numbers<[1], [0], [0], [1], [0, 0, 1, 1], [], []>} : vector<144x128xf32>, vector<128x128xf32>, vector<144x128xf32> -> vector<144x128xf32>
    %38 = arith.addf %32, %37 : vector<144x128xf32>
    %39 = vector.extract_strided_slice %1 {offsets = [0, 2, 0, 0], sizes = [1, 12, 12, 128], strides = [1, 1, 1, 1]} : vector<1x14x14x128xf32> to vector<1x12x12x128xf32>
    %40 = vector.shape_cast %39 : vector<1x12x12x128xf32> to vector<144x128xf32>
    %c6 = arith.constant 6 : index
    %c0_21 = arith.constant 0 : index
    %c0_22 = arith.constant 0 : index
    %41 = vector.load %arg2[%c6, %c0_21, %c0_22] : memref<9x128x128xf32, #tpu.memory_space<vmem>>, vector<1x128x128xf32>
    %42 = vector.shape_cast %41 : vector<1x128x128xf32> to vector<128x128xf32>
    %cst_23 = arith.constant dense<0.000000e+00> : vector<144x128xf32>
    %43 = tpu.matmul %40, %42, %cst_23 {dimension_numbers = #tpu.dot_dimension_numbers<[1], [0], [0], [1], [0, 0, 1, 1], [], []>} : vector<144x128xf32>, vector<128x128xf32>, vector<144x128xf32> -> vector<144x128xf32>
    %44 = arith.addf %38, %43 : vector<144x128xf32>
    %45 = vector.extract_strided_slice %1 {offsets = [0, 2, 1, 0], sizes = [1, 12, 12, 128], strides = [1, 1, 1, 1]} : vector<1x14x14x128xf32> to vector<1x12x12x128xf32>
    %46 = vector.shape_cast %45 : vector<1x12x12x128xf32> to vector<144x128xf32>
    %c7 = arith.constant 7 : index
    %c0_24 = arith.constant 0 : index
    %c0_25 = arith.constant 0 : index
    %47 = vector.load %arg2[%c7, %c0_24, %c0_25] : memref<9x128x128xf32, #tpu.memory_space<vmem>>, vector<1x128x128xf32>
    %48 = vector.shape_cast %47 : vector<1x128x128xf32> to vector<128x128xf32>
    %cst_26 = arith.constant dense<0.000000e+00> : vector<144x128xf32>
    %49 = tpu.matmul %46, %48, %cst_26 {dimension_numbers = #tpu.dot_dimension_numbers<[1], [0], [0], [1], [0, 0, 1, 1], [], []>} : vector<144x128xf32>, vector<128x128xf32>, vector<144x128xf32> -> vector<144x128xf32>
    %50 = arith.addf %44, %49 : vector<144x128xf32>
    %51 = vector.extract_strided_slice %1 {offsets = [0, 2, 2, 0], sizes = [1, 12, 12, 128], strides = [1, 1, 1, 1]} : vector<1x14x14x128xf32> to vector<1x12x12x128xf32>
    %52 = vector.shape_cast %51 : vector<1x12x12x128xf32> to vector<144x128xf32>
    %c8 = arith.constant 8 : index
    %c0_27 = arith.constant 0 : index
    %c0_28 = arith.constant 0 : index
    %53 = vector.load %arg2[%c8, %c0_27, %c0_28] : memref<9x128x128xf32, #tpu.memory_space<vmem>>, vector<1x128x128xf32>
    %54 = vector.shape_cast %53 : vector<1x128x128xf32> to vector<128x128xf32>
    %cst_29 = arith.constant dense<0.000000e+00> : vector<144x128xf32>
    %55 = tpu.matmul %52, %54, %cst_29 {dimension_numbers = #tpu.dot_dimension_numbers<[1], [0], [0], [1], [0, 0, 1, 1], [], []>} : vector<144x128xf32>, vector<128x128xf32>, vector<144x128xf32> -> vector<144x128xf32>
    %56 = arith.addf %50, %55 : vector<144x128xf32>
    %c0_30 = arith.constant 0 : index
    %c0_31 = arith.constant 0 : index
    %57 = vector.load %arg3[%c0_30, %c0_31] : memref<1x128xf32, #tpu.memory_space<vmem>>, vector<1x128xf32>
    %58 = vector.broadcast %57 : vector<1x128xf32> to vector<144x128xf32>
    %59 = arith.addf %56, %58 : vector<144x128xf32>
    %cst_32 = arith.constant 0.000000e+00 : f32
    %60 = vector.broadcast %cst_32 : f32 to vector<144x128xf32>
    %61 = arith.maximumf %59, %60 : vector<144x128xf32>
    %62 = vector.shape_cast %61 : vector<144x128xf32> to vector<1x144x128xf32>
    %c0_33 = arith.constant 0 : index
    %c0_34 = arith.constant 0 : index
    %c0_35 = arith.constant 0 : index
    %63 = vector.load %arg4[%c0_33, %c0_34, %c0_35] : memref<1x144x128xf32, #tpu.memory_space<vmem>>, vector<1x144x128xf32>
    tpu.vector_store %arg4[%c0_33, %c0_34, %c0_35], %62 {strides = array<i32>} : memref<1x144x128xf32, #tpu.memory_space<vmem>>, vector<1x144x128xf32>,
    %cst_36 = arith.constant dense<0.000000e+00> : vector<128xf32>
    %64 = vector.multi_reduction <add>, %61, %cst_36 [0] : vector<144x128xf32> to vector<128xf32>
    %65 = vector.shape_cast %64 : vector<128xf32> to vector<1x128xf32>
    %66 = arith.mulf %61, %61 : vector<144x128xf32>
    %cst_37 = arith.constant dense<0.000000e+00> : vector<128xf32>
    %67 = vector.multi_reduction <add>, %66, %cst_37 [0] : vector<144x128xf32> to vector<128xf32>
    %68 = vector.shape_cast %67 : vector<128xf32> to vector<1x128xf32>
    %69 = tpu.concatenate %65, %68 in 0 : vector<1x128xf32>, vector<1x128xf32> -> vector<2x128xf32>
    %c0_38 = arith.constant 0 : index
    %c0_39 = arith.constant 0 : index
    %c0_40 = arith.constant 0 : index
    %70 = vector.load %arg5[%c0_38, %c0_39, %c0_40] : memref<1x2x128xf32, #tpu.memory_space<vmem>>, vector<1x2x128xf32>
    %71 = vector.shape_cast %70 : vector<1x2x128xf32> to vector<2x128xf32>
    %72 = vector.shape_cast %69 : vector<2x128xf32> to vector<1x2x128xf32>
    tpu.vector_store %arg5[%c0_38, %c0_39, %c0_40], %72 {strides = array<i32>} : memref<1x2x128xf32, #tpu.memory_space<vmem>>, vector<1x2x128xf32>,
    return
  }
  func.func @transform_0(%arg0: i32) -> (i32, i32, i32) {
    %c0_i32 = arith.constant 0 : i32
    %c0_i32_0 = arith.constant 0 : i32
    %c0_i32_1 = arith.constant 0 : i32
    return %arg0, %c0_i32, %c0_i32_0 : i32, i32, i32
  }
  func.func @transform_1(%arg0: i32) -> (i32, i32, i32) {
    %c0_i32 = arith.constant 0 : i32
    %c0_i32_0 = arith.constant 0 : i32
    %c0_i32_1 = arith.constant 0 : i32
    %c0_i32_2 = arith.constant 0 : i32
    return %c0_i32, %c0_i32_0, %c0_i32_1 : i32, i32, i32
  }
  func.func @transform_2(%arg0: i32) -> (i32, i32) {
    %c0_i32 = arith.constant 0 : i32
    %c0_i32_0 = arith.constant 0 : i32
    %c0_i32_1 = arith.constant 0 : i32
    return %c0_i32, %c0_i32_0 : i32, i32
  }
  func.func @transform_3(%arg0: i32) -> (i32, i32, i32) {
    %c0_i32 = arith.constant 0 : i32
    %c0_i32_0 = arith.constant 0 : i32
    %c0_i32_1 = arith.constant 0 : i32
    return %arg0, %c0_i32, %c0_i32_0 : i32, i32, i32
  }
  func.func @transform_4(%arg0: i32) -> (i32, i32, i32) {
    %c0_i32 = arith.constant 0 : i32
    %c0_i32_0 = arith.constant 0 : i32
    %c0_i32_1 = arith.constant 0 : i32
    return %arg0, %c0_i32, %c0_i32_0 : i32, i32, i32
  }
}

module attributes {stable_mosaic.version = 11 : i64} {
  func.func @_affine_kernel(%arg0: i32, %arg1: memref<1x144x128xf32, #tpu.memory_space<vmem>>, %arg2: memref<1x128xf32, #tpu.memory_space<vmem>>, %arg3: memref<1x128xf32, #tpu.memory_space<vmem>>, %arg4: memref<1x144x128xf32, #tpu.memory_space<vmem>>) attributes {dimension_semantics = [#tpu.dimension_semantics<parallel>], iteration_bounds = array<i64: 2>, scalar_prefetch = 0 : i64, scratch_operands = 0 : i64, tpu.core_type = #tpu.core_type<tc>, window_params = [{transform_indices = @transform_0, window_bounds = array<i64: 1, 144, 128>}, {pipeline_mode = #tpu.pipeline_mode<synchronous>, transform_indices = @transform_1, window_bounds = array<i64: 1, 128>}, {pipeline_mode = #tpu.pipeline_mode<synchronous>, transform_indices = @transform_2, window_bounds = array<i64: 1, 128>}, {transform_indices = @transform_3, window_bounds = array<i64: 1, 144, 128>}]} {
    %c0 = arith.constant 0 : index
    %c0_0 = arith.constant 0 : index
    %c0_1 = arith.constant 0 : index
    %0 = vector.load %arg1[%c0, %c0_0, %c0_1] : memref<1x144x128xf32, #tpu.memory_space<vmem>>, vector<1x144x128xf32>
    %c0_2 = arith.constant 0 : index
    %c0_3 = arith.constant 0 : index
    %1 = vector.load %arg2[%c0_2, %c0_3] : memref<1x128xf32, #tpu.memory_space<vmem>>, vector<1x128xf32>
    %2 = vector.shape_cast %1 : vector<1x128xf32> to vector<1x1x128xf32>
    %3 = vector.broadcast %2 : vector<1x1x128xf32> to vector<1x144x128xf32>
    %4 = arith.mulf %0, %3 : vector<1x144x128xf32>
    %c0_4 = arith.constant 0 : index
    %c0_5 = arith.constant 0 : index
    %5 = vector.load %arg3[%c0_4, %c0_5] : memref<1x128xf32, #tpu.memory_space<vmem>>, vector<1x128xf32>
    %6 = vector.shape_cast %5 : vector<1x128xf32> to vector<1x1x128xf32>
    %7 = vector.broadcast %6 : vector<1x1x128xf32> to vector<1x144x128xf32>
    %8 = arith.addf %4, %7 : vector<1x144x128xf32>
    %c0_6 = arith.constant 0 : index
    %c0_7 = arith.constant 0 : index
    %c0_8 = arith.constant 0 : index
    %9 = vector.load %arg4[%c0_6, %c0_7, %c0_8] : memref<1x144x128xf32, #tpu.memory_space<vmem>>, vector<1x144x128xf32>
    tpu.vector_store %arg4[%c0_6, %c0_7, %c0_8], %8 {strides = array<i32>} : memref<1x144x128xf32, #tpu.memory_space<vmem>>, vector<1x144x128xf32>,
    return
  }
  func.func @transform_0(%arg0: i32) -> (i32, i32, i32) {
    %c0_i32 = arith.constant 0 : i32
    %c0_i32_0 = arith.constant 0 : i32
    %c0_i32_1 = arith.constant 0 : i32
    return %arg0, %c0_i32, %c0_i32_0 : i32, i32, i32
  }
  func.func @transform_1(%arg0: i32) -> (i32, i32) {
    %c0_i32 = arith.constant 0 : i32
    %c0_i32_0 = arith.constant 0 : i32
    %c0_i32_1 = arith.constant 0 : i32
    return %c0_i32, %c0_i32_0 : i32, i32
  }
  func.func @transform_2(%arg0: i32) -> (i32, i32) {
    %c0_i32 = arith.constant 0 : i32
    %c0_i32_0 = arith.constant 0 : i32
    %c0_i32_1 = arith.constant 0 : i32
    return %c0_i32, %c0_i32_0 : i32, i32
  }
  func.func @transform_3(%arg0: i32) -> (i32, i32, i32) {
    %c0_i32 = arith.constant 0 : i32
    %c0_i32_0 = arith.constant 0 : i32
    %c0_i32_1 = arith.constant 0 : i32
    return %arg0, %c0_i32, %c0_i32_0 : i32, i32, i32
  }
}

</mosaic_0001>

<bundles_post_ra>
// kernel: unet_layer_pallas.5
= control target key start
LH: loop header
LB: loop body
LE: loop exit
PB: predicated region body
PF: predicated region fallthrough
CT: control target
= control target key end

     0   :  { %8 = vsyncpa [#allocation3], 0  ;;  %s998_s0 = inlined_call_operand.hbm [shape: f32[2,144,128], index: 0, kind: input, shape index: {}]   ;;  %s999_s1 = inlined_call_operand.hbm [shape: f32[1,128], index: 1, kind: input, shape index: {}]   ;;  %s1000_s2 = inlined_call_operand.hbm [shape: f32[1,128], index: 2, kind: input, shape index: {}]   ;;  %s1001_s3 = inlined_call_operand.hbm [shape: f32[2,144,128], index: 3, kind: output, shape index: {}]  }
   0x1   :  { %10 = vsyncpa [#allocation3 + $0x1], 0 }
   0x2   :  { %11 = vsyncpa [#allocation6], 0 }
   0x3   :  { %12 = vsyncpa [#allocation4], 0 }
   0x4   :  { %14 = vsyncpa [#allocation4 + $0x1], 0  ;;  %s681_s12 = smov 0   ;;  %s683_s13 = smov 0  }
   0x5   :  { %s685_s14 = smov 0   ;;  %s687_s15 = smov 0  }
   0x6 LB: > { %s702_s16 = sadd.s32 4294967295, %s651_s15   ;;  %s406_s17 = sadd.s32 4294967294, %s651_s15   ;;  %s651_s15 = sphi %s687_s15, %s1026_s15   ;;  %s647_s14 = sphi %s685_s14, %s1025_s14   ;;  %s643_s13 = sphi %s683_s13, %s1024_s13   ;;  %s639_s12 = sphi %s681_s12, %s1023_s12  }
   0x7   : > { %s706_s18 = sadd.s32 1, %s651_s15   ;;  %s27_s19 = sadd.s32 1, %s647_s14 }
   0x8   : > { %s24_s20 = ssub.s32 %s651_s15, %s706_s18  ;;  %p34_p0 = scmp.ne.s32.totalorder %s647_s14, %s643_s13 }
   0x9   : > { %p25_p1 = scmp.eq.s32.totalorder %s24_s20, 0  ;;  %p35_p2 = scmp.eq.s32.totalorder %s651_s15, 0 }
   0xa   : > { %p40_p3 = scmp.ne.s32.totalorder %s643_s13, %s639_s12  ;;  %p1002_p4 = scmp.eq.s32.totalorder %s702_s16, 0 }
   0xb   : > { %s718_s21 = scalar_select %p25_p1, %s647_s14, %s27_s19  }
   0xc   : > { %p720_p5 = por %p35_p2, %p34_p0  ;;  %p726_p6 = por %p1002_p4, %p40_p3 }
   0xd   : > { %p106_p7 = scmp.eq.s32.totalorder %s702_s16, 1  ;;  %p112_p8 = scmp.eq.s32.totalorder %s406_s17, 1 }
   0xe   : > { %s1008_s23 = scalar_select %p726_p6, 1, 0 }
   0xf   : > { %p407_p9 = scmp.ge.s32.totalorder %s651_s15, 1  ;;  %p119_p10 = scmp.lt.s32.totalorder %s651_s15, 3 }
  0x10   : > { %p733_p11 = por %p106_p7, %p34_p0  ;;  %p737_p12 = por %p112_p8, %p40_p3 }
  0x11   : > { %p741_p13 = pnand %p407_p9, %p119_p10  ;;  %s653_s27 = smov [#allocation5]  }
  0x12   : > { %s1009_s24 = scalar_select %p733_p11, 1, 0 }
  0x13   : > { %s1010_s25 = scalar_select %p737_p12, 1, 0 }
  0x14   : > { %s1011_s26 = scalar_select %p741_p13, 1, 0 }
  0x15   : > { %p436_p2 = pneg %p741_p13  ;;  %s132_s28 = sshll.u32 %s653_s27, 4  ;;  %s133_s28 = int_to_ptr.vmem [resolvable:$true] %s132_s28 }
  0x16   : > { %p453_p4 = scmp.lt.s32.totalorder %s651_s15, 2  ;;  %p1012_p0 = scmp.eq.s32.totalorder %s702_s16, 0 }
  0x17   : > { %s654_s4 = smov [#allocation7]   ;;  %s495_s8 = scalar_lea.hbm %s999_s1, 16 }
  0x18   : > { %p751_p7 = pnand %p436_p2, %p1012_p0  ;;  %p757_p3 = pnand %p453_p4, %p720_p5 }
  0x19   : > { %s143_s5 = sshll.u32 %s654_s4, 4  ;;  %p496_p8 = scmp.ne.s32.totalorder %s999_s1, %s495_s8  ;;  %s761_s5 = int_to_ptr.vmem [resolvable:$true] %s143_s5 }
  0x1a   : > { %s1014_s30 = scalar_select %p757_p3, 1, 0 }
  0x1b   : > { %p497_p9 = pneg %p751_p7  ;;  %p502_p10 = scmp.lt.u32.totalorder %s495_s8, %s999_s1 }
  0x1d   : > { %p498_p4 = pnand %p497_p9, %p496_p8 }
  0x1f   : > { %p499_p5 = pneg %p498_p4 }
  0x21   : > { %p504_p2 = pnand %p502_p10, %p499_p5 }
  0x23   : > { %507 = shalt.err (!%p504_p2)
}
  0x24   : > { %s508_s19 = scalar_lea.vmem %s133_s28, 16  ;;  %s515_s20 = scalar_lea.vmem %s133_s28, 32 }
  0x25   : > { %p509_p0 = scmp.ne.s32.totalorder %s133_s28, %s508_s19  ;;  %p516_p11 = scmp.lt.s32.totalorder %s133_s28, %s133_s28 }
  0x26   : > { %p517_p6 = scmp.lt.s32.totalorder %s515_s20, %s508_s19 }
  0x27   : > { %p511_p1 = pnand %p509_p0, %p497_p9 }
  0x28   : > { %p518_p13 = por %p517_p6, %p516_p11 }
  0x29   : > { %p512_p12 = pneg %p511_p1 }
  0x2b   : > { %p519_p3 = pnand %p518_p13, %p512_p12 }
  0x2d   : > { %522 = shalt.err (!%p519_p3)
}
  0x2e   : > { %439 = dma.hbm_to_vmem [thread:$0]  (!%p751_p7), %s999_s1, 16, %s133_s28, [#allocation6]  }
  0x2f   : > { %s154_s4 = sand.u32 1, %s647_s14   ;;  %s523_s8 = scalar_lea.hbm %s1000_s2, 16 }
  0x30   : > { %p524_p1 = scmp.ne.s32.totalorder %s1000_s2, %s523_s8  ;;  %p530_p12 = scmp.lt.u32.totalorder %s523_s8, %s1000_s2 }
  0x32   : > { %p526_p6 = pnand %p524_p1, %p497_p9 }
  0x34   : > { %p527_p11 = pneg %p526_p6 }
  0x36   : > { %p532_p13 = pnand %p530_p12, %p527_p11 }
  0x38   : > { %535 = shalt.err (!%p532_p13)
}
  0x39   : > { %s536_s28 = scalar_lea.vmem %s761_s5, 16  ;;  %s543_s19 = scalar_lea.vmem %s761_s5, 32 }
  0x3a   : > { %p537_p3 = scmp.ne.s32.totalorder %s761_s5, %s536_s28  ;;  %p544_p5 = scmp.lt.s32.totalorder %s761_s5, %s761_s5 }
  0x3b   : > { %p545_p10 = scmp.lt.s32.totalorder %s543_s19, %s536_s28 }
  0x3c   : > { %p539_p8 = pnand %p537_p3, %p497_p9 }
  0x3d   : > { %p546_p2 = por %p545_p10, %p544_p5 }
  0x3e   : > { %p540_p4 = pneg %p539_p8 }
  0x40   : > { %p547_p0 = pnand %p546_p2, %p540_p4 }
  0x42   : > { %550 = shalt.err (!%p547_p0)
}
  0x43   : > { %442 = dma.hbm_to_vmem [thread:$0]  (!%p751_p7), %s1000_s2, 16, %s761_s5, [#allocation6]  }
  0x44   : > { %s420_s27 = smul.u32 144, %s154_s4  ;;  %s820_s11 = scalar_lea.sflag [#allocation3], %s154_s4 }
  0x45   : > { %s421_s6 = smul.u32 2304, %s651_s15  ;;  %p1015_p7 = scmp.ne.s32.totalorder %s1014_s30, 0 }
  0x46   : > { %s158_s29 = scalar_lea.vmem [#allocation2], %s420_s27  ;;  %s556_s19 = scalar_lea.hbm %s998_s0, 4608 }
  0x47   : > { %s816_s9 = scalar_lea.hbm %s998_s0, %s421_s6  ;;  %s165_s10 = sshll.u32 %s158_s29, 4  ;;  %s818_s10 = int_to_ptr.vmem [resolvable:$true] %s165_s10 }
  0x48   : > { %s551_s17 = scalar_lea.hbm %s816_s9, 2304  ;;  %p553_p1 = pneg %p1015_p7 }
  0x49   : > { %p552_p9 = scmp.ne.s32.totalorder %s816_s9, %s551_s17  ;;  %p557_p12 = scmp.lt.u32.totalorder %s816_s9, %s998_s0 }
  0x4a   : > { %p558_p13 = scmp.lt.u32.totalorder %s556_s19, %s551_s17  ;;  %p560_p8 = scmp.lt.u32.totalorder %s551_s17, %s816_s9 }
  0x4b   : > { %p554_p6 = pnand %p553_p1, %p552_p9 }
  0x4c   : > { %p559_p3 = por %p558_p13, %p557_p12 }
  0x4d   : > { %p555_p11 = pneg %p554_p6 }
  0x4e   : > { %p561_p4 = por %p560_p8, %p559_p3 }
  0x50   : > { %p562_p5 = pnand %p561_p4, %p555_p11 }
  0x52   : > { %565 = shalt.err (!%p562_p5)
}
  0x53   : > { %s566_s4 = scalar_lea.vmem %s818_s10, 2304  ;;  %s655_s27 = smov [#allocation2]  }
  0x54   : > { %p567_p10 = scmp.ne.s32.totalorder %s818_s10, %s566_s4  ;;  %s571_s6 = sshll.u32 %s655_s27, 4  ;;  %s572_s6 = int_to_ptr.vmem [resolvable:$false] %s571_s6 }
  0x55   : > { %s573_s7 = scalar_lea.vmem %s572_s6, 4608  ;;  %p574_p9 = scmp.lt.s32.totalorder %s818_s10, %s572_s6 }
  0x56   : > { %p569_p2 = pnand %p567_p10, %p553_p1  ;;  %p575_p6 = scmp.lt.s32.totalorder %s573_s7, %s566_s4 }
  0x58   : > { %p570_p0 = pneg %p569_p2  ;;  %p576_p12 = por %p575_p6, %p574_p9 }
  0x5a   : > { %p577_p13 = pnand %p576_p12, %p570_p0 }
  0x5c   : > { %580 = shalt.err (!%p577_p13)
}
  0x5d   : > { %s656_s8 = smov 128   ;;  %s657_s29 = smov 8  }
  0x5e   : > { %446 = dma.hbm_to_vmem [thread:$0]  (!%p1015_p7), %s816_s9, 2304, %s818_s10, %s820_s11, %s656_s8, %s656_s8, %s657_s29  }
  0x5f   : > { %p1016_p1 = scmp.ne.s32.totalorder %s1011_s26, 0 }
  0x60   : > { %s851_s17 = sand.u32 (!%p1016_p1), 1, %s643_s13   ;;  %p1017_p11 = scmp.ne.s32.totalorder (!%p1016_p1), %s1008_s23, 0 }
  0x61   : > { %177 = sbr.rel (%p1016_p1) target bundleno = 138 (0x8a), region = 32  ;;  %s180_s28 = scalar_lea.sflag (!%p1016_p1), [#allocation3], %s851_s17 }
  0x62   : > { %s422_s5 = smul.u32 (!%p1016_p1), 144, %s851_s17 }
  0x64   : > { %s857_s19 = scalar_lea.vmem (!%p1016_p1), [#allocation2], %s422_s5 }
  0x68   : > { %626 = dma.done.wait (%p1017_p11), %s180_s28, 2304  }
  0x69   : > { %628 = vsyncadd (%p1017_p11), %s180_s28, 4294964992  ;;  %p1018_p7 = scmp.eq.s32.totalorder %s702_s16, 0 }
  0x6b   : > { %630 = dma.done.wait (%p1018_p7), [#allocation6], 32   ;;  %p1019_p3 = pmov %p1018_p7 }
  0x6c   : > { %v214_v0 = vld [vmem:[%s857_s19] sm:$0xff]  ;;  %v215_v4 = vld [vmem:[%s857_s19 + $0x8] sm:$0xff]  ;;  %v216_v5 = vld [vmem:[%s857_s19 + $0x10] sm:$0xff]  ;;  %s898_s23 = scalar_lea.vmem [#allocation8], %s422_s5  ;;  %s423_s26 = smul.u32 2304, %s702_s16 }
  0x6d   : > { %632 = vsyncadd (%p1019_p3), [#allocation6], 4294967264  ;;  %v868_v1 = vld [vmem:[#allocation5] ss:$0 sm:$0xff]  ;;  %v870_v2 = vld [vmem:[#allocation7] ss:$0 sm:$0xff] }
  0x6e   : > { %v239_v3 = vmul.f32 %v868_v1, %v214_v0  ;;  %v217_v6 = vld [vmem:[%s857_s19 + $0x18] sm:$0xff]  ;;  %v240_v7 = vmul.f32 %v868_v1, %v215_v4  ;;  %v241_v8 = vmul.f32 %v868_v1, %v216_v5  ;;  %v218_v10 = vld [vmem:[%s857_s19 + $0x20] sm:$0xff]  ;;  %v219_v11 = vld [vmem:[%s857_s19 + $0x28] sm:$0xff]  ;;  %s314_s30 = sshll.u32 %s898_s23, 4  ;;  %s952_s10 = scalar_lea.hbm %s1001_s3, %s423_s26  ;;  %s945_s30 = int_to_ptr.vmem [resolvable:$true] %s314_s30 }
  0x6f   : > { %v242_v9 = vmul.f32 %v868_v1, %v217_v6  ;;  %v220_v12 = vld [vmem:[%s857_s19 + $0x30] sm:$0xff]  ;;  %v243_v14 = vmul.f32 %v868_v1, %v218_v10  ;;  %v244_v15 = vmul.f32 %v868_v1, %v219_v11  ;;  %v221_v17 = vld [vmem:[%s857_s19 + $0x38] sm:$0xff]  ;;  %v222_v18 = vld [vmem:[%s857_s19 + $0x40] sm:$0xff]  ;;  %s301_s11 = scalar_lea.sflag [#allocation4], %s851_s17  ;;  %s581_s20 = scalar_lea.vmem %s945_s30, 2304 }
  0x70   : > { %v264_v13 = vadd.f32 %v870_v2, %v239_v3  ;;  %v245_v16 = vmul.f32 %v868_v1, %v220_v12  ;;  %v223_v19 = vld [vmem:[%s857_s19 + $0x48] sm:$0xff]  ;;  %v265_v20 = vadd.f32 %v870_v2, %v240_v7  ;;  %v266_v21 = vadd.f32 %v870_v2, %v241_v8  ;;  %v224_v24 = vld [vmem:[%s857_s19 + $0x50] sm:$0xff]  ;;  %v225_v25 = vld [vmem:[%s857_s19 + $0x58] sm:$0xff]  ;;  %p582_p8 = scmp.ne.s32.totalorder %s945_s30, %s581_s20  ;;  %p1020_p4 = scmp.ne.s32.totalorder %s1009_s24, 0 }
  0x71   : > { %v267_v22 = vadd.f32 %v870_v2, %v242_v9  ;;  %v246_v23 = vmul.f32 %v868_v1, %v221_v17  ;;  %v226_v26 = vld [vmem:[%s857_s19 + $0x60] sm:$0xff]  ;;  %v268_v27 = vadd.f32 %v870_v2, %v243_v14  ;;  %v269_v28 = vadd.f32 %v870_v2, %v244_v15  ;;  %v227_v31 = vld [vmem:[%s857_s19 + $0x68] sm:$0xff]  ;;  %v228_v32 = vld [vmem:[%s857_s19 + $0x70] sm:$0xff]  ;;  %s658_s22 = smov [#allocation8]  }
  0x72   : > { %282 = vst [vmem:[%s898_s23] sm:$0xff] %v264_v13  ;;  %v270_v29 = vadd.f32 %v870_v2, %v245_v16  ;;  %v247_v30 = vmul.f32 %v868_v1, %v222_v18  ;;  %v229_v33 = vld [vmem:[%s857_s19 + $0x78] sm:$0xff]  ;;  %283 = vst [vmem:[%s898_s23 + $0x8] sm:$0xff] %v265_v20  ;;  %v248_v35 = vmul.f32 %v868_v1, %v223_v19  ;;  %v230_v38 = vld [vmem:[%s857_s19 + $0x80] sm:$0xff]  ;;  %p583_p5 = pnand %p582_p8, %p1020_p4  ;;  %s585_s4 = sshll.u32 %s658_s22, 4  ;;  %s586_s4 = int_to_ptr.vmem [resolvable:$false] %s585_s4 }
  0x73   : > { %284 = vst [vmem:[%s898_s23 + $0x10] sm:$0xff] %v266_v21  ;;  %285 = vst [vmem:[%s898_s23 + $0x18] sm:$0xff] %v267_v22  ;;  %v271_v34 = vadd.f32 %v870_v2, %v246_v23  ;;  %v249_v36 = vmul.f32 %v868_v1, %v224_v24  ;;  %v250_v37 = vmul.f32 %v868_v1, %v225_v25  ;;  %v231_v43 = vld [vmem:[%s857_s19 + $0x88] sm:$0xff]  ;;  %s587_s27 = scalar_lea.vmem %s586_s4, 4608  ;;  %p588_p2 = scmp.lt.s32.totalorder %s945_s30, %s586_s4 }
  0x74   : > { %286 = vst [vmem:[%s898_s23 + $0x20] sm:$0xff] %v268_v27  ;;  %287 = vst [vmem:[%s898_s23 + $0x28] sm:$0xff] %v269_v28  ;;  %v272_v39 = vadd.f32 %v870_v2, %v247_v30  ;;  %v251_v40 = vmul.f32 %v868_v1, %v226_v26  ;;  %v252_v41 = vmul.f32 %v868_v1, %v227_v31  ;;  %p584_p10 = pneg %p583_p5  ;;  %p589_p0 = scmp.lt.s32.totalorder %s587_s27, %s581_s20 }
  0x75   : > { %288 = vst [vmem:[%s898_s23 + $0x30] sm:$0xff] %v270_v29  ;;  %v253_v42 = vmul.f32 %v868_v1, %v228_v32  ;;  %289 = vst [vmem:[%s898_s23 + $0x38] sm:$0xff] %v271_v34  ;;  %v273_v44 = vadd.f32 %v870_v2, %v248_v35  ;;  %v274_v45 = vadd.f32 %v870_v2, %v249_v36 }
  0x76   : > { %v275_v46 = vadd.f32 %v870_v2, %v250_v37  ;;  %v254_v47 = vmul.f32 %v868_v1, %v229_v33  ;;  %290 = vst [vmem:[%s898_s23 + $0x40] sm:$0xff] %v272_v39  ;;  %v276_v48 = vadd.f32 %v870_v2, %v251_v40  ;;  %v277_v49 = vadd.f32 %v870_v2, %v252_v41  ;;  %p590_p9 = por %p589_p0, %p588_p2 }
  0x77   : > { %v278_v50 = vadd.f32 %v870_v2, %v253_v42  ;;  %v255_v51 = vmul.f32 %v868_v1, %v230_v38  ;;  %291 = vst [vmem:[%s898_s23 + $0x48] sm:$0xff] %v273_v44  ;;  %292 = vst [vmem:[%s898_s23 + $0x50] sm:$0xff] %v274_v45  ;;  %v256_v53 = vmul.f32 %v868_v1, %v231_v43 }
  0x78   : > { %293 = vst [vmem:[%s898_s23 + $0x58] sm:$0xff] %v275_v46  ;;  %v279_v52 = vadd.f32 %v870_v2, %v254_v47  ;;  %294 = vst [vmem:[%s898_s23 + $0x60] sm:$0xff] %v276_v48  ;;  %p591_p6 = pnand %p590_p9, %p584_p10 }
  0x79   : > { %295 = vst [vmem:[%s898_s23 + $0x68] sm:$0xff] %v277_v49  ;;  %296 = vst [vmem:[%s898_s23 + $0x70] sm:$0xff] %v278_v50  ;;  %v280_v54 = vadd.f32 %v870_v2, %v255_v51  ;;  %v281_v55 = vadd.f32 %v870_v2, %v256_v53 }
  0x7a   : > { %297 = vst [vmem:[%s898_s23 + $0x78] sm:$0xff] %v279_v52 }
  0x7b   : > { %298 = vst [vmem:[%s898_s23 + $0x80] sm:$0xff] %v280_v54  ;;  %299 = vst [vmem:[%s898_s23 + $0x88] sm:$0xff] %v281_v55 }
  0x7c   : > { %594 = shalt.err (!%p591_p6)
}
  0x7d   : > { %s595_s6 = scalar_lea.hbm %s952_s10, 2304  ;;  %s599_s29 = scalar_lea.hbm %s1001_s3, 4608 }
  0x7e   : > { %p596_p12 = scmp.ne.s32.totalorder %s952_s10, %s595_s6  ;;  %p600_p11 = scmp.lt.u32.totalorder %s952_s10, %s1001_s3 }
  0x7f   : > { %p601_p7 = scmp.lt.u32.totalorder %s599_s29, %s595_s6  ;;  %p603_p8 = scmp.lt.u32.totalorder %s595_s6, %s952_s10 }
  0x80   : > { %p597_p13 = pnand %p596_p12, %p1020_p4 }
  0x81   : > { %p602_p3 = por %p601_p7, %p600_p11 }
  0x82   : > { %p598_p1 = pneg %p597_p13 }
  0x83   : > { %p604_p5 = por %p603_p8, %p602_p3 }
  0x85   : > { %p605_p10 = pnand %p604_p5, %p598_p1 }
  0x87   : > { %608 = shalt.err (!%p605_p10)
}
  0x88   : > { %s659_s19 = smov 128   ;;  %s660_s23 = smov 8  }
  0x89   : > { %434 = dma.vmem_to_hbm [thread:$0]  (%p1020_p4), %s945_s30, 2304, %s952_s10, %s301_s11, %s659_s19, %s659_s19, %s660_s23  }
  0x8a PF: > { %s329_s26 = sand.u32 1, %s639_s12   ;;  %p1021_p2 = scmp.ne.s32.totalorder %s1010_s25, 0 }
  0x8b   : > { %p1022_p0 = scmp.ge.s32.totalorder %s651_s15, 2  ;;  %s330_s16 = scalar_lea.sflag [#allocation4], %s329_s26 }
  0x8d   : > { %p448_p9 = pnand %p1022_p0, %p1021_p2 }
  0x8f   : > { %634 = dma.done.wait (!%p448_p9), %s330_s16, 2304  }
  0x90   : > { %636 = vsyncadd (!%p448_p9), %s330_s16, 4294964992  ;;  %p17_p6 = scmp.ge.s32.totalorder %s706_s18, 4   ;;  %s1023_s12 = smov %s643_s13 }
  0x91   : > { %s1024_s13 = smov %s647_s14  ;;  %s1025_s14 = smov %s718_s21 }
  0x92   : > { %s1026_s15 = smov %s706_s18  ;;  %19 = sbr.rel (!%p17_p6) target bundleno = 6 (0x6), region = 85 }
  0x99   :  { %335 = vsyncpa [#allocation3], 1 }
  0x9a   :  { %337 = vsyncpa [#allocation3 + $0x1], 1 }
  0x9b   :  { %338 = vsyncpa [#allocation6], 1 }
  0x9c   :  { %339 = vsyncpa [#allocation4], 1 }
  0x9d   :  { %341 = vsyncpa [#allocation4 + $0x1], 1 }

// kernel: unet_layer_pallas.4
= control target key start
LH: loop header
LB: loop body
LE: loop exit
PB: predicated region body
PF: predicated region fallthrough
CT: control target
= control target key end

     0   :  { %10 = vsyncpa [#allocation3], 0  ;;  %s7749_s0 = inlined_call_operand.hbm [shape: f32[2,196,128], index: 0, kind: input, shape index: {}]   ;;  %s7750_s1 = inlined_call_operand.hbm [shape: f32[9,128,128], index: 1, kind: input, shape index: {}]   ;;  %s7751_s2 = inlined_call_operand.hbm [shape: f32[1,128], index: 2, kind: input, shape index: {}]   ;;  %s7752_s3 = inlined_call_operand.hbm [shape: f32[2,144,128], index: 3, kind: output, shape index: {0}]   ;;  %s7753_s4 = inlined_call_operand.hbm [shape: f32[2,2,128], index: 4, kind: output, shape index: {1}]  }
   0x1   :  { %12 = vsyncpa [#allocation3 + $0x1], 0 }
   0x2   :  { %13 = vsyncpa [#allocation6], 0 }
   0x3   :  { %14 = vsyncpa [#allocation4], 0 }
   0x4   :  { %16 = vsyncpa [#allocation4 + $0x1], 0 }
   0x5   :  { %17 = vsyncpa [#allocation10], 0 }
   0x6   :  { %19 = vsyncpa [#allocation10 + $0x1], 0  ;;  %s5838_s15 = smov 0   ;;  %s5840_s16 = smov 0  }
   0x7   :  { %s5842_s17 = smov 0   ;;  %s5844_s18 = smov 0  }
   0x8 LB: > { %s5859_s19 = sadd.s32 4294967295, %s5801_s18   ;;  %s4191_s20 = sadd.s32 4294967294, %s5801_s18   ;;  %s5801_s18 = sphi %s5844_s18, %s8230_s18   ;;  %s5797_s17 = sphi %s5842_s17, %s8229_s17   ;;  %s5793_s16 = sphi %s5840_s16, %s8228_s16   ;;  %s5789_s15 = sphi %s5838_s15, %s8227_s15  }
   0x9   : > { %p45_p0 = scmp.ne.s32.totalorder %s5793_s16, %s5789_s15  ;;  %p7754_p1 = scmp.eq.s32.totalorder %s5859_s19, 0 }
   0xa   : > { %p117_p3 = scmp.eq.s32.totalorder %s4191_s20, 1  ;;  %p4192_p5 = scmp.ge.s32.totalorder %s5801_s18, 1 }
   0xb   : > { %p5868_p4 = por %p7754_p1, %p45_p0  ;;  %p150_p7 = scmp.lt.s32.totalorder %s5801_s18, 3 }
   0xc   : > { %p5873_p6 = por %p117_p3, %p45_p0  ;;  %s5803_s24 = smov [#allocation5]  }
   0xd   : > { %s7938_s21 = scalar_select %p5868_p4, 1, 0 }
   0xe   : > { %s7939_s22 = scalar_select %p5873_p6, 1, 0 }
   0xf   : > { %p5878_p8 = pnand %p4192_p5, %p150_p7  ;;  %s162_s25 = sshll.u32 %s5803_s24, 4  ;;  %s5882_s25 = int_to_ptr.vmem [resolvable:$true] %s162_s25 }
  0x10   : > { %s5804_s27 = smov [#allocation7]   ;;  %s5613_s5 = scalar_lea.hbm %s7750_s1, 18432 }
  0x11   : > { %p5526_p9 = pneg %p5878_p8  ;;  %s176_s28 = sshll.u32 %s5804_s27, 4  ;;  %s5893_s28 = int_to_ptr.vmem [resolvable:$true] %s176_s28 }
  0x12   : > { %p5614_p12 = scmp.ne.s32.totalorder %s7750_s1, %s5613_s5  ;;  %p5620_p5 = scmp.lt.u32.totalorder %s5613_s5, %s7750_s1 }
  0x13   : > { %p5889_p11 = pnand %p5526_p9, %p7754_p1 }
  0x15   : > { %p5615_p13 = pneg %p5889_p11 }
  0x17   : > { %p5616_p0 = pnand %p5615_p13, %p5614_p12 }
  0x19   : > { %p5617_p3 = pneg %p5616_p0 }
  0x1b   : > { %p5622_p7 = pnand %p5620_p5, %p5617_p3 }
  0x1d   : > { %5625 = shalt.err (!%p5622_p7)
}
  0x1e   : > { %s5626_s10 = scalar_lea.vmem %s5882_s25, 18432  ;;  %p5634_p2 = scmp.lt.s32.totalorder %s5882_s25, %s5882_s25 }
  0x1f   : > { %p5627_p9 = scmp.ne.s32.totalorder %s5882_s25, %s5626_s10  ;;  %p5635_p12 = scmp.lt.s32.totalorder %s5626_s10, %s5626_s10 }
  0x21   : > { %p5629_p10 = pnand %p5627_p9, %p5615_p13  ;;  %p5636_p0 = por %p5635_p12, %p5634_p2 }
  0x23   : > { %p5630_p1 = pneg %p5629_p10 }
  0x25   : > { %p5637_p6 = pnand %p5636_p0, %p5630_p1 }
  0x27   : > { %5640 = shalt.err (!%p5637_p6)
}
  0x28   : > { %s5805_s11 = smov 128   ;;  %s5806_s12 = smov 8  }
  0x29   : > { %5529 = dma.hbm_to_vmem [thread:$0]  (!%p5889_p11), %s7750_s1, 18432, %s5882_s25, [#allocation6], %s5805_s11, %s5805_s11, %s5806_s12  }
  0x2a   : > { %s5641_s27 = scalar_lea.hbm %s7751_s2, 16 }
  0x2b   : > { %p5642_p1 = scmp.ne.s32.totalorder %s7751_s2, %s5641_s27  ;;  %p5648_p10 = scmp.lt.u32.totalorder %s5641_s27, %s7751_s2 }
  0x2d   : > { %p5644_p2 = pnand %p5642_p1, %p5615_p13 }
  0x2f   : > { %p5645_p6 = pneg %p5644_p2 }
  0x31   : > { %p5650_p3 = pnand %p5648_p10, %p5645_p6 }
  0x33   : > { %5653 = shalt.err (!%p5650_p3)
}
  0x34   : > { %s5654_s25 = scalar_lea.vmem %s5893_s28, 16  ;;  %s5661_s7 = scalar_lea.vmem %s5893_s28, 32 }
  0x35   : > { %p5655_p5 = scmp.ne.s32.totalorder %s5893_s28, %s5654_s25  ;;  %p5662_p12 = scmp.lt.s32.totalorder %s5893_s28, %s5893_s28 }
  0x36   : > { %p5663_p0 = scmp.lt.s32.totalorder %s5661_s7, %s5654_s25 }
  0x37   : > { %p5657_p7 = pnand %p5655_p5, %p5615_p13 }
  0x38   : > { %p5664_p1 = por %p5663_p0, %p5662_p12 }
  0x39   : > { %p5658_p9 = pneg %p5657_p7 }
  0x3b   : > { %p5665_p2 = pnand %p5664_p1, %p5658_p9 }
  0x3d   : > { %5668 = shalt.err (!%p5665_p2)
}
  0x3e   : > { %5532 = dma.hbm_to_vmem [thread:$0]  (!%p5889_p11), %s7751_s2, 16, %s5893_s28, [#allocation6]  }
  0x3f   : > { %s5952_s10 = sadd.s32 1, %s5801_s18   ;;  %s32_s26 = sadd.s32 1, %s5797_s17 }
  0x40   : > { %s29_s13 = ssub.s32 %s5801_s18, %s5952_s10  ;;  %p39_p13 = scmp.ne.s32.totalorder %s5797_s17, %s5793_s16 }
  0x41   : > { %p30_p6 = scmp.eq.s32.totalorder %s29_s13, 0  ;;  %p40_p10 = scmp.eq.s32.totalorder %s5801_s18, 0 }
  0x42   : > { %p7942_p3 = scmp.eq.s32.totalorder %s5859_s19, 1  ;;  %p5546_p7 = scmp.lt.s32.totalorder %s5801_s18, 2 }
  0x43   : > { %s5968_s20 = scalar_select %p30_p6, %s5797_s17, %s32_s26  }
  0x44   : > { %p5962_p5 = por %p7942_p3, %p39_p13  ;;  %p41_p9 = por %p40_p10, %p39_p13 }
  0x45   : > { %s187_s24 = sand.u32 1, %s5797_s17   ;;  %s5508_s28 = smul.u32 3200, %s5801_s18 }
  0x46   : > { %s7943_s14 = scalar_select %p5962_p5, 1, 0 }
  0x47   : > { %s5507_s27 = smul.u32 200, %s187_s24  ;;  %p5972_p11 = pnand %p5546_p7, %p41_p9 }
  0x48   : > { %s5979_s6 = scalar_lea.hbm %s7749_s0, %s5508_s28  ;;  %s5983_s8 = scalar_lea.sflag [#allocation3], %s187_s24 }
  0x49   : > { %s191_s25 = scalar_lea.vmem [#allocation2], %s5507_s27  ;;  %s5669_s9 = scalar_lea.hbm %s5979_s6, 3200 }
  0x4a   : > { %s198_s7 = sshll.u32 %s191_s25, 4  ;;  %p5670_p12 = scmp.ne.s32.totalorder %s5979_s6, %s5669_s9  ;;  %s5981_s7 = int_to_ptr.vmem [resolvable:$true] %s198_s7 }
  0x4b   : > { %p5671_p0 = pneg %p5972_p11  ;;  %s5674_s28 = scalar_lea.hbm %s7749_s0, 6400 }
  0x4c   : > { %p5675_p13 = scmp.lt.u32.totalorder %s5979_s6, %s7749_s0  ;;  %p5676_p6 = scmp.lt.u32.totalorder %s5674_s28, %s5669_s9 }
  0x4d   : > { %p5672_p1 = pnand %p5671_p0, %p5670_p12  ;;  %p5678_p3 = scmp.lt.u32.totalorder %s5669_s9, %s5979_s6 }
  0x4e   : > { %p5677_p10 = por %p5676_p6, %p5675_p13 }
  0x4f   : > { %p5673_p2 = pneg %p5672_p1 }
  0x50   : > { %p5679_p7 = por %p5678_p3, %p5677_p10 }
  0x52   : > { %p5680_p9 = pnand %p5679_p7, %p5673_p2 }
  0x54   : > { %5683 = shalt.err (!%p5680_p9)
}
  0x55   : > { %s5684_s24 = scalar_lea.vmem %s5981_s7, 3200  ;;  %s5807_s27 = smov [#allocation2]  }
  0x56   : > { %p5685_p12 = scmp.ne.s32.totalorder %s5981_s7, %s5684_s24  ;;  %s5689_s25 = sshll.u32 %s5807_s27, 4  ;;  %s5690_s25 = int_to_ptr.vmem [resolvable:$false] %s5689_s25 }
  0x57   : > { %s5691_s26 = scalar_lea.vmem %s5690_s25, 6400  ;;  %p5692_p4 = scmp.lt.s32.totalorder %s5981_s7, %s5690_s25 }
  0x58   : > { %p5687_p1 = pnand %p5685_p12, %p5671_p0  ;;  %p5693_p13 = scmp.lt.s32.totalorder %s5691_s26, %s5684_s24 }
  0x5a   : > { %p5688_p5 = pneg %p5687_p1  ;;  %p5694_p6 = por %p5693_p13, %p5692_p4 }
  0x5c   : > { %p5695_p10 = pnand %p5694_p6, %p5688_p5 }
  0x5e   : > { %5698 = shalt.err (!%p5695_p10)
}
  0x5f   : > { %5536 = dma.hbm_to_vmem [thread:$0]  (!%p5972_p11), %s5979_s6, 3200, %s5981_s7, %s5983_s8, %s5805_s11, %s5805_s11, %s5806_s12  }
  0x60   : > { %210 = sbr.rel (%p5878_p8) target bundleno = 683 (0x2ab), region = 32 }
  0x67   : > { %s6017_s9 = sand.u32 1, %s5793_s16   ;;  %p7945_p4 = scmp.ne.s32.totalorder %s7938_s21, 0 }
  0x68   : > { %s5509_s13 = smul.u32 200, %s6017_s9  ;;  %s213_s28 = scalar_lea.sflag [#allocation3], %s6017_s9 }
  0x6a   : > { %s6021_s30 = scalar_lea.vmem [#allocation2], %s5509_s13 }
  0x6b   : > { %5772 = dma.done.wait (%p7945_p4), %s213_s28, 3200  }
  0x6c   : > { %5774 = vsyncadd (%p7945_p4), %s213_s28, 4294964096  ;;  %p7946_p5 = scmp.eq.s32.totalorder %s5859_s19, 0 }
  0x6e   : > { %5776 = dma.done.wait (%p7946_p5), [#allocation6], 18448   ;;  %p7947_p8 = pmov %p7946_p5 }
  0x6f   : > { %vm736_vm0 = vcmask 1040384   ;;  %vm737_vm1 = vcmask 1042434   ;;  %v5808_v0 = vmov 1983009808   ;;  %v308_v2 = vlaneseq  ;;  %v972_v4 = vld [vmem:[#allocation5 + $0x80] sm:$0xff]  ;;  %v973_v5 = vld [vmem:[#allocation5 + $0x88] sm:$0xff] }
  0x70   : > { %5778 = vsyncadd (%p7947_p8), [#allocation6], 4294948848  ;;  %v306_v1 = vunpack.c.l.s4 %v5808_v0  ;;  %v2730_v6 = vld [vmem:[#allocation5 + $0x200] sm:$0xff]  ;;  %vm739_vm3 = vcmask 1044484   ;;  %v5059_v7 = vpack.c.bf16 %v973_v5, %v972_v4  ;;  %v2731_v8 = vld [vmem:[#allocation5 + $0x208] sm:$0xff]  ;;  %vm741_vm5 = vcmask 1046534  }
  0x71   : > { %vm6032_vm2 = vmor %vm736_vm0, %vm737_vm1  ;;  %v974_v9 = vld [vmem:[#allocation5 + $0x90] sm:$0xff]  ;;  %v975_v10 = vld [vmem:[#allocation5 + $0x98] sm:$0xff]  ;;  %v5187_v11 = vpack.c.bf16 %v2731_v8, %v2730_v6  ;;  %v309_v21 = vshrl.u32 %v308_v2, 7  ;;  %v7952_v5 = vmov 0  ;;  %s5510_s21 = smul.u32 144, %s6017_s9  ;;  %s4036_s8 = scalar_lea.sflag [#allocation4], %s6017_s9 }
  0x72   : > { %v5063_v12 = vpack.c.bf16 %v975_v10, %v974_v9  ;;  %v2732_v13 = vld [vmem:[#allocation5 + $0x210] sm:$0xff]  ;;  %v2733_v14 = vld [vmem:[#allocation5 + $0x218] sm:$0xff]  ;;  %v976_v15 = vld [vmem:[#allocation5 + $0xa0] sm:$0xff]  ;;  %5060 = vmatprep.subr.bf16.mxu1 %v5059_v7  ;;  %v307_v20 = vunpack.c.0.s8 %v306_v1  ;;  %s5511_s11 = smul.u32 2304, %s5859_s19  ;;  %p8224_p0 = scmp.ne.s32.totalorder %s7943_s14, 0 }
  0x73   : > { %v5191_v16 = vpack.c.bf16 %v2733_v14, %v2732_v13  ;;  %v977_v17 = vld [vmem:[#allocation5 + $0xa8] sm:$0xff]  ;;  %v2734_v18 = vld [vmem:[#allocation5 + $0x220] sm:$0xff]  ;;  %vm6039_vm4 = vmor %vm6032_vm2, %vm739_vm3  ;;  %5188 = vmatprep.subr.bf16.mxu0 %v5187_v11  ;;  %5062 = vmatpush3.bf16.msra.mxu1 %v5059_v7  ;;  %s7579_s23 = scalar_lea.vmem [#allocation8], %s5510_s21  ;;  %s5809_s24 = smov [#allocation8]  }
  0x74   : > { %v2735_v19 = vld [vmem:[#allocation5 + $0x228] sm:$0xff]  ;;  %v978_v23 = vld [vmem:[#allocation5 + $0xb0] sm:$0xff]  ;;  %v979_v24 = vld [vmem:[#allocation5 + $0xb8] sm:$0xff]  ;;  %5190 = vmatpush3.bf16.msra.mxu0 %v5187_v11  ;;  %5064 = vmatprep.subr.bf16.mxu1 %v5063_v12  ;;  %v5067_v26 = vpack.c.bf16 %v977_v17, %v976_v15  ;;  %v6043_v37 = vsub.s32 %v307_v20, %v309_v21  ;;  %s4054_s12 = sshll.u32 %s7579_s23, 4  ;;  %s7645_s7 = scalar_lea.hbm %s7752_s3, %s5511_s11  ;;  %s7648_s12 = int_to_ptr.vmem [resolvable:$true] %s4054_s12 }
  0x75   : > { %v2736_v25 = vld [vmem:[#allocation5 + $0x230] sm:$0xff]  ;;  %v2737_v27 = vld [vmem:[#allocation5 + $0x238] sm:$0xff]  ;;  %v980_v28 = vld [vmem:[#allocation5 + $0xc0] sm:$0xff]  ;;  %5192 = vmatprep.subr.bf16.mxu0 %v5191_v16  ;;  %v5195_v30 = vpack.c.bf16 %v2735_v19, %v2734_v18  ;;  %v5071_v41 = vpack.c.bf16 %v979_v24, %v978_v23  ;;  %s5699_s5 = scalar_lea.vmem %s7648_s12, 2304  ;;  %s5703_s27 = sshll.u32 %s5809_s24, 4  ;;  %s5704_s27 = int_to_ptr.vmem [resolvable:$false] %s5703_s27 }
  0x76   : > { %v981_v29 = vld [vmem:[#allocation5 + $0xc8] sm:$0xff]  ;;  %v2738_v31 = vld [vmem:[#allocation5 + $0x240] sm:$0xff]  ;;  %v982_v33 = vld [vmem:[#allocation5 + $0xd0] sm:$0xff]  ;;  %v5199_v42 = vpack.c.bf16 %v2737_v27, %v2736_v25  ;;  %p5700_p11 = scmp.ne.s32.totalorder %s7648_s12, %s5699_s5  ;;  %s5705_s25 = scalar_lea.vmem %s5704_s27, 4608 }
  0x77   : > { %v2739_v32 = vld [vmem:[#allocation5 + $0x248] sm:$0xff]  ;;  %v983_v34 = vld [vmem:[#allocation5 + $0xd8] sm:$0xff]  ;;  %v2740_v35 = vld [vmem:[#allocation5 + $0x250] sm:$0xff]  ;;  %5066 = vmatpush3.bf16.msra.mxu1 %v5063_v12  ;;  %v5075_v43 = vpack.c.bf16 %v981_v29, %v980_v28  ;;  %p5706_p7 = scmp.lt.s32.totalorder %s7648_s12, %s5704_s27  ;;  %p5707_p9 = scmp.lt.s32.totalorder %s5705_s25, %s5699_s5 }
  0x78   : > { %v2741_v36 = vld [vmem:[#allocation5 + $0x258] sm:$0xff]  ;;  %v984_v38 = vld [vmem:[#allocation5 + $0xe0] sm:$0xff]  ;;  %v985_v39 = vld [vmem:[#allocation5 + $0xe8] sm:$0xff]  ;;  %5194 = vmatpush3.bf16.msra.mxu0 %v5191_v16  ;;  %5068 = vmatprep.subr.bf16.mxu1 %v5067_v26  ;;  %v5203_v47 = vpack.c.bf16 %v2739_v32, %v2738_v31  ;;  %v6045_v48 = vpack.c.bf16 %v983_v34, %v982_v33  ;;  %p5701_p2 = pnand %p5700_p11, %p8224_p0 }
  0x79   : > { %v2742_v40 = vld [vmem:[#allocation5 + $0x260] sm:$0xff]  ;;  %v2743_v44 = vld [vmem:[#allocation5 + $0x268] sm:$0xff]  ;;  %v986_v45 = vld [vmem:[#allocation5 + $0xf0] sm:$0xff]  ;;  %5196 = vmatprep.subr.bf16.mxu0 %v5195_v30  ;;  %v6047_v49 = vpack.c.bf16 %v2741_v36, %v2740_v35  ;;  %v6049_v50 = vpack.c.bf16 %v985_v39, %v984_v38  ;;  %p5708_p12 = por %p5707_p9, %p5706_p7 }
  0x7a   : > { %v987_v46 = vld [vmem:[#allocation5 + $0xf8] sm:$0xff]  ;;  %v2744_v51 = vld [vmem:[#allocation5 + $0x270] sm:$0xff]  ;;  %v6052_v54 = vpack.c.bf16 %v2743_v44, %v2742_v40  ;;  %v256_v59 = vld [vmem:[%s6021_s30 + $0x10] sm:$0xff]  ;;  %p5702_p3 = pneg %p5701_p2 }
  0x7b   : > { %v2745_v52 = vld [vmem:[#allocation5 + $0x278] sm:$0xff]  ;;  %v6054_v55 = vpack.c.bf16 %v987_v46, %v986_v45  ;;  %v6062_v60 = vld [vmem:[%s6021_s30 + $0x18] sm:$0xff]  ;;  %5070 = vmatpush3.bf16.msra.mxu1 %v5067_v26  ;;  %v338_v63 = vcombine.high %v256_v59, %v256_v59  ;;  %v6067_v0 = vrot.slane %v256_v59, %v6043_v37  ;;  %vm6083_vm6 = vmor %vm6039_vm4, %vm741_vm5 }
  0x7c   : > { %v254_v53 = vld [vmem:[%s6021_s30] sm:$0xff]  ;;  %v255_v56 = vld [vmem:[%s6021_s30 + $0x8] sm:$0xff]  ;;  %v6064_v61 = vpack.c.bf16 %v2745_v52, %v2744_v51  ;;  %5198 = vmatpush3.bf16.msra.mxu0 %v5195_v30  ;;  %5072 = vmatprep.subr.bf16.mxu1 %v5071_v41  ;;  %v7953_v5 = vsel %vm6083_vm6, 4294967295, %v7952_v5  ;;  %v355_v9 = vcombine.high %v6062_v60, %v6062_v60  ;;  %v2981_v44 = vld [vmem:[#allocation5 + $0x288] sm:$0xff]  ;;  %v6149_v51 = vrot.slane %v6062_v60, %v6043_v37  ;;  %p5709_p1 = pnand %p5708_p12, %p5702_p3 }
  0x7d   : > { %v304_v57 = vcombine.high %v254_v53, %v254_v53  ;;  %v6058_v58 = vrot.slane %v254_v53, %v6043_v37  ;;  %v321_v62 = vcombine.high %v255_v56, %v255_v56  ;;  %v6077_v3 = vrot.slane %v255_v56, %v6043_v37  ;;  %5200 = vmatprep.subr.bf16.mxu0 %v5199_v42 }
  0x7e   : > { %7954 = vst [vmem:[#allocation15_spill] sm:$0xff] %v7953_v5  ;;  %v6091_v7 = vrot.slane %v338_v63, %v6043_v37  ;;  %v6095_v8 = vcombine.high %v6067_v0, %v6067_v0  ;;  %v764_v13 = vrot.slane %v6067_v0, 7  ;;  %v6156_v59 = vrot.slane %v355_v9, %v6043_v37 }
  0x7f   : > { %v6070_v1 = vrot.slane %v304_v57, %v6043_v37  ;;  %v6074_v2 = vcombine.high %v6058_v58, %v6058_v58  ;;  %v4202_v4 = vrot.slane %v6058_v58, 9  ;;  %v6088_v6 = vrot.slane %v321_v62, %v6043_v37  ;;  %5074 = vmatpush3.bf16.msra.mxu1 %v5071_v41  ;;  %v258_v57 = vld [vmem:[%s6021_s30 + $0x20] sm:$0xff] }
  0x80   : > { %v754_v14 = vrot.slane %v6077_v3, 7  ;;  %v6113_v16 = vcombine.high %v6091_v7, %v6091_v7  ;;  %v767_v17 = vrot.slane %v6095_v8, 7  ;;  %5202 = vmatpush3.bf16.msra.mxu0 %v5199_v42  ;;  %5076 = vmatprep.subr.bf16.mxu1 %v5075_v43  ;;  %v766_v23 = vrot.slane %v764_v13, 2 }
  0x81   : > { %v6101_v10 = vcombine.high %v6070_v1, %v6070_v1  ;;  %v745_v11 = vrot.slane %v6074_v2, 7  ;;  %v748_v12 = vrot.slane %v6070_v1, 7  ;;  %v6109_v15 = vcombine.high %v6088_v6, %v6088_v6  ;;  %5204 = vmatprep.subr.bf16.mxu0 %v5203_v47 }
  0x82   : > { %v769_v24 = vrot.slane %v767_v17, 2  ;;  %v770_v25 = vrot.slane %v6091_v7, 7  ;;  %v773_v29 = vrot.slane %v6113_v16, 7  ;;  %v756_v30 = vrot.slane %v754_v14, 2 }
  0x83   : > { %v746_v18 = vsel %vm6083_vm6, %v4202_v4, %v745_v11  ;;  %v747_v19 = vrot.slane %v745_v11, 2  ;;  %v750_v20 = vrot.slane %v748_v12, 2  ;;  %v751_v21 = vrot.slane %v6101_v10, 7  ;;  %5078 = vmatpush3.bf16.msra.mxu1 %v5075_v43  ;;  %v2980_v43 = vld [vmem:[#allocation5 + $0x280] sm:$0xff] }
  0x84   : > { %v4203_v22 = vrot.slane %v6109_v15, 9  ;;  %v768_v33 = vsel %vm6083_vm6, %v766_v23, %v767_v17  ;;  %5206 = vmatpush3.bf16.msra.mxu0 %v5203_v47  ;;  %5080 = vmatprep.subr.bf16.mxu1 %v6045_v48  ;;  %v771_v35 = vsel %vm6083_vm6, %v769_v24, %v770_v25  ;;  %v772_v36 = vrot.slane %v770_v25, 2 }
  0x85   : > { %v749_v26 = vsel %vm6083_vm6, %v747_v19, %v748_v12  ;;  %v752_v27 = vsel %vm6083_vm6, %v750_v20, %v751_v21  ;;  %v753_v28 = vrot.slane %v751_v21, 2  ;;  %5208 = vmatprep.subr.bf16.mxu0 %v6047_v49  ;;  %v775_v41 = vrot.slane %v773_v29, 2 }
  0x86   : > { %v988_v31 = vcombine.low %v746_v18, %v749_v26  ;;  %v765_v32 = vsel %vm6083_vm6, %v4203_v22, %v764_v13  ;;  %v6139_v42 = vcombine.high %v6077_v3, %v6077_v3  ;;  %v774_v45 = vsel %vm6083_vm6, %v772_v36, %v773_v29  ;;  %v259_v18 = vld [vmem:[%s6021_s30 + $0x28] sm:$0xff] }
  0x87   : > { %v755_v34 = vsel %vm6083_vm6, %v753_v28, %v754_v14  ;;  %v1006_v38 = vcombine.low %v765_v32, %v768_v33  ;;  %v760_v47 = vrot.slane %v6088_v6, 7  ;;  %5082 = vmatpush3.bf16.msra.mxu1 %v6045_v48  ;;  %v1022_v53 = vcombine.low %v771_v35, %v774_v45  ;;  %v720_v26 = vld [vmem:[#allocation5] sm:$0xff] }
  0x88   : > { %v989_v39 = vcombine.low %v752_v27, %v755_v34  ;;  %v996_v40 = vrot.slane %v988_v31, %v6043_v37  ;;  %v757_v56 = vrot.slane %v6139_v42, 7  ;;  %5210 = vmatpush3.bf16.msra.mxu0 %v6047_v49  ;;  %5084 = vmatprep.subr.bf16.mxu1 %v6049_v50  ;;  %v6162_v60 = vcombine.high %v6149_v51, %v6149_v51  ;;  %v721_v27 = vld [vmem:[#allocation5 + $0x8] sm:$0xff] }
  0x89   : > { %v6144_v46 = vrot.slane %v1006_v38, %v6043_v37  ;;  %v6165_v48 = vrot.slane %v258_v57, %v6043_v37  ;;  %v776_v62 = vrot.slane %v6149_v51, 7  ;;  %v6168_v63 = vpack.c.bf16 %v2981_v44, %v2980_v43  ;;  %5212 = vmatprep.subr.bf16.mxu0 %v6052_v54  ;;  %v260_v44 = vld [vmem:[%s6021_s30 + $0x30] sm:$0xff] }
  0x8a   : > { %v1003_v52 = vrot.slane %v989_v39, %v6043_v37  ;;  %v1030_v9 = vrot.slane %v1022_v53, %v6043_v37  ;;  %v758_v49 = vsel %vm6083_vm6, %v756_v30, %v757_v56  ;;  %v759_v11 = vrot.slane %v757_v56, 2 }
  0x8b   : > { %v6176_v12 = vcombine.high %v6156_v59, %v6156_v59  ;;  %v777_v13 = vsel %vm6083_vm6, %v775_v41, %v776_v62  ;;  %v778_v14 = vrot.slane %v776_v62, 2  ;;  %v779_v17 = vrot.slane %v6162_v60, 7  ;;  %5086 = vmatpush3.bf16.msra.mxu1 %v6049_v50 }
  0x8c   : > { %v1004_v4 = vcombine.low %v996_v40, %v1003_v52  ;;  %v2746_v19 = vcombine.low %v6144_v46, %v1030_v9  ;;  %v761_v20 = vsel %vm6083_vm6, %v759_v11, %v760_v47  ;;  %v4204_v21 = vrot.slane %v6156_v59, 9  ;;  %5214 = vmatpush3.bf16.msra.mxu0 %v6052_v54  ;;  %5088 = vmatprep.subr.bf16.mxu1 %v6054_v55 }
  0x8d   : > { %v786_v22 = vrot.slane %v6165_v48, 7  ;;  %v1005_v23 = vcombine.low %v758_v49, %v761_v20  ;;  %v780_v24 = vsel %vm6083_vm6, %v778_v14, %v779_v17  ;;  %v783_v50 = vrot.slane %v6176_v12, 7  ;;  %5216 = vmatprep.subr.bf16.mxu0 %v6064_v61 }
  0x8e   : > { %4560 = vmatprep.mubr.f32.mxu1 %v1004_v4  ;;  %v372_v25 = vcombine.high %v258_v57, %v258_v57  ;;  %4796 = vmatprep.mubr.f32.mxu0 %v2746_v19  ;;  %v1023_v28 = vcombine.low %v777_v13, %v780_v24  ;;  %v6196_v29 = vcombine.high %v6165_v48, %v6165_v48 }
  0x8f   : > { %v389_v54 = vcombine.high %v259_v18, %v259_v18  ;;  %v788_v30 = vrot.slane %v786_v22, 2  ;;  %v1013_v31 = vrot.slane %v1005_v23, %v6043_v37  ;;  %v784_v32 = vsel %vm6083_vm6, %v4204_v21, %v783_v50  ;;  %5090 = vmatpush3.bf16.msra.mxu1 %v6054_v55  ;;  %v2983_v23 = vld [vmem:[#allocation5 + $0x298] sm:$0xff] }
  0x90   : > { %v785_v33 = vrot.slane %v783_v50, 2  ;;  %v6202_v34 = vrot.slane %v372_v25, %v6043_v37  ;;  %v1037_v35 = vrot.slane %v1023_v28, %v6043_v37  ;;  %v6207_v36 = vrot.slane %v259_v18, %v6043_v37  ;;  %5218 = vmatpush3.bf16.msra.mxu0 %v6064_v61 }
  0x91   : > { %v789_v38 = vrot.slane %v6196_v29, 7  ;;  %v5091_v39 = vpack.c.bf16 %v721_v27, %v720_v26  ;;  %v1021_v40 = vcombine.low %v1013_v31, %v6144_v46  ;;  %5220 = vmatprep.subr.bf16.mxu0 %v6168_v63  ;;  %v6226_v57 = vrot.slane %v389_v54, %v6043_v37  ;;  %v261_v27 = vld [vmem:[%s6021_s30 + $0x38] sm:$0xff] }
  0x92   : > { %v787_v41 = vsel %vm6083_vm6, %v785_v33, %v786_v22  ;;  %v6216_v43 = vcombine.high %v6202_v34, %v6202_v34  ;;  %v792_v55 = vrot.slane %v6202_v34, 7  ;;  %v1038_v47 = vcombine.low %v1030_v9, %v1037_v35  ;;  %v2982_v22 = vld [vmem:[#allocation5 + $0x290] sm:$0xff] }
  0x93   : > { %v1039_v45 = vcombine.low %v784_v32, %v787_v41  ;;  %v790_v52 = vsel %vm6083_vm6, %v788_v30, %v789_v38  ;;  %v791_v61 = vrot.slane %v789_v38, 2  ;;  %5092 = vmatprep.subr.bf16.mxu1 %v5091_v39  ;;  %4561 = vmatmul.mubr.f32.vlgmr.msra.gmra.mrb[0].mxu1 %v1021_v40  ;;  %v798_v56 = vrot.slane %v6207_v36, 7 }
  0x94   : > { %v794_v46 = vrot.slane %v792_v55, 2  ;;  %v795_v53 = vrot.slane %v6216_v43, 7  ;;  %4563 = vmatprep.mubr.f32.mxu1 %v1038_v47  ;;  %v6233_v9 = vcombine.high %v6207_v36, %v6207_v36  ;;  %v6236_v49 = vrot.slane %v260_v44, %v6043_v37  ;;  %5094 = vmatpush3.bf16.msra.mxu1 %v5091_v39  ;;  %v723_v47 = vld [vmem:[#allocation5 + $0x18] sm:$0xff] }
  0x95   : > { %v1047_v62 = vrot.slane %v1039_v45, %v6043_v37  ;;  %v793_v4 = vsel %vm6083_vm6, %v791_v61, %v792_v55  ;;  %v6242_v17 = vcombine.high %v6226_v57, %v6226_v57  ;;  %v802_v21 = vrot.slane %v6226_v57, 7  ;;  %v722_v45 = vld [vmem:[#allocation5 + $0x10] sm:$0xff] }
  0x96   : > { %v796_v11 = vsel %vm6083_vm6, %v794_v46, %v795_v53  ;;  %v797_v13 = vrot.slane %v795_v53, 2  ;;  %v1040_v14 = vcombine.low %v790_v52, %v793_v4  ;;  %v6246_v19 = vcombine.high %v6236_v49, %v6236_v49  ;;  %v262_v4 = vld [vmem:[%s6021_s30 + $0x40] sm:$0xff] }
  0x97   : > { %v2747_v18 = vcombine.low %v1037_v35, %v1047_v62  ;;  %v4205_v20 = vrot.slane %v6233_v9, 9  ;;  %v805_v25 = vrot.slane %v6242_v17, 7  ;;  %v808_v26 = vrot.slane %v6236_v49, 7 }
  0x98   : > { %v799_v24 = vsel %vm6083_vm6, %v797_v13, %v798_v56  ;;  %v1054_v50 = vrot.slane %v1040_v14, %v6043_v37  ;;  %v804_v30 = vrot.slane %v802_v21, 2  ;;  %v811_v31 = vrot.slane %v6246_v19, 7 }
  0x99   : > { %4797 = vmatmul.mubr.f32.vlgmr.msra.gmra.mrb[0].mxu0 %v2747_v18  ;;  %v1056_v28 = vcombine.low %v796_v11, %v799_v24  ;;  %v803_v54 = vsel %vm6083_vm6, %v4205_v20, %v802_v21  ;;  %v807_v33 = vrot.slane %v805_v25, 2  ;;  %v810_v35 = vrot.slane %v808_v26, 2 }
  0x9a   : > { %5222 = vmatpush3.bf16.msra.mxu0 %v6168_v63  ;;  %v6260_v32 = vcombine.low %v1047_v62, %v1054_v50  ;;  %v5223_v38 = vpack.c.bf16 %v2983_v23, %v2982_v22  ;;  %v806_v40 = vsel %vm6083_vm6, %v804_v30, %v805_v25  ;;  %v406_v41 = vcombine.high %v260_v44, %v260_v44 }
  0x9b   : > { %v1064_v39 = vrot.slane %v1056_v28, %v6043_v37  ;;  %v423_v55 = vcombine.high %v261_v27, %v261_v27  ;;  %v809_v63 = vsel %vm6083_vm6, %v807_v33, %v808_v26  ;;  %v812_v52 = vsel %vm6083_vm6, %v810_v35, %v811_v31  ;;  %v2985_v28 = vld [vmem:[#allocation5 + $0x2a8] sm:$0xff] }
  0x9c   : > { %7955 = vst [vmem:[#allocation16_spill] sm:$0xff] %v6260_v32  ;;  %4564 = vmatmul.mubr.f32.gmra.mrb[2].mxu1 %v6260_v32  ;;  %v1057_v61 = vcombine.low %v803_v54, %v806_v40  ;;  %5224 = vmatprep.subr.bf16.mxu0 %v5223_v38  ;;  %v813_v46 = vrot.slane %v811_v31, 2  ;;  %v1073_v56 = vcombine.low %v809_v63, %v812_v52  ;;  %v263_v54 = vld [vmem:[%s6021_s30 + $0x48] sm:$0xff] }
  0x9d   : > { %v2748_v53 = vcombine.low %v1054_v50, %v1064_v39  ;;  %v6271_v62 = vrot.slane %v406_v41, %v6043_v37  ;;  %v6274_v44 = vrot.slane %v261_v27, %v6043_v37  ;;  %v6279_v13 = vrot.slane %v423_v55, %v6043_v37  ;;  %v2984_v27 = vld [vmem:[#allocation5 + $0x2a0] sm:$0xff] }
  0x9e   : > { %v1071_v11 = vrot.slane %v1057_v61, %v6043_v37  ;;  %5226 = vmatpush3.bf16.msra.mxu0 %v5223_v38  ;;  %v5095_v14 = vpack.c.bf16 %v723_v47, %v722_v45  ;;  %v440_v18 = vcombine.high %v262_v4, %v262_v4  ;;  %v1081_v20 = vrot.slane %v1073_v56, %v6043_v37 }
  0x9f   : > { %7956 = vst [vmem:[#allocation17_spill] sm:$0xff] %v6274_v44  ;;  %4799 = vmatprep.mubr.f32.mxu0 %v2748_v53  ;;  %v6284_v21 = vcombine.high %v6271_v62, %v6271_v62  ;;  %v6288_v22 = vcombine.high %v6274_v44, %v6274_v44  ;;  %v814_v23 = vrot.slane %v6271_v62, 7  ;;  %v4206_v50 = vrot.slane %v6274_v44, 9 }
  0xa0   : > { %v6291_v24 = vcombine.low %v1064_v39, %v1071_v11  ;;  %v824_v25 = vrot.slane %v6279_v13, 7  ;;  %5096 = vmatprep.subr.bf16.mxu1 %v5095_v14  ;;  %v6297_v26 = vcombine.high %v6279_v13, %v6279_v13  ;;  %v2749_v30 = vcombine.low %v1071_v11, %v1081_v20 }
  0xa1   : > { %v815_v31 = vsel %vm6083_vm6, %v813_v46, %v814_v23  ;;  %v816_v33 = vrot.slane %v814_v23, 2  ;;  %v817_v35 = vrot.slane %v6284_v21, 7  ;;  %5098 = vmatpush3.bf16.msra.mxu1 %v5095_v14  ;;  %v821_v38 = vrot.slane %v6288_v22, 7 }
  0xa2   : > { %7957 = vst [vmem:[#allocation18_spill] sm:$0xff] %v6291_v24  ;;  %4566 = vmatprep.mubr.f32.mxu1 %v6291_v24  ;;  %v6306_v39 = vrot.slane %v262_v4, %v6043_v37  ;;  %v6309_v40 = vrot.slane %v440_v18, %v6043_v37  ;;  %v826_v41 = vrot.slane %v824_v25, 2  ;;  %4800 = vmatmul.mubr.f32.gmra.mrb[2].mxu0 %v2749_v30  ;;  %v827_v45 = vrot.slane %v6297_v26, 7 }
  0xa3   : > { %v818_v55 = vsel %vm6083_vm6, %v816_v33, %v817_v35  ;;  %v5227_v47 = vpack.c.bf16 %v2985_v28, %v2984_v27  ;;  %v457_v63 = vcombine.high %v263_v54, %v263_v54  ;;  %v822_v52 = vsel %vm6083_vm6, %v4206_v50, %v821_v38 }
  0xa4   : > { %v823_v61 = vrot.slane %v821_v38, 2  ;;  %v1074_v46 = vcombine.low %v815_v31, %v818_v55  ;;  %v6318_v53 = vcombine.high %v6306_v39, %v6306_v39  ;;  %v828_v56 = vsel %vm6083_vm6, %v826_v41, %v827_v45 }
  0xa5   : > { %v829_v4 = vrot.slane %v827_v45, 2  ;;  %v830_v11 = vrot.slane %v6306_v39, 7  ;;  %v836_v14 = vrot.slane %v6309_v40, 7  ;;  %5228 = vmatprep.subr.bf16.mxu0 %v5227_v47  ;;  %v6330_v27 = vcombine.high %v6309_v40, %v6309_v40 }
  0xa6   : > { %v825_v18 = vsel %vm6083_vm6, %v823_v61, %v824_v25  ;;  %v1088_v23 = vrot.slane %v1074_v46, %v6043_v37  ;;  %v833_v50 = vrot.slane %v6318_v53, 7  ;;  %5230 = vmatpush3.bf16.msra.mxu0 %v5227_v47  ;;  %v6335_v33 = vrot.slane %v263_v54, %v6043_v37  ;;  %v724_v46 = vld [vmem:[#allocation5 + $0x20] sm:$0xff] }
  0xa7   : > { %7958 = vst [vmem:[#allocation19_spill] sm:$0xff] %v6330_v27  ;;  %v1090_v28 = vcombine.low %v822_v52, %v825_v18  ;;  %v831_v30 = vsel %vm6083_vm6, %v829_v4, %v830_v11  ;;  %v832_v31 = vrot.slane %v830_v11, 2  ;;  %v6340_v41 = vrot.slane %v457_v63, %v6043_v37 }
  0xa8   : > { %7959 = vst [vmem:[#allocation20_spill] sm:$0xff] %v6335_v33  ;;  %v6337_v35 = vcombine.low %v1081_v20, %v1088_v23  ;;  %v835_v25 = vrot.slane %v833_v50, 2  ;;  %v1091_v38 = vcombine.low %v828_v56, %v831_v30  ;;  %v6347_v47 = vcombine.high %v6335_v33, %v6335_v33  ;;  %v725_v56 = vld [vmem:[#allocation5 + $0x28] sm:$0xff] }
  0xa9   : > { %7961 = vst [vmem:[#allocation22_spill] sm:$0xff] %v6340_v41  ;;  %v1098_v55 = vrot.slane %v1090_v28, %v6043_v37  ;;  %v834_v45 = vsel %vm6083_vm6, %v832_v31, %v833_v50  ;;  %v4207_v54 = vrot.slane %v6330_v27, 9  ;;  %v6356_v52 = vcombine.high %v6340_v41, %v6340_v41  ;;  %v264_v28 = vld [vmem:[%s6021_s30 + $0x50] sm:$0xff] }
  0xaa   : > { %7960 = vst [vmem:[#allocation21_spill] sm:$0xff] %v6337_v35  ;;  %7962 = vst [vmem:[#allocation23_spill] sm:$0xff] %v6347_v47  ;;  %4567 = vmatmul.mubr.f32.gmra.mrb[4].mxu1 %v6337_v35  ;;  %v837_v20 = vsel %vm6083_vm6, %v835_v25, %v836_v14  ;;  %v1105_v63 = vrot.slane %v1091_v38, %v6043_v37  ;;  %v840_v61 = vrot.slane %v6335_v33, 7  ;;  %v843_v18 = vrot.slane %v6347_v47, 7 }
  0xab   : > { %7963 = vst [vmem:[#allocation24_spill] sm:$0xff] %v6356_v52  ;;  %v2750_v4 = vcombine.low %v1088_v23, %v1098_v55  ;;  %v1107_v11 = vcombine.low %v834_v45, %v837_v20  ;;  %v846_v50 = vrot.slane %v6340_v41, 7  ;;  %v849_v25 = vrot.slane %v6356_v52, 7  ;;  %v265_v45 = vld [vmem:[%s6021_s30 + $0x58] sm:$0xff] }
  0xac   : > { %v6362_v30 = vcombine.low %v1098_v55, %v1105_v63  ;;  %v841_v14 = vsel %vm6083_vm6, %v4207_v54, %v840_v61  ;;  %v842_v31 = vrot.slane %v840_v61, 2  ;;  %v845_v35 = vrot.slane %v843_v18, 2  ;;  %v2986_v61 = vld [vmem:[#allocation5 + $0x2b0] sm:$0xff] }
  0xad   : > { %4802 = vmatprep.mubr.f32.mxu0 %v2750_v4  ;;  %v1115_v38 = vrot.slane %v1107_v11, %v6043_v37  ;;  %v848_v24 = vrot.slane %v846_v50, 2  ;;  %v5099_v23 = vpack.c.bf16 %v725_v56, %v724_v46  ;;  %v474_v55 = vcombine.high %v264_v28, %v264_v28  ;;  %v2987_v4 = vld [vmem:[#allocation5 + $0x2b8] sm:$0xff] }
  0xae   : > { %7964 = vst [vmem:[#allocation25_spill] sm:$0xff] %v6362_v30  ;;  %4569 = vmatprep.mubr.f32.mxu1 %v6362_v30  ;;  %v844_v20 = vsel %vm6083_vm6, %v842_v31, %v843_v18  ;;  %v6373_v32 = vrot.slane %v264_v28, %v6043_v37  ;;  %v6376_v54 = vrot.slane %v265_v45, %v6043_v37  ;;  %v851_v27 = vrot.slane %v849_v25, 2 }
  0xaf   : > { %v2751_v11 = vcombine.low %v1105_v63, %v1115_v38  ;;  %v847_v46 = vsel %vm6083_vm6, %v845_v35, %v846_v50  ;;  %v850_v56 = vsel %vm6083_vm6, %v848_v24, %v849_v25  ;;  %v1108_v30 = vcombine.low %v841_v14, %v844_v20  ;;  %5100 = vmatprep.subr.bf16.mxu1 %v5099_v23  ;;  %v266_v14 = vld [vmem:[%s6021_s30 + $0x60] sm:$0xff] }
  0xb0   : > { %7965 = vst [vmem:[#allocation26_spill] sm:$0xff] %v6373_v32  ;;  %7966 = vst [vmem:[#allocation27_spill] sm:$0xff] %v6376_v54  ;;  %v1124_v18 = vcombine.low %v847_v46, %v850_v56  ;;  %v6383_v31 = vrot.slane %v474_v55, %v6043_v37  ;;  %v6387_v28 = vcombine.high %v6373_v32, %v6373_v32  ;;  %5102 = vmatpush3.bf16.msra.mxu1 %v5099_v23 }
  0xb1   : > { %4803 = vmatmul.mubr.f32.gmra.mrb[4].mxu0 %v2751_v11  ;;  %v1122_v63 = vrot.slane %v1108_v30, %v6043_v37  ;;  %v852_v35 = vrot.slane %v6373_v32, 7  ;;  %v862_v50 = vrot.slane %v6376_v54, 7  ;;  %v5231_v24 = vpack.c.bf16 %v2987_v4, %v2986_v61 }
  0xb2   : > { %7967 = vst [vmem:[#allocation28_spill] sm:$0xff] %v6383_v31  ;;  %7968 = vst [vmem:[#allocation29_spill] sm:$0xff] %v6387_v28  ;;  %v1132_v20 = vrot.slane %v1124_v18, %v6043_v37  ;;  %v6396_v55 = vcombine.high %v6383_v31, %v6383_v31  ;;  %v855_v46 = vrot.slane %v6387_v28, 7  ;;  %v4208_v25 = vrot.slane %v6383_v31, 9  ;;  %v726_v28 = vld [vmem:[#allocation5 + $0x30] sm:$0xff]  ;;  %v727_v31 = vld [vmem:[#allocation5 + $0x38] sm:$0xff] }
  0xb3   : > { %v6400_v23 = vcombine.low %v1115_v38, %v1122_v63  ;;  %v853_v30 = vsel %vm6083_vm6, %v851_v27, %v852_v35  ;;  %v854_v11 = vrot.slane %v852_v35, 2  ;;  %5232 = vmatprep.subr.bf16.mxu0 %v5231_v24  ;;  %v491_v56 = vcombine.high %v265_v45, %v265_v45 }
  0xb4   : > { %7969 = vst [vmem:[#allocation30_spill] sm:$0xff] %v6396_v55  ;;  %v2752_v61 = vcombine.low %v1122_v63, %v1132_v20  ;;  %v859_v4 = vrot.slane %v6396_v55, 7  ;;  %v6407_v18 = vcombine.high %v6376_v54, %v6376_v54  ;;  %v508_v32 = vcombine.high %v266_v14, %v266_v14  ;;  %5234 = vmatpush3.bf16.msra.mxu0 %v5231_v24 }
  0xb5   : > { %7970 = vst [vmem:[#allocation31_spill] sm:$0xff] %v6400_v23  ;;  %4570 = vmatmul.mubr.f32.gmra.mrb[6].mxu1 %v6400_v23  ;;  %v856_v27 = vsel %vm6083_vm6, %v854_v11, %v855_v46  ;;  %v6413_v38 = vrot.slane %v491_v56, %v6043_v37  ;;  %v6416_v45 = vrot.slane %v266_v14, %v6043_v37  ;;  %v864_v63 = vrot.slane %v862_v50, 2  ;;  %v267_v14 = vld [vmem:[%s6021_s30 + $0x68] sm:$0xff] }
  0xb6   : > { %7971 = vst [vmem:[#allocation32_spill] sm:$0xff] %v6407_v18  ;;  %4805 = vmatprep.mubr.f32.mxu0 %v2752_v61  ;;  %v860_v35 = vsel %vm6083_vm6, %v4208_v25, %v859_v4  ;;  %v861_v24 = vrot.slane %v859_v4, 2  ;;  %v1125_v55 = vcombine.low %v853_v30, %v856_v27  ;;  %v865_v54 = vrot.slane %v6407_v18, 7 }
  0xb7   : > { %7972 = vst [vmem:[#allocation33_spill] sm:$0xff] %v6413_v38  ;;  %7973 = vst [vmem:[#allocation34_spill] sm:$0xff] %v6416_v45  ;;  %v6423_v23 = vcombine.high %v6413_v38, %v6413_v38  ;;  %v868_v46 = vrot.slane %v6413_v38, 7  ;;  %v874_v11 = vrot.slane %v6416_v45, 7  ;;  %v5103_v56 = vpack.c.bf16 %v727_v31, %v726_v28  ;;  %v8038_v5 = vld [vmem:[#allocation26_spill] sm:$0xff] }
  0xb8   : > { %v863_v61 = vsel %vm6083_vm6, %v861_v24, %v862_v50  ;;  %v1139_v41 = vrot.slane %v1125_v55, %v6043_v37  ;;  %v866_v25 = vsel %vm6083_vm6, %v864_v63, %v865_v54  ;;  %v867_v30 = vrot.slane %v865_v54, 2 }
  0xb9   : > { %7974 = vst [vmem:[#allocation35_spill] sm:$0xff] %v6423_v23  ;;  %v1141_v4 = vcombine.low %v860_v35, %v863_v61  ;;  %v870_v27 = vrot.slane %v868_v46, 2  ;;  %v871_v18 = vrot.slane %v6423_v23, 7  ;;  %5104 = vmatprep.subr.bf16.mxu1 %v5103_v56  ;;  %v6435_v38 = vrot.slane %v508_v32, %v6043_v37  ;;  %v2989_v61 = vld [vmem:[#allocation5 + $0x2c8] sm:$0xff] }
  0xba   : > { %v6437_v52 = vcombine.low %v1132_v20, %v1139_v41  ;;  %v869_v31 = vsel %vm6083_vm6, %v867_v30, %v868_v46  ;;  %v6443_v28 = vcombine.high %v6416_v45, %v6416_v45  ;;  %v6446_v50 = vrot.slane %v267_v14, %v6043_v37  ;;  %5106 = vmatpush3.bf16.msra.mxu1 %v5103_v56  ;;  %v2988_v56 = vld [vmem:[#allocation5 + $0x2c0] sm:$0xff] }
  0xbb   : > { %7975 = vst [vmem:[#allocation36_spill] sm:$0xff] %v6435_v38  ;;  %v1149_v54 = vrot.slane %v1141_v4, %v6043_v37  ;;  %v872_v55 = vsel %vm6083_vm6, %v870_v27, %v871_v18  ;;  %v873_v32 = vrot.slane %v871_v18, 2  ;;  %v1142_v63 = vcombine.low %v866_v25, %v869_v31 }
  0xbc   : > { %7976 = vst [vmem:[#allocation37_spill] sm:$0xff] %v6437_v52  ;;  %7977 = vst [vmem:[#allocation38_spill] sm:$0xff] %v6443_v28  ;;  %4572 = vmatprep.mubr.f32.mxu1 %v6437_v52  ;;  %v6454_v20 = vcombine.high %v6435_v38, %v6435_v38  ;;  %v6458_v35 = vcombine.high %v6446_v50, %v6446_v50  ;;  %v4209_v24 = vrot.slane %v6443_v28, 9  ;;  %v878_v46 = vrot.slane %v6435_v38, 7  ;;  %v268_v28 = vld [vmem:[%s6021_s30 + $0x70] sm:$0xff] }
  0xbd   : > { %7978 = vst [vmem:[#allocation39_spill] sm:$0xff] %v6446_v50  ;;  %v2753_v30 = vcombine.low %v1139_v41, %v1149_v54  ;;  %v875_v18 = vsel %vm6083_vm6, %v873_v32, %v874_v11  ;;  %v1156_v25 = vrot.slane %v1142_v63, %v6043_v37  ;;  %v884_v4 = vrot.slane %v6446_v50, 7 }
  0xbe   : > { %7979 = vst [vmem:[#allocation40_spill] sm:$0xff] %v6454_v20  ;;  %7980 = vst [vmem:[#allocation41_spill] sm:$0xff] %v6458_v35  ;;  %v1158_v27 = vcombine.low %v872_v55, %v875_v18  ;;  %v879_v31 = vsel %vm6083_vm6, %v4209_v24, %v878_v46  ;;  %v880_v52 = vrot.slane %v878_v46, 2  ;;  %v881_v23 = vrot.slane %v6454_v20, 7  ;;  %v728_v18 = vld [vmem:[#allocation5 + $0x40] sm:$0xff]  ;;  %v729_v24 = vld [vmem:[#allocation5 + $0x48] sm:$0xff] }
  0xbf   : > { %4806 = vmatmul.mubr.f32.gmra.mrb[6].mxu0 %v2753_v30  ;;  %v6470_v38 = vcombine.low %v1149_v54, %v1156_v25  ;;  %v886_v45 = vrot.slane %v884_v4, 2  ;;  %v887_v41 = vrot.slane %v6458_v35, 7  ;;  %v5235_v33 = vpack.c.bf16 %v2989_v61, %v2988_v56 }
  0xc0   : > { %v1166_v11 = vrot.slane %v1158_v27, %v6043_v37  ;;  %v882_v32 = vsel %vm6083_vm6, %v880_v52, %v881_v23  ;;  %v883_v55 = vrot.slane %v881_v23, 2  ;;  %v525_v63 = vcombine.high %v267_v14, %v267_v14 }
  0xc1   : > { %7981 = vst [vmem:[#allocation42_spill] sm:$0xff] %v6470_v38  ;;  %4573 = vmatmul.mubr.f32.gmra.mrb[8].mxu1 %v6470_v38  ;;  %v888_v46 = vsel %vm6083_vm6, %v886_v45, %v887_v41  ;;  %v1159_v54 = vcombine.low %v879_v31, %v882_v32  ;;  %5236 = vmatprep.subr.bf16.mxu0 %v5235_v33  ;;  %v889_v50 = vrot.slane %v887_v41, 2  ;;  %v269_v41 = vld [vmem:[%s6021_s30 + $0x78] sm:$0xff]  ;;  %v270_v38 = vld [vmem:[%s6021_s30 + $0x80] sm:$0xff] }
  0xc2   : > { %v542_v30 = vcombine.high %v268_v28, %v268_v28  ;;  %v2754_v56 = vcombine.low %v1156_v25, %v1166_v11  ;;  %v885_v61 = vsel %vm6083_vm6, %v883_v55, %v884_v4  ;;  %v6482_v52 = vrot.slane %v525_v63, %v6043_v37  ;;  %5238 = vmatpush3.bf16.msra.mxu0 %v5235_v33 }
  0xc3   : > { %v6485_v23 = vrot.slane %v268_v28, %v6043_v37  ;;  %v1173_v14 = vrot.slane %v1159_v54, %v6043_v37  ;;  %v1175_v27 = vcombine.low %v885_v61, %v888_v46  ;;  %v5107_v31 = vpack.c.bf16 %v729_v24, %v728_v18 }
  0xc4   : > { %7982 = vst [vmem:[#allocation43_spill] sm:$0xff] %v6482_v52  ;;  %v6489_v45 = vrot.slane %v542_v30, %v6043_v37  ;;  %4808 = vmatprep.mubr.f32.mxu0 %v2754_v56  ;;  %v6493_v25 = vcombine.high %v6482_v52, %v6482_v52  ;;  %v890_v28 = vrot.slane %v6482_v52, 7  ;;  %v6516_v61 = vrot.slane %v269_v41, %v6043_v37  ;;  %v731_v52 = vld [vmem:[#allocation5 + $0x58] sm:$0xff] }
  0xc5   : > { %7983 = vst [vmem:[#allocation44_spill] sm:$0xff] %v6485_v23  ;;  %v6497_v4 = vcombine.high %v6485_v23, %v6485_v23  ;;  %v4210_v33 = vrot.slane %v6485_v23, 9  ;;  %v1183_v32 = vrot.slane %v1175_v27, %v6043_v37  ;;  %v6503_v55 = vcombine.low %v1166_v11, %v1173_v14  ;;  %5108 = vmatprep.subr.bf16.mxu1 %v5107_v31 }
  0xc6   : > { %7984 = vst [vmem:[#allocation45_spill] sm:$0xff] %v6489_v45  ;;  %7985 = vst [vmem:[#allocation46_spill] sm:$0xff] %v6493_v25  ;;  %v900_v63 = vrot.slane %v6489_v45, 7  ;;  %v6508_v18 = vcombine.high %v6489_v45, %v6489_v45  ;;  %v891_v24 = vsel %vm6083_vm6, %v889_v50, %v890_v28  ;;  %v892_v46 = vrot.slane %v890_v28, 2  ;;  %5110 = vmatpush3.bf16.msra.mxu1 %v5107_v31 }
  0xc7   : > { %7986 = vst [vmem:[#allocation47_spill] sm:$0xff] %v6497_v4  ;;  %7987 = vst [vmem:[#allocation48_spill] sm:$0xff] %v6503_v55  ;;  %v893_v54 = vrot.slane %v6493_v25, 7  ;;  %v897_v30 = vrot.slane %v6497_v4, 7  ;;  %v2755_v56 = vcombine.low %v1173_v14, %v1183_v32  ;;  %4575 = vmatprep.mubr.f32.mxu1 %v6503_v55  ;;  %v559_v11 = vcombine.high %v269_v41, %v269_v41  ;;  %v271_v25 = vld [vmem:[%s6021_s30 + $0x88] sm:$0xff] }
  0xc8   : > { %7988 = vst [vmem:[#allocation49_spill] sm:$0xff] %v6508_v18  ;;  %7989 = vst [vmem:[#allocation50_spill] sm:$0xff] %v6516_v61  ;;  %v902_v27 = vrot.slane %v900_v63, 2  ;;  %v903_v45 = vrot.slane %v6508_v18, 7  ;;  %v6529_v41 = vcombine.high %v6516_v61, %v6516_v61  ;;  %v906_v55 = vrot.slane %v6516_v61, 7 }
  0xc9   : > { %v894_v23 = vsel %vm6083_vm6, %v892_v46, %v893_v54  ;;  %v898_v50 = vsel %vm6083_vm6, %v4210_v33, %v897_v30  ;;  %v899_v28 = vrot.slane %v897_v30, 2  ;;  %4809 = vmatmul.mubr.f32.gmra.mrb[8].mxu0 %v2755_v56  ;;  %v6525_v14 = vrot.slane %v559_v11, %v6043_v37 }
  0xca   : > { %v1176_v31 = vcombine.low %v891_v24, %v894_v23  ;;  %7991 = vst [vmem:[#allocation52_spill] sm:$0xff] %v6529_v41  ;;  %v904_v33 = vsel %vm6083_vm6, %v902_v27, %v903_v45  ;;  %v905_v54 = vrot.slane %v903_v45, 2  ;;  %v576_v30 = vcombine.high %v270_v38, %v270_v38  ;;  %v2990_v45 = vld [vmem:[#allocation5 + $0x2d0] sm:$0xff]  ;;  %v2991_v27 = vld [vmem:[#allocation5 + $0x2d8] sm:$0xff] }
  0xcb   : > { %7990 = vst [vmem:[#allocation51_spill] sm:$0xff] %v6525_v14  ;;  %v901_v46 = vsel %vm6083_vm6, %v899_v28, %v900_v63  ;;  %v908_v24 = vrot.slane %v906_v55, 2  ;;  %v909_v11 = vrot.slane %v6529_v41, 7  ;;  %v912_v4 = vrot.slane %v6525_v14, 7 }
  0xcc   : > { %v1190_v56 = vrot.slane %v1176_v31, %v6043_v37  ;;  %v1192_v23 = vcombine.low %v898_v50, %v901_v46  ;;  %v907_v18 = vsel %vm6083_vm6, %v905_v54, %v906_v55  ;;  %v6543_v61 = vcombine.high %v6525_v14, %v6525_v14  ;;  %v730_v14 = vld [vmem:[#allocation5 + $0x50] sm:$0xff] }
  0xcd   : > { %v6546_v63 = vrot.slane %v270_v38, %v6043_v37  ;;  %v910_v31 = vsel %vm6083_vm6, %v908_v24, %v909_v11  ;;  %v911_v46 = vrot.slane %v909_v11, 2  ;;  %v1193_v55 = vcombine.low %v904_v33, %v907_v18 }
  0xce   : > { %7992 = vst [vmem:[#allocation53_spill] sm:$0xff] %v6543_v61  ;;  %v1200_v28 = vrot.slane %v1192_v23, %v6043_v37  ;;  %v6549_v50 = vcombine.low %v1183_v32, %v1190_v56  ;;  %v6554_v54 = vrot.slane %v576_v30, %v6043_v37  ;;  %v4211_v38 = vrot.slane %v6543_v61, 9 }
  0xcf   : > { %7993 = vst [vmem:[#allocation54_spill] sm:$0xff] %v6546_v63  ;;  %v6558_v41 = vcombine.high %v6546_v63, %v6546_v63  ;;  %v913_v32 = vsel %vm6083_vm6, %v911_v46, %v912_v4  ;;  %v916_v24 = vrot.slane %v6546_v63, 7  ;;  %v5239_v18 = vpack.c.bf16 %v2991_v27, %v2990_v45  ;;  %v272_v63 = vld [vmem:[%s6021_s30 + $0x90] sm:$0xff] }
  0xd0   : > { %7994 = vst [vmem:[#allocation55_spill] sm:$0xff] %v6549_v50  ;;  %7995 = vst [vmem:[#allocation56_spill] sm:$0xff] %v6554_v54  ;;  %v2756_v23 = vcombine.low %v1190_v56, %v1200_v28  ;;  %4576 = vmatmul.mubr.f32.gmra.mrb[10].mxu1 %v6549_v50  ;;  %v1207_v33 = vrot.slane %v1193_v55, %v6043_v37  ;;  %v1209_v30 = vcombine.low %v910_v31, %v913_v32 }
  0xd1   : > { %7996 = vst [vmem:[#allocation57_spill] sm:$0xff] %v6558_v41  ;;  %v6568_v11 = vcombine.high %v6554_v54, %v6554_v54  ;;  %v919_v61 = vrot.slane %v6558_v41, 7  ;;  %v917_v56 = vsel %vm6083_vm6, %v4211_v38, %v916_v24  ;;  %v918_v50 = vrot.slane %v916_v24, 2  ;;  %5240 = vmatprep.subr.bf16.mxu0 %v5239_v18 }
  0xd2   : > { %4811 = vmatprep.mubr.f32.mxu0 %v2756_v23  ;;  %v922_v4 = vrot.slane %v6554_v54, 7  ;;  %v5111_v45 = vpack.c.bf16 %v731_v52, %v730_v14  ;;  %v1217_v27 = vrot.slane %v1209_v30, %v6043_v37  ;;  %v6576_v31 = vcombine.low %v1200_v28, %v1207_v33  ;;  %5242 = vmatpush3.bf16.msra.mxu0 %v5239_v18 }
  0xd3   : > { %7997 = vst [vmem:[#allocation58_spill] sm:$0xff] %v6568_v11  ;;  %v921_v46 = vrot.slane %v919_v61, 2  ;;  %v925_v55 = vrot.slane %v6568_v11, 7  ;;  %v920_v32 = vsel %vm6083_vm6, %v918_v50, %v919_v61  ;;  %v593_v38 = vcombine.high %v271_v25, %v271_v25 }
  0xd4   : > { %7998 = vst [vmem:[#allocation59_spill] sm:$0xff] %v6576_v31  ;;  %v924_v23 = vrot.slane %v922_v4, 2  ;;  %5112 = vmatprep.subr.bf16.mxu1 %v5111_v45  ;;  %v6583_v24 = vrot.slane %v271_v25, %v6043_v37  ;;  %v2757_v52 = vcombine.low %v1207_v33, %v1217_v27  ;;  %4578 = vmatprep.mubr.f32.mxu1 %v6576_v31 }
  0xd5   : > { %v923_v14 = vsel %vm6083_vm6, %v921_v46, %v922_v4  ;;  %v1210_v28 = vcombine.low %v917_v56, %v920_v32  ;;  %v6589_v18 = vrot.slane %v272_v63, %v6043_v37  ;;  %v6594_v50 = vrot.slane %v593_v38, %v6043_v37  ;;  %5114 = vmatpush3.bf16.msra.mxu1 %v5111_v45  ;;  %v273_v32 = vld [vmem:[%s6021_s30 + $0x98] sm:$0xff] }
  0xd6   : > { %7999 = vst [vmem:[#allocation60_spill] sm:$0xff] %v6583_v24  ;;  %v926_v61 = vsel %vm6083_vm6, %v924_v23, %v925_v55  ;;  %v6598_v25 = vcombine.high %v6583_v24, %v6583_v24  ;;  %v927_v33 = vrot.slane %v925_v55, 2  ;;  %4812 = vmatmul.mubr.f32.gmra.mrb[10].mxu0 %v2757_v52  ;;  %v928_v56 = vrot.slane %v6583_v24, 7 }
  0xd7   : > { %8000 = vst [vmem:[#allocation61_spill] sm:$0xff] %v6589_v18  ;;  %8001 = vst [vmem:[#allocation62_spill] sm:$0xff] %v6594_v50  ;;  %v1224_v30 = vrot.slane %v1210_v28, %v6043_v37  ;;  %v1226_v4 = vcombine.low %v923_v14, %v926_v61  ;;  %v938_v46 = vrot.slane %v6589_v18, 7  ;;  %v6606_v23 = vcombine.high %v6594_v50, %v6594_v50 }
  0xd8   : > { %8002 = vst [vmem:[#allocation63_spill] sm:$0xff] %v6598_v25  ;;  %v931_v38 = vrot.slane %v6598_v25, 7  ;;  %v4212_v31 = vrot.slane %v6594_v50, 9  ;;  %v610_v54 = vcombine.high %v272_v63, %v272_v63  ;;  %v929_v52 = vsel %vm6083_vm6, %v927_v33, %v928_v56  ;;  %v2992_v50 = vld [vmem:[#allocation5 + $0x2e0] sm:$0xff]  ;;  %v2993_v63 = vld [vmem:[#allocation5 + $0x2e8] sm:$0xff] }
  0xd9   : > { %8003 = vst [vmem:[#allocation64_spill] sm:$0xff] %v6606_v23  ;;  %v1234_v45 = vrot.slane %v1226_v4, %v6043_v37  ;;  %v6611_v55 = vcombine.low %v1217_v27, %v1224_v30  ;;  %v930_v14 = vrot.slane %v928_v56, 2  ;;  %v935_v28 = vrot.slane %v6606_v23, 7  ;;  %v733_v56 = vld [vmem:[#allocation5 + $0x68] sm:$0xff] }
  0xda   : > { %v6617_v61 = vrot.slane %v610_v54, %v6043_v37  ;;  %v6621_v24 = vcombine.high %v6589_v18, %v6589_v18  ;;  %v627_v25 = vcombine.high %v273_v32, %v273_v32  ;;  %v6627_v33 = vrot.slane %v273_v32, %v6043_v37  ;;  %v732_v54 = vld [vmem:[#allocation5 + $0x60] sm:$0xff] }
  0xdb   : > { %8004 = vst [vmem:[#allocation65_spill] sm:$0xff] %v6611_v55  ;;  %v2758_v11 = vcombine.low %v1224_v30, %v1234_v45  ;;  %4579 = vmatmul.mubr.f32.gmra.mrb[12].mxu1 %v6611_v55  ;;  %v932_v27 = vsel %vm6083_vm6, %v930_v14, %v931_v38  ;;  %v940_v4 = vrot.slane %v938_v46, 2  ;;  %v936_v23 = vsel %vm6083_vm6, %v4212_v31, %v935_v28 }
  0xdc   : > { %8005 = vst [vmem:[#allocation66_spill] sm:$0xff] %v6617_v61  ;;  %8006 = vst [vmem:[#allocation67_spill] sm:$0xff] %v6621_v24  ;;  %v937_v18 = vrot.slane %v935_v28, 2  ;;  %v1227_v41 = vcombine.low %v929_v52, %v932_v27  ;;  %v6633_v30 = vcombine.high %v6617_v61, %v6617_v61  ;;  %v941_v55 = vrot.slane %v6621_v24, 7  ;;  %v274_v28 = vld [vmem:[%s6021_s30 + $0xa0] sm:$0xff] }
  0xdd   : > { %4814 = vmatprep.mubr.f32.mxu0 %v2758_v11  ;;  %v944_v38 = vrot.slane %v6617_v61, 7  ;;  %v950_v32 = vrot.slane %v6627_v33, 7  ;;  %v5243_v14 = vpack.c.bf16 %v2993_v63, %v2992_v50  ;;  %v5115_v52 = vpack.c.bf16 %v733_v56, %v732_v54 }
  0xde   : > { %v939_v35 = vsel %vm6083_vm6, %v937_v18, %v938_v46  ;;  %v1241_v20 = vrot.slane %v1227_v41, %v6043_v37  ;;  %v947_v31 = vrot.slane %v6633_v30, 7  ;;  %v942_v11 = vsel %vm6083_vm6, %v940_v4, %v941_v55 }
  0xdf   : > { %v1243_v27 = vcombine.low %v936_v23, %v939_v35  ;;  %v943_v47 = vrot.slane %v941_v55, 2  ;;  %v946_v24 = vrot.slane %v944_v38, 2  ;;  %5244 = vmatprep.subr.bf16.mxu0 %v5243_v14  ;;  %5116 = vmatprep.subr.bf16.mxu1 %v5115_v52  ;;  %v6648_v50 = vrot.slane %v627_v25, %v6043_v37 }
  0xe0   : > { %v6645_v61 = vcombine.low %v1234_v45, %v1241_v20  ;;  %v949_v44 = vrot.slane %v947_v31, 2  ;;  %v6652_v41 = vcombine.high %v6627_v33, %v6627_v33  ;;  %5246 = vmatpush3.bf16.msra.mxu0 %v5243_v14  ;;  %v6660_v23 = vrot.slane %v274_v28, %v6043_v37  ;;  %5118 = vmatpush3.bf16.msra.mxu1 %v5115_v52 }
  0xe1   : > { %v1251_v35 = vrot.slane %v1243_v27, %v6043_v37  ;;  %v945_v18 = vsel %vm6083_vm6, %v943_v47, %v944_v38  ;;  %v948_v46 = vsel %vm6083_vm6, %v946_v24, %v947_v31  ;;  %v6667_v55 = vcombine.high %v6648_v50, %v6648_v50 }
  0xe2   : > { %8007 = vst [vmem:[#allocation68_spill] sm:$0xff] %v6645_v61  ;;  %8008 = vst [vmem:[#allocation69_spill] sm:$0xff] %v6652_v41  ;;  %4581 = vmatprep.mubr.f32.mxu1 %v6645_v61  ;;  %v951_v25 = vsel %vm6083_vm6, %v949_v44, %v950_v32  ;;  %v1244_v45 = vcombine.low %v942_v11, %v945_v18  ;;  %v4213_v47 = vrot.slane %v6652_v41, 9  ;;  %v954_v54 = vrot.slane %v6648_v50, 7  ;;  %v275_v32 = vld [vmem:[%s6021_s30 + $0xa8] sm:$0xff] }
  0xe3   : > { %8009 = vst [vmem:[#allocation70_spill] sm:$0xff] %v6660_v23  ;;  %v2759_v63 = vcombine.low %v1241_v20, %v1251_v35  ;;  %v1260_v4 = vcombine.low %v948_v46, %v951_v25  ;;  %v6672_v24 = vcombine.high %v6660_v23, %v6660_v23  ;;  %v957_v38 = vrot.slane %v6667_v55, 7 }
  0xe4   : > { %v1258_v56 = vrot.slane %v1244_v45, %v6043_v37  ;;  %v960_v44 = vrot.slane %v6660_v23, 7  ;;  %v644_v14 = vcombine.high %v274_v28, %v274_v28  ;;  %v955_v20 = vsel %vm6083_vm6, %v4213_v47, %v954_v54 }
  0xe5   : > { %4815 = vmatmul.mubr.f32.gmra.mrb[12].mxu0 %v2759_v63  ;;  %v1268_v31 = vrot.slane %v1260_v4, %v6043_v37  ;;  %v956_v52 = vrot.slane %v954_v54, 2  ;;  %v963_v27 = vrot.slane %v6672_v24, 7  ;;  %v959_v18 = vrot.slane %v957_v38, 2 }
  0xe6   : > { %v6683_v11 = vcombine.low %v1251_v35, %v1258_v56  ;;  %v962_v46 = vrot.slane %v960_v44, 2  ;;  %v6686_v25 = vrot.slane %v644_v14, %v6043_v37  ;;  %v661_v63 = vcombine.high %v275_v32, %v275_v32 }
  0xe7   : > { %v2760_v45 = vcombine.low %v1258_v56, %v1268_v31  ;;  %v958_v28 = vsel %vm6083_vm6, %v956_v52, %v957_v38  ;;  %v6691_v4 = vrot.slane %v275_v32, %v6043_v37  ;;  %v961_v47 = vsel %vm6083_vm6, %v959_v18, %v960_v44  ;;  %v734_v56 = vld [vmem:[#allocation5 + $0x70] sm:$0xff]  ;;  %v735_v38 = vld [vmem:[#allocation5 + $0x78] sm:$0xff] }
  0xe8   : > { %8010 = vst [vmem:[#allocation71_spill] sm:$0xff] %v6683_v11  ;;  %8011 = vst [vmem:[#allocation72_spill] sm:$0xff] %v6686_v25  ;;  %4582 = vmatmul.mubr.f32.gmra.mrb[14].mxu1 %v6683_v11  ;;  %v964_v35 = vsel %vm6083_vm6, %v962_v46, %v963_v27  ;;  %v1261_v54 = vcombine.low %v955_v20, %v958_v28  ;;  %v6700_v14 = vcombine.high %v6686_v25, %v6686_v25 }
  0xe9   : > { %8012 = vst [vmem:[#allocation73_spill] sm:$0xff] %v6691_v4  ;;  %4817 = vmatprep.mubr.f32.mxu0 %v2760_v45  ;;  %v1277_v52 = vcombine.low %v961_v47, %v964_v35  ;;  %v6703_v32 = vrot.slane %v661_v63, %v6043_v37  ;;  %v6707_v11 = vcombine.high %v6691_v4, %v6691_v4  ;;  %v965_v44 = vrot.slane %v963_v27, 2  ;;  %v276_v35 = vld [vmem:[%s6021_s30 + $0xb0] sm:$0xff] }
  0xea   : > { %8013 = vst [vmem:[#allocation74_spill] sm:$0xff] %v6700_v14  ;;  %v1275_v18 = vrot.slane %v1261_v54, %v6043_v37  ;;  %v966_v20 = vrot.slane %v6686_v25, 7  ;;  %v969_v46 = vrot.slane %v6700_v14, 7  ;;  %v4214_v28 = vrot.slane %v6691_v4, 9  ;;  %v2994_v14 = vld [vmem:[#allocation5 + $0x2f0] sm:$0xff]  ;;  %v2995_v4 = vld [vmem:[#allocation5 + $0x2f8] sm:$0xff] }
  0xeb   : > { %8014 = vst [vmem:[#allocation75_spill] sm:$0xff] %v6703_v32  ;;  %8015 = vst [vmem:[#allocation76_spill] sm:$0xff] %v6707_v11  ;;  %v1285_v61 = vrot.slane %v1277_v52, %v6043_v37  ;;  %v2712_v45 = vrot.slane %v6707_v11, 7  ;;  %v2715_v63 = vrot.slane %v6703_v32, 7  ;;  %v5119_v47 = vpack.c.bf16 %v735_v38, %v734_v56 }
  0xec   : > { %v6717_v41 = vcombine.low %v1268_v31, %v1275_v18  ;;  %v967_v27 = vsel %vm6083_vm6, %v965_v44, %v966_v20  ;;  %v968_v54 = vrot.slane %v966_v20, 2  ;;  %v6723_v25 = vcombine.high %v6703_v32, %v6703_v32 }
  0xed   : > { %v2761_v23 = vcombine.low %v1275_v18, %v1285_v61  ;;  %v2713_v52 = vsel %vm6083_vm6, %v4214_v28, %v2712_v45  ;;  %v2714_v11 = vrot.slane %v2712_v45, 2  ;;  %5120 = vmatprep.subr.bf16.mxu1 %v5119_v47  ;;  %v678_v56 = vcombine.high %v276_v35, %v276_v35 }
  0xee   : > { %8016 = vst [vmem:[#allocation77_spill] sm:$0xff] %v6717_v41  ;;  %4584 = vmatprep.mubr.f32.mxu1 %v6717_v41  ;;  %v970_v31 = vsel %vm6083_vm6, %v968_v54, %v969_v46  ;;  %v6731_v38 = vrot.slane %v276_v35, %v6043_v37  ;;  %v2717_v44 = vrot.slane %v2715_v63, 2  ;;  %v2718_v20 = vrot.slane %v6723_v25, 7  ;;  %5122 = vmatpush3.bf16.msra.mxu1 %v5119_v47 }
  0xef   : > { %4818 = vmatmul.mubr.f32.gmra.mrb[14].mxu0 %v2761_v23  ;;  %v1278_v18 = vcombine.low %v967_v27, %v970_v31  ;;  %v2716_v28 = vsel %vm6083_vm6, %v2714_v11, %v2715_v63  ;;  %v6737_v45 = vrot.slane %v678_v56, %v6043_v37  ;;  %v5247_v32 = vpack.c.bf16 %v2995_v4, %v2994_v14 }
  0xf0   : > { %v1485_v41 = vcombine.low %v6109_v15, %v6067_v0  ;;  %v2762_v46 = vcombine.low %v2713_v52, %v2716_v28  ;;  %v6743_v35 = vcombine.high %v6731_v38, %v6731_v38  ;;  %v2720_v54 = vrot.slane %v2718_v20, 2 }
  0xf1   : > { %v1292_v47 = vrot.slane %v1278_v18, %v6043_v37  ;;  %v2719_v23 = vsel %vm6083_vm6, %v2717_v44, %v2718_v20  ;;  %v2721_v11 = vrot.slane %v6731_v38, 7  ;;  %5248 = vmatprep.subr.bf16.mxu0 %v5247_v32  ;;  %v1467_v4 = vcombine.low %v6058_v58, %v6074_v2 }
  0xf2   : > { %v6752_v14 = vrot.slane %v2762_v46, %v6043_v37  ;;  %v2724_v15 = vrot.slane %v6743_v35, 7  ;;  %v2727_v63 = vrot.slane %v6737_v45, 7  ;;  %5250 = vmatpush3.bf16.msra.mxu0 %v5247_v32  ;;  %v1468_v27 = vcombine.low %v6070_v1, %v6101_v10 }
  0xf3   : > { %v6758_v52 = vcombine.low %v1285_v61, %v1292_v47  ;;  %v2722_v56 = vsel %vm6083_vm6, %v2720_v54, %v2721_v11  ;;  %v2723_v31 = vrot.slane %v2721_v11, 2  ;;  %v1475_v44 = vrot.slane %v1467_v4, %v6043_v37  ;;  %v3230_v11 = vld [vmem:[#allocation5 + $0x300] sm:$0xff] }
  0xf4   : > { %8017 = vst [vmem:[#allocation78_spill] sm:$0xff] %v6752_v14  ;;  %v2770_v58 = vcombine.low %v1292_v47, %v6752_v14  ;;  %v2726_v20 = vrot.slane %v2724_v15, 2  ;;  %v2771_v18 = vcombine.low %v2719_v23, %v2722_v56  ;;  %v1482_v28 = vrot.slane %v1468_v27, %v6043_v37  ;;  %v3231_v47 = vld [vmem:[#allocation5 + $0x308] sm:$0xff] }
  0xf5   : > { %8018 = vst [vmem:[#allocation79_spill] sm:$0xff] %v6758_v52  ;;  %4585 = vmatmul.mubr.f32.gmra.mrb[16].mxu1 %v6758_v52  ;;  %v2725_v32 = vsel %vm6083_vm6, %v2723_v31, %v2724_v15  ;;  %v1980_v61 = vcombine.low %v6139_v42, %v6088_v6  ;;  %v1981_v46 = vcombine.low %v6067_v0, %v6095_v8 }
  0xf6   : > { %v1997_v54 = vcombine.low %v6091_v7, %v6113_v16  ;;  %4820 = vmatprep.mubr.f32.mxu0 %v2770_v58  ;;  %v2728_v23 = vsel %vm6083_vm6, %v2726_v20, %v2727_v63  ;;  %v6777_v4 = vrot.slane %v2771_v18, %v6043_v37  ;;  %v1483_v27 = vcombine.low %v1475_v44, %v1482_v28 }
  0xf7   : > { %v1484_v15 = vcombine.low %v6077_v3, %v6139_v42  ;;  %v2772_v6 = vcombine.low %v2725_v32, %v2728_v23  ;;  %v6782_v56 = vrot.slane %v1981_v46, %v6043_v37  ;;  %v6788_v31 = vrot.slane %v1485_v41, %v6043_v37 }
  0xf8   : > { %8019 = vst [vmem:[#allocation80_spill] sm:$0xff] %v6777_v4  ;;  %v6785_v0 = vrot.slane %v1997_v54, %v6043_v37  ;;  %4619 = vmatprep.mubr.f32.mxu1 %v1483_v27  ;;  %v1998_v58 = vcombine.low %v6149_v51, %v6162_v60  ;;  %v2014_v44 = vcombine.low %v6176_v12, %v6165_v48 }
  0xf9   : > { %v1492_v63 = vrot.slane %v1484_v15, %v6043_v37  ;;  %v5251_v42 = vpack.c.bf16 %v3231_v47, %v3230_v11  ;;  %v6796_v20 = vrot.slane %v2772_v6, %v6043_v37  ;;  %v6799_v18 = vrot.slane %v1980_v61, %v6043_v37  ;;  %v1947_v61 = vld [vmem:[#allocation5 + $0x100] sm:$0xff]  ;;  %v1948_v11 = vld [vmem:[#allocation5 + $0x108] sm:$0xff]  ;;  %v3232_v6 = vld [vmem:[#allocation5 + $0x310] sm:$0xff] }
  0xfa   : > { %v2996_v41 = vcombine.low %v6782_v56, %v6785_v0  ;;  %v1501_v28 = vcombine.low %v6095_v8, %v6091_v7  ;;  %v6807_v60 = vrot.slane %v1998_v58, %v6043_v37  ;;  %v6810_v46 = vrot.slane %v2014_v44, %v6043_v37 }
  0xfb   : > { %8020 = vst [vmem:[#allocation81_spill] sm:$0xff] %v6796_v20  ;;  %v1500_v32 = vcombine.low %v1492_v63, %v6788_v31  ;;  %5252 = vmatprep.subr.bf16.mxu0 %v5251_v42  ;;  %v1502_v54 = vcombine.low %v6113_v16, %v6149_v51  ;;  %v2787_v47 = vcombine.low %v6777_v4, %v6796_v20  ;;  %v3233_v63 = vld [vmem:[#allocation5 + $0x318] sm:$0xff] }
  0xfc   : > { %v6817_v23 = vrot.slane %v1501_v28, %v6043_v37  ;;  %v2015_v7 = vcombine.low %v6196_v29, %v6202_v34  ;;  %v2031_v8 = vcombine.low %v6216_v43, %v6207_v36  ;;  %v2997_v27 = vcombine.low %v6807_v60, %v6810_v46  ;;  %v8037_v4 = vld [vmem:[#allocation29_spill] sm:$0xff] }
  0xfd   : > { %4620 = vmatmul.mubr.f32.vlgmr.msra.gmra.mrb[0].mxu1 %v1500_v32  ;;  %v6826_v16 = vrot.slane %v1502_v54, %v6043_v37  ;;  %v1518_v51 = vcombine.low %v6156_v59, %v6176_v12  ;;  %v1519_v15 = vcombine.low %v6165_v48, %v6196_v29  ;;  %4821 = vmatmul.mubr.f32.gmra.mrb[16].mxu0 %v2787_v47  ;;  %v3237_v47 = vld [vmem:[#allocation5 + $0x338] sm:$0xff] }
  0xfe   : > { %v6833_v58 = vrot.slane %v2015_v7, %v6043_v37  ;;  %v6836_v36 = vrot.slane %v2031_v8, %v6043_v37  ;;  %v5123_v44 = vpack.c.bf16 %v1948_v11, %v1947_v61  ;;  %v2032_v28 = vcombine.low %v6226_v57, %v6242_v17  ;;  %4855 = vmatprep.mubr.f32.mxu0 %v2996_v41 }
  0xff   : > { %8021 = vst [vmem:[#allocation82_spill] sm:$0xff] %v6826_v16  ;;  %v1517_v59 = vcombine.low %v6817_v23, %v6826_v16  ;;  %v6843_v12 = vrot.slane %v1518_v51, %v6043_v37  ;;  %v6846_v48 = vrot.slane %v1519_v15, %v6043_v37  ;;  %v2048_v29 = vcombine.low %v6236_v49, %v6246_v19  ;;  %v1949_v15 = vld [vmem:[#allocation5 + $0x110] sm:$0xff]  ;;  %v1954_v16 = vld [vmem:[#allocation5 + $0x138] sm:$0xff] }
 0x100   : > { %v2998_v32 = vcombine.low %v6833_v58, %v6836_v36  ;;  %5124 = vmatprep.subr.bf16.mxu1 %v5123_v44  ;;  %v6853_v54 = vrot.slane %v2032_v28, %v6043_v37  ;;  %v5255_v41 = vpack.c.bf16 %v3233_v63, %v3232_v6  ;;  %v1535_v61 = vcombine.low %v6202_v34, %v6216_v43  ;;  %v1950_v6 = vld [vmem:[#allocation5 + $0x118] sm:$0xff] }
 0x101   : > { %8022 = vst [vmem:[#allocation83_spill] sm:$0xff] %v6843_v12  ;;  %8023 = vst [vmem:[#allocation84_spill] sm:$0xff] %v6846_v48  ;;  %4622 = vmatprep.mubr.f32.mxu1 %v1517_v59  ;;  %v6859_v11 = vcombine.low %v6843_v12, %v6846_v48  ;;  %v6864_v7 = vrot.slane %v2048_v29, %v6043_v37  ;;  %5126 = vmatpush3.bf16.msra.mxu1 %v5123_v44  ;;  %v3235_v44 = vld [vmem:[#allocation5 + $0x328] sm:$0xff]  ;;  %v1953_v12 = vld [vmem:[#allocation5 + $0x130] sm:$0xff] }
 0x102   : > { %4856 = vmatmul.mubr.f32.vlgmr.msra.gmra.mrb[0].mxu0 %v2997_v27  ;;  %v1536_v8 = vcombine.low %v6233_v9, %v6226_v57  ;;  %v6869_v51 = vrot.slane %v1535_v61, %v6043_v37  ;;  %v2049_v34 = vcombine.low %v6271_v62, %v6284_v21  ;;  %v2065_v43 = vcombine.low %v6288_v22, %v6279_v13  ;;  %v3234_v9 = vld [vmem:[#allocation5 + $0x320] sm:$0xff]  ;;  %v8053_v48 = vld [vmem:[#allocation41_spill] sm:$0xff] }
 0x103   : > { %5254 = vmatpush3.bf16.msra.mxu0 %v5251_v42  ;;  %4858 = vmatprep.mubr.f32.mxu0 %v2998_v32  ;;  %v2999_v63 = vcombine.low %v6853_v54, %v6864_v7  ;;  %v1552_v27 = vcombine.low %v6242_v17, %v6236_v49  ;;  %v1553_v57 = vcombine.low %v6246_v19, %v6271_v62 }
 0x104   : > { %8024 = vst [vmem:[#allocation85_spill] sm:$0xff] %v6869_v51  ;;  %4623 = vmatmul.mubr.f32.gmra.mrb[2].mxu1 %v6859_v11  ;;  %5256 = vmatprep.subr.bf16.mxu0 %v5255_v41  ;;  %v6883_v21 = vrot.slane %v1536_v8, %v6043_v37  ;;  %v6886_v42 = vrot.slane %v2049_v34, %v6043_v37 }
 0x105   : > { %v6889_v28 = vrot.slane %v2065_v43, %v6043_v37  ;;  %v6892_v59 = vrot.slane %v1552_v27, %v6043_v37  ;;  %v6895_v49 = vrot.slane %v1553_v57, %v6043_v37  ;;  %v5127_v17 = vpack.c.bf16 %v1950_v6, %v1949_v15  ;;  %v8028_v43 = vld [vmem:[#allocation17_spill] sm:$0xff]  ;;  %v1951_v57 = vld [vmem:[#allocation5 + $0x120] sm:$0xff] }
 0x106   : > { %8025 = vst [vmem:[#allocation86_spill] sm:$0xff] %v6883_v21  ;;  %v2066_v19 = vcombine.low %v6297_v26, %v6306_v39  ;;  %4859 = vmatmul.mubr.f32.gmra.mrb[2].mxu0 %v2999_v63  ;;  %v6901_v62 = vcombine.low %v6869_v51, %v6883_v21  ;;  %v2082_v32 = vcombine.low %v6318_v53, %v6309_v40  ;;  %v8030_v63 = vld [vmem:[#allocation20_spill] sm:$0xff] }
 0x107   : > { %8026 = vst [vmem:[#allocation87_spill] sm:$0xff] %v6892_v59  ;;  %8027 = vst [vmem:[#allocation88_spill] sm:$0xff] %v6895_v49  ;;  %v3000_v29 = vcombine.low %v6886_v42, %v6889_v28  ;;  %v5259_v61 = vpack.c.bf16 %v3235_v44, %v3234_v9  ;;  %5258 = vmatpush3.bf16.msra.mxu0 %v5255_v41  ;;  %v6909_v8 = vcombine.low %v6892_v59, %v6895_v49  ;;  %v8029_v41 = vld [vmem:[#allocation23_spill] sm:$0xff] }
 0x108   : > { %5128 = vmatprep.subr.bf16.mxu1 %v5127_v17  ;;  %v6912_v34 = vrot.slane %v2066_v19, %v6043_v37  ;;  %v1569_v15 = vcombine.low %v8028_v43, %v6288_v22  ;;  %4625 = vmatprep.mubr.f32.mxu1 %v6901_v62  ;;  %v6918_v6 = vrot.slane %v2082_v32, %v6043_v37  ;;  %v1952_v9 = vld [vmem:[#allocation5 + $0x128] sm:$0xff]  ;;  %v8033_v19 = vld [vmem:[#allocation22_spill] sm:$0xff]  ;;  %v3236_v43 = vld [vmem:[#allocation5 + $0x330] sm:$0xff] }
 0x109   : > { %4861 = vmatprep.mubr.f32.mxu0 %v3000_v29  ;;  %v1570_v40 = vcombine.low %v6279_v13, %v6297_v26  ;;  %v2083_v27 = vcombine.low %v8030_v63, %v8029_v41  ;;  %4626 = vmatmul.mubr.f32.gmra.mrb[4].mxu1 %v6909_v8  ;;  %v8032_v22 = vld [vmem:[#allocation24_spill] sm:$0xff]  ;;  %v1586_v32 = vcombine.low %v6306_v39, %v6318_v53 }
 0x10a   : > { %5260 = vmatprep.subr.bf16.mxu0 %v5259_v61  ;;  %v6926_v44 = vrot.slane %v1569_v15, %v6043_v37  ;;  %v2099_v29 = vcombine.low %v8033_v19, %v8032_v22  ;;  %v3001_v13 = vcombine.low %v6912_v34, %v6918_v6  ;;  %5130 = vmatpush3.bf16.msra.mxu1 %v5127_v17  ;;  %v8035_v15 = vld [vmem:[#allocation19_spill] sm:$0xff] }
 0x10b   : > { %v6935_v26 = vrot.slane %v1570_v40, %v6043_v37  ;;  %v6938_v20 = vrot.slane %v2083_v27, %v6043_v37  ;;  %v1587_v52 = vcombine.low %v8035_v15, %v8030_v63  ;;  %5262 = vmatpush3.bf16.msra.mxu0 %v5259_v61  ;;  %v6946_v39 = vrot.slane %v1586_v32, %v6043_v37  ;;  %v8040_v63 = vld [vmem:[#allocation27_spill] sm:$0xff]  ;;  %v8041_v61 = vld [vmem:[#allocation30_spill] sm:$0xff] }
 0x10c   : > { %8031 = vst [vmem:[#allocation17_spill] sm:$0xff] %v6926_v44  ;;  %v6943_v14 = vrot.slane %v2099_v29, %v6043_v37  ;;  %v5131_v53 = vpack.c.bf16 %v1952_v9, %v1951_v57  ;;  %v2100_v17 = vcombine.low %v8038_v5, %v8037_v4  ;;  %4862 = vmatmul.mubr.f32.gmra.mrb[4].mxu0 %v3001_v13  ;;  %v8043_v13 = vld [vmem:[#allocation32_spill] sm:$0xff] }
 0x10d   : > { %8034 = vst [vmem:[#allocation23_spill] sm:$0xff] %v6935_v26  ;;  %8036 = vst [vmem:[#allocation20_spill] sm:$0xff] %v6946_v39  ;;  %v6952_v40 = vcombine.low %v6926_v44, %v6935_v26  ;;  %v6955_v27 = vrot.slane %v1587_v52, %v6043_v37  ;;  %v2116_v15 = vcombine.low %v8041_v61, %v8040_v63  ;;  %v3238_v26 = vld [vmem:[#allocation5 + $0x340] sm:$0xff] }
 0x10e   : > { %v5263_v29 = vpack.c.bf16 %v3237_v47, %v3236_v43  ;;  %v3002_v32 = vcombine.low %v6938_v20, %v6943_v14  ;;  %5132 = vmatprep.subr.bf16.mxu1 %v5131_v53  ;;  %v6962_v57 = vrot.slane %v2100_v17, %v6043_v37  ;;  %v1603_v4 = vcombine.low %v8029_v41, %v8033_v19  ;;  %v8042_v43 = vld [vmem:[#allocation33_spill] sm:$0xff]  ;;  %v8047_v19 = vld [vmem:[#allocation35_spill] sm:$0xff] }
 0x10f   : > { %8039 = vst [vmem:[#allocation24_spill] sm:$0xff] %v6955_v27  ;;  %v1604_v9 = vcombine.low %v8032_v22, %v8038_v5  ;;  %4628 = vmatprep.mubr.f32.mxu1 %v6952_v40  ;;  %v6971_v52 = vcombine.low %v6946_v39, %v6955_v27  ;;  %v6974_v47 = vrot.slane %v2116_v15, %v6043_v37  ;;  %v8046_v22 = vld [vmem:[#allocation34_spill] sm:$0xff]  ;;  %v3239_v15 = vld [vmem:[#allocation5 + $0x348] sm:$0xff] }
 0x110   : > { %5134 = vmatpush3.bf16.msra.mxu1 %v5131_v53  ;;  %v2117_v17 = vcombine.low %v8043_v13, %v8042_v43  ;;  %4864 = vmatprep.mubr.f32.mxu0 %v3002_v32  ;;  %v6979_v41 = vrot.slane %v1603_v4, %v6043_v37  ;;  %v2133_v27 = vcombine.low %v8047_v19, %v8046_v22  ;;  %v8048_v32 = vld [vmem:[#allocation28_spill] sm:$0xff] }
 0x111   : > { %5264 = vmatprep.subr.bf16.mxu0 %v5263_v29  ;;  %v6982_v5 = vrot.slane %v1604_v9, %v6043_v37  ;;  %4629 = vmatmul.mubr.f32.gmra.mrb[6].mxu1 %v6971_v52  ;;  %v3003_v53 = vcombine.low %v6962_v57, %v6974_v47  ;;  %v1620_v4 = vcombine.low %v8048_v32, %v8041_v61  ;;  %v8054_v61 = vld [vmem:[#allocation39_spill] sm:$0xff] }
 0x112   : > { %8044 = vst [vmem:[#allocation22_spill] sm:$0xff] %v6979_v41  ;;  %v6990_v39 = vrot.slane %v2117_v17, %v6043_v37  ;;  %5266 = vmatpush3.bf16.msra.mxu0 %v5263_v29  ;;  %v6999_v22 = vrot.slane %v2133_v27, %v6043_v37  ;;  %v1621_v49 = vcombine.low %v8040_v63, %v8043_v13  ;;  %v8051_v17 = vld [vmem:[#allocation40_spill] sm:$0xff] }
 0x113   : > { %8045 = vst [vmem:[#allocation19_spill] sm:$0xff] %v6982_v5  ;;  %v6996_v9 = vcombine.low %v6979_v41, %v6982_v5  ;;  %v5135_v44 = vpack.c.bf16 %v1954_v16, %v1953_v12  ;;  %4865 = vmatmul.mubr.f32.gmra.mrb[6].mxu0 %v3003_v53  ;;  %v7004_v21 = vrot.slane %v1620_v4, %v6043_v37  ;;  %v8052_v29 = vld [vmem:[#allocation36_spill] sm:$0xff]  ;;  %v8064_v41 = vld [vmem:[#allocation47_spill] sm:$0xff] }
 0x114   : > { %8049 = vst [vmem:[#allocation29_spill] sm:$0xff] %v6999_v22  ;;  %v2134_v59 = vcombine.low %v8052_v29, %v8051_v17  ;;  %v2150_v32 = vcombine.low %v8054_v61, %v8053_v48  ;;  %v5267_v51 = vpack.c.bf16 %v3239_v15, %v3238_v26  ;;  %v3004_v27 = vcombine.low %v6990_v39, %v6999_v22  ;;  %v8058_v26 = vld [vmem:[#allocation38_spill] sm:$0xff]  ;;  %v1956_v53 = vld [vmem:[#allocation5 + $0x148] sm:$0xff] }
 0x115   : > { %8050 = vst [vmem:[#allocation26_spill] sm:$0xff] %v7004_v21  ;;  %4631 = vmatprep.mubr.f32.mxu1 %v6996_v9  ;;  %v7014_v5 = vrot.slane %v1621_v49, %v6043_v37  ;;  %5136 = vmatprep.subr.bf16.mxu1 %v5135_v44  ;;  %v1637_v16 = vcombine.low %v8042_v43, %v8047_v19  ;;  %v1955_v15 = vld [vmem:[#allocation5 + $0x140] sm:$0xff] }
 0x116   : > { %v7019_v12 = vrot.slane %v2134_v59, %v6043_v37  ;;  %v7022_v63 = vrot.slane %v2150_v32, %v6043_v37  ;;  %5138 = vmatpush3.bf16.msra.mxu1 %v5135_v44  ;;  %5268 = vmatprep.subr.bf16.mxu0 %v5267_v51  ;;  %v1638_v13 = vcombine.low %v8058_v26, %v8052_v29  ;;  %v8061_v59 = vld [vmem:[#allocation46_spill] sm:$0xff]  ;;  %v8062_v19 = vld [vmem:[#allocation43_spill] sm:$0xff]  ;;  %v8063_v32 = vld [vmem:[#allocation45_spill] sm:$0xff] }
 0x117   : > { %8055 = vst [vmem:[#allocation27_spill] sm:$0xff] %v7014_v5  ;;  %4867 = vmatprep.mubr.f32.mxu0 %v3004_v27  ;;  %v7028_v49 = vcombine.low %v7004_v21, %v7014_v5  ;;  %v7031_v43 = vrot.slane %v1637_v16, %v6043_v37  ;;  %v2151_v4 = vcombine.low %v8062_v19, %v8061_v59  ;;  %v8068_v21 = vld [vmem:[#allocation50_spill] sm:$0xff] }
 0x118   : > { %8056 = vst [vmem:[#allocation30_spill] sm:$0xff] %v7019_v12  ;;  %8057 = vst [vmem:[#allocation33_spill] sm:$0xff] %v7022_v63  ;;  %v2167_v44 = vcombine.low %v8064_v41, %v8063_v32  ;;  %v3005_v22 = vcombine.low %v7019_v12, %v7022_v63  ;;  %v7040_v29 = vrot.slane %v1638_v13, %v6043_v37  ;;  %5270 = vmatpush3.bf16.msra.mxu0 %v5267_v51  ;;  %v8069_v63 = vld [vmem:[#allocation49_spill] sm:$0xff] }
 0x119   : > { %8059 = vst [vmem:[#allocation32_spill] sm:$0xff] %v7028_v49  ;;  %8060 = vst [vmem:[#allocation34_spill] sm:$0xff] %v7031_v43  ;;  %v1654_v27 = vcombine.low %v8051_v17, %v8054_v61  ;;  %v1655_v16 = vcombine.low %v8053_v48, %v8062_v19  ;;  %4632 = vmatmul.mubr.f32.gmra.mrb[8].mxu1 %v7028_v49  ;;  %v7048_v26 = vrot.slane %v2151_v4, %v6043_v37  ;;  %v8073_v61 = vld [vmem:[#allocation51_spill] sm:$0xff]  ;;  %v8074_v19 = vld [vmem:[#allocation52_spill] sm:$0xff] }
 0x11a   : > { %8065 = vst [vmem:[#allocation35_spill] sm:$0xff] %v7040_v29  ;;  %v7051_v59 = vrot.slane %v2167_v44, %v6043_v37  ;;  %v5139_v5 = vpack.c.bf16 %v1956_v53, %v1955_v15  ;;  %v2168_v13 = vcombine.low %v8069_v63, %v8068_v21  ;;  %4868 = vmatmul.mubr.f32.gmra.mrb[8].mxu0 %v3005_v22  ;;  %v3240_v44 = vld [vmem:[#allocation5 + $0x350] sm:$0xff]  ;;  %v3241_v12 = vld [vmem:[#allocation5 + $0x358] sm:$0xff] }
 0x11b   : > { %8066 = vst [vmem:[#allocation28_spill] sm:$0xff] %v7048_v26  ;;  %v7057_v51 = vcombine.low %v7031_v43, %v7040_v29  ;;  %v7060_v17 = vrot.slane %v1654_v27, %v6043_v37  ;;  %v7063_v48 = vrot.slane %v1655_v16, %v6043_v37  ;;  %v2184_v4 = vcombine.low %v8074_v19, %v8073_v61  ;;  %v8076_v53 = vld [vmem:[#allocation44_spill] sm:$0xff]  ;;  %v8079_v43 = vld [vmem:[#allocation57_spill] sm:$0xff] }
 0x11c   : > { %8067 = vst [vmem:[#allocation40_spill] sm:$0xff] %v7051_v59  ;;  %v3006_v15 = vcombine.low %v7048_v26, %v7051_v59  ;;  %5140 = vmatprep.subr.bf16.mxu1 %v5139_v5  ;;  %v7070_v22 = vrot.slane %v2168_v13, %v6043_v37  ;;  %v1671_v29 = vcombine.low %v8076_v53, %v8064_v41  ;;  %v8080_v59 = vld [vmem:[#allocation54_spill] sm:$0xff]  ;;  %v1957_v26 = vld [vmem:[#allocation5 + $0x150] sm:$0xff] }
 0x11d   : > { %8070 = vst [vmem:[#allocation36_spill] sm:$0xff] %v7057_v51  ;;  %8071 = vst [vmem:[#allocation41_spill] sm:$0xff] %v7060_v17  ;;  %v1672_v27 = vcombine.low %v8063_v32, %v8069_v63  ;;  %4634 = vmatprep.mubr.f32.mxu1 %v7057_v51  ;;  %v7079_v16 = vcombine.low %v7060_v17, %v7063_v48  ;;  %v7082_v61 = vrot.slane %v2184_v4, %v6043_v37  ;;  %v1958_v49 = vld [vmem:[#allocation5 + $0x158] sm:$0xff]  ;;  %v8084_v53 = vld [vmem:[#allocation56_spill] sm:$0xff] }
 0x11e   : > { %8072 = vst [vmem:[#allocation39_spill] sm:$0xff] %v7063_v48  ;;  %8075 = vst [vmem:[#allocation38_spill] sm:$0xff] %v7070_v22  ;;  %5142 = vmatpush3.bf16.msra.mxu1 %v5139_v5  ;;  %v2185_v13 = vcombine.low %v8080_v59, %v8079_v43  ;;  %4870 = vmatprep.mubr.f32.mxu0 %v3006_v15  ;;  %v7087_v41 = vrot.slane %v1671_v29, %v6043_v37  ;;  %v8083_v32 = vld [vmem:[#allocation58_spill] sm:$0xff]  ;;  %v8086_v29 = vld [vmem:[#allocation53_spill] sm:$0xff] }
 0x11f   : > { %8077 = vst [vmem:[#allocation46_spill] sm:$0xff] %v7079_v16  ;;  %8078 = vst [vmem:[#allocation43_spill] sm:$0xff] %v7082_v61  ;;  %v7090_v63 = vrot.slane %v1672_v27, %v6043_v37  ;;  %v2201_v48 = vcombine.low %v8084_v53, %v8083_v32  ;;  %v5271_v17 = vpack.c.bf16 %v3241_v12, %v3240_v44  ;;  %4635 = vmatmul.mubr.f32.gmra.mrb[10].mxu1 %v7079_v16  ;;  %v8089_v16 = vld [vmem:[#allocation63_spill] sm:$0xff] }
 0x120   : > { %8081 = vst [vmem:[#allocation45_spill] sm:$0xff] %v7087_v41  ;;  %v3007_v5 = vcombine.low %v7070_v22, %v7082_v61  ;;  %v7098_v4 = vrot.slane %v2185_v13, %v6043_v37  ;;  %v1688_v15 = vcombine.low %v8068_v21, %v8074_v19  ;;  %v1689_v51 = vcombine.low %v8086_v29, %v8080_v59  ;;  %v8090_v61 = vld [vmem:[#allocation60_spill] sm:$0xff]  ;;  %v8092_v59 = vld [vmem:[#allocation61_spill] sm:$0xff] }
 0x121   : > { %8082 = vst [vmem:[#allocation47_spill] sm:$0xff] %v7090_v63  ;;  %v7106_v27 = vcombine.low %v7087_v41, %v7090_v63  ;;  %v7109_v12 = vrot.slane %v2201_v48, %v6043_v37  ;;  %5272 = vmatprep.subr.bf16.mxu0 %v5271_v17  ;;  %v5143_v44 = vpack.c.bf16 %v1958_v49, %v1957_v26  ;;  %v8093_v19 = vld [vmem:[#allocation64_spill] sm:$0xff]  ;;  %v3242_v48 = vld [vmem:[#allocation5 + $0x360] sm:$0xff] }
 0x122   : > { %8085 = vst [vmem:[#allocation50_spill] sm:$0xff] %v7098_v4  ;;  %v2202_v22 = vcombine.low %v8090_v61, %v8089_v16  ;;  %4871 = vmatmul.mubr.f32.gmra.mrb[10].mxu0 %v3007_v5  ;;  %v7114_v13 = vrot.slane %v1688_v15, %v6043_v37  ;;  %v7117_v21 = vrot.slane %v1689_v51, %v6043_v37  ;;  %v3243_v41 = vld [vmem:[#allocation5 + $0x368] sm:$0xff]  ;;  %v1959_v16 = vld [vmem:[#allocation5 + $0x160] sm:$0xff] }
 0x123   : > { %8087 = vst [vmem:[#allocation49_spill] sm:$0xff] %v7106_v27  ;;  %8088 = vst [vmem:[#allocation51_spill] sm:$0xff] %v7109_v12  ;;  %v2218_v29 = vcombine.low %v8093_v19, %v8092_v59  ;;  %v1705_v63 = vcombine.low %v8079_v43, %v8084_v53  ;;  %4637 = vmatprep.mubr.f32.mxu1 %v7106_v27  ;;  %v3008_v49 = vcombine.low %v7098_v4, %v7109_v12  ;;  %v1960_v5 = vld [vmem:[#allocation5 + $0x168] sm:$0xff]  ;;  %v8097_v12 = vld [vmem:[#allocation66_spill] sm:$0xff] }
 0x124   : > { %8091 = vst [vmem:[#allocation52_spill] sm:$0xff] %v7117_v21  ;;  %5144 = vmatprep.subr.bf16.mxu1 %v5143_v44  ;;  %v7127_v26 = vrot.slane %v2202_v22, %v6043_v37  ;;  %v1706_v51 = vcombine.low %v8083_v32, %v8090_v61  ;;  %v7133_v15 = vcombine.low %v7114_v13, %v7117_v21  ;;  %v8098_v61 = vld [vmem:[#allocation67_spill] sm:$0xff] }
 0x125   : > { %v7136_v43 = vrot.slane %v2218_v29, %v6043_v37  ;;  %5274 = vmatpush3.bf16.msra.mxu0 %v5271_v17  ;;  %5146 = vmatpush3.bf16.msra.mxu1 %v5143_v44  ;;  %v7139_v53 = vrot.slane %v1705_v63, %v6043_v37  ;;  %v2219_v32 = vcombine.low %v8098_v61, %v8097_v12  ;;  %v8099_v44 = vld [vmem:[#allocation62_spill] sm:$0xff] }
 0x126   : > { %8094 = vst [vmem:[#allocation44_spill] sm:$0xff] %v7127_v26  ;;  %8095 = vst [vmem:[#allocation57_spill] sm:$0xff] %v7133_v15  ;;  %4873 = vmatprep.mubr.f32.mxu0 %v3008_v49  ;;  %v7142_v22 = vrot.slane %v1706_v51, %v6043_v37  ;;  %v2235_v4 = vcombine.low %v6633_v30, %v6627_v33  ;;  %v5275_v27 = vpack.c.bf16 %v3243_v41, %v3242_v48  ;;  %v8103_v48 = vld [vmem:[#allocation70_spill] sm:$0xff] }
 0x127   : > { %8096 = vst [vmem:[#allocation54_spill] sm:$0xff] %v7136_v43  ;;  %4638 = vmatmul.mubr.f32.gmra.mrb[12].mxu1 %v7133_v15  ;;  %v3009_v17 = vcombine.low %v7127_v26, %v7136_v43  ;;  %v1722_v63 = vcombine.low %v8099_v44, %v8093_v19  ;;  %v1723_v29 = vcombine.low %v8092_v59, %v8098_v61  ;;  %v8107_v43 = vld [vmem:[#allocation74_spill] sm:$0xff] }
 0x128   : > { %v5147_v49 = vpack.c.bf16 %v1960_v5, %v1959_v16  ;;  %v7157_v51 = vcombine.low %v7139_v53, %v7142_v22  ;;  %v7160_v21 = vrot.slane %v2219_v32, %v6043_v37  ;;  %v7163_v33 = vrot.slane %v2235_v4, %v6043_v37  ;;  %5276 = vmatprep.subr.bf16.mxu0 %v5275_v27  ;;  %v1961_v32 = vld [vmem:[#allocation5 + $0x170] sm:$0xff]  ;;  %v3245_v15 = vld [vmem:[#allocation5 + $0x378] sm:$0xff] }
 0x129   : > { %v2236_v41 = vcombine.low %v6648_v50, %v6667_v55  ;;  %4874 = vmatmul.mubr.f32.gmra.mrb[12].mxu0 %v3009_v17  ;;  %v7168_v19 = vrot.slane %v1722_v63, %v6043_v37  ;;  %v7171_v59 = vrot.slane %v1723_v29, %v6043_v37  ;;  %v2252_v16 = vcombine.low %v8103_v48, %v6672_v24  ;;  %v1962_v17 = vld [vmem:[#allocation5 + $0x178] sm:$0xff] }
 0x12a   : > { %8100 = vst [vmem:[#allocation58_spill] sm:$0xff] %v7157_v51  ;;  %8101 = vst [vmem:[#allocation56_spill] sm:$0xff] %v7160_v21  ;;  %5148 = vmatprep.subr.bf16.mxu1 %v5147_v49  ;;  %4640 = vmatprep.mubr.f32.mxu1 %v7157_v51  ;;  %v3010_v4 = vcombine.low %v7160_v21, %v7163_v33  ;;  %v1739_v61 = vcombine.low %v8097_v12, %v6633_v30  ;;  %v8106_v29 = vld [vmem:[#allocation69_spill] sm:$0xff]  ;;  %v8110_v30 = vld [vmem:[#allocation75_spill] sm:$0xff] }
 0x12b   : > { %8102 = vst [vmem:[#allocation53_spill] sm:$0xff] %v7163_v33  ;;  %v7179_v5 = vrot.slane %v2236_v41, %v6043_v37  ;;  %5278 = vmatpush3.bf16.msra.mxu0 %v5275_v27  ;;  %v7185_v44 = vcombine.low %v7168_v19, %v7171_v59  ;;  %v7188_v63 = vrot.slane %v2252_v16, %v6043_v37  ;;  %v8108_v41 = vld [vmem:[#allocation72_spill] sm:$0xff] }
 0x12c   : > { %5150 = vmatpush3.bf16.msra.mxu1 %v5147_v49  ;;  %v1740_v33 = vcombine.low %v8106_v29, %v6648_v50  ;;  %v2253_v21 = vcombine.low %v8108_v41, %v8107_v43  ;;  %4876 = vmatprep.mubr.f32.mxu0 %v3010_v4  ;;  %v7195_v27 = vrot.slane %v1739_v61, %v6043_v37  ;;  %v8111_v12 = vld [vmem:[#allocation76_spill] sm:$0xff] }
 0x12d   : > { %8104 = vst [vmem:[#allocation63_spill] sm:$0xff] %v7179_v5  ;;  %8105 = vst [vmem:[#allocation60_spill] sm:$0xff] %v7188_v63  ;;  %v3012_v51 = vcombine.low %v8111_v12, %v8110_v30  ;;  %v1756_v26 = vcombine.low %v6667_v55, %v8103_v48  ;;  %v1757_v16 = vcombine.low %v6672_v24, %v8108_v41  ;;  %v3244_v49 = vld [vmem:[#allocation5 + $0x370] sm:$0xff]  ;;  %4641 = vmatmul.mubr.f32.gmra.mrb[14].mxu1 %v7185_v44  ;;  %v3469_v41 = vld [vmem:[#allocation5 + $0x380] sm:$0xff] }
 0x12e   : > { %8109 = vst [vmem:[#allocation61_spill] sm:$0xff] %v7195_v27  ;;  %v3011_v50 = vcombine.low %v7179_v5, %v7188_v63  ;;  %v7207_v43 = vrot.slane %v1740_v33, %v6043_v37  ;;  %v7210_v4 = vrot.slane %v2253_v21, %v6043_v37  ;;  %v5151_v61 = vpack.c.bf16 %v1962_v17, %v1961_v32  ;;  %v3470_v63 = vld [vmem:[#allocation5 + $0x388] sm:$0xff] }
 0x12f   : > { %v7213_v29 = vrot.slane %v3012_v51, %v6043_v37  ;;  %v7216_v55 = vrot.slane %v1756_v26, %v6043_v37  ;;  %v7219_v24 = vrot.slane %v1757_v16, %v6043_v37  ;;  %v3021_v48 = vcombine.low %v6723_v25, %v6731_v38  ;;  %v2462_v5 = vld [vmem:[#allocation5 + $0x188] sm:$0xff] }
 0x130   : > { %8112 = vst [vmem:[#allocation64_spill] sm:$0xff] %v7207_v43  ;;  %8113 = vst [vmem:[#allocation66_spill] sm:$0xff] %v7210_v4  ;;  %4877 = vmatmul.mubr.f32.gmra.mrb[14].mxu0 %v3011_v50  ;;  %v7225_v21 = vcombine.low %v7195_v27, %v7207_v43  ;;  %5152 = vmatprep.subr.bf16.mxu1 %v5151_v61  ;;  %v3022_v51 = vcombine.low %v6743_v35, %v6737_v45  ;;  %v2461_v50 = vld [vmem:[#allocation5 + $0x180] sm:$0xff]  ;;  %v3483_v27 = vld [vmem:[#allocation5 + $0x3f0] sm:$0xff] }
 0x131   : > { %8114 = vst [vmem:[#allocation67_spill] sm:$0xff] %v7216_v55  ;;  %8115 = vst [vmem:[#allocation62_spill] sm:$0xff] %v7219_v24  ;;  %v5279_v33 = vpack.c.bf16 %v3245_v15, %v3244_v49  ;;  %v3020_v26 = vcombine.low %v7210_v4, %v7213_v29  ;;  %v7233_v32 = vcombine.low %v7216_v55, %v7219_v24  ;;  %5154 = vmatpush3.bf16.msra.mxu1 %v5151_v61  ;;  %v3471_v4 = vld [vmem:[#allocation5 + $0x390] sm:$0xff]  ;;  %v3689_v55 = vld [vmem:[#allocation5 + $0x400] sm:$0xff] }
 0x132   : > { %8116 = vst [vmem:[#allocation70_spill] sm:$0xff] %v7225_v21  ;;  %v7236_v17 = vrot.slane %v3021_v48, %v6043_v37  ;;  %v1963_v16 = vcombine.low %v6074_v2, %v6070_v1  ;;  %4643 = vmatprep.mubr.f32.mxu1 %v7225_v21  ;;  %v7242_v15 = vrot.slane %v3022_v51, %v6043_v37  ;;  %v3472_v21 = vld [vmem:[#allocation5 + $0x398] sm:$0xff] }
 0x133   : > { %5280 = vmatprep.subr.bf16.mxu0 %v5279_v33  ;;  %v1964_v49 = vcombine.low %v6101_v10, %v6077_v3  ;;  %v5283_v24 = vpack.c.bf16 %v3470_v63, %v3469_v41  ;;  %4879 = vmatprep.mubr.f32.mxu0 %v3020_v26  ;;  %v5155_v48 = vpack.c.bf16 %v2462_v5, %v2461_v50  ;;  %v2463_v63 = vld [vmem:[#allocation5 + $0x190] sm:$0xff]  ;;  %v2464_v41 = vld [vmem:[#allocation5 + $0x198] sm:$0xff]  ;;  %v3474_v26 = vld [vmem:[#allocation5 + $0x3a8] sm:$0xff] }
 0x134   : > { %8117 = vst [vmem:[#allocation69_spill] sm:$0xff] %v7242_v15  ;;  %4644 = vmatmul.mubr.f32.gmra.mrb[16].mxu1 %v7233_v32  ;;  %v1971_v61 = vrot.slane %v1963_v16, %v6043_v37  ;;  %v3037_v1 = vcombine.low %v7236_v17, %v7242_v15  ;;  %5282 = vmatpush3.bf16.msra.mxu0 %v5279_v33  ;;  %v2466_v16 = vld [vmem:[#allocation5 + $0x1a8] sm:$0xff]  ;;  %v8159_v15 = vld [vmem:[#allocation57_spill] sm:$0xff] }
 0x135   : > { %v1978_v2 = vrot.slane %v1964_v49, %v6043_v37  ;;  %v1996_v51 = vcombine.low %v6799_v18, %v6782_v56  ;;  %5284 = vmatprep.subr.bf16.mxu0 %v5283_v24  ;;  %v2013_v10 = vcombine.low %v6785_v0, %v6807_v60  ;;  %5156 = vmatprep.subr.bf16.mxu1 %v5155_v48  ;;  %v3473_v18 = vld [vmem:[#allocation5 + $0x3a0] sm:$0xff]  ;;  %v2470_v49 = vld [vmem:[#allocation5 + $0x1c8] sm:$0xff] }
 0x136   : > { %4880 = vmatmul.mubr.f32.gmra.mrb[16].mxu0 %v3037_v1  ;;  %v5287_v33 = vpack.c.bf16 %v3472_v21, %v3471_v4  ;;  %v7258_v5 = vcombine.low %v6810_v46, %v6833_v58  ;;  %v5159_v56 = vpack.c.bf16 %v2464_v41, %v2463_v63  ;;  %v7263_v0 = vcombine.low %v6836_v36, %v6853_v54  ;;  %v2465_v60 = vld [vmem:[#allocation5 + $0x1a0] sm:$0xff]  ;;  %v3476_v36 = vld [vmem:[#allocation5 + $0x3b8] sm:$0xff]  ;;  %v2467_v54 = vld [vmem:[#allocation5 + $0x1b0] sm:$0xff] }
 0x137   : > { %v1979_v3 = vcombine.low %v1971_v61, %v1978_v2  ;;  %4914 = vmatprep.mubr.f32.mxu0 %v6859_v11  ;;  %v5291_v11 = vpack.c.bf16 %v3474_v26, %v3473_v18  ;;  %v7269_v46 = vcombine.low %v6864_v7, %v6886_v42  ;;  %v5163_v58 = vpack.c.bf16 %v2466_v16, %v2465_v60  ;;  %v2468_v4 = vld [vmem:[#allocation5 + $0x1b8] sm:$0xff]  ;;  %v3478_v21 = vld [vmem:[#allocation5 + $0x3c8] sm:$0xff] }
 0x138   : > { %8118 = vst [vmem:[#allocation74_spill] sm:$0xff] %v7258_v5  ;;  %8119 = vst [vmem:[#allocation72_spill] sm:$0xff] %v7263_v0  ;;  %v7280_v7 = vcombine.low %v6918_v6, %v6938_v20  ;;  %v277_v42 = vld [vmem:[%s6021_s30 + $0xb8] sm:$0xff]  ;;  %v7285_v50 = vcombine.low %v6943_v14, %v6962_v57  ;;  %v3480_v14 = vld [vmem:[#allocation5 + $0x3d8] sm:$0xff] }
 0x139   : > { %4678 = vmatprep.mubr.f32.mxu1 %v1979_v3  ;;  %8120 = vst [vmem:[#allocation75_spill] sm:$0xff] %v7269_v46  ;;  %v3479_v6 = vld [vmem:[#allocation5 + $0x3d0] sm:$0xff]  ;;  %v2472_v1 = vld [vmem:[#allocation5 + $0x1d8] sm:$0xff] }
 0x13a   : > { %4679 = vmatmul.mubr.f32.vlgmr.msra.gmra.mrb[0].mxu1 %v1996_v51  ;;  %4915 = vmatmul.mubr.f32.vlgmr.msra.gmra.mrb[0].mxu0 %v6901_v62  ;;  %v3475_v62 = vld [vmem:[#allocation5 + $0x3b0] sm:$0xff]  ;;  %8122 = vst [vmem:[#allocation89_spill] sm:$0xff] %v7280_v7  ;;  %8123 = vst [vmem:[#allocation90_spill] sm:$0xff] %v7285_v50  ;;  %v8127_v51 = vld [vmem:[#allocation87_spill] sm:$0xff] }
 0x13b   : > { %4681 = vmatprep.mubr.f32.mxu1 %v2013_v10  ;;  %5286 = vmatpush3.bf16.msra.mxu0 %v5283_v24  ;;  %v3477_v24 = vld [vmem:[#allocation5 + $0x3c0] sm:$0xff]  ;;  %v2471_v57 = vld [vmem:[#allocation5 + $0x1d0] sm:$0xff] }
 0x13c   : > { %4917 = vmatprep.mubr.f32.mxu0 %v6909_v8  ;;  %5158 = vmatpush3.bf16.msra.mxu1 %v5155_v48  ;;  %v7275_v8 = vcombine.low %v6889_v28, %v6912_v34  ;;  %v7289_v28 = vcombine.low %v6974_v47, %v6990_v39  ;;  %v2469_v34 = vld [vmem:[#allocation5 + $0x1c0] sm:$0xff]  ;;  %v5299_v20 = vpack.c.bf16 %v3478_v21, %v3477_v24  ;;  %v8125_v47 = vld [vmem:[#allocation85_spill] sm:$0xff]  ;;  %v8126_v2 = vld [vmem:[#allocation84_spill] sm:$0xff] }
 0x13d   : > { %5288 = vmatprep.subr.bf16.mxu0 %v5287_v33  ;;  %5160 = vmatprep.subr.bf16.mxu1 %v5159_v56  ;;  %v695_v39 = vcombine.high %v277_v42, %v277_v42  ;;  %v8128_v3 = vld [vmem:[#allocation86_spill] sm:$0xff]  ;;  %v8129_v63 = vld [vmem:[#allocation32_spill] sm:$0xff]  ;;  %v8134_v18 = vld [vmem:[#allocation33_spill] sm:$0xff]  ;;  %v5171_v60 = vpack.c.bf16 %v2470_v49, %v2469_v34 }
 0x13e   : > { %4682 = vmatmul.mubr.f32.gmra.mrb[2].mxu1 %v7258_v5  ;;  %4918 = vmatmul.mubr.f32.gmra.mrb[2].mxu0 %v6952_v40  ;;  %8121 = vst [vmem:[#allocation76_spill] sm:$0xff] %v7275_v8  ;;  %v5295_v40 = vpack.c.bf16 %v3476_v36, %v3475_v62  ;;  %8124 = vst [vmem:[#allocation91_spill] sm:$0xff] %v7289_v28  ;;  %v8130_v41 = vld [vmem:[#allocation30_spill] sm:$0xff]  ;;  %v8137_v62 = vld [vmem:[#allocation40_spill] sm:$0xff] }
 0x13f   : > { %4684 = vmatprep.mubr.f32.mxu1 %v7263_v0  ;;  %5290 = vmatpush3.bf16.msra.mxu0 %v5287_v33  ;;  %v8131_v33 = vld [vmem:[#allocation29_spill] sm:$0xff]  ;;  %v8136_v16 = vld [vmem:[#allocation38_spill] sm:$0xff]  ;;  %v8141_v24 = vld [vmem:[#allocation20_spill] sm:$0xff]  ;;  %v7324_v34 = vrot.slane %v695_v39, %v6043_v37  ;;  %v2502_v39 = vcombine.low %v8110_v30, %v6723_v25 }
 0x140   : > { %4920 = vmatprep.mubr.f32.mxu0 %v6971_v52  ;;  %5162 = vmatpush3.bf16.msra.mxu1 %v5159_v56  ;;  %v5167_v52 = vpack.c.bf16 %v2468_v4, %v2467_v54  ;;  %v7303_v56 = vcombine.low %v8131_v33, %v8130_v41  ;;  %v7311_v36 = vcombine.low %v8137_v62, %v8136_v16  ;;  %v8139_v54 = vld [vmem:[#allocation17_spill] sm:$0xff]  ;;  %v8140_v4 = vld [vmem:[#allocation88_spill] sm:$0xff]  ;;  %v8142_v21 = vld [vmem:[#allocation23_spill] sm:$0xff] }
 0x141   : > { %5292 = vmatprep.subr.bf16.mxu0 %v5291_v11  ;;  %5164 = vmatprep.subr.bf16.mxu1 %v5163_v58  ;;  %v5303_v41 = vpack.c.bf16 %v3480_v14, %v3479_v6  ;;  %v5175_v33 = vpack.c.bf16 %v2472_v1, %v2471_v57  ;;  %v8144_v49 = vld [vmem:[#allocation22_spill] sm:$0xff]  ;;  %v8150_v14 = vld [vmem:[#allocation27_spill] sm:$0xff]  ;;  %v8151_v1 = vld [vmem:[#allocation41_spill] sm:$0xff] }
 0x142   : > { %4685 = vmatmul.mubr.f32.gmra.mrb[4].mxu1 %v7269_v46  ;;  %4921 = vmatmul.mubr.f32.gmra.mrb[4].mxu0 %v6996_v9  ;;  %8132 = vst [vmem:[#allocation85_spill] sm:$0xff] %v7303_v56  ;;  %v8133_v9 = vld [vmem:[#allocation28_spill] sm:$0xff]  ;;  %8138 = vst [vmem:[#allocation87_spill] sm:$0xff] %v7311_v36  ;;  %v8146_v62 = vld [vmem:[#allocation26_spill] sm:$0xff] }
 0x143   : > { %4687 = vmatprep.mubr.f32.mxu1 %v7275_v8  ;;  %5294 = vmatpush3.bf16.msra.mxu0 %v5291_v11  ;;  %v7307_v26 = vcombine.low %v8134_v18, %v8133_v9  ;;  %v7319_v9 = vrot.slane %v277_v42, %v6043_v37  ;;  %v8145_v18 = vld [vmem:[#allocation24_spill] sm:$0xff]  ;;  %v8148_v10 = vld [vmem:[#allocation46_spill] sm:$0xff]  ;;  %v7333_v42 = vcombine.high %v6737_v45, %v6737_v45  ;;  %v8153_v16 = vld [vmem:[#allocation73_spill] sm:$0xff] }
 0x144   : > { %4923 = vmatprep.mubr.f32.mxu0 %v8129_v63  ;;  %5166 = vmatpush3.bf16.msra.mxu1 %v5163_v58  ;;  %v8143_v58 = vld [vmem:[#allocation36_spill] sm:$0xff]  ;;  %v8147_v63 = vld [vmem:[#allocation19_spill] sm:$0xff]  ;;  %v8149_v6 = vld [vmem:[#allocation34_spill] sm:$0xff]  ;;  %v2493_v48 = vcombine.low %v8153_v16, %v8111_v12 }
 0x145   : > { %8135 = vst [vmem:[#allocation84_spill] sm:$0xff] %v7307_v26  ;;  %5296 = vmatprep.subr.bf16.mxu0 %v5295_v40  ;;  %5168 = vmatprep.subr.bf16.mxu1 %v5167_v52  ;;  %v8154_v61 = vld [vmem:[#allocation45_spill] sm:$0xff]  ;;  %v8155_v11 = vld [vmem:[#allocation39_spill] sm:$0xff]  ;;  %v8157_v12 = vld [vmem:[#allocation52_spill] sm:$0xff]  ;;  %v3247_v16 = vcombine.low %v7333_v42, %v7319_v9 }
 0x146   : > { %4688 = vmatmul.mubr.f32.gmra.mrb[6].mxu1 %v7280_v7  ;;  %4924 = vmatmul.mubr.f32.gmra.mrb[6].mxu0 %v8143_v58  ;;  %v8152_v58 = vld [vmem:[#allocation35_spill] sm:$0xff]  ;;  %v7358_v7 = vcombine.high %v7324_v34, %v7324_v34  ;;  %v8160_v25 = vld [vmem:[#allocation50_spill] sm:$0xff]  ;;  %v7384_v5 = vrot.slane %v2493_v48, %v6043_v37 }
 0x147   : > { %4690 = vmatprep.mubr.f32.mxu1 %v7285_v50  ;;  %4926 = vmatprep.mubr.f32.mxu0 %v8148_v10  ;;  %v3481_v45 = vld [vmem:[#allocation5 + $0x3e0] sm:$0xff]  ;;  %v3482_v57 = vld [vmem:[#allocation5 + $0x3e8] sm:$0xff]  ;;  %v8158_v50 = vld [vmem:[#allocation49_spill] sm:$0xff] }
 0x148   : > { %5298 = vmatpush3.bf16.msra.mxu0 %v5295_v40  ;;  %5170 = vmatpush3.bf16.msra.mxu1 %v5167_v52  ;;  %v8156_v40 = vld [vmem:[#allocation47_spill] sm:$0xff]  ;;  %v7350_v52 = vcombine.high %v7319_v9, %v7319_v9  ;;  %v5307_v30 = vpack.c.bf16 %v3482_v57, %v3481_v45  ;;  %v3484_v8 = vld [vmem:[#allocation5 + $0x3f8] sm:$0xff]  ;;  %v2475_v57 = vld [vmem:[#allocation5 + $0x1f0] sm:$0xff] }
 0x149   : > { %5300 = vmatprep.subr.bf16.mxu0 %v5299_v20  ;;  %5172 = vmatprep.subr.bf16.mxu1 %v5171_v60  ;;  %v2473_v10 = vld [vmem:[#allocation5 + $0x1e0] sm:$0xff]  ;;  %v2476_v45 = vld [vmem:[#allocation5 + $0x1f8] sm:$0xff] }
 0x14a   : > { %4691 = vmatmul.mubr.f32.gmra.mrb[8].mxu1 %v7289_v28  ;;  %4927 = vmatmul.mubr.f32.gmra.mrb[8].mxu0 %v8158_v50  ;;  %v2474_v28 = vld [vmem:[#allocation5 + $0x1e8] sm:$0xff]  ;;  %v2503_v50 = vcombine.low %v6731_v38, %v6743_v35  ;;  %v8169_v43 = vld [vmem:[#allocation70_spill] sm:$0xff] }
 0x14b   : > { %4693 = vmatprep.mubr.f32.mxu1 %v7303_v56  ;;  %4929 = vmatprep.mubr.f32.mxu0 %v8159_v15  ;;  %v7370_v56 = vld.sshfl [vmem:[%s6021_s30 + $0xc0] sm:$0x33 pattern:$0x76325410]  ;;  %v8161_v46 = vld [vmem:[#allocation43_spill] sm:$0xff] }
 0x14c   : > { %5302 = vmatpush3.bf16.msra.mxu0 %v5299_v20  ;;  %5174 = vmatpush3.bf16.msra.mxu1 %v5171_v60  ;;  %v7376_v0 = vcombine.low %v8161_v46, %v8160_v25  ;;  %v8162_v15 = vld [vmem:[#allocation44_spill] sm:$0xff]  ;;  %v8163_v38 = vld [vmem:[#allocation51_spill] sm:$0xff]  ;;  %v5179_v20 = vpack.c.bf16 %v2474_v28, %v2473_v10  ;;  %v8164_v60 = vld [vmem:[#allocation58_spill] sm:$0xff]  ;;  %v7389_v46 = vrot.slane %v2502_v39, %v6043_v37 }
 0x14d   : > { %5304 = vmatprep.subr.bf16.mxu0 %v5303_v41  ;;  %5176 = vmatprep.subr.bf16.mxu1 %v5175_v33  ;;  %v7381_v35 = vcombine.low %v8163_v38, %v8162_v15  ;;  %v3256_v25 = vcombine.low %v7350_v52, %v7324_v34  ;;  %v3257_v28 = vcombine.low %v7358_v7, %v7370_v56  ;;  %v8165_v38 = vld [vmem:[#allocation56_spill] sm:$0xff] }
 0x14e   : > { %4694 = vmatmul.mubr.f32.gmra.mrb[10].mxu1 %v7307_v26  ;;  %4930 = vmatmul.mubr.f32.gmra.mrb[10].mxu0 %v8164_v60  ;;  %v7397_v48 = vrot.slane %v2503_v50, %v6043_v37  ;;  %v3254_v10 = vrot.slane %v3247_v16, %v6043_v37  ;;  %v3705_v39 = vcombine.low %v7213_v29, %v7236_v17  ;;  %v8166_v60 = vld [vmem:[#allocation54_spill] sm:$0xff]  ;;  %v3690_v16 = vld [vmem:[#allocation5 + $0x408] sm:$0xff] }
 0x14f   : > { %4696 = vmatprep.mubr.f32.mxu1 %v7311_v36  ;;  %4932 = vmatprep.mubr.f32.mxu0 %v7185_v44  ;;  %v5311_v15 = vpack.c.bf16 %v3484_v8, %v3483_v27  ;;  %v7405_v36 = vcombine.low %v8166_v60, %v8165_v38  ;;  %v8167_v44 = vld [vmem:[#allocation63_spill] sm:$0xff]  ;;  %v5183_v50 = vpack.c.bf16 %v2476_v45, %v2475_v57  ;;  %v8171_v45 = vld [vmem:[#allocation60_spill] sm:$0xff] }
 0x150   : > { %5306 = vmatpush3.bf16.msra.mxu0 %v5303_v41  ;;  %5178 = vmatpush3.bf16.msra.mxu1 %v5175_v33  ;;  %v8168_v41 = vld [vmem:[#allocation53_spill] sm:$0xff]  ;;  %v3246_v27 = vcombine.low %v7384_v5, %v7389_v46  ;;  %v3264_v8 = vrot.slane %v3256_v25, %v6043_v37  ;;  %v3271_v33 = vrot.slane %v3257_v28, %v6043_v37 }
 0x151   : > { %5308 = vmatprep.subr.bf16.mxu0 %v5307_v30  ;;  %5180 = vmatprep.subr.bf16.mxu1 %v5179_v20  ;;  %v7409_v26 = vcombine.low %v8168_v41, %v8167_v44  ;;  %v3255_v38 = vcombine.low %v7397_v48, %v3254_v10  ;;  %v5315_v57 = vpack.c.bf16 %v3690_v16, %v3689_v55  ;;  %v3692_v55 = vld [vmem:[#allocation5 + $0x418] sm:$0xff]  ;;  %v8175_v44 = vld [vmem:[#allocation83_spill] sm:$0xff] }
 0x152   : > { %4697 = vmatmul.mubr.f32.gmra.mrb[12].mxu1 %v7376_v0  ;;  %4933 = vmatmul.mubr.f32.gmra.mrb[12].mxu0 %v8169_v43  ;;  %v8170_v43 = vld [vmem:[#allocation66_spill] sm:$0xff]  ;;  %v3272_v25 = vcombine.low %v3264_v8, %v3271_v33  ;;  %v8179_v8 = vld [vmem:[#allocation21_spill] sm:$0xff] }
 0x153   : > { %4699 = vmatprep.mubr.f32.mxu1 %v7381_v35  ;;  %4935 = vmatprep.mubr.f32.mxu0 %v7233_v32  ;;  %v7422_v60 = vcombine.low %v8171_v45, %v8170_v43  ;;  %v3691_v32 = vld [vmem:[#allocation5 + $0x410] sm:$0xff]  ;;  %v8174_v10 = vld [vmem:[#allocation82_spill] sm:$0xff]  ;;  %v8182_v45 = vcombine.low %v8140_v4, %v8139_v54  ;;  %v8186_v54 = vcombine.low %v8145_v18, %v8144_v49  ;;  %v3454_v4 = vrot.slane %v7350_v52, 7 }
 0x154   : > { %5310 = vmatpush3.bf16.msra.mxu0 %v5307_v30  ;;  %5182 = vmatpush3.bf16.msra.mxu1 %v5179_v20  ;;  %v8172_v30 = vcombine.low %v6788_v31, %v6817_v23  ;;  %v8173_v20 = vld [vmem:[#allocation16_spill] sm:$0xff]  ;;  %v5319_v28 = vpack.c.bf16 %v3692_v55, %v3691_v32  ;;  %v8176_v41 = vcombine.low %v8174_v10, %v8175_v44  ;;  %v8177_v16 = vld [vmem:[#allocation18_spill] sm:$0xff]  ;;  %v8181_v43 = vld [vmem:[#allocation25_spill] sm:$0xff]  ;;  %v3457_v55 = vrot.slane %v7324_v34, 7 }
 0x155   : > { %5312 = vmatprep.subr.bf16.mxu0 %v5311_v15  ;;  %5184 = vmatprep.subr.bf16.mxu1 %v5183_v50  ;;  %v8180_v23 = vcombine.low %v8128_v3, %v8127_v51  ;;  %v3695_v33 = vld [vmem:[#allocation5 + $0x430] sm:$0xff]  ;;  %v8184_v51 = vcombine.low %v8142_v21, %v8141_v24  ;;  %v3697_v3 = vld [vmem:[#allocation5 + $0x440] sm:$0xff]  ;;  %v3460_v10 = vrot.slane %v7358_v7, 7  ;;  %v8188_v18 = vcombine.low %v8147_v63, %v8146_v62 }
 0x156   : > { %4700 = vmatmul.mubr.f32.gmra.mrb[14].mxu1 %v7405_v36  ;;  %4936 = vmatmul.mubr.f32.gmra.mrb[14].mxu0 %v3246_v27  ;;  %v8178_v27 = vcombine.low %v8126_v2, %v8125_v47  ;;  %v8183_v47 = vld [vmem:[#allocation31_spill] sm:$0xff]  ;;  %v3451_v2 = vrot.slane %v7319_v9, 7  ;;  %v8185_v32 = vld [vmem:[#allocation37_spill] sm:$0xff]  ;;  %v8187_v24 = vld [vmem:[#allocation42_spill] sm:$0xff] }
 0x157   : > { %4702 = vmatprep.mubr.f32.mxu1 %v7409_v26  ;;  %4938 = vmatprep.mubr.f32.mxu0 %v3255_v38  ;;  %v3696_v38 = vld [vmem:[#allocation5 + $0x438] sm:$0xff]  ;;  %v3699_v44 = vld [vmem:[#allocation5 + $0x450] sm:$0xff]  ;;  %v3462_v62 = vrot.slane %v3460_v10, 2 }
 0x158   : > { %5314 = vmatpush3.bf16.msra.mxu0 %v5311_v15  ;;  %5186 = vmatpush3.bf16.msra.mxu1 %v5183_v50  ;;  %v3693_v15 = vld [vmem:[#allocation5 + $0x420] sm:$0xff]  ;;  %v3694_v50 = vld [vmem:[#allocation5 + $0x428] sm:$0xff]  ;;  %v3453_v21 = vrot.slane %v3451_v2, 2 }
 0x159   : > { %5316 = vmatprep.subr.bf16.mxu0 %v5315_v57  ;;  %5347 = vmatprep.subr.bf16.mxu1 %v5315_v57  ;;  %v5323_v31 = vpack.c.bf16 %v3694_v50, %v3693_v15  ;;  %v8190_v15 = vcombine.low %v8150_v14, %v8149_v6  ;;  %v3456_v50 = vrot.slane %v3454_v4, 2  ;;  %v8193_v6 = vcombine.low %v8152_v58, %v8151_v1  ;;  %v3701_v14 = vld [vmem:[#allocation5 + $0x460] sm:$0xff] }
 0x15a   : > { %4703 = vmatmul.mubr.f32.gmra.mrb[16].mxu1 %v7422_v60  ;;  %4939 = vmatmul.mubr.f32.gmra.mrb[16].mxu0 %v3272_v25  ;;  %v3698_v25 = vld [vmem:[#allocation5 + $0x448] sm:$0xff]  ;;  %v3455_v63 = vsel %vm6083_vm6, %v3453_v21, %v3454_v4  ;;  %v8199_v4 = vcombine.low %v8157_v12, %v7139_v53  ;;  %v8204_v53 = vld [vmem:[#allocation77_spill] sm:$0xff] }
 0x15b   : > { %4737 = vmatprep.mubr.f32.mxu1 %v8172_v30  ;;  %4973 = vmatprep.mubr.f32.mxu0 %v8173_v20  ;;  %v3463_v30 = vrot.slane %v7370_v56, 7  ;;  %v4215_v20 = vrot.slane %v7333_v42, 9  ;;  %v5331_v49 = vpack.c.bf16 %v3698_v25, %v3697_v3  ;;  %v3700_v42 = vld [vmem:[#allocation5 + $0x458] sm:$0xff]  ;;  %v3703_v25 = vld [vmem:[#allocation5 + $0x470] sm:$0xff] }
 0x15c   : > { %v8202_v21 = vld [vmem:[#allocation80_spill] sm:$0xff]  ;;  %v8205_v12 = vld [vmem:[#allocation61_spill] sm:$0xff] }
 0x15d   : > { %v3464_v58 = vsel %vm6083_vm6, %v3462_v62, %v3463_v30 }
 0x15e   : > { %4738 = vmatmul.mubr.f32.vlgmr.msra.gmra.mrb[0].mxu1 %v8176_v41  ;;  %4974 = vmatmul.mubr.f32.vlgmr.msra.gmra.mrb[0].mxu0 %v8177_v16  ;;  %v8189_v41 = vld [vmem:[#allocation48_spill] sm:$0xff]  ;;  %v3459_v16 = vrot.slane %v3457_v55, 2 }
 0x15f   : > { %4740 = vmatprep.mubr.f32.mxu1 %v8178_v27  ;;  %5318 = vmatpush3.bf16.msra.mxu0 %v5315_v57  ;;  %v3465_v27 = vrot.slane %v3463_v30, 2 }
 0x160   : > { %4976 = vmatprep.mubr.f32.mxu0 %v8179_v8  ;;  %5355 = vmatpush3.bf16.msra.mxu1 %v5315_v57  ;;  %v5327_v57 = vpack.c.bf16 %v3696_v38, %v3695_v33  ;;  %v8191_v8 = vld [vmem:[#allocation55_spill] sm:$0xff]  ;;  %v5335_v38 = vpack.c.bf16 %v3700_v42, %v3699_v44  ;;  %v3461_v1 = vsel %vm6083_vm6, %v3459_v16, %v3460_v10  ;;  %v8203_v10 = vld [vmem:[#allocation78_spill] sm:$0xff]  ;;  %v8210_v16 = vld [vmem:[#allocation64_spill] sm:$0xff] }
 0x161   : > { %5320 = vmatprep.subr.bf16.mxu0 %v5319_v28  ;;  %5348 = vmatprep.subr.bf16.mxu1 %v5319_v28  ;;  %v8207_v44 = vld [vmem:[#allocation62_spill] sm:$0xff] }
 0x162   : > { %4741 = vmatmul.mubr.f32.gmra.mrb[2].mxu1 %v8180_v23  ;;  %4977 = vmatmul.mubr.f32.gmra.mrb[2].mxu0 %v8181_v43  ;;  %v3452_v23 = vsel %vm6083_vm6, %v4215_v20, %v3451_v2  ;;  %v3702_v43 = vld [vmem:[#allocation5 + $0x468] sm:$0xff]  ;;  %v2501_v42 = vcombine.low %v8207_v44, %v7384_v5 }
 0x163   : > { %4743 = vmatprep.mubr.f32.mxu1 %v8182_v45  ;;  %5322 = vmatpush3.bf16.msra.mxu0 %v5319_v28  ;;  %v8194_v45 = vld [vmem:[#allocation59_spill] sm:$0xff]  ;;  %v3486_v2 = vcombine.low %v3452_v23, %v3455_v63  ;;  %v8213_v23 = vld [vmem:[#allocation74_spill] sm:$0xff]  ;;  %v8214_v63 = vld [vmem:[#allocation72_spill] sm:$0xff] }
 0x164   : > { %4979 = vmatprep.mubr.f32.mxu0 %v8183_v47  ;;  %5356 = vmatpush3.bf16.msra.mxu1 %v5319_v28  ;;  %v7461_v28 = vcombine.high %v7370_v56, %v7370_v56  ;;  %v8195_v47 = vcombine.low %v8155_v11, %v8154_v61  ;;  %v5339_v61 = vpack.c.bf16 %v3702_v43, %v3701_v14  ;;  %v8200_v20 = vld [vmem:[#allocation71_spill] sm:$0xff] }
 0x165   : > { %5324 = vmatprep.subr.bf16.mxu0 %v5323_v31  ;;  %5349 = vmatprep.subr.bf16.mxu1 %v5323_v31  ;;  %v8197_v11 = vcombine.low %v8156_v40, %v7114_v13  ;;  %v8201_v40 = vcombine.low %v7142_v22, %v7168_v19  ;;  %v8209_v22 = vld [vmem:[#allocation81_spill] sm:$0xff] }
 0x166   : > { %4744 = vmatmul.mubr.f32.gmra.mrb[4].mxu1 %v8184_v51  ;;  %4980 = vmatmul.mubr.f32.gmra.mrb[4].mxu0 %v8185_v32  ;;  %v3466_v33 = vrot.slane %v7461_v28, 7  ;;  %v3458_v51 = vsel %vm6083_vm6, %v3456_v50, %v3457_v55  ;;  %v3704_v32 = vld [vmem:[#allocation5 + $0x478] sm:$0xff]  ;;  %v8208_v50 = vld [vmem:[#allocation79_spill] sm:$0xff] }
 0x167   : > { %4746 = vmatprep.mubr.f32.mxu1 %v8186_v54  ;;  %5326 = vmatpush3.bf16.msra.mxu0 %v5323_v31  ;;  %v8198_v54 = vld [vmem:[#allocation68_spill] sm:$0xff]  ;;  %v3495_v55 = vcombine.low %v3458_v51, %v3461_v1  ;;  %v5343_v13 = vpack.c.bf16 %v3704_v32, %v3703_v25 }
 0x168   : > { %4982 = vmatprep.mubr.f32.mxu0 %v8187_v24  ;;  %5357 = vmatpush3.bf16.msra.mxu1 %v5323_v31  ;;  %v3467_v3 = vsel %vm6083_vm6, %v3465_v27, %v3466_v33  ;;  %v3493_v24 = vrot.slane %v3486_v2, %v6043_v37  ;;  %v8211_v27 = vld [vmem:[#allocation67_spill] sm:$0xff]  ;;  %v3706_v31 = vcombine.low %v7319_v9, %v7350_v52  ;;  %v8222_v33 = vld [vmem:[#allocation84_spill] sm:$0xff] }
 0x169   : > { %5328 = vmatprep.subr.bf16.mxu0 %v5327_v57  ;;  %5350 = vmatprep.subr.bf16.mxu1 %v5327_v57  ;;  %v3496_v30 = vcombine.low %v3464_v58, %v3467_v3 }
 0x16a   : > { %4747 = vmatmul.mubr.f32.gmra.mrb[6].mxu1 %v8188_v18  ;;  %4983 = vmatmul.mubr.f32.gmra.mrb[6].mxu0 %v8189_v41  ;;  %v8206_v18 = vcombine.low %v7171_v59, %v8205_v12  ;;  %v3503_v41 = vrot.slane %v3495_v55, %v6043_v37  ;;  %v3494_v19 = vcombine.low %v8209_v22, %v3493_v24 }
 0x16b   : > { %4749 = vmatprep.mubr.f32.mxu1 %v8190_v15  ;;  %4985 = vmatprep.mubr.f32.mxu0 %v8191_v8  ;;  %v3510_v15 = vrot.slane %v3496_v30, %v6043_v37  ;;  %v8212_v8 = vcombine.low %v8210_v16, %v8211_v27  ;;  %v2518_v59 = vcombine.low %v7389_v46, %v7397_v48 }
 0x16c   : > { %5330 = vmatpush3.bf16.msra.mxu0 %v5327_v57  ;;  %5358 = vmatpush3.bf16.msra.mxu1 %v5327_v57  ;;  %v8196_v57 = vld [vmem:[#allocation65_spill] sm:$0xff]  ;;  %v3715_v46 = vcombine.low %v7324_v34, %v7358_v7  ;;  %v3716_v48 = vcombine.low %v7370_v56, %v7461_v28  ;;  %v3713_v62 = vrot.slane %v3706_v31, %v6043_v37  ;;  %v8219_v28 = vld [vmem:[#allocation90_spill] sm:$0xff] }
 0x16d   : > { %5332 = vmatprep.subr.bf16.mxu0 %v5331_v49  ;;  %5351 = vmatprep.subr.bf16.mxu1 %v5331_v49  ;;  %v3511_v5 = vcombine.low %v3503_v41, %v3510_v15  ;;  %v8217_v7 = vld [vmem:[#allocation69_spill] sm:$0xff] }
 0x16e   : > { %4750 = vmatmul.mubr.f32.gmra.mrb[8].mxu1 %v8193_v6  ;;  %4986 = vmatmul.mubr.f32.gmra.mrb[8].mxu0 %v8194_v45  ;;  %v3723_v9 = vrot.slane %v3715_v46, %v6043_v37  ;;  %v3730_v52 = vrot.slane %v3716_v48, %v6043_v37  ;;  %v3714_v56 = vcombine.low %v8217_v7, %v3713_v62  ;;  %v8218_v34 = vld [vmem:[#allocation89_spill] sm:$0xff] }
 0x16f   : > { %4752 = vmatprep.mubr.f32.mxu1 %v8195_v47  ;;  %4988 = vmatprep.mubr.f32.mxu0 %v8196_v57  ;;  %v8221_v37 = vld [vmem:[#allocation85_spill] sm:$0xff] }
 0x170   : > { %5334 = vmatpush3.bf16.msra.mxu0 %v5331_v49  ;;  %5359 = vmatpush3.bf16.msra.mxu1 %v5331_v49  ;;  %v3485_v49 = vcombine.low %v8203_v10, %v8202_v21 }
 0x171   : > { %5336 = vmatprep.subr.bf16.mxu0 %v5335_v38  ;;  %5352 = vmatprep.subr.bf16.mxu1 %v5335_v38 }
 0x172   : > { %4753 = vmatmul.mubr.f32.gmra.mrb[10].mxu1 %v8197_v11  ;;  %4989 = vmatmul.mubr.f32.gmra.mrb[10].mxu0 %v8198_v54 }
 0x173   : > { %4755 = vmatprep.mubr.f32.mxu1 %v8199_v4  ;;  %4991 = vmatprep.mubr.f32.mxu0 %v8200_v20 }
 0x174   : > { %5338 = vmatpush3.bf16.msra.mxu0 %v5335_v38  ;;  %5360 = vmatpush3.bf16.msra.mxu1 %v5335_v38 }
 0x175   : > { %5340 = vmatprep.subr.bf16.mxu0 %v5339_v61  ;;  %5353 = vmatprep.subr.bf16.mxu1 %v5339_v61 }
 0x176   : > { %4756 = vmatmul.mubr.f32.gmra.mrb[12].mxu1 %v8201_v40  ;;  %4992 = vmatmul.mubr.f32.gmra.mrb[12].mxu0 %v8204_v53 }
 0x177   : > { %4758 = vmatprep.mubr.f32.mxu1 %v8206_v18  ;;  %4994 = vmatprep.mubr.f32.mxu0 %v8208_v50 }
 0x178   : > { %5342 = vmatpush3.bf16.msra.mxu0 %v5339_v61  ;;  %5361 = vmatpush3.bf16.msra.mxu1 %v5339_v61 }
 0x179   : > { %5344 = vmatprep.subr.bf16.mxu0 %v5343_v13  ;;  %5354 = vmatprep.subr.bf16.mxu1 %v5343_v13 }
 0x17a   : > { %4759 = vmatmul.mubr.f32.gmra.mrb[14].mxu1 %v8212_v8  ;;  %4995 = vmatmul.mubr.f32.gmra.mrb[14].mxu0 %v3485_v49 }
 0x17b   : > { %4761 = vmatprep.mubr.f32.mxu1 %v2501_v42  ;;  %4997 = vmatprep.mubr.f32.mxu0 %v3494_v19  ;;  %v7569_v42 = vld [vmem:[#allocation7] ss:$0 sm:$0xff] }
 0x17c   : > { %5346 = vmatpush3.bf16.msra.mxu0 %v5343_v13  ;;  %5362 = vmatpush3.bf16.msra.mxu1 %v5343_v13 }
 0x17e   : > { %4762 = vmatmul.mubr.f32.gmra.mrb[16].mxu1 %v2518_v59  ;;  %4998 = vmatmul.mubr.f32.gmra.mrb[16].mxu0 %v3511_v5 }
 0x17f   : > { %5047 = vmatprep.mubr.f32.mxu1 %v7376_v0  ;;  %5032 = vmatprep.mubr.f32.mxu0 %v8213_v23  ;;  %v8215_v0 = vld [vmem:[#allocation75_spill] sm:$0xff] }
 0x182   : > { %5048 = vmatmul.mubr.f32.vlgmr.msra.gmra.mrb[18].mxu1 %v7381_v35  ;;  %5033 = vmatmul.mubr.f32.vlgmr.msra.gmra.mrb[0].mxu0 %v8214_v63  ;;  %v8216_v35 = vld [vmem:[#allocation76_spill] sm:$0xff] }
 0x183   : > { %5050 = vmatprep.mubr.f32.mxu1 %v7405_v36  ;;  %5035 = vmatprep.mubr.f32.mxu0 %v8215_v0  ;;  %v3731_v36 = vcombine.low %v3723_v9, %v3730_v52 }
 0x186   : > { %5051 = vmatmul.mubr.f32.gmra.mrb[20].mxu1 %v7409_v26  ;;  %5036 = vmatmul.mubr.f32.gmra.mrb[2].mxu0 %v8216_v35  ;;  %v8220_v26 = vld [vmem:[#allocation91_spill] sm:$0xff] }
 0x187   : > { %5053 = vmatprep.mubr.f32.mxu1 %v7422_v60  ;;  %5038 = vmatprep.mubr.f32.mxu0 %v8218_v34  ;;  %v8223_v60 = vld [vmem:[#allocation87_spill] sm:$0xff] }
 0x18a   : > { %5054 = vmatmul.mubr.f32.gmra.mrb[22].mxu1 %v3705_v39  ;;  %5039 = vmatmul.mubr.f32.gmra.mrb[4].mxu0 %v8219_v28 }
 0x18b   : > { %5056 = vmatprep.mubr.f32.mxu1 %v3714_v56  ;;  %5041 = vmatprep.mubr.f32.mxu0 %v8220_v26 }
 0x18e   : > { %5057 = vmatmul.mubr.f32.gmra.mrb[24].mxu1 %v3731_v36  ;;  %5042 = vmatmul.mubr.f32.gmra.mrb[6].mxu0 %v8221_v37 }
 0x18f   : > { %5044 = vmatprep.mubr.f32.mxu0 %v8222_v33 }
 0x192   : > { %5045 = vmatmul.mubr.f32.gmra.mrb[8].mxu0 %v8223_v60 }
 0x231   : > { %v4739_v38 = vpop.f32.mrb[0].mxu1 }
 0x232   : > { %v2603_v6 = vpop.f32.mrb[1].mxu1 }
 0x235   : > { %v4742_v14 = vpop.f32.mrb[2].mxu1 }
 0x236   : > { %v2613_v43 = vpop.f32.mrb[3].mxu1 }
 0x239   : > { %v7550_v45 = vpop.f32.mrb[4].mxu1 }
 0x23a   : > { %v7552_v29 = vpop.f32.mrb[5].mxu1 }
 0x23d   : > { %v7554_v17 = vpop.f32.mrb[6].mxu1 }
 0x23e   : > { %v7556_v39 = vpop.f32.mrb[7].mxu1 }
 0x241   : > { %v7558_v47 = vpop.f32.mrb[8].mxu1 }
 0x242   : > { %v7560_v2 = vpop.f32.mrb[9].mxu1 }
 0x245   : > { %v4754_v51 = vpop.f32.mrb[10].mxu1  ;;  %v4990_v57 = vpop.f32.mrb[10].mxu0 }
 0x246   : > { %v2653_v1 = vpop.f32.mrb[11].mxu1  ;;  %v5373_v58 = vadd.f32 %v4990_v57, %v4754_v51  ;;  %v3631_v3 = vpop.f32.mrb[11].mxu0 }
 0x247   : > { %v5375_v61 = vadd.f32 %v3631_v3, %v2653_v1 }
 0x249   : > { %v4757_v11 = vpop.f32.mrb[12].mxu1  ;;  %v4993_v25 = vpop.f32.mrb[12].mxu0 }
 0x24a   : > { %v2663_v32 = vpop.f32.mrb[13].mxu1  ;;  %v5377_v54 = vadd.f32 %v4993_v25, %v4757_v11  ;;  %v3641_v4 = vpop.f32.mrb[13].mxu0 }
 0x24b   : > { %v5379_v55 = vadd.f32 %v3641_v4, %v2663_v32 }
 0x24d   : > { %v4760_v30 = vpop.f32.mrb[14].mxu1  ;;  %v4996_v20 = vpop.f32.mrb[14].mxu0 }
 0x24e   : > { %v2673_v24 = vpop.f32.mrb[15].mxu1  ;;  %v5381_v13 = vadd.f32 %v4996_v20, %v4760_v30  ;;  %v3651_v40 = vpop.f32.mrb[15].mxu0 }
 0x24f   : > { %v7562_v21 = vadd.f32 %v3651_v40, %v2673_v24 }
 0x251   : > { %v4763_v10 = vpop.f32.mrb[16].mxu1  ;;  %v4999_v49 = vpop.f32.mrb[16].mxu0 }
 0x252   : > { %v2683_v53 = vpop.f32.mrb[17].mxu1  ;;  %v7564_v12 = vadd.f32 %v4999_v49, %v4763_v10  ;;  %v3661_v18 = vpop.f32.mrb[17].mxu0 }
 0x253   : > { %v7566_v44 = vadd.f32 %v3661_v18, %v2683_v53 }
 0x255   : > { %v5049_v41 = vpop.f32.mrb[18].mxu1  ;;  %v5034_v15 = vpop.f32.mrb[0].mxu0 }
 0x256   : > { %v5374_v50 = vadd.f32 %v5373_v58, %v5049_v41  ;;  %v3851_v22 = vpop.f32.mrb[19].mxu1  ;;  %v5363_v19 = vadd.f32 %v5034_v15, %v4739_v38  ;;  %v3801_v16 = vpop.f32.mrb[1].mxu0 }
 0x257   : > { %v5376_v27 = vadd.f32 %v5375_v61, %v3851_v22  ;;  %v5364_v59 = vadd.f32 %v3801_v16, %v2603_v6 }
 0x258   : > { %v3926_v8 = vadd.f32 %v5374_v50, %v7569_v42  ;;  %v3916_v5 = vadd.f32 %v5363_v19, %v7569_v42 }
 0x259   : > { %v3925_v31 = vadd.f32 %v5376_v27, %v7569_v42  ;;  %v5052_v23 = vpop.f32.mrb[20].mxu1  ;;  %v3915_v48 = vadd.f32 %v5364_v59, %v7569_v42  ;;  %v5037_v63 = vpop.f32.mrb[2].mxu0 }
 0x25a   : > { %v7574_v46 = vmax.f32 %v3926_v8, 0.0  ;;  %v5378_v62 = vadd.f32 %v5377_v54, %v5052_v23  ;;  %v3861_v0 = vpop.f32.mrb[21].mxu1  ;;  %v3934_v9 = vmax.f32 %v3916_v5, 0.0  ;;  %v5365_v35 = vadd.f32 %v5037_v63, %v4742_v14  ;;  %v3811_v7 = vpop.f32.mrb[3].mxu0 }
 0x25b   : > { %v7577_v52 = vmax.f32 %v3925_v31, 0.0  ;;  %v5380_v56 = vadd.f32 %v5379_v55, %v3861_v0  ;;  %v3933_v34 = vmax.f32 %v3915_v48, 0.0  ;;  %v5366_v28 = vadd.f32 %v3811_v7, %v2613_v43 }
 0x25c   : > { %3962 = vst [vmem:[%s7579_s23 + $0x58] sm:$0xff] %v7574_v46  ;;  %v3928_v36 = vadd.f32 %v5378_v62, %v7569_v42  ;;  %3952 = vst [vmem:[%s7579_s23 + $0x8] sm:$0xff] %v3934_v9  ;;  %v3993_v26 = vmul.f32 %v3934_v9, %v3934_v9  ;;  %v3918_v37 = vadd.f32 %v5365_v35, %v7569_v42 }
 0x25d   : > { %3961 = vst [vmem:[%s7579_s23 + $0x50] sm:$0xff] %v7577_v52  ;;  %v3927_v33 = vadd.f32 %v5380_v56, %v7569_v42  ;;  %v5055_v60 = vpop.f32.mrb[22].mxu1  ;;  %3951 = vst [vmem:[%s7579_s23] sm:$0xff] %v3933_v34  ;;  %v3969_v38 = vadd.f32 %v3934_v9, %v3933_v34  ;;  %v3992_v6 = vmul.f32 %v3933_v34, %v3933_v34  ;;  %v5040_v43 = vpop.f32.mrb[4].mxu0 }
 0x25e   : > { %v7590_v14 = vmax.f32 %v3928_v36, 0.0  ;;  %v3917_v51 = vadd.f32 %v5366_v28, %v7569_v42  ;;  %v3871_v57 = vpop.f32.mrb[23].mxu1  ;;  %v3936_v1 = vmax.f32 %v3918_v37, 0.0  ;;  %v5367_v3 = vadd.f32 %v5040_v43, %v7550_v45  ;;  %v3821_v11 = vpop.f32.mrb[5].mxu0 }
 0x25f   : > { %v7593_v58 = vmax.f32 %v3927_v33, 0.0  ;;  %v5382_v61 = vadd.f32 %v5381_v13, %v5055_v60  ;;  %v4010_v25 = vadd.f32 %v3993_v26, %v3992_v6  ;;  %v5368_v54 = vadd.f32 %v3821_v11, %v7552_v29 }
 0x260   : > { %3964 = vst [vmem:[%s7579_s23 + $0x68] sm:$0xff] %v7590_v14  ;;  %v3935_v32 = vmax.f32 %v3917_v51, 0.0  ;;  %3954 = vst [vmem:[%s7579_s23 + $0x18] sm:$0xff] %v3936_v1  ;;  %v3995_v4 = vmul.f32 %v3936_v1, %v3936_v1  ;;  %v3920_v55 = vadd.f32 %v5367_v3, %v7569_v42  ;;  %v5384_v40 = vadd.f32 %v7562_v21, %v3871_v57 }
 0x261   : > { %3963 = vst [vmem:[%s7579_s23 + $0x60] sm:$0xff] %v7593_v58  ;;  %v3930_v30 = vadd.f32 %v5382_v61, %v7569_v42  ;;  %v5058_v20 = vpop.f32.mrb[24].mxu1  ;;  %v3919_v13 = vadd.f32 %v5368_v54, %v7569_v42  ;;  %v5043_v29 = vpop.f32.mrb[6].mxu0 }
 0x262   : > { %3953 = vst [vmem:[%s7579_s23 + $0x10] sm:$0xff] %v3935_v32  ;;  %v3970_v45 = vadd.f32 %v3969_v38, %v3935_v32  ;;  %v3994_v24 = vmul.f32 %v3935_v32, %v3935_v32  ;;  %v3881_v10 = vpop.f32.mrb[25].mxu1  ;;  %v3938_v49 = vmax.f32 %v3920_v55, 0.0  ;;  %v5369_v18 = vadd.f32 %v5043_v29, %v7554_v17  ;;  %v3831_v15 = vpop.f32.mrb[7].mxu0 }
 0x263   : > { %v7607_v53 = vmax.f32 %v3930_v30, 0.0  ;;  %v5386_v41 = vadd.f32 %v7564_v12, %v5058_v20  ;;  %v3937_v22 = vmax.f32 %v3919_v13, 0.0  ;;  %v3929_v16 = vadd.f32 %v5384_v40, %v7569_v42 }
 0x264   : > { %v4011_v50 = vadd.f32 %v4010_v25, %v3994_v24  ;;  %v3971_v19 = vadd.f32 %v3970_v45, %v3936_v1  ;;  %3956 = vst [vmem:[%s7579_s23 + $0x28] sm:$0xff] %v3938_v49  ;;  %v3922_v21 = vadd.f32 %v5369_v18, %v7569_v42  ;;  %v5370_v48 = vadd.f32 %v3831_v15, %v7556_v39 }
 0x265   : > { %3966 = vst [vmem:[%s7579_s23 + $0x78] sm:$0xff] %v7607_v53  ;;  %v3932_v27 = vadd.f32 %v5386_v41, %v7569_v42  ;;  %3955 = vst [vmem:[%s7579_s23 + $0x20] sm:$0xff] %v3937_v22  ;;  %v3996_v17 = vmul.f32 %v3937_v22, %v3937_v22  ;;  %v7618_v59 = vmax.f32 %v3929_v16, 0.0  ;;  %v5046_v5 = vpop.f32.mrb[8].mxu0  ;;  %v5388_v63 = vadd.f32 %v7566_v44, %v3881_v10 }
 0x266   : > { %v3972_v8 = vadd.f32 %v3971_v19, %v3937_v22  ;;  %v4012_v12 = vadd.f32 %v4011_v50, %v3995_v4  ;;  %v3940_v31 = vmax.f32 %v3922_v21, 0.0  ;;  %v3841_v62 = vpop.f32.mrb[9].mxu0  ;;  %v3997_v0 = vmul.f32 %v3938_v49, %v3938_v49 }
 0x267   : > { %v7620_v23 = vmax.f32 %v3932_v27, 0.0  ;;  %3965 = vst [vmem:[%s7579_s23 + $0x70] sm:$0xff] %v7618_v59  ;;  %v5371_v7 = vadd.f32 %v5046_v5, %v7558_v47  ;;  %v3921_v56 = vadd.f32 %v5370_v48, %v7569_v42  ;;  %v3931_v39 = vadd.f32 %v5388_v63, %v7569_v42 }
 0x268   : > { %v4013_v9 = vadd.f32 %v4012_v12, %v3996_v17  ;;  %v3973_v35 = vadd.f32 %v3972_v8, %v3938_v49  ;;  %3958 = vst [vmem:[%s7579_s23 + $0x38] sm:$0xff] %v3940_v31  ;;  %v5372_v36 = vadd.f32 %v3841_v62, %v7560_v2  ;;  %v3999_v38 = vmul.f32 %v3940_v31, %v3940_v31 }
 0x269   : > { %3968 = vst [vmem:[%s7579_s23 + $0x88] sm:$0xff] %v7620_v23  ;;  %v3924_v34 = vadd.f32 %v5371_v7, %v7569_v42  ;;  %v3939_v28 = vmax.f32 %v3921_v56, 0.0  ;;  %v7635_v26 = vmax.f32 %v3931_v39, 0.0 }
 0x26a   : > { %v4014_v44 = vadd.f32 %v4013_v9, %v3997_v0  ;;  %v3923_v37 = vadd.f32 %v5372_v36, %v7569_v42 }
 0x26b   : > { %v3942_v47 = vmax.f32 %v3924_v34, 0.0  ;;  %3957 = vst [vmem:[%s7579_s23 + $0x30] sm:$0xff] %v3939_v28  ;;  %v3974_v33 = vadd.f32 %v3973_v35, %v3939_v28  ;;  %v3998_v60 = vmul.f32 %v3939_v28, %v3939_v28  ;;  %3967 = vst [vmem:[%s7579_s23 + $0x80] sm:$0xff] %v7635_v26 }
 0x26c   : > { %v3941_v2 = vmax.f32 %v3923_v37, 0.0 }
 0x26d   : > { %3960 = vst [vmem:[%s7579_s23 + $0x48] sm:$0xff] %v3942_v47  ;;  %v4015_v42 = vadd.f32 %v4014_v44, %v3998_v60  ;;  %v3975_v6 = vadd.f32 %v3974_v33, %v3940_v31 }
 0x26e   : > { %3959 = vst [vmem:[%s7579_s23 + $0x40] sm:$0xff] %v3941_v2  ;;  %v4000_v51 = vmul.f32 %v3941_v2, %v3941_v2 }
 0x26f   : > { %v3976_v43 = vadd.f32 %v3975_v6, %v3941_v2  ;;  %v4016_v57 = vadd.f32 %v4015_v42, %v3999_v38 }
 0x270   : > { %5712 = shalt.err (!%p5709_p1)
}
 0x271   : > { %s5713_s26 = scalar_lea.hbm %s7645_s7, 2304  ;;  %s5717_s30 = scalar_lea.hbm %s7752_s3, 4608 }
 0x272   : > { %p5714_p13 = scmp.ne.s32.totalorder %s7645_s7, %s5713_s26  ;;  %p5718_p4 = scmp.lt.u32.totalorder %s7645_s7, %s7752_s3 }
 0x273   : > { %p5719_p5 = scmp.lt.u32.totalorder %s5717_s30, %s5713_s26  ;;  %p5721_p11 = scmp.lt.u32.totalorder %s5713_s26, %s7645_s7 }
 0x274   : > { %p5715_p6 = pnand %p5714_p13, %p8224_p0 }
 0x275   : > { %p5720_p8 = por %p5719_p5, %p5718_p4 }
 0x276   : > { %p5716_p10 = pneg %p5715_p6 }
 0x277   : > { %p5722_p2 = por %p5721_p11, %p5720_p8 }
 0x279   : > { %p5723_p3 = pnand %p5722_p2, %p5716_p10 }
 0x27b   : > { %5726 = shalt.err (!%p5723_p3)
}
 0x27c   : > { %s5810_s11 = smov 128   ;;  %s5811_s29 = smov 8   ;;  %v4001_v1 = vmul.f32 %v3942_v47, %v3942_v47  ;;  %v3977_v3 = vadd.f32 %v3976_v43, %v3942_v47  ;;  %v4017_v61 = vadd.f32 %v4016_v57, %v4000_v51  ;;  %v4002_v11 = vmul.f32 %v7577_v52, %v7577_v52 }
 0x27d   : > { %5522 = dma.vmem_to_hbm [thread:$0]  (%p8224_p0), %s7648_s12, 2304, %s7645_s7, %s4036_s8, %s5810_s11, %s5810_s11, %s5811_s29   ;;  %v4003_v54 = vmul.f32 %v7574_v46, %v7574_v46  ;;  %v4004_v30 = vmul.f32 %v7593_v58, %v7593_v58  ;;  %v4005_v24 = vmul.f32 %v7590_v14, %v7590_v14  ;;  %v4007_v10 = vmul.f32 %v7607_v53, %v7607_v53 }
 0x27e   : > { %v3978_v25 = vadd.f32 %v3977_v3, %v7577_v52  ;;  %v4018_v32 = vadd.f32 %v4017_v61, %v4001_v1  ;;  %v4006_v52 = vmul.f32 %v7618_v59, %v7618_v59  ;;  %v4008_v18 = vmul.f32 %v7635_v26, %v7635_v26  ;;  %s4200_s12 = sshll.u32 %s6017_s9, 1  ;;  %s4219_s6 = sshll.u32 %s5859_s19, 5 }
 0x27f   : > { %v4009_v15 = vmul.f32 %v7620_v23, %v7620_v23  ;;  %s253_s7 = scalar_lea.vmem [#allocation9], %s4200_s12  ;;  %s7704_s27 = scalar_lea.hbm %s7753_s4, %s4219_s6 }
 0x280   : > { %v3979_v4 = vadd.f32 %v3978_v25, %v7574_v46  ;;  %v4019_v55 = vadd.f32 %v4018_v32, %v4002_v11  ;;  %s4070_s8 = sshll.u32 %s253_s7, 4  ;;  %s4041_s25 = scalar_lea.sflag [#allocation10], %s6017_s9  ;;  %s7706_s8 = int_to_ptr.vmem [resolvable:$true] %s4070_s8 }
 0x281   : > { %s5727_s26 = scalar_lea.vmem %s7706_s8, 32  ;;  %s5812_s19 = smov [#allocation9]  }
 0x282   : > { %v3980_v20 = vadd.f32 %v3979_v4, %v7593_v58  ;;  %v4020_v45 = vadd.f32 %v4019_v55, %v4003_v54  ;;  %p5728_p7 = scmp.ne.s32.totalorder %s7706_s8, %s5727_s26  ;;  %s5731_s13 = sshll.u32 %s5812_s19, 4  ;;  %s5732_s13 = int_to_ptr.vmem [resolvable:$false] %s5731_s13 }
 0x283   : > { %s5733_s28 = scalar_lea.vmem %s5732_s13, 64  ;;  %p5734_p1 = scmp.lt.s32.totalorder %s7706_s8, %s5732_s13 }
 0x284   : > { %v3981_v13 = vadd.f32 %v3980_v20, %v7590_v14  ;;  %v4021_v40 = vadd.f32 %v4020_v45, %v4004_v30  ;;  %p5729_p9 = pnand %p5728_p7, %p8224_p0  ;;  %p5735_p13 = scmp.lt.s32.totalorder %s5733_s28, %s5727_s26 }
 0x286   : > { %v3982_v29 = vadd.f32 %v3981_v13, %v7618_v59  ;;  %v4022_v46 = vadd.f32 %v4021_v40, %v4005_v24  ;;  %p5730_p12 = pneg %p5729_p9  ;;  %p5736_p6 = por %p5735_p13, %p5734_p1 }
 0x288   : > { %v3983_v49 = vadd.f32 %v3982_v29, %v7607_v53  ;;  %v4023_v58 = vadd.f32 %v4022_v46, %v4006_v52  ;;  %p5737_p10 = pnand %p5736_p6, %p5730_p12 }
 0x28a   : > { %v3984_v41 = vadd.f32 %v3983_v49, %v7635_v26  ;;  %v4024_v14 = vadd.f32 %v4023_v58, %v4007_v10 }
 0x28c   : > { %v3985_v50 = vadd.f32 %v3984_v41, %v7620_v23  ;;  %v4025_v22 = vadd.f32 %v4024_v14, %v4008_v18 }
 0x28e   : > { %v3986_v19 = vrot.slane %v3985_v50, 4  ;;  %v4026_v16 = vadd.f32 %v4025_v22, %v4009_v15 }
 0x290   : > { %v3987_v21 = vadd.f32 %v3986_v19, %v3985_v50  ;;  %v4027_v27 = vrot.slane %v4026_v16, 4 }
 0x292   : > { %v3988_v53 = vrot.slane %v3987_v21, 2  ;;  %v4028_v8 = vadd.f32 %v4027_v27, %v4026_v16 }
 0x294   : > { %v3989_v17 = vadd.f32 %v3988_v53, %v3987_v21  ;;  %v4029_v12 = vrot.slane %v4028_v8, 2 }
 0x296   : > { %v3990_v59 = vrot.slane %v3989_v17, 1  ;;  %v4030_v5 = vadd.f32 %v4029_v12, %v4028_v8 }
 0x298   : > { %v4031_v31 = vrot.slane %v4030_v5, 1  ;;  %v3991_v48 = vadd.f32 %v3990_v59, %v3989_v17 }
 0x29a   : > { %v4032_v23 = vadd.f32 %v4031_v31, %v4030_v5 }
 0x29c   : > { %v4033_v63 = vsel %vm736_vm0, %v3991_v48, %v4032_v23 }
 0x29d   : > { %4034 = vst [vmem:[%s253_s7] sm:$0x3] %v4033_v63 }
 0x29e   : > { %5740 = shalt.err (!%p5737_p10)
}
 0x29f   : > { %s5741_s9 = scalar_lea.hbm %s7704_s27, 32  ;;  %s5745_s23 = scalar_lea.hbm %s7753_s4, 64 }
 0x2a0   : > { %p5742_p4 = scmp.ne.s32.totalorder %s7704_s27, %s5741_s9  ;;  %p5746_p11 = scmp.lt.u32.totalorder %s7704_s27, %s7753_s4 }
 0x2a1   : > { %p5747_p2 = scmp.lt.u32.totalorder %s5745_s23, %s5741_s9  ;;  %p5749_p7 = scmp.lt.u32.totalorder %s5741_s9, %s7704_s27 }
 0x2a2   : > { %p5743_p5 = pnand %p5742_p4, %p8224_p0 }
 0x2a3   : > { %p5748_p3 = por %p5747_p2, %p5746_p11 }
 0x2a4   : > { %p5744_p8 = pneg %p5743_p5 }
 0x2a5   : > { %p5750_p9 = por %p5749_p7, %p5748_p3 }
 0x2a7   : > { %p5751_p12 = pnand %p5750_p9, %p5744_p8 }
 0x2a9   : > { %5754 = shalt.err (!%p5751_p12)
}
 0x2aa   : > { %5523 = dma.vmem_to_hbm [thread:$0]  (%p8224_p0), %s7706_s8, 32, %s7704_s27, %s4041_s25  }
 0x2ab PF: > { %s4082_s12 = sand.u32 1, %s5789_s15   ;;  %p8225_p1 = scmp.ne.s32.totalorder %s7939_s22, 0 }
 0x2ac   : > { %p8226_p13 = scmp.ge.s32.totalorder %s5801_s18, 2  ;;  %s4083_s6 = scalar_lea.sflag [#allocation4], %s4082_s12 }
 0x2ae   : > { %p5538_p6 = pnand %p8226_p13, %p8225_p1 }
 0x2b0   : > { %5780 = dma.done.wait (!%p5538_p6), %s4083_s6, 2304  }
 0x2b1   : > { %5782 = vsyncadd (!%p5538_p6), %s4083_s6, 4294964992  ;;  %s4092_s7 = scalar_lea.sflag [#allocation10], %s4082_s12 }
 0x2b2   : > { %5784 = dma.done.wait (!%p5538_p6), %s4092_s7, 32  }
 0x2b3   : > { %5786 = vsyncadd (!%p5538_p6), %s4092_s7, 4294967264  ;;  %p22_p0 = scmp.ge.s32.totalorder %s5952_s10, 4   ;;  %s8227_s15 = smov %s5793_s16 }
 0x2b4   : > { %s8228_s16 = smov %s5797_s17  ;;  %s8229_s17 = smov %s5968_s20 }
 0x2b5   : > { %s8230_s18 = smov %s5952_s10  ;;  %24 = sbr.rel (!%p22_p0) target bundleno = 8 (0x8), region = 110 }
 0x2bc   :  { %4097 = vsyncpa [#allocation3], 1 }
 0x2bd   :  { %4099 = vsyncpa [#allocation3 + $0x1], 1 }
 0x2be   :  { %4100 = vsyncpa [#allocation6], 1 }
 0x2bf   :  { %4101 = vsyncpa [#allocation4], 1 }
 0x2c0   :  { %4103 = vsyncpa [#allocation4 + $0x1], 1 }
 0x2c1   :  { %4104 = vsyncpa [#allocation10], 1 }
 0x2c2   :  { %4106 = vsyncpa [#allocation10 + $0x1], 1 }

// kernel: unet_layer_pallas.3
= control target key start
LH: loop header
LB: loop body
LE: loop exit
PB: predicated region body
PF: predicated region fallthrough
CT: control target
= control target key end

     0   :  { %10 = vsyncpa [#allocation3], 0  ;;  %s11367_s0 = inlined_call_operand.hbm [shape: f32[2,256,4], index: 0, kind: input, shape index: {}]   ;;  %s11368_s1 = inlined_call_operand.hbm [shape: f32[9,4,128], index: 1, kind: input, shape index: {}]   ;;  %s11369_s2 = inlined_call_operand.hbm [shape: f32[1,128], index: 2, kind: input, shape index: {}]   ;;  %s11370_s3 = inlined_call_operand.hbm [shape: f32[2,196,128], index: 3, kind: output, shape index: {0}]   ;;  %s11371_s4 = inlined_call_operand.hbm [shape: f32[2,2,128], index: 4, kind: output, shape index: {1}]  }
   0x1   :  { %12 = vsyncpa [#allocation3 + $0x1], 0 }
   0x2   :  { %13 = vsyncpa [#allocation6], 0 }
   0x3   :  { %14 = vsyncpa [#allocation4], 0 }
   0x4   :  { %16 = vsyncpa [#allocation4 + $0x1], 0 }
   0x5   :  { %17 = vsyncpa [#allocation10], 0 }
   0x6   :  { %19 = vsyncpa [#allocation10 + $0x1], 0  ;;  %s7605_s15 = smov 0   ;;  %s7607_s16 = smov 0  }
   0x7   :  { %s7609_s17 = smov 0   ;;  %s7611_s18 = smov 0  }
   0x8 LB: > { %s7626_s19 = sadd.s32 4294967295, %s7564_s18   ;;  %s6045_s20 = sadd.s32 4294967294, %s7564_s18   ;;  %s7564_s18 = sphi %s7611_s18, %s12388_s18   ;;  %s7560_s17 = sphi %s7609_s17, %s12387_s17   ;;  %s7556_s16 = sphi %s7607_s16, %s12386_s16   ;;  %s7552_s15 = sphi %s7605_s15, %s12385_s15  }
   0x9   : > { %p45_p0 = scmp.ne.s32.totalorder %s7556_s16, %s7552_s15  ;;  %p11372_p1 = scmp.eq.s32.totalorder %s7626_s19, 0 }
   0xa   : > { %p117_p3 = scmp.eq.s32.totalorder %s6045_s20, 1  ;;  %p6046_p5 = scmp.ge.s32.totalorder %s7564_s18, 1 }
   0xb   : > { %p7635_p4 = por %p11372_p1, %p45_p0  ;;  %p150_p7 = scmp.lt.s32.totalorder %s7564_s18, 3 }
   0xc   : > { %p7640_p6 = por %p117_p3, %p45_p0  ;;  %s7566_s24 = smov [#allocation5]  }
   0xd   : > { %s11751_s21 = scalar_select %p7635_p4, 1, 0 }
   0xe   : > { %s11752_s22 = scalar_select %p7640_p6, 1, 0 }
   0xf   : > { %p7645_p8 = pnand %p6046_p5, %p150_p7  ;;  %s162_s25 = sshll.u32 %s7566_s24, 4  ;;  %s7649_s25 = int_to_ptr.vmem [resolvable:$true] %s162_s25 }
  0x10   : > { %s7567_s27 = smov [#allocation7]   ;;  %s7376_s5 = scalar_lea.hbm %s11368_s1, 576 }
  0x11   : > { %p7275_p9 = pneg %p7645_p8  ;;  %s176_s28 = sshll.u32 %s7567_s27, 4  ;;  %s7660_s28 = int_to_ptr.vmem [resolvable:$true] %s176_s28 }
  0x12   : > { %p7377_p12 = scmp.ne.s32.totalorder %s11368_s1, %s7376_s5  ;;  %p7383_p5 = scmp.lt.u32.totalorder %s7376_s5, %s11368_s1 }
  0x13   : > { %p7656_p11 = pnand %p7275_p9, %p11372_p1 }
  0x15   : > { %p7378_p13 = pneg %p7656_p11 }
  0x17   : > { %p7379_p0 = pnand %p7378_p13, %p7377_p12 }
  0x19   : > { %p7380_p3 = pneg %p7379_p0 }
  0x1b   : > { %p7385_p7 = pnand %p7383_p5, %p7380_p3 }
  0x1d   : > { %7388 = shalt.err (!%p7385_p7)
}
  0x1e   : > { %s7389_s10 = scalar_lea.vmem %s7649_s25, 576  ;;  %p7397_p2 = scmp.lt.s32.totalorder %s7649_s25, %s7649_s25 }
  0x1f   : > { %p7390_p9 = scmp.ne.s32.totalorder %s7649_s25, %s7389_s10  ;;  %p7398_p12 = scmp.lt.s32.totalorder %s7389_s10, %s7389_s10 }
  0x21   : > { %p7392_p10 = pnand %p7390_p9, %p7378_p13  ;;  %p7399_p0 = por %p7398_p12, %p7397_p2 }
  0x23   : > { %p7393_p1 = pneg %p7392_p10 }
  0x25   : > { %p7400_p6 = pnand %p7399_p0, %p7393_p1 }
  0x27   : > { %7403 = shalt.err (!%p7400_p6)
}
  0x28   : > { %s7568_s11 = smov 64   ;;  %s7569_s12 = smov 4  }
  0x29   : > { %7278 = dma.hbm_to_vmem [thread:$0]  (!%p7656_p11), %s11368_s1, 576, %s7649_s25, [#allocation6], %s7568_s11, %s7568_s11, %s7569_s12  }
  0x2a   : > { %s7404_s27 = scalar_lea.hbm %s11369_s2, 16 }
  0x2b   : > { %p7405_p2 = scmp.ne.s32.totalorder %s11369_s2, %s7404_s27  ;;  %p7411_p10 = scmp.lt.u32.totalorder %s7404_s27, %s11369_s2 }
  0x2d   : > { %p7407_p1 = pnand %p7405_p2, %p7378_p13 }
  0x2f   : > { %p7408_p6 = pneg %p7407_p1 }
  0x31   : > { %p7413_p3 = pnand %p7411_p10, %p7408_p6 }
  0x33   : > { %7416 = shalt.err (!%p7413_p3)
}
  0x34   : > { %s7417_s25 = scalar_lea.vmem %s7660_s28, 16  ;;  %s7424_s7 = scalar_lea.vmem %s7660_s28, 32 }
  0x35   : > { %p7418_p5 = scmp.ne.s32.totalorder %s7660_s28, %s7417_s25  ;;  %p7425_p12 = scmp.lt.s32.totalorder %s7660_s28, %s7660_s28 }
  0x36   : > { %p7426_p0 = scmp.lt.s32.totalorder %s7424_s7, %s7417_s25 }
  0x37   : > { %p7420_p7 = pnand %p7418_p5, %p7378_p13 }
  0x38   : > { %p7427_p2 = por %p7426_p0, %p7425_p12 }
  0x39   : > { %p7421_p9 = pneg %p7420_p7 }
  0x3b   : > { %p7428_p1 = pnand %p7427_p2, %p7421_p9 }
  0x3d   : > { %7431 = shalt.err (!%p7428_p1)
}
  0x3e   : > { %7281 = dma.hbm_to_vmem [thread:$0]  (!%p7656_p11), %s11369_s2, 16, %s7660_s28, [#allocation6]  }
  0x3f   : > { %s7716_s10 = sadd.s32 1, %s7564_s18   ;;  %s32_s26 = sadd.s32 1, %s7560_s17 }
  0x40   : > { %s29_s11 = ssub.s32 %s7564_s18, %s7716_s10  ;;  %p39_p13 = scmp.ne.s32.totalorder %s7560_s17, %s7556_s16 }
  0x41   : > { %p30_p6 = scmp.eq.s32.totalorder %s29_s11, 0  ;;  %p40_p10 = scmp.eq.s32.totalorder %s7564_s18, 0 }
  0x42   : > { %p11755_p3 = scmp.eq.s32.totalorder %s7626_s19, 1  ;;  %p7295_p7 = scmp.lt.s32.totalorder %s7564_s18, 2 }
  0x43   : > { %s7732_s13 = scalar_select %p30_p6, %s7560_s17, %s32_s26  }
  0x44   : > { %p7726_p5 = por %p11755_p3, %p39_p13  ;;  %p41_p9 = por %p40_p10, %p39_p13 }
  0x45   : > { %s187_s14 = sand.u32 1, %s7560_s17   ;;  %s6329_s28 = sshll.u32 %s7564_s18, 12 }
  0x46   : > { %s11756_s12 = scalar_select %p7726_p5, 1, 0 }
  0x47   : > { %s6050_s20 = sshll.u32 %s187_s14, 8  ;;  %s7739_s29 = scalar_lea.hbm %s11367_s0, %s6329_s28 }
  0x48   : > { %s191_s30 = scalar_lea.vmem [#allocation2], %s6050_s20  ;;  %p7743_p11 = pnand %p7295_p7, %p41_p9 }
  0x49   : > { %s198_s5 = sshll.u32 %s191_s30, 4  ;;  %s7747_s25 = scalar_lea.sflag [#allocation3], %s187_s14  ;;  %s7741_s5 = int_to_ptr.vmem [resolvable:$true] %s198_s5 }
  0x4a   : > { %s7432_s7 = scalar_lea.hbm %s7739_s29, 4096  ;;  %p7434_p0 = pneg %p7743_p11 }
  0x4b   : > { %p7433_p12 = scmp.ne.s32.totalorder %s7739_s29, %s7432_s7  ;;  %s7437_s26 = scalar_lea.hbm %s11367_s0, 8192 }
  0x4c   : > { %p7438_p13 = scmp.lt.u32.totalorder %s7739_s29, %s11367_s0  ;;  %p7439_p6 = scmp.lt.u32.totalorder %s7437_s26, %s7432_s7 }
  0x4d   : > { %p7435_p2 = pnand %p7434_p0, %p7433_p12  ;;  %p7441_p3 = scmp.lt.u32.totalorder %s7432_s7, %s7739_s29 }
  0x4e   : > { %p7440_p10 = por %p7439_p6, %p7438_p13 }
  0x4f   : > { %p7436_p1 = pneg %p7435_p2 }
  0x50   : > { %p7442_p7 = por %p7441_p3, %p7440_p10 }
  0x52   : > { %p7443_p9 = pnand %p7442_p7, %p7436_p1 }
  0x54   : > { %7446 = shalt.err (!%p7443_p9)
}
  0x55   : > { %s7447_s14 = scalar_lea.vmem %s7741_s5, 4096  ;;  %s7570_s28 = smov [#allocation2]  }
  0x56   : > { %p7448_p12 = scmp.ne.s32.totalorder %s7741_s5, %s7447_s14  ;;  %s7452_s24 = sshll.u32 %s7570_s28, 4  ;;  %s7453_s24 = int_to_ptr.vmem [resolvable:$false] %s7452_s24 }
  0x57   : > { %s7454_s27 = scalar_lea.vmem %s7453_s24, 8192  ;;  %p7455_p4 = scmp.lt.s32.totalorder %s7741_s5, %s7453_s24 }
  0x58   : > { %p7450_p2 = pnand %p7448_p12, %p7434_p0  ;;  %p7456_p13 = scmp.lt.s32.totalorder %s7454_s27, %s7447_s14 }
  0x5a   : > { %p7451_p5 = pneg %p7450_p2  ;;  %p7457_p6 = por %p7456_p13, %p7455_p4 }
  0x5c   : > { %p7458_p10 = pnand %p7457_p6, %p7451_p5 }
  0x5e   : > { %7461 = shalt.err (!%p7458_p10)
}
  0x5f   : > { %s7571_s30 = smov 128   ;;  %s7572_s7 = smov 8  }
  0x60   : > { %7285 = dma.hbm_to_vmem [thread:$0]  (!%p7743_p11), %s7739_s29, 4096, %s7741_s5, %s7747_s25, %s7571_s30, %s7571_s30, %s7572_s7  }
  0x61   : > { %210 = sbr.rel (%p7645_p8) target bundleno = 930 (0x3a2), region = 32 }
  0x68   : > { %s7778_s8 = sand.u32 1, %s7556_s16   ;;  %p11758_p4 = scmp.ne.s32.totalorder %s11751_s21, 0 }
  0x69   : > { %s6054_s9 = sshll.u32 %s7778_s8, 8  ;;  %s213_s26 = scalar_lea.sflag [#allocation3], %s7778_s8 }
  0x6a   : > { %s7782_s11 = scalar_lea.vmem [#allocation2], %s6054_s9 }
  0x6b   : > { %7535 = dma.done.wait (%p11758_p4), %s213_s26, 4096  }
  0x6c   : > { %7537 = vsyncadd (%p11758_p4), %s213_s26, 4294963200  ;;  %p11759_p5 = scmp.eq.s32.totalorder %s7626_s19, 0 }
  0x6e   : > { %7539 = dma.done.wait (%p11759_p5), [#allocation6], 592   ;;  %p11760_p8 = pmov %p11759_p5 }
  0x6f   : > { %v318_v0 = vlaneseq  ;;  %v11376_v1 = vmov 0.0   ;;  %vm7574_vm0 = vmmov 0   ;;  %v7575_v2 = vmov 1983009808   ;;  %v1107_v7 = vld [vmem:[#allocation5 + $0x4] sm:$0xf] }
  0x70   : > { %7541 = vsyncadd (%p11760_p8), [#allocation6], 4294966704  ;;  %6564 = vmatprep.subr.mxu0 %v11376_v1  ;;  %7257 = vmatprep.subr.mxu1 %v11376_v1  ;;  %v316_v3 = vunpack.c.l.s4 %v7575_v2  ;;  %vm791_vm1 = vcmask 1040384   ;;  %vm792_vm2 = vcmask 1042434   ;;  %vm1575_vm3 = vcmask 1043456   ;;  %v254_v8 = vld [vmem:[%s7782_s11] sm:$0xff] }
  0x71   : > { %6566 = vmatprep.mubr.msk.f32.mxu0 %vm7574_vm0, %v11376_v1  ;;  %6605 = vmatprep.mubr.msk.f32.mxu1 %vm7574_vm0, %v11376_v1  ;;  %v319_v4 = vshrl.u32 %v318_v0, 7  ;;  %vm793_vm4 = vmor %vm791_vm1, %vm792_vm2  ;;  %vm794_vm5 = vcmask 1044484   ;;  %v255_v9 = vld [vmem:[%s7782_s11 + $0x8] sm:$0xff]  ;;  %v314_v10 = vcombine.high %v254_v8, %v254_v8  ;;  %vm796_vm7 = vcmask 1046534   ;;  %v268_v13 = vld [vmem:[%s7782_s11 + $0x70] sm:$0xff]  ;;  %s7259_s21 = smul.u32 200, %s7778_s8 }
  0x72   : > { %v317_v5 = vunpack.c.0.s8 %v316_v3  ;;  %6565 = vmatpush3.msk.msra.mxu0 %vm1575_vm3, %v1107_v7  ;;  %7258 = vmatpush3.msk.msra.mxu1 %vm1575_vm3, %v1107_v7  ;;  %v331_v12 = vcombine.high %v255_v9, %v255_v9  ;;  %vm795_vm6 = vmor %vm793_vm4, %vm794_vm5  ;;  %v269_v14 = vld [vmem:[%s7782_s11 + $0x78] sm:$0xff]  ;;  %v545_v16 = vcombine.high %v268_v13, %v268_v13  ;;  %v11762_v23 = vmov 0  ;;  %v7866_v44 = vld [vmem:[%s7782_s11 + $0x10] sm:$0xff]  ;;  %s7260_s29 = smul.u32 3200, %s7626_s19  ;;  %s5890_s14 = scalar_lea.sflag [#allocation4], %s7778_s8 }
  0x73   : > { %6718 = vmatprep.subr.mxu0 %v11376_v1  ;;  %v562_v17 = vcombine.high %v269_v14, %v269_v14  ;;  %6641 = vmatprep.subr.mxu1 %v11376_v1  ;;  %vm7829_vm8 = vmor %vm795_vm6, %vm796_vm7  ;;  %vm1524_vm9 = vcmask 31744   ;;  %v270_v7 = vld [vmem:[%s7782_s11 + $0x80] sm:$0xff]  ;;  %v271_v13 = vld [vmem:[%s7782_s11 + $0x88] sm:$0xff]  ;;  %s11210_s23 = scalar_lea.vmem [#allocation8], %s7259_s21  ;;  %p12382_p0 = scmp.ne.s32.totalorder %s11756_s12, 0 }
  0x74   : > { %v7799_v6 = vsub.s32 %v317_v5, %v319_v4  ;;  %v11763_v23 = vsel %vm7829_vm8, 4294967295, %v11762_v23  ;;  %s5908_s5 = sshll.u32 %s11210_s23, 4  ;;  %s11286_s20 = scalar_lea.hbm %s11370_s3, %s7260_s29  ;;  %s11288_s5 = int_to_ptr.vmem [resolvable:$true] %s5908_s5 }
  0x75   : > { %11764 = vst [vmem:[#allocation16_spill] sm:$0xff] %v11763_v23  ;;  %s7462_s28 = scalar_lea.vmem %s11288_s5, 3200  ;;  %s7576_s24 = smov [#allocation8]  }
  0x76   : > { %v7806_v11 = vrot.slane %v254_v8, %v7799_v6  ;;  %v7812_v15 = vrot.slane %v255_v9, %v7799_v6  ;;  %v7815_v18 = vrot.slane %v269_v14, %v7799_v6  ;;  %v7818_v19 = vrot.slane %v314_v10, %v7799_v6  ;;  %p7463_p11 = scmp.ne.s32.totalorder %s11288_s5, %s7462_s28  ;;  %s7466_s27 = sshll.u32 %s7576_s24, 4  ;;  %s7467_s27 = int_to_ptr.vmem [resolvable:$false] %s7466_s27 }
  0x77   : > { %v7825_v21 = vrot.slane %v331_v12, %v7799_v6  ;;  %v7835_v25 = vrot.slane %v545_v16, %v7799_v6  ;;  %v7838_v26 = vrot.slane %v562_v17, %v7799_v6  ;;  %v7895_v56 = vrot.slane %v7866_v44, %v7799_v6  ;;  %v2429_v16 = vld [vmem:[#allocation5 + $0x8] sm:$0xf]  ;;  %s7468_s30 = scalar_lea.vmem %s7467_s27, 6400  ;;  %p7469_p7 = scmp.lt.s32.totalorder %s11288_s5, %s7467_s27 }
  0x78   : > { %11761 = vst [vmem:[#allocation15_spill] sm:$0xff] %v7815_v18  ;;  %v7822_v20 = vcombine.high %v7806_v11, %v7806_v11  ;;  %v6058_v22 = vrot.slane %v7806_v11, 9  ;;  %v809_v24 = vrot.slane %v7812_v15, 7  ;;  %v7842_v27 = vcombine.high %v7815_v18, %v7815_v18  ;;  %p7464_p1 = pnand %p7463_p11, %p12382_p0  ;;  %p7470_p9 = scmp.lt.s32.totalorder %s7468_s30, %s7462_s28 }
  0x79   : > { %11765 = vst [vmem:[#allocation17_spill] sm:$0xff] %v7838_v26  ;;  %v7846_v28 = vcombine.high %v7818_v19, %v7818_v19  ;;  %v803_v30 = vrot.slane %v7818_v19, 7  ;;  %v963_v31 = vrot.slane %v7815_v18, 7  ;;  %v7853_v32 = vcombine.high %v7835_v25, %v7835_v25 }
  0x7a   : > { %11766 = vst [vmem:[#allocation18_spill] sm:$0xff] %v7842_v27  ;;  %v800_v29 = vrot.slane %v7822_v20, 7  ;;  %v7857_v33 = vcombine.high %v7838_v26, %v7838_v26  ;;  %v966_v34 = vrot.slane %v7842_v27, 7  ;;  %v969_v35 = vrot.slane %v7838_v26, 7  ;;  %v278_v27 = vld [vmem:[%s7782_s11 + $0xc0] sm:$0xff]  ;;  %p7465_p3 = pneg %p7464_p1  ;;  %p7471_p12 = por %p7470_p9, %p7469_p7 }
  0x7b   : > { %v805_v38 = vrot.slane %v803_v30, 2  ;;  %v806_v39 = vrot.slane %v7846_v28, 7  ;;  %v11375_v40 = vrot.slane %v7853_v32, 7  ;;  %v965_v41 = vrot.slane %v963_v31, 2 }
  0x7c   : > { %11767 = vst [vmem:[#allocation19_spill] sm:$0xff] %v7857_v33  ;;  %v801_v36 = vsel %vm7829_vm8, %v6058_v22, %v800_v29  ;;  %v802_v37 = vrot.slane %v800_v29, 2  ;;  %v968_v42 = vrot.slane %v966_v34, 2  ;;  %v971_v43 = vrot.slane %v969_v35, 2  ;;  %p7472_p2 = pnand %p7471_p12, %p7465_p3 }
  0x7d   : > { %v807_v46 = vsel %vm7829_vm8, %v805_v38, %v806_v39  ;;  %v808_v47 = vrot.slane %v806_v39, 2  ;;  %v972_v48 = vrot.slane %v7857_v33, 7  ;;  %v962_v50 = vrot.slane %v11375_v40, 2 }
  0x7e   : > { %v804_v45 = vsel %vm7829_vm8, %v802_v37, %v803_v30  ;;  %v7877_v51 = vsel %vm7829_vm8, %v965_v41, %v966_v34  ;;  %v7881_v52 = vsel %vm7829_vm8, %v968_v42, %v969_v35  ;;  %v7891_v55 = vcombine.high %v7812_v15, %v7812_v15  ;;  %v776_v30 = vld [vmem:[#allocation5] sm:$0xf] }
  0x7f   : > { %v1108_v49 = vcombine.low %v801_v36, %v804_v45  ;;  %11768 = vst [vmem:[#allocation20_spill] sm:$0xff] %v7877_v51  ;;  %11769 = vst [vmem:[#allocation21_spill] sm:$0xff] %v7881_v52  ;;  %v810_v53 = vsel %vm7829_vm8, %v808_v47, %v809_v24  ;;  %v7887_v54 = vsel %vm7829_vm8, %v971_v43, %v972_v48  ;;  %v811_v0 = vrot.slane %v809_v24, 2  ;;  %v257_v45 = vld [vmem:[%s7782_s11 + $0x18] sm:$0xff] }
  0x80   : > { %11770 = vst [vmem:[#allocation22_spill] sm:$0xff] %v7887_v54  ;;  %v1109_v57 = vcombine.low %v807_v46, %v810_v53  ;;  %v7900_v59 = vsel %vm7829_vm8, %v962_v50, %v963_v31  ;;  %v1330_v60 = vcombine.low %v7881_v52, %v7887_v54  ;;  %v7908_v62 = vcombine.high %v7895_v56, %v7895_v56 }
  0x81   : > { %v1116_v58 = vrot.slane %v1108_v49, %v7799_v6  ;;  %11771 = vst [vmem:[#allocation23_spill] sm:$0xff] %v7900_v59  ;;  %v1329_v61 = vcombine.low %v7900_v59, %v7877_v51  ;;  %v777_v63 = vcombine.high %v7825_v21, %v7825_v21  ;;  %v812_v4 = vrot.slane %v7891_v55, 7 }
  0x82   : > { %v1123_v2 = vrot.slane %v1109_v57, %v7799_v6  ;;  %v7914_v3 = vrot.slane %v1330_v60, %v7799_v6  ;;  %v815_v5 = vrot.slane %v7825_v21, 7  ;;  %v6059_v10 = vrot.slane %v7895_v56, 9 }
  0x83   : > { %v7920_v8 = vrot.slane %v1329_v61, %v7799_v6  ;;  %v818_v9 = vrot.slane %v777_v63, 7  ;;  %v822_v12 = vrot.slane %v7908_v62, 7  ;;  %v813_v17 = vsel %vm7829_vm8, %v811_v0, %v812_v4 }
  0x84   : > { %11772 = vst [vmem:[#allocation24_spill] sm:$0xff] %v7914_v3  ;;  %v1124_v14 = vcombine.low %v1116_v58, %v1123_v2  ;;  %v814_v22 = vrot.slane %v812_v4, 2  ;;  %v817_v24 = vrot.slane %v815_v5, 2  ;;  %v578_v34 = vcombine.high %v270_v7, %v270_v7 }
  0x85   : > { %11773 = vst [vmem:[#allocation25_spill] sm:$0xff] %v7920_v8  ;;  %v1345_v29 = vcombine.low %v7920_v8, %v7914_v3  ;;  %v7931_v31 = vsel %vm7829_vm8, %v6059_v10, %v822_v12  ;;  %v7934_v35 = vrot.slane %v270_v7, %v7799_v6  ;;  %v595_v38 = vcombine.high %v271_v13, %v271_v13 }
  0x86   : > { %11774 = vst [vmem:[#allocation26_spill] sm:$0xff] %v7931_v31  ;;  %6567 = vmatmul.mubr.msk.f32.vlgmr.msra.gmra.mrb[0].mxu0 %vm1524_vm9, %v1124_v14  ;;  %v816_v36 = vsel %vm7829_vm8, %v814_v22, %v815_v5  ;;  %v819_v37 = vsel %vm7829_vm8, %v817_v24, %v818_v9  ;;  %v7942_v39 = vrot.slane %v271_v13, %v7799_v6  ;;  %v824_v5 = vrot.slane %v822_v12, 2 }
  0x87   : > { %11775 = vst [vmem:[#allocation27_spill] sm:$0xff] %v7934_v35  ;;  %6606 = vmatmul.mubr.msk.f32.vlgmr.msra.gmra.mrb[0].mxu1 %vm1524_vm9, %v1345_v29  ;;  %6719 = vmatpush3.msk.msra.mxu0 %vm1575_vm3, %v2429_v16  ;;  %v1125_v41 = vcombine.low %v813_v17, %v816_v36  ;;  %v1126_v42 = vcombine.low %v819_v37, %v7931_v31  ;;  %v6066_v48 = vrot.slane %v7934_v35, 9 }
  0x88   : > { %11776 = vst [vmem:[#allocation28_spill] sm:$0xff] %v7942_v39  ;;  %v7948_v43 = vrot.slane %v578_v34, %v7799_v6  ;;  %6642 = vmatpush3.msk.msra.mxu1 %vm1575_vm3, %v776_v30  ;;  %6569 = vmatprep.mubr.msk.f32.mxu0 %vm7574_vm0, %v11376_v1  ;;  %v7956_v46 = vcombine.high %v7934_v35, %v7934_v35  ;;  %v985_v61 = vrot.slane %v7942_v39, 7  ;;  %v8011_v30 = vld [vmem:[%s7782_s11 + $0x90] sm:$0xff] }
  0x89   : > { %v7959_v47 = vrot.slane %v595_v38, %v7799_v6  ;;  %v347_v49 = vcombine.high %v7866_v44, %v7866_v44  ;;  %6608 = vmatprep.mubr.msk.f32.mxu1 %vm7574_vm0, %v11376_v1  ;;  %v1133_v50 = vrot.slane %v1125_v41, %v7799_v6  ;;  %v1140_v53 = vrot.slane %v1126_v42, %v7799_v6 }
  0x8a   : > { %11777 = vst [vmem:[#allocation29_spill] sm:$0xff] %v7948_v43  ;;  %11778 = vst [vmem:[#allocation30_spill] sm:$0xff] %v7956_v46  ;;  %v7970_v57 = vcombine.high %v7948_v43, %v7948_v43  ;;  %v979_v58 = vrot.slane %v7948_v43, 7  ;;  %6795 = vmatprep.subr.mxu1 %v11376_v1  ;;  %v976_v60 = vrot.slane %v7956_v46, 7  ;;  %v7980_v63 = vrot.slane %v257_v45, %v7799_v6 }
  0x8b   : > { %11779 = vst [vmem:[#allocation31_spill] sm:$0xff] %v7959_v47  ;;  %v7977_v44 = vrot.slane %v347_v49, %v7799_v6  ;;  %6872 = vmatprep.subr.mxu0 %v11376_v1  ;;  %v1141_v0 = vcombine.low %v1133_v50, %v1140_v53  ;;  %v364_v13 = vcombine.high %v257_v45, %v257_v45 }
  0x8c   : > { %11780 = vst [vmem:[#allocation32_spill] sm:$0xff] %v7970_v57  ;;  %v981_v2 = vrot.slane %v979_v58, 2  ;;  %v982_v4 = vrot.slane %v7970_v57, 7  ;;  %v7986_v7 = vsel %vm7829_vm8, %v6066_v48, %v976_v60  ;;  %v978_v9 = vrot.slane %v976_v60, 2 }
  0x8d   : > { %11781 = vst [vmem:[#allocation33_spill] sm:$0xff] %v7986_v7  ;;  %v7990_v10 = vcombine.high %v7977_v44, %v7977_v44  ;;  %6570 = vmatmul.mubr.msk.f32.gmra.mrb[2].mxu0 %vm1524_vm9, %v1141_v0  ;;  %v7999_v12 = vcombine.high %v7980_v63, %v7980_v63  ;;  %v825_v17 = vrot.slane %v7977_v44, 7  ;;  %v831_v29 = vrot.slane %v7980_v63, 7 }
  0x8e   : > { %v7995_v14 = vsel %vm7829_vm8, %v981_v2, %v982_v4  ;;  %v984_v16 = vrot.slane %v982_v4, 2  ;;  %v8004_v22 = vsel %vm7829_vm8, %v978_v9, %v979_v58  ;;  %6572 = vmatprep.mubr.msk.f32.mxu0 %vm7574_vm0, %v11376_v1  ;;  %v8015_v34 = vcombine.high %v7942_v39, %v7942_v39 }
  0x8f   : > { %11782 = vst [vmem:[#allocation34_spill] sm:$0xff] %v7995_v14  ;;  %11783 = vst [vmem:[#allocation35_spill] sm:$0xff] %v8004_v22  ;;  %v828_v24 = vrot.slane %v7990_v10, 7  ;;  %v1346_v37 = vcombine.low %v7986_v7, %v8004_v22  ;;  %v8025_v38 = vsel %vm7829_vm8, %v824_v5, %v825_v17  ;;  %v827_v41 = vrot.slane %v825_v17, 2  ;;  %v258_v17 = vld [vmem:[%s7782_s11 + $0x20] sm:$0xff] }
  0x90   : > { %11784 = vst [vmem:[#allocation36_spill] sm:$0xff] %v8015_v34  ;;  %v8019_v36 = vsel %vm7829_vm8, %v984_v16, %v985_v61  ;;  %11786 = vst [vmem:[#allocation38_spill] sm:$0xff] %v8025_v38  ;;  %v833_v48 = vrot.slane %v831_v29, 2  ;;  %v834_v49 = vrot.slane %v7999_v12, 7  ;;  %v8041_v60 = vrot.slane %v8011_v30, %v7799_v6 }
  0x91   : > { %11785 = vst [vmem:[#allocation37_spill] sm:$0xff] %v8019_v36  ;;  %v1347_v42 = vcombine.low %v7995_v14, %v8019_v36  ;;  %v830_v45 = vrot.slane %v828_v24, 2  ;;  %v8031_v50 = vrot.slane %v1346_v37, %v7799_v6  ;;  %v8035_v53 = vsel %vm7829_vm8, %v827_v41, %v828_v24 }
  0x92   : > { %11788 = vst [vmem:[#allocation40_spill] sm:$0xff] %v8035_v53  ;;  %11789 = vst [vmem:[#allocation41_spill] sm:$0xff] %v8041_v60  ;;  %v8052_v4 = vsel %vm7829_vm8, %v833_v48, %v834_v49  ;;  %v1142_v5 = vcombine.low %v8025_v38, %v8035_v53  ;;  %v8057_v9 = vrot.slane %v364_v13, %v7799_v6  ;;  %v987_v13 = vrot.slane %v985_v61, 2 }
  0x93   : > { %11787 = vst [vmem:[#allocation39_spill] sm:$0xff] %v8031_v50  ;;  %v8044_v0 = vrot.slane %v1347_v42, %v7799_v6  ;;  %v8048_v2 = vsel %vm7829_vm8, %v830_v45, %v831_v29  ;;  %11792 = vst [vmem:[#allocation44_spill] sm:$0xff] %v8052_v4  ;;  %v8065_v24 = vcombine.high %v8041_v60, %v8041_v60  ;;  %v988_v45 = vrot.slane %v8015_v34, 7 }
  0x94   : > { %11791 = vst [vmem:[#allocation43_spill] sm:$0xff] %v8048_v2  ;;  %v1143_v16 = vcombine.low %v8048_v2, %v8052_v4  ;;  %v1150_v37 = vrot.slane %v1142_v5, %v7799_v6  ;;  %v8072_v41 = vcombine.high %v7959_v47, %v7959_v47  ;;  %v991_v48 = vrot.slane %v7959_v47, 7 }
  0x95   : > { %11790 = vst [vmem:[#allocation42_spill] sm:$0xff] %v8044_v0  ;;  %11793 = vst [vmem:[#allocation45_spill] sm:$0xff] %v8065_v24  ;;  %v1362_v29 = vcombine.low %v8031_v50, %v8044_v0  ;;  %v6067_v40 = vrot.slane %v8041_v60, 9  ;;  %v998_v5 = vrot.slane %v8065_v24, 7  ;;  %v380_v1 = vcombine.high %v258_v17, %v258_v17  ;;  %v262_v60 = vld [vmem:[%s7782_s11 + $0x40] sm:$0xff] }
  0x96   : > { %11794 = vst [vmem:[#allocation46_spill] sm:$0xff] %v8072_v41  ;;  %v1157_v42 = vrot.slane %v1143_v16, %v7799_v6  ;;  %v994_v58 = vrot.slane %v8072_v41, 7  ;;  %v11795_v0 = vmov 0.0   ;;  %v8086_v16 = vsel %vm7829_vm8, %v987_v13, %v988_v45 }
  0x97   : > { %6609 = vmatmul.mubr.msk.f32.gmra.mrb[2].mxu1 %vm1524_vm9, %v1362_v29  ;;  %11796 = vst [vmem:[#allocation47_spill] sm:$0xff] %v8086_v16  ;;  %v990_v3 = vrot.slane %v988_v45, 2  ;;  %v993_v50 = vrot.slane %v991_v48, 2  ;;  %v8090_v29 = vsel %vm7829_vm8, %v6067_v40, %v998_v5  ;;  %v8093_v8 = vrot.slane %v258_v17, %v7799_v6 }
  0x98   : > { %6611 = vmatprep.mubr.msk.f32.mxu1 %vm7574_vm0, %v11795_v0  ;;  %v1158_v61 = vcombine.low %v1150_v37, %v1157_v42  ;;  %11797 = vst [vmem:[#allocation48_spill] sm:$0xff] %v8090_v29  ;;  %v8096_v41 = vrot.slane %v380_v1, %v7799_v6  ;;  %v8100_v37 = vcombine.high %v8057_v9, %v8057_v9  ;;  %v836_v42 = vrot.slane %v834_v49, 2 }
  0x99   : > { %v8105_v13 = vsel %vm7829_vm8, %v990_v3, %v991_v48  ;;  %v8109_v40 = vsel %vm7829_vm8, %v993_v50, %v994_v58  ;;  %v837_v17 = vrot.slane %v8057_v9, 7  ;;  %v8120_v3 = vcombine.high %v8093_v8, %v8093_v8  ;;  %v273_v50 = vld [vmem:[%s7782_s11 + $0x98] sm:$0xff] }
  0x9a   : > { %6573 = vmatmul.mubr.msk.f32.gmra.mrb[4].mxu0 %vm1524_vm9, %v1158_v61  ;;  %11798 = vst [vmem:[#allocation49_spill] sm:$0xff] %v8105_v13  ;;  %11799 = vst [vmem:[#allocation50_spill] sm:$0xff] %v8109_v40  ;;  %v1363_v1 = vcombine.low %v8086_v16, %v8105_v13  ;;  %v1364_v45 = vcombine.low %v8109_v40, %v8090_v29  ;;  %v840_v48 = vrot.slane %v8100_v37, 7  ;;  %v6060_v61 = vrot.slane %v8093_v8, 9 }
  0x9b   : > { %6575 = vmatprep.mubr.msk.f32.mxu0 %vm7574_vm0, %v11795_v0  ;;  %v8126_v49 = vsel %vm7829_vm8, %v836_v42, %v837_v17  ;;  %v839_v58 = vrot.slane %v837_v17, 2  ;;  %v847_v13 = vrot.slane %v8096_v41, 7  ;;  %v844_v36 = vrot.slane %v8120_v3, 7 }
  0x9c   : > { %11800 = vst [vmem:[#allocation51_spill] sm:$0xff] %v8126_v49  ;;  %v8131_v29 = vrot.slane %v1363_v1, %v7799_v6  ;;  %v8134_v40 = vrot.slane %v1364_v45, %v7799_v6  ;;  %v611_v16 = vcombine.high %v8011_v30, %v8011_v30  ;;  %v628_v17 = vcombine.high %v273_v50, %v273_v50 }
  0x9d   : > { %v8141_v42 = vsel %vm7829_vm8, %v839_v58, %v840_v48  ;;  %v8144_v22 = vrot.slane %v273_v50, %v7799_v6  ;;  %v1000_v14 = vrot.slane %v998_v5, 2  ;;  %v8150_v45 = vsel %vm7829_vm8, %v6060_v61, %v844_v36  ;;  %v259_v58 = vld [vmem:[%s7782_s11 + $0x28] sm:$0xff] }
  0x9e   : > { %11801 = vst [vmem:[#allocation52_spill] sm:$0xff] %v8131_v29  ;;  %11802 = vst [vmem:[#allocation53_spill] sm:$0xff] %v8134_v40  ;;  %v1379_v1 = vcombine.low %v8131_v29, %v8134_v40  ;;  %v846_v54 = vrot.slane %v844_v36, 2  ;;  %v1159_v30 = vcombine.low %v8126_v49, %v8141_v42  ;;  %v8155_v7 = vrot.slane %v611_v16, %v7799_v6 }
  0x9f   : > { %11803 = vst [vmem:[#allocation54_spill] sm:$0xff] %v8141_v42  ;;  %11804 = vst [vmem:[#allocation55_spill] sm:$0xff] %v8144_v22  ;;  %v8158_v48 = vrot.slane %v628_v17, %v7799_v6  ;;  %v8162_v5 = vcombine.high %v8144_v22, %v8144_v22  ;;  %v1007_v50 = vrot.slane %v8144_v22, 7  ;;  %v8174_v16 = vcombine.high %v8096_v41, %v8096_v41 }
  0xa0   : > { %11805 = vst [vmem:[#allocation56_spill] sm:$0xff] %v8150_v45  ;;  %11806 = vst [vmem:[#allocation57_spill] sm:$0xff] %v8155_v7  ;;  %6612 = vmatmul.mubr.msk.f32.gmra.mrb[4].mxu1 %vm1524_vm9, %v1379_v1  ;;  %v8169_v36 = vsel %vm7829_vm8, %v846_v54, %v847_v13  ;;  %v1167_v61 = vrot.slane %v1159_v30, %v7799_v6  ;;  %v397_v17 = vcombine.high %v259_v58, %v259_v58 }
  0xa1   : > { %11807 = vst [vmem:[#allocation58_spill] sm:$0xff] %v8158_v48  ;;  %11808 = vst [vmem:[#allocation59_spill] sm:$0xff] %v8162_v5  ;;  %6614 = vmatprep.mubr.msk.f32.mxu1 %vm7574_vm0, %v11795_v0  ;;  %v1160_v40 = vcombine.low %v8150_v45, %v8169_v36  ;;  %v8182_v1 = vcombine.high %v8155_v7, %v8155_v7  ;;  %v1001_v54 = vrot.slane %v8155_v7, 7  ;;  %v1009_v29 = vrot.slane %v1007_v50, 2 }
  0xa2   : > { %11809 = vst [vmem:[#allocation60_spill] sm:$0xff] %v8169_v36  ;;  %v1010_v30 = vrot.slane %v8162_v5, 7  ;;  %v8187_v51 = vrot.slane %v259_v58, %v7799_v6  ;;  %v8190_v52 = vrot.slane %v397_v17, %v7799_v6  ;;  %v849_v59 = vrot.slane %v847_v13, 2  ;;  %v274_v17 = vld [vmem:[%s7782_s11 + $0xa0] sm:$0xff] }
  0xa3   : > { %11810 = vst [vmem:[#allocation61_spill] sm:$0xff] %v8182_v1  ;;  %v8193_v42 = vrot.slane %v1160_v40, %v7799_v6  ;;  %v8197_v36 = vsel %vm7829_vm8, %v1000_v14, %v1001_v54  ;;  %v1003_v45 = vrot.slane %v1001_v54, 2  ;;  %v1004_v4 = vrot.slane %v8182_v1, 7 }
  0xa4   : > { %11811 = vst [vmem:[#allocation62_spill] sm:$0xff] %v8190_v52  ;;  %11813 = vst [vmem:[#allocation64_spill] sm:$0xff] %v8197_v36  ;;  %v8202_v49 = vsel %vm7829_vm8, %v1009_v29, %v1010_v30  ;;  %v8206_v58 = vcombine.high %v8187_v51, %v8187_v51  ;;  %v850_v13 = vrot.slane %v8174_v16, 7  ;;  %v853_v40 = vrot.slane %v8187_v51, 7 }
  0xa5   : > { %11812 = vst [vmem:[#allocation63_spill] sm:$0xff] %v8193_v42  ;;  %11814 = vst [vmem:[#allocation65_spill] sm:$0xff] %v8202_v49  ;;  %v1175_v2 = vcombine.low %v1167_v61, %v8193_v42  ;;  %v8214_v14 = vsel %vm7829_vm8, %v1003_v45, %v1004_v4  ;;  %v1006_v54 = vrot.slane %v1004_v4, 2  ;;  %v859_v53 = vrot.slane %v8190_v52, 7 }
  0xa6   : > { %11815 = vst [vmem:[#allocation66_spill] sm:$0xff] %v8214_v14  ;;  %v1380_v29 = vcombine.low %v8197_v36, %v8214_v14  ;;  %v8221_v38 = vsel %vm7829_vm8, %v849_v59, %v850_v13  ;;  %v852_v31 = vrot.slane %v850_v13, 2  ;;  %v855_v5 = vrot.slane %v853_v40, 2  ;;  %v260_v36 = vld [vmem:[%s7782_s11 + $0x30] sm:$0xff] }
  0xa7   : > { %11816 = vst [vmem:[#allocation67_spill] sm:$0xff] %v8221_v38  ;;  %6576 = vmatmul.mubr.msk.f32.gmra.mrb[6].mxu0 %vm1524_vm9, %v1175_v2  ;;  %v8226_v61 = vsel %vm7829_vm8, %v1006_v54, %v1007_v50  ;;  %v856_v45 = vrot.slane %v8206_v58, 7  ;;  %v644_v4 = vcombine.high %v274_v17, %v274_v17  ;;  %v8230_v1 = vrot.slane %v274_v17, %v7799_v6 }
  0xa8   : > { %11817 = vst [vmem:[#allocation68_spill] sm:$0xff] %v8226_v61  ;;  %v1381_v14 = vcombine.low %v8226_v61, %v8202_v49  ;;  %v8235_v59 = vrot.slane %v1380_v29, %v7799_v6  ;;  %6578 = vmatprep.mubr.msk.f32.mxu0 %vm7574_vm0, %v11795_v0  ;;  %v8241_v2 = vsel %vm7829_vm8, %v852_v31, %v853_v40  ;;  %v1012_v40 = vrot.slane %v1010_v30, 2 }
  0xa9   : > { %11818 = vst [vmem:[#allocation69_spill] sm:$0xff] %v8230_v1  ;;  %11820 = vst [vmem:[#allocation71_spill] sm:$0xff] %v8241_v2  ;;  %v8245_v50 = vcombine.high %v8158_v48, %v8158_v48  ;;  %v8249_v13 = vsel %vm7829_vm8, %v855_v5, %v856_v45  ;;  %v858_v17 = vrot.slane %v856_v45, 2  ;;  %v1176_v54 = vcombine.low %v8221_v38, %v8241_v2 }
  0xaa   : > { %11819 = vst [vmem:[#allocation70_spill] sm:$0xff] %v8235_v59  ;;  %11822 = vst [vmem:[#allocation73_spill] sm:$0xff] %v8249_v13  ;;  %v8254_v29 = vrot.slane %v644_v4, %v7799_v6  ;;  %v8257_v49 = vrot.slane %v1381_v14, %v7799_v6  ;;  %v8261_v31 = vcombine.high %v8230_v1, %v8230_v1  ;;  %v1013_v61 = vrot.slane %v8158_v48, 7  ;;  %v12036_v23 = vld [vmem:[#allocation61_spill] sm:$0xff] }
  0xab   : > { %11821 = vst [vmem:[#allocation72_spill] sm:$0xff] %v8245_v50  ;;  %v8267_v5 = vsel %vm7829_vm8, %v858_v17, %v859_v53  ;;  %v8270_v45 = vrot.slane %v1176_v54, %v7799_v6  ;;  %v1016_v4 = vrot.slane %v8245_v50, 7  ;;  %v6068_v14 = vrot.slane %v8230_v1, 9 }
  0xac   : > { %11823 = vst [vmem:[#allocation74_spill] sm:$0xff] %v8254_v29  ;;  %11824 = vst [vmem:[#allocation75_spill] sm:$0xff] %v8257_v49  ;;  %v1396_v2 = vcombine.low %v8235_v59, %v8257_v49  ;;  %v1177_v30 = vcombine.low %v8249_v13, %v8267_v5  ;;  %v8280_v38 = vsel %vm7829_vm8, %v1012_v40, %v1013_v61  ;;  %v1015_v48 = vrot.slane %v1013_v61, 2  ;;  %v275_v13 = vld [vmem:[%s7782_s11 + $0xa8] sm:$0xff] }
  0xad   : > { %11825 = vst [vmem:[#allocation76_spill] sm:$0xff] %v8261_v31  ;;  %11826 = vst [vmem:[#allocation77_spill] sm:$0xff] %v8267_v5  ;;  %v1020_v54 = vrot.slane %v8261_v31, 7  ;;  %v1023_v50 = vrot.slane %v8254_v29, 7  ;;  %v413_v1 = vcombine.high %v260_v36, %v260_v36  ;;  %v8295_v61 = vrot.slane %v260_v36, %v7799_v6 }
  0xae   : > { %11827 = vst [vmem:[#allocation78_spill] sm:$0xff] %v8270_v45  ;;  %11828 = vst [vmem:[#allocation79_spill] sm:$0xff] %v8280_v38  ;;  %6615 = vmatmul.mubr.msk.f32.gmra.mrb[6].mxu1 %vm1524_vm9, %v1396_v2  ;;  %v8288_v49 = vrot.slane %v1177_v30, %v7799_v6  ;;  %v8292_v59 = vsel %vm7829_vm8, %v1015_v48, %v1016_v4  ;;  %v8299_v40 = vcombine.high %v8190_v52, %v8190_v52 }
  0xaf   : > { %11830 = vst [vmem:[#allocation81_spill] sm:$0xff] %v8292_v59  ;;  %6617 = vmatprep.mubr.msk.f32.mxu1 %vm7574_vm0, %v11795_v0  ;;  %v8305_v2 = vsel %vm7829_vm8, %v6068_v14, %v1020_v54  ;;  %v1022_v30 = vrot.slane %v1020_v54, 2  ;;  %v1397_v17 = vcombine.low %v8280_v38, %v8292_v59  ;;  %v8310_v48 = vrot.slane %v413_v1, %v7799_v6 }
  0xb0   : > { %11829 = vst [vmem:[#allocation80_spill] sm:$0xff] %v8288_v49  ;;  %11831 = vst [vmem:[#allocation82_spill] sm:$0xff] %v8299_v40  ;;  %v1192_v36 = vcombine.low %v8270_v45, %v8288_v49  ;;  %v8316_v4 = vcombine.high %v8295_v61, %v8295_v61  ;;  %v861_v42 = vrot.slane %v859_v53, 2  ;;  %v862_v5 = vrot.slane %v8299_v40, 7 }
  0xb1   : > { %11832 = vst [vmem:[#allocation83_spill] sm:$0xff] %v8305_v2  ;;  %v8322_v14 = vsel %vm7829_vm8, %v1022_v30, %v1023_v50  ;;  %v8325_v54 = vrot.slane %v1397_v17, %v7799_v6  ;;  %v8329_v1 = vcombine.high %v8310_v48, %v8310_v48  ;;  %v6061_v49 = vrot.slane %v8295_v61, 9 }
  0xb2   : > { %11833 = vst [vmem:[#allocation84_spill] sm:$0xff] %v8322_v14  ;;  %6579 = vmatmul.mubr.msk.f32.gmra.mrb[8].mxu0 %vm1524_vm9, %v1192_v36  ;;  %v1398_v53 = vcombine.low %v8305_v2, %v8322_v14  ;;  %v8337_v45 = vsel %vm7829_vm8, %v861_v42, %v862_v5  ;;  %v866_v30 = vrot.slane %v8316_v4, 7  ;;  %v869_v17 = vrot.slane %v8310_v48, 7 }
  0xb3   : > { %11834 = vst [vmem:[#allocation85_spill] sm:$0xff] %v8325_v54  ;;  %11835 = vst [vmem:[#allocation86_spill] sm:$0xff] %v8337_v45  ;;  %6581 = vmatprep.mubr.msk.f32.mxu0 %vm7574_vm0, %v11795_v0  ;;  %v872_v40 = vrot.slane %v8329_v1, 7  ;;  %v8346_v36 = vcombine.high %v8254_v29, %v8254_v29  ;;  %v661_v59 = vcombine.high %v275_v13, %v275_v13  ;;  %v1025_v22 = vrot.slane %v1023_v50, 2 }
  0xb4   : > { %v8349_v14 = vrot.slane %v275_v13, %v7799_v6  ;;  %v8352_v42 = vrot.slane %v1398_v53, %v7799_v6  ;;  %v8356_v5 = vsel %vm7829_vm8, %v6061_v49, %v866_v30  ;;  %v868_v2 = vrot.slane %v866_v30, 2  ;;  %v261_v53 = vld [vmem:[%s7782_s11 + $0x38] sm:$0xff] }
  0xb5   : > { %11836 = vst [vmem:[#allocation87_spill] sm:$0xff] %v8346_v36  ;;  %11839 = vst [vmem:[#allocation90_spill] sm:$0xff] %v8356_v5  ;;  %v871_v38 = vrot.slane %v869_v17, 2  ;;  %v1193_v31 = vcombine.low %v8337_v45, %v8356_v5  ;;  %v8361_v29 = vrot.slane %v661_v59, %v7799_v6  ;;  %v1026_v59 = vrot.slane %v8346_v36, 7 }
  0xb6   : > { %11837 = vst [vmem:[#allocation88_spill] sm:$0xff] %v8349_v14  ;;  %11838 = vst [vmem:[#allocation89_spill] sm:$0xff] %v8352_v42  ;;  %v8365_v13 = vcombine.high %v8349_v14, %v8349_v14  ;;  %v1413_v24 = vcombine.low %v8325_v54, %v8352_v42  ;;  %v8372_v49 = vsel %vm7829_vm8, %v868_v2, %v869_v17  ;;  %v1029_v50 = vrot.slane %v8349_v14, 7  ;;  %v276_v54 = vld [vmem:[%s7782_s11 + $0xb0] sm:$0xff] }
  0xb7   : > { %11840 = vst [vmem:[#allocation91_spill] sm:$0xff] %v8361_v29  ;;  %11842 = vst [vmem:[#allocation93_spill] sm:$0xff] %v8372_v49  ;;  %v8376_v30 = vsel %vm7829_vm8, %v871_v38, %v872_v40  ;;  %v8382_v45 = vrot.slane %v1193_v31, %v7799_v6  ;;  %v8390_v2 = vsel %vm7829_vm8, %v1025_v22, %v1026_v59  ;;  %v1028_v38 = vrot.slane %v1026_v59, 2 }
  0xb8   : > { %11841 = vst [vmem:[#allocation92_spill] sm:$0xff] %v8365_v13  ;;  %11843 = vst [vmem:[#allocation94_spill] sm:$0xff] %v8376_v30  ;;  %v1194_v5 = vcombine.low %v8372_v49, %v8376_v30  ;;  %v1032_v42 = vrot.slane %v8365_v13, 7  ;;  %6618 = vmatmul.mubr.msk.f32.gmra.mrb[8].mxu1 %vm1524_vm9, %v1413_v24  ;;  %v1035_v17 = vrot.slane %v8361_v29, 7  ;;  %v430_v36 = vcombine.high %v261_v53, %v261_v53 }
  0xb9   : > { %11844 = vst [vmem:[#allocation95_spill] sm:$0xff] %v8382_v45  ;;  %11845 = vst [vmem:[#allocation96_spill] sm:$0xff] %v8390_v2  ;;  %6620 = vmatprep.mubr.msk.f32.mxu1 %vm7574_vm0, %v11795_v0  ;;  %v1031_v30 = vrot.slane %v1029_v50, 2  ;;  %v8399_v14 = vrot.slane %v261_v53, %v7799_v6  ;;  %v8403_v24 = vsel %vm7829_vm8, %v1028_v38, %v1029_v50  ;;  %v874_v59 = vrot.slane %v872_v40, 2 }
  0xba   : > { %v8396_v31 = vrot.slane %v1194_v5, %v7799_v6  ;;  %v1034_v49 = vrot.slane %v1032_v42, 2  ;;  %11847 = vst [vmem:[#allocation98_spill] sm:$0xff] %v8403_v24  ;;  %v8406_v22 = vrot.slane %v430_v36, %v7799_v6  ;;  %v677_v13 = vcombine.high %v276_v54, %v276_v54 }
  0xbb   : > { %v8412_v5 = vsel %vm7829_vm8, %v1031_v30, %v1032_v42  ;;  %v1414_v50 = vcombine.low %v8390_v2, %v8403_v24  ;;  %v8424_v40 = vcombine.high %v8399_v14, %v8399_v14  ;;  %v875_v42 = vrot.slane %v8399_v14, 7 }
  0xbc   : > { %11846 = vst [vmem:[#allocation97_spill] sm:$0xff] %v8396_v31  ;;  %v1209_v7 = vcombine.low %v8382_v45, %v8396_v31  ;;  %11848 = vst [vmem:[#allocation99_spill] sm:$0xff] %v8412_v5  ;;  %v8416_v53 = vsel %vm7829_vm8, %v1034_v49, %v1035_v17  ;;  %v8428_v38 = vcombine.high %v8406_v22, %v8406_v22  ;;  %v881_v30 = vrot.slane %v8406_v22, 7 }
  0xbd   : > { %11849 = vst [vmem:[#allocation100_spill] sm:$0xff] %v8416_v53  ;;  %v1415_v36 = vcombine.low %v8412_v5, %v8416_v53  ;;  %v8433_v49 = vrot.slane %v1414_v50, %v7799_v6  ;;  %v8437_v31 = vrot.slane %v276_v54, %v7799_v6  ;;  %v8440_v45 = vrot.slane %v677_v13, %v7799_v6 }
  0xbe   : > { %6582 = vmatmul.mubr.msk.f32.gmra.mrb[10].mxu0 %vm1524_vm9, %v1209_v7  ;;  %v8449_v7 = vsel %vm7829_vm8, %v874_v59, %v875_v42  ;;  %v877_v50 = vrot.slane %v875_v42, 2  ;;  %v878_v24 = vrot.slane %v8424_v40, 7  ;;  %v883_v5 = vrot.slane %v881_v30, 2 }
  0xbf   : > { %11850 = vst [vmem:[#allocation101_spill] sm:$0xff] %v8433_v49  ;;  %11851 = vst [vmem:[#allocation102_spill] sm:$0xff] %v8437_v31  ;;  %v8443_v53 = vrot.slane %v1415_v36, %v7799_v6  ;;  %6584 = vmatprep.mubr.msk.f32.mxu0 %vm7574_vm0, %v11795_v0  ;;  %v884_v54 = vrot.slane %v8428_v38, 7  ;;  %v8455_v13 = vcombine.high %v8437_v31, %v8437_v31  ;;  %v1037_v33 = vrot.slane %v1035_v17, 2 }
  0xc0   : > { %11852 = vst [vmem:[#allocation103_spill] sm:$0xff] %v8440_v45  ;;  %11854 = vst [vmem:[#allocation105_spill] sm:$0xff] %v8449_v7  ;;  %v8459_v36 = vcombine.high %v8440_v45, %v8440_v45  ;;  %v8465_v59 = vsel %vm7829_vm8, %v877_v50, %v878_v24  ;;  %v880_v42 = vrot.slane %v878_v24, 2  ;;  %v8469_v47 = vcombine.high %v8361_v29, %v8361_v29 }
  0xc1   : > { %11853 = vst [vmem:[#allocation104_spill] sm:$0xff] %v8443_v53  ;;  %11855 = vst [vmem:[#allocation106_spill] sm:$0xff] %v8455_v13  ;;  %v1430_v2 = vcombine.low %v8433_v49, %v8443_v53  ;;  %v8474_v39 = vsel %vm7829_vm8, %v883_v5, %v884_v54  ;;  %v1210_v34 = vcombine.low %v8449_v7, %v8465_v59  ;;  %v6069_v53 = vrot.slane %v8437_v31, 9 }
  0xc2   : > { %11856 = vst [vmem:[#allocation107_spill] sm:$0xff] %v8459_v36  ;;  %11857 = vst [vmem:[#allocation108_spill] sm:$0xff] %v8465_v59  ;;  %v8482_v24 = vsel %vm7829_vm8, %v880_v42, %v881_v30  ;;  %v1038_v50 = vrot.slane %v8469_v47, 7  ;;  %v1042_v49 = vrot.slane %v8455_v13, 7  ;;  %v1045_v29 = vrot.slane %v8440_v45, 7  ;;  %v263_v30 = vld [vmem:[%s7782_s11 + $0x48] sm:$0xff] }
  0xc3   : > { %11858 = vst [vmem:[#allocation109_spill] sm:$0xff] %v8469_v47  ;;  %11859 = vst [vmem:[#allocation110_spill] sm:$0xff] %v8474_v39  ;;  %6621 = vmatmul.mubr.msk.f32.gmra.mrb[10].mxu1 %vm1524_vm9, %v1430_v2  ;;  %v1211_v17 = vcombine.low %v8482_v24, %v8474_v39  ;;  %v8492_v5 = vrot.slane %v1210_v34, %v7799_v6  ;;  %v1048_v2 = vrot.slane %v8459_v36, 7 }
  0xc4   : > { %11860 = vst [vmem:[#allocation111_spill] sm:$0xff] %v8482_v24  ;;  %6623 = vmatprep.mubr.msk.f32.mxu1 %vm7574_vm0, %v11795_v0  ;;  %v446_v54 = vcombine.high %v262_v60, %v262_v60  ;;  %v8498_v42 = vsel %vm7829_vm8, %v1037_v33, %v1038_v50  ;;  %v8502_v47 = vsel %vm7829_vm8, %v6069_v53, %v1042_v49  ;;  %v1044_v59 = vrot.slane %v1042_v49, 2 }
  0xc5   : > { %11861 = vst [vmem:[#allocation112_spill] sm:$0xff] %v8492_v5  ;;  %11862 = vst [vmem:[#allocation113_spill] sm:$0xff] %v8498_v42  ;;  %v1047_v7 = vrot.slane %v1045_v29, 2  ;;  %v8505_v39 = vrot.slane %v1211_v17, %v7799_v6  ;;  %v1431_v34 = vcombine.low %v8498_v42, %v8502_v47  ;;  %v8510_v24 = vrot.slane %v262_v60, %v7799_v6  ;;  %v277_v17 = vld [vmem:[%s7782_s11 + $0xb8] sm:$0xff] }
  0xc6   : > { %11863 = vst [vmem:[#allocation114_spill] sm:$0xff] %v8502_v47  ;;  %v8513_v36 = vrot.slane %v446_v54, %v7799_v6  ;;  %v8517_v33 = vsel %vm7829_vm8, %v1044_v59, %v1045_v29  ;;  %v463_v49 = vcombine.high %v263_v30, %v263_v30  ;;  %v8524_v50 = vrot.slane %v263_v30, %v7799_v6 }
  0xc7   : > { %11864 = vst [vmem:[#allocation115_spill] sm:$0xff] %v8505_v39  ;;  %11865 = vst [vmem:[#allocation116_spill] sm:$0xff] %v8517_v33  ;;  %v8521_v53 = vsel %vm7829_vm8, %v1047_v7, %v1048_v2  ;;  %v1226_v60 = vcombine.low %v8492_v5, %v8505_v39  ;;  %v8532_v47 = vrot.slane %v1431_v34, %v7799_v6  ;;  %v6062_v30 = vrot.slane %v8510_v24, 9 }
  0xc8   : > { %11866 = vst [vmem:[#allocation117_spill] sm:$0xff] %v8521_v53  ;;  %11867 = vst [vmem:[#allocation118_spill] sm:$0xff] %v8524_v50  ;;  %v1432_v54 = vcombine.low %v8517_v33, %v8521_v53  ;;  %v8536_v29 = vcombine.high %v8510_v24, %v8510_v24  ;;  %v8540_v7 = vcombine.high %v8513_v36, %v8513_v36  ;;  %v891_v39 = vrot.slane %v8513_v36, 7 }
  0xc9   : > { %11868 = vst [vmem:[#allocation119_spill] sm:$0xff] %v8532_v47  ;;  %v8543_v59 = vrot.slane %v463_v49, %v7799_v6  ;;  %6585 = vmatmul.mubr.msk.f32.gmra.mrb[12].mxu0 %vm1524_vm9, %v1226_v60  ;;  %v897_v53 = vrot.slane %v8524_v50, 7  ;;  %v694_v33 = vcombine.high %v277_v17, %v277_v17  ;;  %v8557_v13 = vrot.slane %v277_v17, %v7799_v6 }
  0xca   : > { %v8549_v34 = vrot.slane %v1432_v54, %v7799_v6  ;;  %v888_v5 = vrot.slane %v8536_v29, 7  ;;  %6587 = vmatprep.mubr.msk.f32.mxu0 %vm7574_vm0, %v11795_v0  ;;  %v893_v42 = vrot.slane %v891_v39, 2  ;;  %v894_v49 = vrot.slane %v8540_v7, 7 }
  0xcb   : > { %11869 = vst [vmem:[#allocation120_spill] sm:$0xff] %v8543_v59  ;;  %11871 = vst [vmem:[#allocation122_spill] sm:$0xff] %v8557_v13  ;;  %v1050_v45 = vrot.slane %v1048_v2, 2  ;;  %v8566_v43 = vrot.slane %v694_v33, %v7799_v6  ;;  %v8574_v17 = vcombine.high %v8557_v13, %v8557_v13  ;;  %v1051_v2 = vrot.slane %v8557_v13, 7  ;;  %v8588_v33 = vld [vmem:[%s7782_s11 + $0x50] sm:$0xff] }
  0xcc   : > { %11870 = vst [vmem:[#allocation121_spill] sm:$0xff] %v8549_v34  ;;  %v1447_v60 = vcombine.low %v8532_v47, %v8549_v34  ;;  %v8563_v54 = vsel %vm7829_vm8, %v6062_v30, %v888_v5  ;;  %v890_v31 = vrot.slane %v888_v5, 2  ;;  %v8570_v57 = vsel %vm7829_vm8, %v893_v42, %v894_v49 }
  0xcd   : > { %11872 = vst [vmem:[#allocation123_spill] sm:$0xff] %v8563_v54  ;;  %11873 = vst [vmem:[#allocation124_spill] sm:$0xff] %v8566_v43  ;;  %v896_v35 = vrot.slane %v894_v49, 2  ;;  %v8584_v5 = vcombine.high %v8566_v43, %v8566_v43  ;;  %v1057_v42 = vrot.slane %v8566_v43, 7  ;;  %v8592_v49 = vcombine.high %v8524_v50, %v8524_v50 }
  0xce   : > { %11874 = vst [vmem:[#allocation125_spill] sm:$0xff] %v8570_v57  ;;  %11875 = vst [vmem:[#allocation126_spill] sm:$0xff] %v8574_v17  ;;  %6624 = vmatmul.mubr.msk.f32.gmra.mrb[12].mxu1 %vm1524_vm9, %v1447_v60  ;;  %v8580_v30 = vsel %vm7829_vm8, %v890_v31, %v891_v39  ;;  %v8604_v31 = vsel %vm7829_vm8, %v1050_v45, %v1051_v2  ;;  %v1053_v34 = vrot.slane %v1051_v2, 2  ;;  %v1054_v43 = vrot.slane %v8574_v17, 7 }
  0xcf   : > { %11876 = vst [vmem:[#allocation127_spill] sm:$0xff] %v8580_v30  ;;  %11877 = vst [vmem:[#allocation128_spill] sm:$0xff] %v8584_v5  ;;  %6626 = vmatprep.mubr.msk.f32.mxu1 %vm7574_vm0, %v11795_v0  ;;  %v8598_v60 = vsel %vm7829_vm8, %v896_v35, %v897_v53  ;;  %v1227_v39 = vcombine.low %v8563_v54, %v8580_v30  ;;  %v1059_v13 = vrot.slane %v1057_v42, 2  ;;  %v1060_v46 = vrot.slane %v8584_v5, 7 }
  0xd0   : > { %11878 = vst [vmem:[#allocation129_spill] sm:$0xff] %v8598_v60  ;;  %11879 = vst [vmem:[#allocation130_spill] sm:$0xff] %v8604_v31  ;;  %v1228_v47 = vcombine.low %v8570_v57, %v8598_v60  ;;  %v8615_v30 = vrot.slane %v8588_v33, %v7799_v6  ;;  %v8619_v45 = vcombine.high %v8543_v59, %v8543_v59  ;;  %v899_v2 = vrot.slane %v897_v53, 2 }
  0xd1   : > { %v8611_v35 = vrot.slane %v1227_v39, %v7799_v6  ;;  %v8626_v57 = vsel %vm7829_vm8, %v1053_v34, %v1054_v43  ;;  %v1056_v54 = vrot.slane %v1054_v43, 2  ;;  %v8630_v39 = vsel %vm7829_vm8, %v1059_v13, %v1060_v46 }
  0xd2   : > { %11881 = vst [vmem:[#allocation132_spill] sm:$0xff] %v8615_v30  ;;  %11882 = vst [vmem:[#allocation133_spill] sm:$0xff] %v8619_v45  ;;  %v8622_v60 = vrot.slane %v1228_v47, %v7799_v6  ;;  %v1448_v5 = vcombine.low %v8604_v31, %v8626_v57  ;;  %v8636_v17 = vcombine.high %v8615_v30, %v8615_v30  ;;  %v900_v53 = vrot.slane %v8592_v49, 7 }
  0xd3   : > { %11880 = vst [vmem:[#allocation131_spill] sm:$0xff] %v8611_v35  ;;  %11884 = vst [vmem:[#allocation135_spill] sm:$0xff] %v8626_v57  ;;  %v903_v47 = vrot.slane %v8543_v59, 7  ;;  %v8645_v43 = vsel %vm7829_vm8, %v1056_v54, %v1057_v42  ;;  %v906_v46 = vrot.slane %v8619_v45, 7  ;;  %v6063_v13 = vrot.slane %v8615_v30, 9  ;;  %v279_v57 = vld [vmem:[%s7782_s11 + $0xc8] sm:$0xff] }
  0xd4   : > { %11883 = vst [vmem:[#allocation134_spill] sm:$0xff] %v8622_v60  ;;  %11885 = vst [vmem:[#allocation136_spill] sm:$0xff] %v8630_v39  ;;  %v1243_v34 = vcombine.low %v8611_v35, %v8622_v60  ;;  %v1449_v31 = vcombine.low %v8645_v43, %v8630_v39  ;;  %v8653_v26 = vrot.slane %v1448_v5, %v7799_v6  ;;  %v902_v60 = vrot.slane %v900_v53, 2  ;;  %v266_v30 = vld [vmem:[%s7782_s11 + $0x60] sm:$0xff] }
  0xd5   : > { %11886 = vst [vmem:[#allocation137_spill] sm:$0xff] %v8636_v17  ;;  %11887 = vst [vmem:[#allocation138_spill] sm:$0xff] %v8645_v43  ;;  %v8657_v18 = vsel %vm7829_vm8, %v899_v2, %v900_v53  ;;  %v905_v54 = vrot.slane %v903_v47, 2  ;;  %v910_v42 = vrot.slane %v8636_v17, 7  ;;  %v710_v35 = vcombine.high %v278_v27, %v278_v27 }
  0xd6   : > { %11888 = vst [vmem:[#allocation139_spill] sm:$0xff] %v8653_v26  ;;  %11889 = vst [vmem:[#allocation140_spill] sm:$0xff] %v8657_v18  ;;  %6588 = vmatmul.mubr.msk.f32.gmra.mrb[14].mxu0 %vm1524_vm9, %v1243_v34  ;;  %v8662_v45 = vrot.slane %v278_v27, %v7799_v6  ;;  %v8665_v39 = vrot.slane %v1449_v31, %v7799_v6  ;;  %v8671_v5 = vsel %vm7829_vm8, %v902_v60, %v903_v47 }
  0xd7   : > { %6590 = vmatprep.mubr.msk.f32.mxu0 %vm7574_vm0, %v11795_v0  ;;  %11892 = vst [vmem:[#allocation143_spill] sm:$0xff] %v8671_v5  ;;  %v727_v2 = vcombine.high %v279_v57, %v279_v57  ;;  %v8674_v53 = vrot.slane %v279_v57, %v7799_v6  ;;  %v8678_v34 = vsel %vm7829_vm8, %v905_v54, %v906_v46 }
  0xd8   : > { %11890 = vst [vmem:[#allocation141_spill] sm:$0xff] %v8662_v45  ;;  %11891 = vst [vmem:[#allocation142_spill] sm:$0xff] %v8665_v39  ;;  %v8682_v27 = vsel %vm7829_vm8, %v6063_v13, %v910_v42  ;;  %v1244_v31 = vcombine.low %v8657_v18, %v8671_v5  ;;  %v8687_v43 = vrot.slane %v710_v35, %v7799_v6  ;;  %v265_v13 = vld [vmem:[%s7782_s11 + $0x58] sm:$0xff] }
  0xd9   : > { %11893 = vst [vmem:[#allocation144_spill] sm:$0xff] %v8674_v53  ;;  %11894 = vst [vmem:[#allocation145_spill] sm:$0xff] %v8678_v34  ;;  %v1464_v60 = vcombine.low %v8653_v26, %v8665_v39  ;;  %v1245_v57 = vcombine.low %v8678_v34, %v8682_v27  ;;  %v8695_v47 = vcombine.high %v8662_v45, %v8662_v45  ;;  %v6070_v39 = vrot.slane %v8662_v45, 9 }
  0xda   : > { %11895 = vst [vmem:[#allocation146_spill] sm:$0xff] %v8682_v27  ;;  %11896 = vst [vmem:[#allocation147_spill] sm:$0xff] %v8687_v43  ;;  %v8698_v46 = vrot.slane %v727_v2, %v7799_v6  ;;  %v8702_v54 = vrot.slane %v1244_v31, %v7799_v6  ;;  %v8706_v35 = vcombine.high %v8687_v43, %v8687_v43  ;;  %v1067_v26 = vrot.slane %v8687_v43, 7 }
  0xdb   : > { %11897 = vst [vmem:[#allocation148_spill] sm:$0xff] %v8695_v47  ;;  %6627 = vmatmul.mubr.msk.f32.gmra.mrb[14].mxu1 %vm1524_vm9, %v1464_v60  ;;  %v8712_v27 = vrot.slane %v1245_v57, %v7799_v6  ;;  %v1064_v2 = vrot.slane %v8695_v47, 7  ;;  %v1073_v5 = vrot.slane %v8674_v53, 7  ;;  %v479_v31 = vcombine.high %v8588_v33, %v8588_v33 }
  0xdc   : > { %11898 = vst [vmem:[#allocation149_spill] sm:$0xff] %v8698_v46  ;;  %11899 = vst [vmem:[#allocation150_spill] sm:$0xff] %v8702_v54  ;;  %6629 = vmatprep.mubr.msk.f32.mxu1 %vm7574_vm0, %v11795_v0  ;;  %v1069_v34 = vrot.slane %v1067_v26, 2  ;;  %v1070_v18 = vrot.slane %v8706_v35, 7  ;;  %v496_v43 = vcombine.high %v265_v13, %v265_v13  ;;  %v8722_v60 = vrot.slane %v265_v13, %v7799_v6 }
  0xdd   : > { %11900 = vst [vmem:[#allocation151_spill] sm:$0xff] %v8706_v35  ;;  %11901 = vst [vmem:[#allocation152_spill] sm:$0xff] %v8712_v27  ;;  %v1260_v57 = vcombine.low %v8702_v54, %v8712_v27  ;;  %v8728_v45 = vsel %vm7829_vm8, %v6070_v39, %v1064_v2  ;;  %v1066_v47 = vrot.slane %v1064_v2, 2  ;;  %v8731_v33 = vrot.slane %v479_v31, %v7799_v6  ;;  %v8755_v31 = vld [vmem:[%s7782_s11 + $0xd0] sm:$0xff] }
  0xde   : > { %11902 = vst [vmem:[#allocation153_spill] sm:$0xff] %v8722_v60  ;;  %11903 = vst [vmem:[#allocation154_spill] sm:$0xff] %v8728_v45  ;;  %v8735_v17 = vsel %vm7829_vm8, %v1069_v34, %v1070_v18  ;;  %v1072_v35 = vrot.slane %v1070_v18, 2  ;;  %v8738_v59 = vrot.slane %v496_v43, %v7799_v6  ;;  %v8742_v13 = vcombine.high %v8722_v60, %v8722_v60 }
  0xdf   : > { %11904 = vst [vmem:[#allocation155_spill] sm:$0xff] %v8731_v33  ;;  %11905 = vst [vmem:[#allocation156_spill] sm:$0xff] %v8735_v17  ;;  %6591 = vmatmul.mubr.msk.f32.gmra.mrb[16].mxu0 %vm1524_vm9, %v1260_v57  ;;  %v8747_v39 = vsel %vm7829_vm8, %v1066_v47, %v1067_v26  ;;  %v8751_v2 = vcombine.high %v8731_v33, %v8731_v33  ;;  %v912_v34 = vrot.slane %v910_v42, 2  ;;  %v913_v18 = vrot.slane %v8731_v33, 7 }
  0xe0   : > { %11906 = vst [vmem:[#allocation157_spill] sm:$0xff] %v8742_v13  ;;  %11907 = vst [vmem:[#allocation158_spill] sm:$0xff] %v8747_v39  ;;  %v8759_v43 = vsel %vm7829_vm8, %v1072_v35, %v1073_v5  ;;  %v1465_v57 = vcombine.low %v8728_v45, %v8747_v39  ;;  %6593 = vmatprep.mubr.msk.f32.mxu0 %vm7574_vm0, %v11795_v0  ;;  %v919_v26 = vrot.slane %v8722_v60, 7  ;;  %v922_v47 = vrot.slane %v8742_v13, 7 }
  0xe1   : > { %11908 = vst [vmem:[#allocation159_spill] sm:$0xff] %v8751_v2  ;;  %11909 = vst [vmem:[#allocation160_spill] sm:$0xff] %v8759_v43  ;;  %v1466_v42 = vcombine.low %v8735_v17, %v8759_v43  ;;  %v8771_v27 = vsel %vm7829_vm8, %v912_v34, %v913_v18  ;;  %v915_v54 = vrot.slane %v913_v18, 2  ;;  %v916_v35 = vrot.slane %v8751_v2, 7 }
  0xe2   : > { %11910 = vst [vmem:[#allocation161_spill] sm:$0xff] %v8771_v27  ;;  %v8775_v33 = vrot.slane %v1465_v57, %v7799_v6  ;;  %v921_v39 = vrot.slane %v919_v26, 2  ;;  %v8779_v45 = vcombine.high %v8674_v53, %v8674_v53  ;;  %v8783_v13 = vrot.slane %v8755_v31, %v7799_v6 }
  0xe3   : > { %v8786_v43 = vrot.slane %v1466_v42, %v7799_v6  ;;  %v8790_v34 = vsel %vm7829_vm8, %v915_v54, %v916_v35  ;;  %v918_v18 = vrot.slane %v916_v35, 2  ;;  %v8794_v57 = vcombine.high %v8698_v46, %v8698_v46 }
  0xe4   : > { %11911 = vst [vmem:[#allocation162_spill] sm:$0xff] %v8775_v33  ;;  %11912 = vst [vmem:[#allocation163_spill] sm:$0xff] %v8779_v45  ;;  %v8798_v17 = vsel %vm7829_vm8, %v921_v39, %v922_v47  ;;  %v1261_v53 = vcombine.low %v8771_v27, %v8790_v34  ;;  %v8804_v42 = vcombine.high %v8783_v13, %v8783_v13  ;;  %v1075_v2 = vrot.slane %v1073_v5, 2 }
  0xe5   : > { %11913 = vst [vmem:[#allocation164_spill] sm:$0xff] %v8783_v13  ;;  %11914 = vst [vmem:[#allocation165_spill] sm:$0xff] %v8786_v43  ;;  %v1481_v54 = vcombine.low %v8775_v33, %v8786_v43  ;;  %v8810_v35 = vsel %vm7829_vm8, %v918_v18, %v919_v26  ;;  %v1076_v60 = vrot.slane %v8779_v45, 7  ;;  %v1079_v39 = vrot.slane %v8698_v46, 7 }
  0xe6   : > { %11915 = vst [vmem:[#allocation166_spill] sm:$0xff] %v8790_v34  ;;  %11916 = vst [vmem:[#allocation167_spill] sm:$0xff] %v8794_v57  ;;  %v1262_v34 = vcombine.low %v8810_v35, %v8798_v17  ;;  %v8818_v27 = vrot.slane %v1261_v53, %v7799_v6  ;;  %v1082_v5 = vrot.slane %v8794_v57, 7  ;;  %v6071_v50 = vrot.slane %v8783_v13, 9 }
  0xe7   : > { %11917 = vst [vmem:[#allocation168_spill] sm:$0xff] %v8798_v17  ;;  %11918 = vst [vmem:[#allocation169_spill] sm:$0xff] %v8804_v42  ;;  %6630 = vmatmul.mubr.msk.f32.gmra.mrb[16].mxu1 %vm1524_vm9, %v1481_v54  ;;  %v8825_v26 = vsel %vm7829_vm8, %v1075_v2, %v1076_v60  ;;  %v1078_v18 = vrot.slane %v1076_v60, 2  ;;  %v1081_v43 = vrot.slane %v1079_v39, 2  ;;  %v1086_v33 = vrot.slane %v8804_v42, 7 }
  0xe8   : > { %11919 = vst [vmem:[#allocation170_spill] sm:$0xff] %v8810_v35  ;;  %11920 = vst [vmem:[#allocation171_spill] sm:$0xff] %v8818_v27  ;;  %6632 = vmatprep.mubr.msk.f32.mxu1 %vm7574_vm0, %v11795_v0  ;;  %v8831_v53 = vrot.slane %v1262_v34, %v7799_v6  ;;  %v512_v57 = vcombine.high %v266_v30, %v266_v30  ;;  %v8834_v17 = vrot.slane %v266_v30, %v7799_v6 }
  0xe9   : > { %11921 = vst [vmem:[#allocation172_spill] sm:$0xff] %v8825_v26  ;;  %v8838_v54 = vcombine.high %v8738_v59, %v8738_v59  ;;  %v8842_v60 = vsel %vm7829_vm8, %v1078_v18, %v1079_v39  ;;  %v8846_v2 = vsel %vm7829_vm8, %v1081_v43, %v1082_v5  ;;  %v8850_v34 = vsel %vm7829_vm8, %v6071_v50, %v1086_v33  ;;  %v281_v18 = vld [vmem:[%s7782_s11 + $0xd8] sm:$0xff] }
  0xea   : > { %11922 = vst [vmem:[#allocation173_spill] sm:$0xff] %v8831_v53  ;;  %11923 = vst [vmem:[#allocation174_spill] sm:$0xff] %v8834_v17  ;;  %v924_v35 = vrot.slane %v922_v47, 2  ;;  %v1277_v30 = vcombine.low %v8818_v27, %v8831_v53  ;;  %v1482_v42 = vcombine.low %v8825_v26, %v8842_v60  ;;  %v1483_v46 = vcombine.low %v8846_v2, %v8850_v34 }
  0xeb   : > { %11924 = vst [vmem:[#allocation175_spill] sm:$0xff] %v8838_v54  ;;  %11925 = vst [vmem:[#allocation176_spill] sm:$0xff] %v8842_v60  ;;  %v8859_v39 = vrot.slane %v512_v57, %v7799_v6  ;;  %v8863_v43 = vcombine.high %v8834_v17, %v8834_v17  ;;  %v925_v50 = vrot.slane %v8738_v59, 7  ;;  %v928_v47 = vrot.slane %v8838_v54, 7 }
  0xec   : > { %11926 = vst [vmem:[#allocation177_spill] sm:$0xff] %v8846_v2  ;;  %11927 = vst [vmem:[#allocation178_spill] sm:$0xff] %v8850_v34  ;;  %v6064_v5 = vrot.slane %v8834_v17, 9  ;;  %6594 = vmatmul.mubr.msk.f32.gmra.mrb[18].mxu0 %vm1524_vm9, %v1277_v30  ;;  %v8871_v53 = vrot.slane %v1482_v42, %v7799_v6  ;;  %v8874_v27 = vrot.slane %v1483_v46, %v7799_v6  ;;  %v1088_v13 = vrot.slane %v1086_v33, 2 }
  0xed   : > { %11928 = vst [vmem:[#allocation179_spill] sm:$0xff] %v8859_v39  ;;  %v935_v57 = vrot.slane %v8859_v39, 7  ;;  %v743_v34 = vcombine.high %v8755_v31, %v8755_v31  ;;  %6596 = vmatprep.mubr.msk.f32.mxu0 %vm7574_vm0, %v11795_v0  ;;  %v8883_v60 = vsel %vm7829_vm8, %v924_v35, %v925_v50  ;;  %v927_v2 = vrot.slane %v925_v50, 2 }
  0xee   : > { %11929 = vst [vmem:[#allocation180_spill] sm:$0xff] %v8871_v53  ;;  %11930 = vst [vmem:[#allocation181_spill] sm:$0xff] %v8874_v27  ;;  %v932_v42 = vrot.slane %v8863_v43, 7  ;;  %v760_v30 = vcombine.high %v281_v18, %v281_v18  ;;  %v1498_v46 = vcombine.low %v8871_v53, %v8874_v27  ;;  %v8892_v31 = vrot.slane %v281_v18, %v7799_v6 }
  0xef   : > { %11931 = vst [vmem:[#allocation182_spill] sm:$0xff] %v8883_v60  ;;  %v8889_v26 = vrot.slane %v743_v34, %v7799_v6  ;;  %v8896_v45 = vsel %vm7829_vm8, %v927_v2, %v928_v47 }
  0xf0   : > { %11933 = vst [vmem:[#allocation184_spill] sm:$0xff] %v8892_v31  ;;  %11934 = vst [vmem:[#allocation185_spill] sm:$0xff] %v8896_v45  ;;  %v8900_v35 = vsel %vm7829_vm8, %v6064_v5, %v932_v42  ;;  %v934_v50 = vrot.slane %v932_v42, 2  ;;  %v8903_v54 = vrot.slane %v760_v30, %v7799_v6  ;;  %6633 = vmatmul.mubr.msk.f32.gmra.mrb[18].mxu1 %vm1524_vm9, %v1498_v46  ;;  %v267_v5 = vld [vmem:[%s7782_s11 + $0x68] sm:$0xff]  ;;  %v1095_v42 = vrot.slane %v8892_v31, 7 }
  0xf1   : > { %11932 = vst [vmem:[#allocation183_spill] sm:$0xff] %v8889_v26  ;;  %11935 = vst [vmem:[#allocation186_spill] sm:$0xff] %v8900_v35  ;;  %v1278_v34 = vcombine.low %v8883_v60, %v8896_v45  ;;  %v8910_v33 = vcombine.high %v8889_v26, %v8889_v26  ;;  %v8914_v2 = vcombine.high %v8892_v31, %v8892_v31  ;;  %v1089_v47 = vrot.slane %v8889_v26, 7 }
  0xf2   : > { %11936 = vst [vmem:[#allocation187_spill] sm:$0xff] %v8903_v54  ;;  %6635 = vmatprep.mubr.msk.f32.mxu1 %vm7574_vm0, %v11795_v0  ;;  %v8922_v18 = vsel %vm7829_vm8, %v934_v50, %v935_v57  ;;  %v8927_v30 = vcombine.high %v8859_v39, %v8859_v39  ;;  %v529_v46 = vcombine.high %v267_v5, %v267_v5  ;;  %v1097_v26 = vrot.slane %v1095_v42, 2 }
  0xf3   : > { %11937 = vst [vmem:[#allocation188_spill] sm:$0xff] %v8910_v33  ;;  %11938 = vst [vmem:[#allocation189_spill] sm:$0xff] %v8914_v2  ;;  %v1279_v27 = vcombine.low %v8900_v35, %v8922_v18  ;;  %v8932_v53 = vrot.slane %v1278_v34, %v7799_v6  ;;  %v8936_v45 = vsel %vm7829_vm8, %v1088_v13, %v1089_v47  ;;  %v1091_v60 = vrot.slane %v1089_v47, 2 }
  0xf4   : > { %11939 = vst [vmem:[#allocation190_spill] sm:$0xff] %v8922_v18  ;;  %11940 = vst [vmem:[#allocation191_spill] sm:$0xff] %v8927_v30  ;;  %v1092_v50 = vrot.slane %v8910_v33, 7  ;;  %v1098_v31 = vrot.slane %v8914_v2, 7  ;;  %v8941_v39 = vrot.slane %v267_v5, %v7799_v6  ;;  %v8947_v18 = vrot.slane %v529_v46, %v7799_v6 }
  0xf5   : > { %11941 = vst [vmem:[#allocation192_spill] sm:$0xff] %v8932_v53  ;;  %11942 = vst [vmem:[#allocation193_spill] sm:$0xff] %v8936_v45  ;;  %v8944_v17 = vrot.slane %v1279_v27, %v7799_v6  ;;  %v937_v34 = vrot.slane %v935_v57, 2  ;;  %v938_v35 = vrot.slane %v8927_v30, 7 }
  0xf6   : > { %11944 = vst [vmem:[#allocation195_spill] sm:$0xff] %v8947_v18  ;;  %v8952_v13 = vsel %vm7829_vm8, %v1091_v60, %v1092_v50  ;;  %v1094_v47 = vrot.slane %v1092_v50, 2  ;;  %v8956_v2 = vsel %vm7829_vm8, %v1097_v26, %v1098_v31  ;;  %v8960_v5 = vcombine.high %v8941_v39, %v8941_v39 }
  0xf7   : > { %11943 = vst [vmem:[#allocation194_spill] sm:$0xff] %v8944_v17  ;;  %11945 = vst [vmem:[#allocation196_spill] sm:$0xff] %v8952_v13  ;;  %v1294_v27 = vcombine.low %v8932_v53, %v8944_v17  ;;  %v1499_v57 = vcombine.low %v8936_v45, %v8952_v13  ;;  %v8968_v46 = vsel %vm7829_vm8, %v937_v34, %v938_v35  ;;  %v940_v60 = vrot.slane %v938_v35, 2 }
  0xf8   : > { %11946 = vst [vmem:[#allocation197_spill] sm:$0xff] %v8956_v2  ;;  %11947 = vst [vmem:[#allocation198_spill] sm:$0xff] %v8968_v46  ;;  %v8972_v50 = vsel %vm7829_vm8, %v1094_v47, %v1095_v42  ;;  %v941_v26 = vrot.slane %v8941_v39, 7  ;;  %v944_v33 = vrot.slane %v8960_v5, 7  ;;  %v947_v30 = vrot.slane %v8947_v18, 7 }
  0xf9   : > { %11948 = vst [vmem:[#allocation199_spill] sm:$0xff] %v8972_v50  ;;  %6597 = vmatmul.mubr.msk.f32.gmra.mrb[20].mxu0 %vm1524_vm9, %v1294_v27  ;;  %v1500_v17 = vcombine.low %v8972_v50, %v8956_v2  ;;  %v8981_v34 = vrot.slane %v1499_v57, %v7799_v6  ;;  %v8985_v35 = vcombine.high %v8903_v54, %v8903_v54  ;;  %v1100_v42 = vrot.slane %v1098_v31, 2  ;;  %v9001_v31 = vld.sshfl [vmem:[%s7782_s11 + $0x70] sm:$0xff pattern:$0x76325410] }
  0xfa   : > { %6599 = vmatprep.mubr.msk.f32.mxu0 %vm7574_vm0, %v11795_v0  ;;  %v8991_v47 = vsel %vm7829_vm8, %v940_v60, %v941_v26  ;;  %v943_v53 = vrot.slane %v941_v26, 2  ;;  %v946_v27 = vrot.slane %v944_v33, 2  ;;  %v1101_v13 = vrot.slane %v8903_v54, 7 }
  0xfb   : > { %11949 = vst [vmem:[#allocation200_spill] sm:$0xff] %v8981_v34  ;;  %11950 = vst [vmem:[#allocation201_spill] sm:$0xff] %v8985_v35  ;;  %v8995_v2 = vrot.slane %v1500_v17, %v7799_v6  ;;  %v1295_v57 = vcombine.low %v8968_v46, %v8991_v47  ;;  %v1104_v50 = vrot.slane %v8985_v35, 7 }
  0xfc   : > { %11951 = vst [vmem:[#allocation202_spill] sm:$0xff] %v8991_v47  ;;  %v9005_v45 = vsel %vm7829_vm8, %v943_v53, %v944_v33  ;;  %v9009_v60 = vsel %vm7829_vm8, %v946_v27, %v947_v30  ;;  %v9013_v26 = vsel %vm7829_vm8, %v1100_v42, %v1101_v13  ;;  %v1103_v17 = vrot.slane %v1101_v13, 2 }
  0xfd   : > { %11952 = vst [vmem:[#allocation203_spill] sm:$0xff] %v8995_v2  ;;  %11953 = vst [vmem:[#allocation204_spill] sm:$0xff] %v9005_v45  ;;  %v1515_v47 = vcombine.low %v8981_v34, %v8995_v2  ;;  %v1296_v46 = vcombine.low %v9005_v45, %v9009_v60  ;;  %v9020_v35 = vrot.slane %v1295_v57, %v7799_v6  ;;  %v949_v42 = vrot.slane %v947_v30, 2 }
  0xfe   : > { %11954 = vst [vmem:[#allocation205_spill] sm:$0xff] %v9009_v60  ;;  %11955 = vst [vmem:[#allocation206_spill] sm:$0xff] %v9013_v26  ;;  %v9024_v53 = vcombine.high %v9001_v31, %v9001_v31  ;;  %v9028_v33 = vsel %vm7829_vm8, %v1103_v17, %v1104_v50  ;;  %v9032_v13 = vcombine.high %v8947_v18, %v8947_v18  ;;  %v6065_v27 = vrot.slane %v9001_v31, 9 }
  0xff   : > { %11956 = vst [vmem:[#allocation207_spill] sm:$0xff] %v9020_v35  ;;  %11958 = vst [vmem:[#allocation209_spill] sm:$0xff] %v9028_v33  ;;  %6636 = vmatmul.mubr.msk.f32.gmra.mrb[20].mxu1 %vm1524_vm9, %v1515_v47  ;;  %v9037_v57 = vrot.slane %v1296_v46, %v7799_v6  ;;  %v1516_v2 = vcombine.low %v9013_v26, %v9028_v33  ;;  %v957_v50 = vrot.slane %v7835_v25, 7 }
 0x100   : > { %11957 = vst [vmem:[#allocation208_spill] sm:$0xff] %v9024_v53  ;;  %11959 = vst [vmem:[#allocation210_spill] sm:$0xff] %v9032_v13  ;;  %v954_v34 = vrot.slane %v9024_v53, 7  ;;  %6638 = vmatprep.mubr.msk.f32.mxu1 %vm7574_vm0, %v11795_v0  ;;  %v950_v17 = vrot.slane %v9032_v13, 7  ;;  %v1769_v30 = vcombine.low %v7806_v11, %v7822_v20  ;;  %v1770_v47 = vcombine.low %v7818_v19, %v7846_v28 }
 0x101   : > { %11960 = vst [vmem:[#allocation211_spill] sm:$0xff] %v9037_v57  ;;  %v1786_v46 = vcombine.low %v7812_v15, %v7891_v55  ;;  %v1311_v33 = vcombine.low %v9020_v35, %v9037_v57  ;;  %v9055_v26 = vrot.slane %v1516_v2, %v7799_v6  ;;  %v959_v45 = vrot.slane %v957_v50, 2 }
 0x102   : > { %v9059_v60 = vsel %vm7829_vm8, %v6065_v27, %v954_v34  ;;  %v956_v13 = vrot.slane %v954_v34, 2  ;;  %v9063_v11 = vsel %vm7829_vm8, %v949_v42, %v950_v17  ;;  %v1777_v54 = vrot.slane %v1769_v30, %v7799_v6 }
 0x103   : > { %11961 = vst [vmem:[#allocation212_spill] sm:$0xff] %v9055_v26  ;;  %11962 = vst [vmem:[#allocation213_spill] sm:$0xff] %v9059_v60  ;;  %v1784_v53 = vrot.slane %v1770_v47, %v7799_v6  ;;  %6600 = vmatmul.mubr.msk.f32.gmra.mrb[22].mxu0 %vm1524_vm9, %v1311_v33  ;;  %6639 = vmatmul.mubr.msk.f32.gmra.mrb[22].mxu1 %vm1524_vm9, %v9055_v26  ;;  %v1312_v34 = vcombine.low %v9063_v11, %v9059_v60  ;;  %v11964_v33 = vrot.slane %v7853_v32, 7  ;;  %v3150_v47 = vld [vmem:[#allocation5 + $0xc] sm:$0xf]  ;;  %v12063_v60 = vld [vmem:[#allocation91_spill] sm:$0xff] }
 0x104   : > { %v9072_v2 = vsel %vm7829_vm8, %v956_v13, %v957_v50  ;;  %v1787_v42 = vcombine.low %v7825_v21, %v7895_v56  ;;  %6602 = vmatprep.mubr.msk.f32.mxu0 %vm7574_vm0, %v11795_v0  ;;  %6643 = vmatprep.mubr.msk.f32.mxu1 %vm7574_vm0, %v11795_v0  ;;  %v1794_v50 = vrot.slane %v1786_v46, %v7799_v6 }
 0x105   : > { %11963 = vst [vmem:[#allocation214_spill] sm:$0xff] %v9072_v2  ;;  %v9086_v27 = vsel %vm7829_vm8, %v959_v45, %v11964_v33  ;;  %v1785_v13 = vcombine.low %v1777_v54, %v1784_v53  ;;  %v9092_v30 = vrot.slane %v1312_v34, %v7799_v6  ;;  %v2430_v57 = vcombine.low %v7822_v20, %v7818_v19 }
 0x106   : > { %11965 = vst [vmem:[#allocation215_spill] sm:$0xff] %v9086_v27  ;;  %v1313_v17 = vcombine.low %v9072_v2, %v9086_v27  ;;  %v1801_v26 = vrot.slane %v1787_v42, %v7799_v6  ;;  %v2431_v35 = vcombine.low %v7846_v28, %v7812_v15  ;;  %v1803_v45 = vcombine.low %v7908_v62, %v7977_v44 }
 0x107   : > { %11966 = vst [vmem:[#allocation216_spill] sm:$0xff] %v9092_v30  ;;  %v1804_v54 = vcombine.low %v7990_v10, %v7980_v63  ;;  %v2447_v53 = vcombine.low %v7891_v55, %v7825_v21  ;;  %6644 = vmatmul.mubr.msk.f32.vlgmr.msra.gmra.mrb[24].mxu1 %vm1524_vm9, %v1785_v13  ;;  %v2438_v19 = vrot.slane %v2430_v57, %v7799_v6 }
 0x108   : > { %v9106_v46 = vrot.slane %v1313_v17, %v7799_v6  ;;  %v1802_v34 = vcombine.low %v1794_v50, %v1801_v26  ;;  %v6124_v15 = vcombine.high %v7825_v21, %v7895_v56  ;;  %6796 = vmatpush3.msk.msra.mxu1 %vm1575_vm3, %v3150_v47  ;;  %6646 = vmatprep.mubr.msk.f32.mxu1 %vm7574_vm0, %v11795_v0 }
 0x109   : > { %v2445_v20 = vrot.slane %v2431_v35, %v7799_v6  ;;  %v1811_v28 = vrot.slane %v1803_v45, %v7799_v6  ;;  %v1818_v55 = vrot.slane %v1804_v54, %v7799_v6  ;;  %v2455_v26 = vrot.slane %v2447_v53, %v7799_v6  ;;  %6949 = vmatprep.subr.mxu1 %v11795_v0  ;;  %v3603_v45 = vld [vmem:[#allocation5 + $0x10] sm:$0xf] }
 0x10a   : > { %11967 = vst [vmem:[#allocation217_spill] sm:$0xff] %v9106_v46  ;;  %v1328_v42 = vcombine.low %v9092_v30, %v9106_v46  ;;  %v1820_v57 = vcombine.low %v7999_v12, %v8057_v9  ;;  %v2462_v33 = vrot.slane %v6124_v15, %v7799_v6  ;;  %v1821_v35 = vcombine.low %v8093_v8, %v8120_v3  ;;  %v11988_v30 = vld [vmem:[#allocation155_spill] sm:$0xff] }
 0x10b   : > { %v2446_v21 = vcombine.low %v2438_v19, %v2445_v20  ;;  %v2464_v13 = vcombine.low %v7977_v44, %v7990_v10  ;;  %6647 = vmatmul.mubr.msk.f32.gmra.mrb[26].mxu1 %vm1524_vm9, %v1802_v34  ;;  %v9131_v50 = vcombine.low %v1811_v28, %v1818_v55  ;;  %v2465_v47 = vcombine.low %v7980_v63, %v7999_v12 }
 0x10c   : > { %6603 = vmatmul.mubr.msk.f32.gmra.mrb[24].mxu0 %vm1524_vm9, %v1328_v42  ;;  %v9134_v17 = vrot.slane %v1820_v57, %v7799_v6  ;;  %6649 = vmatprep.mubr.msk.f32.mxu1 %vm7574_vm0, %v11795_v0  ;;  %v9143_v44 = vrot.slane %v1821_v35, %v7799_v6  ;;  %v1837_v53 = vcombine.low %v8096_v41, %v8174_v16 }
 0x10d   : > { %11968 = vst [vmem:[#allocation218_spill] sm:$0xff] %v9131_v50  ;;  %6720 = vmatprep.mubr.msk.f32.mxu0 %vm7574_vm0, %v11795_v0  ;;  %v9146_v10 = vrot.slane %v2464_v13, %v7799_v6  ;;  %v9149_v54 = vrot.slane %v2465_v47, %v7799_v6  ;;  %v1838_v63 = vcombine.low %v8187_v51, %v8206_v58 }
 0x10e   : > { %11969 = vst [vmem:[#allocation219_spill] sm:$0xff] %v9134_v17  ;;  %11970 = vst [vmem:[#allocation220_spill] sm:$0xff] %v9143_v44  ;;  %v2481_v12 = vcombine.low %v8057_v9, %v8100_v37  ;;  %v2463_v34 = vcombine.low %v2455_v26, %v2462_v33  ;;  %v2482_v19 = vcombine.low %v8120_v3, %v8096_v41 }
 0x10f   : > { %v1854_v15 = vcombine.low %v8190_v52, %v8295_v61  ;;  %6650 = vmatmul.mubr.msk.f32.gmra.mrb[28].mxu1 %vm1524_vm9, %v9131_v50  ;;  %v1836_v20 = vcombine.low %v9134_v17, %v9143_v44  ;;  %v9167_v28 = vrot.slane %v1837_v53, %v7799_v6  ;;  %v9170_v37 = vrot.slane %v1838_v63, %v7799_v6  ;;  %v12033_v44 = vld [vmem:[#allocation57_spill] sm:$0xff]  ;;  %v12035_v50 = vld [vmem:[#allocation55_spill] sm:$0xff] }
 0x110   : > { %6721 = vmatmul.mubr.msk.f32.vlgmr.msra.gmra.mrb[26].mxu0 %vm1524_vm9, %v2446_v21  ;;  %v2480_v41 = vcombine.low %v9146_v10, %v9149_v54  ;;  %6652 = vmatprep.mubr.msk.f32.mxu1 %vm7574_vm0, %v11795_v0  ;;  %v2489_v55 = vrot.slane %v2481_v12, %v7799_v6  ;;  %v9183_v42 = vrot.slane %v2482_v19, %v7799_v6 }
 0x111   : > { %11971 = vst [vmem:[#allocation221_spill] sm:$0xff] %v9167_v28  ;;  %11972 = vst [vmem:[#allocation222_spill] sm:$0xff] %v9170_v37  ;;  %6873 = vmatpush3.msk.msra.mxu0 %vm1575_vm3, %v3603_v45  ;;  %6723 = vmatprep.mubr.msk.f32.mxu0 %vm7574_vm0, %v11795_v0  ;;  %v1855_v26 = vcombine.low %v8316_v4, %v8310_v48  ;;  %v9189_v57 = vcombine.low %v9167_v28, %v9170_v37 }
 0x112   : > { %v9192_v21 = vrot.slane %v1854_v15, %v7799_v6  ;;  %v2498_v33 = vcombine.low %v8174_v16, %v8187_v51  ;;  %v2499_v35 = vcombine.low %v8206_v58, %v8190_v52  ;;  %7026 = vmatprep.subr.mxu0 %v11795_v0  ;;  %v1871_v47 = vcombine.low %v8329_v1, %v8399_v14 }
 0x113   : > { %11973 = vst [vmem:[#allocation223_spill] sm:$0xff] %v9189_v57  ;;  %6653 = vmatmul.mubr.msk.f32.gmra.mrb[30].mxu1 %vm1524_vm9, %v1836_v20  ;;  %v9202_v13 = vrot.slane %v1855_v26, %v7799_v6  ;;  %v1872_v45 = vcombine.low %v8424_v40, %v8406_v22  ;;  %v2497_v51 = vcombine.low %v2489_v55, %v9183_v42 }
 0x114   : > { %11974 = vst [vmem:[#allocation224_spill] sm:$0xff] %v9192_v21  ;;  %6724 = vmatmul.mubr.msk.f32.gmra.mrb[28].mxu0 %vm1524_vm9, %v2463_v34  ;;  %6655 = vmatprep.mubr.msk.f32.mxu1 %vm7574_vm0, %v11795_v0  ;;  %v6125_v16 = vcombine.high %v8190_v52, %v8295_v61  ;;  %v2516_v58 = vcombine.low %v8310_v48, %v8329_v1  ;;  %v12034_v52 = vld [vmem:[#allocation45_spill] sm:$0xff] }
 0x115   : > { %11975 = vst [vmem:[#allocation225_spill] sm:$0xff] %v9202_v13  ;;  %6726 = vmatprep.mubr.msk.f32.mxu0 %vm7574_vm0, %v11795_v0  ;;  %v9218_v53 = vrot.slane %v2498_v33, %v7799_v6  ;;  %v9221_v63 = vrot.slane %v2499_v35, %v7799_v6  ;;  %v1888_v12 = vcombine.low %v8510_v24, %v8536_v29  ;;  %v11982_v35 = vld [vmem:[#allocation118_spill] sm:$0xff] }
 0x116   : > { %v1889_v34 = vcombine.low %v8513_v36, %v8540_v7  ;;  %v1870_v48 = vcombine.low %v9192_v21, %v9202_v13  ;;  %v9233_v1 = vrot.slane %v1871_v47, %v7799_v6  ;;  %v9236_v19 = vrot.slane %v1872_v45, %v7799_v6  ;;  %v12013_v13 = vld [vmem:[#allocation18_spill] sm:$0xff] }
 0x117   : > { %11976 = vst [vmem:[#allocation226_spill] sm:$0xff] %v9221_v63  ;;  %6656 = vmatmul.mubr.msk.f32.gmra.mrb[32].mxu1 %vm1524_vm9, %v9189_v57  ;;  %v9243_v15 = vrot.slane %v6125_v16, %v7799_v6  ;;  %v9246_v20 = vrot.slane %v2516_v58, %v7799_v6  ;;  %v2533_v55 = vcombine.low %v8406_v22, %v8428_v38  ;;  %v11985_v38 = vld [vmem:[#allocation120_spill] sm:$0xff]  ;;  %v12023_v57 = vld [vmem:[#allocation29_spill] sm:$0xff] }
 0x118   : > { %6727 = vmatmul.mubr.msk.f32.gmra.mrb[30].mxu0 %vm1524_vm9, %v2480_v41  ;;  %11977 = vst [vmem:[#allocation227_spill] sm:$0xff] %v9233_v1  ;;  %11978 = vst [vmem:[#allocation228_spill] sm:$0xff] %v9236_v19  ;;  %6658 = vmatprep.mubr.msk.f32.mxu1 %vm7574_vm0, %v11795_v0  ;;  %v2532_v41 = vcombine.low %v8399_v14, %v8424_v40  ;;  %v9253_v26 = vrot.slane %v1888_v12, %v7799_v6  ;;  %v11984_v40 = vld [vmem:[#allocation132_spill] sm:$0xff] }
 0x119   : > { %6729 = vmatprep.mubr.msk.f32.mxu0 %vm7574_vm0, %v11795_v0  ;;  %11979 = vst [vmem:[#allocation229_spill] sm:$0xff] %v9243_v15  ;;  %v9256_v33 = vrot.slane %v1889_v34, %v7799_v6  ;;  %v1905_v47 = vcombine.low %v11982_v35, %v8592_v49  ;;  %v2514_v45 = vcombine.low %v9218_v53, %v9221_v63 }
 0x11a   : > { %11980 = vst [vmem:[#allocation230_spill] sm:$0xff] %v9253_v26  ;;  %v9266_v14 = vcombine.low %v9233_v1, %v9236_v19  ;;  %v1906_v16 = vcombine.low %v11985_v38, %v11984_v40  ;;  %v9277_v58 = vrot.slane %v2532_v41, %v7799_v6  ;;  %v9280_v12 = vrot.slane %v2533_v55, %v7799_v6  ;;  %v11996_v1 = vld [vmem:[#allocation179_spill] sm:$0xff] }
 0x11b   : > { %11981 = vst [vmem:[#allocation231_spill] sm:$0xff] %v9256_v33  ;;  %6659 = vmatmul.mubr.msk.f32.gmra.mrb[34].mxu1 %vm1524_vm9, %v1870_v48  ;;  %v2549_v34 = vcombine.low %v8536_v29, %v8513_v36  ;;  %v1904_v48 = vcombine.low %v9253_v26, %v9256_v33  ;;  %v9287_v3 = vrot.slane %v1905_v47, %v7799_v6  ;;  %v11991_v36 = vld [vmem:[#allocation153_spill] sm:$0xff]  ;;  %v11992_v29 = vld [vmem:[#allocation159_spill] sm:$0xff] }
 0x11c   : > { %6730 = vmatmul.mubr.msk.f32.gmra.mrb[32].mxu0 %vm1524_vm9, %v2497_v51  ;;  %11983 = vst [vmem:[#allocation118_spill] sm:$0xff] %v9266_v14  ;;  %6661 = vmatprep.mubr.msk.f32.mxu1 %vm7574_vm0, %v11795_v0  ;;  %v2531_v51 = vcombine.low %v9243_v15, %v9246_v20  ;;  %11986 = vst [vmem:[#allocation132_spill] sm:$0xff] %v9280_v12  ;;  %v2550_v46 = vcombine.low %v8540_v7, %v11982_v35  ;;  %v11989_v15 = vld [vmem:[#allocation137_spill] sm:$0xff] }
 0x11d   : > { %6732 = vmatprep.mubr.msk.f32.mxu0 %vm7574_vm0, %v11795_v0  ;;  %11987 = vst [vmem:[#allocation232_spill] sm:$0xff] %v9287_v3  ;;  %v1922_v19 = vcombine.low %v11989_v15, %v11988_v30  ;;  %v9297_v41 = vrot.slane %v1906_v16, %v7799_v6  ;;  %v1923_v55 = vcombine.low %v11992_v29, %v11991_v36 }
 0x11e   : > { %v2583_v47 = vcombine.low %v11988_v30, %v11992_v29  ;;  %v2548_v7 = vcombine.low %v9277_v58, %v9280_v12  ;;  %v9310_v35 = vrot.slane %v2549_v34, %v7799_v6  ;;  %v6126_v16 = vcombine.high %v11985_v38, %v11984_v40  ;;  %v11994_v29 = vld [vmem:[#allocation157_spill] sm:$0xff] }
 0x11f   : > { %6662 = vmatmul.mubr.msk.f32.gmra.mrb[36].mxu1 %vm1524_vm9, %v9266_v14  ;;  %11990 = vst [vmem:[#allocation155_spill] sm:$0xff] %v9297_v41  ;;  %v9317_v30 = vrot.slane %v2550_v46, %v7799_v6  ;;  %v1939_v33 = vcombine.low %v11994_v29, %v8738_v59  ;;  %v11995_v14 = vld [vmem:[#allocation174_spill] sm:$0xff]  ;;  %v2601_v12 = vcombine.low %v8863_v43, %v11996_v1 }
 0x120   : > { %6733 = vmatmul.mubr.msk.f32.gmra.mrb[34].mxu0 %vm1524_vm9, %v2514_v45  ;;  %6664 = vmatprep.mubr.msk.f32.mxu1 %vm7574_vm0, %v11795_v0  ;;  %11993 = vst [vmem:[#allocation137_spill] sm:$0xff] %v9310_v35  ;;  %v2566_v45 = vcombine.low %v8592_v49, %v11985_v38  ;;  %v1940_v26 = vcombine.low %v11995_v14, %v8863_v43  ;;  %v12012_v38 = vld [vmem:[#allocation17_spill] sm:$0xff] }
 0x121   : > { %6735 = vmatprep.mubr.msk.f32.mxu0 %vm7574_vm0, %v11795_v0  ;;  %v1921_v49 = vcombine.low %v9287_v3, %v9297_v41  ;;  %v9330_v34 = vrot.slane %v1922_v19, %v7799_v6  ;;  %v9333_v46 = vrot.slane %v1923_v55, %v7799_v6  ;;  %v2584_v55 = vcombine.low %v11991_v36, %v11994_v29  ;;  %v12002_v41 = vld [vmem:[#allocation191_spill] sm:$0xff] }
 0x122   : > { %v9340_v43 = vrot.slane %v2566_v45, %v7799_v6  ;;  %v9349_v19 = vrot.slane %v1940_v26, %v7799_v6  ;;  %v1956_v3 = vcombine.low %v11996_v1, %v12002_v41  ;;  %v2565_v45 = vcombine.low %v9310_v35, %v9317_v30 }
 0x123   : > { %6665 = vmatmul.mubr.msk.f32.gmra.mrb[38].mxu1 %vm1524_vm9, %v1904_v48  ;;  %11997 = vst [vmem:[#allocation153_spill] sm:$0xff] %v9330_v34  ;;  %11998 = vst [vmem:[#allocation159_spill] sm:$0xff] %v9333_v46  ;;  %v9346_v48 = vrot.slane %v1939_v33, %v7799_v6  ;;  %v9361_v33 = vcombine.low %v9330_v34, %v9333_v46  ;;  %v1957_v26 = vcombine.low %v8941_v39, %v8960_v5 }
 0x124   : > { %6736 = vmatmul.mubr.msk.f32.gmra.mrb[36].mxu0 %vm1524_vm9, %v2531_v51  ;;  %6667 = vmatprep.mubr.msk.f32.mxu1 %vm7574_vm0, %v11795_v0  ;;  %v9343_v51 = vrot.slane %v6126_v16, %v7799_v6  ;;  %12001 = vst [vmem:[#allocation179_spill] sm:$0xff] %v9349_v19  ;;  %v9372_v36 = vrot.slane %v2583_v47, %v7799_v6 }
 0x125   : > { %6738 = vmatprep.mubr.msk.f32.mxu0 %vm7574_vm0, %v11795_v0  ;;  %12000 = vst [vmem:[#allocation174_spill] sm:$0xff] %v9346_v48  ;;  %12003 = vst [vmem:[#allocation191_spill] sm:$0xff] %v9361_v33  ;;  %v9377_v16 = vrot.slane %v2584_v55, %v7799_v6  ;;  %v9380_v29 = vrot.slane %v1956_v3, %v7799_v6  ;;  %v9388_v47 = vrot.slane %v1957_v26, %v7799_v6  ;;  %v12009_v55 = vld [vmem:[#allocation208_spill] sm:$0xff]  ;;  %v12010_v26 = vld [vmem:[#allocation15_spill] sm:$0xff] }
 0x126   : > { %11999 = vst [vmem:[#allocation157_spill] sm:$0xff] %v9343_v51  ;;  %v2582_v1 = vcombine.low %v9340_v43, %v9343_v51  ;;  %12004 = vst [vmem:[#allocation233_spill] sm:$0xff] %v9372_v36  ;;  %v1973_v51 = vcombine.low %v8947_v18, %v9001_v31  ;;  %v2617_v3 = vcombine.low %v12002_v41, %v8941_v39 }
 0x127   : > { %6668 = vmatmul.mubr.msk.f32.gmra.mrb[40].mxu1 %vm1524_vm9, %v1921_v49  ;;  %12005 = vst [vmem:[#allocation234_spill] sm:$0xff] %v9377_v16  ;;  %12006 = vst [vmem:[#allocation235_spill] sm:$0xff] %v9380_v29  ;;  %v12007_v49 = vld [vmem:[#allocation175_spill] sm:$0xff]  ;;  %v9410_v34 = vrot.slane %v2601_v12, %v7799_v6  ;;  %v1991_v37 = vcombine.low %v12013_v13, %v12012_v38  ;;  %v9418_v39 = vcombine.low %v9380_v29, %v9388_v47 }
 0x128   : > { %6739 = vmatmul.mubr.msk.f32.gmra.mrb[38].mxu0 %vm1524_vm9, %v2548_v7  ;;  %6670 = vmatprep.mubr.msk.f32.mxu1 %vm7574_vm0, %v11795_v0  ;;  %v1955_v7 = vcombine.low %v9346_v48, %v9349_v19  ;;  %v2600_v46 = vcombine.low %v8738_v59, %v12007_v49  ;;  %12008 = vst [vmem:[#allocation175_spill] sm:$0xff] %v9388_v47  ;;  %v12020_v47 = vld [vmem:[#allocation30_spill] sm:$0xff]  ;;  %v12021_v29 = vld [vmem:[#allocation27_spill] sm:$0xff] }
 0x129   : > { %6741 = vmatprep.mubr.msk.f32.mxu0 %vm7574_vm0, %v11795_v0  ;;  %v1974_v19 = vcombine.low %v12009_v55, %v7835_v25  ;;  %v1990_v49 = vcombine.low %v7853_v32, %v12010_v26  ;;  %12014 = vst [vmem:[#allocation15_spill] sm:$0xff] %v9418_v39  ;;  %v9431_v12 = vrot.slane %v2617_v3, %v7799_v6  ;;  %v12022_v3 = vld [vmem:[#allocation32_spill] sm:$0xff] }
 0x12a   : > { %v9407_v48 = vrot.slane %v2600_v46, %v7799_v6  ;;  %v2007_v21 = vcombine.low %v12021_v29, %v12020_v47  ;;  %v2008_v28 = vcombine.low %v12023_v57, %v12022_v3  ;;  %v2041_v17 = vcombine.low %v12034_v52, %v12033_v44 }
 0x12b   : > { %6671 = vmatmul.mubr.msk.f32.gmra.mrb[42].mxu1 %vm1524_vm9, %v9361_v33  ;;  %v2599_v33 = vcombine.low %v9372_v36, %v9377_v16  ;;  %v9424_v41 = vrot.slane %v1974_v19, %v7799_v6  ;;  %v9442_v19 = vrot.slane %v1991_v37, %v7799_v6  ;;  %v2042_v27 = vcombine.low %v12036_v23, %v12035_v50 }
 0x12c   : > { %6742 = vmatmul.mubr.msk.f32.gmra.mrb[40].mxu0 %vm1524_vm9, %v2565_v45  ;;  %6673 = vmatprep.mubr.msk.f32.mxu1 %vm7574_vm0, %v11795_v0  ;;  %v2618_v45 = vcombine.low %v8960_v5, %v8947_v18  ;;  %12011 = vst [vmem:[#allocation208_spill] sm:$0xff] %v9407_v48  ;;  %v9421_v5 = vrot.slane %v1973_v51, %v7799_v6 }
 0x12d   : > { %6744 = vmatprep.mubr.msk.f32.mxu0 %vm7574_vm0, %v11795_v0  ;;  %12016 = vst [vmem:[#allocation236_spill] sm:$0xff] %v9424_v41  ;;  %v6127_v51 = vcombine.high %v8947_v18, %v9001_v31  ;;  %12019 = vst [vmem:[#allocation239_spill] sm:$0xff] %v9442_v19  ;;  %v12032_v18 = vld [vmem:[#allocation31_spill] sm:$0xff] }
 0x12e   : > { %12015 = vst [vmem:[#allocation18_spill] sm:$0xff] %v9421_v5  ;;  %v9434_v46 = vrot.slane %v2618_v45, %v7799_v6  ;;  %v2616_v45 = vcombine.low %v9407_v48, %v9410_v34  ;;  %v1989_v37 = vcombine.low %v9421_v5, %v9424_v41  ;;  %v9476_v41 = vrot.slane %v2007_v21, %v7799_v6  ;;  %v12030_v5 = vld [vmem:[#allocation28_spill] sm:$0xff] }
 0x12f   : > { %6674 = vmatmul.mubr.msk.f32.gmra.mrb[44].mxu1 %vm1524_vm9, %v1955_v7  ;;  %v2635_v7 = vcombine.low %v7835_v25, %v7853_v32  ;;  %v9464_v32 = vrot.slane %v6127_v51, %v7799_v6  ;;  %v12028_v51 = vld [vmem:[#allocation19_spill] sm:$0xff]  ;;  %v2668_v21 = vcombine.low %v12020_v47, %v12023_v57 }
 0x130   : > { %6745 = vmatmul.mubr.msk.f32.gmra.mrb[42].mxu0 %vm1524_vm9, %v2582_v1  ;;  %6676 = vmatprep.mubr.msk.f32.mxu1 %vm7574_vm0, %v11795_v0  ;;  %12017 = vst [vmem:[#allocation237_spill] sm:$0xff] %v9434_v46  ;;  %v9437_v1 = vrot.slane %v1990_v49, %v7799_v6  ;;  %v2633_v25 = vcombine.low %v9431_v12, %v9434_v46  ;;  %12026 = vst [vmem:[#allocation29_spill] sm:$0xff] %v9476_v41  ;;  %v12062_v46 = vld [vmem:[#allocation102_spill] sm:$0xff] }
 0x131   : > { %6747 = vmatprep.mubr.msk.f32.mxu0 %vm7574_vm0, %v11795_v0  ;;  %12024 = vst [vmem:[#allocation30_spill] sm:$0xff] %v9464_v32  ;;  %v9473_v48 = vrot.slane %v2635_v7, %v7799_v6  ;;  %v2092_v2 = vcombine.low %v12063_v60, %v12062_v46 }
 0x132   : > { %12018 = vst [vmem:[#allocation238_spill] sm:$0xff] %v9437_v1  ;;  %v9470_v49 = vcombine.low %v9437_v1, %v9442_v19  ;;  %v12031_v1 = vld [vmem:[#allocation41_spill] sm:$0xff] }
 0x133   : > { %6677 = vmatmul.mubr.msk.f32.gmra.mrb[46].mxu1 %vm1524_vm9, %v9418_v39  ;;  %v9479_v39 = vrot.slane %v2008_v28, %v7799_v6  ;;  %v2025_v7 = vcombine.low %v12032_v18, %v12031_v1 }
 0x134   : > { %6748 = vmatmul.mubr.msk.f32.gmra.mrb[44].mxu0 %vm1524_vm9, %v2599_v33  ;;  %6679 = vmatprep.mubr.msk.f32.mxu1 %vm7574_vm0, %v11795_v0  ;;  %v2651_v33 = vcombine.low %v12010_v26, %v12013_v13  ;;  %12025 = vst [vmem:[#allocation32_spill] sm:$0xff] %v9470_v49  ;;  %v2652_v13 = vcombine.low %v12012_v38, %v12028_v51  ;;  %v12029_v26 = vld [vmem:[#allocation36_spill] sm:$0xff] }
 0x135   : > { %6750 = vmatprep.mubr.msk.f32.mxu0 %vm7574_vm0, %v11795_v0  ;;  %12027 = vst [vmem:[#allocation240_spill] sm:$0xff] %v9479_v39  ;;  %v2024_v19 = vcombine.low %v12030_v5, %v12029_v26  ;;  %v2023_v51 = vcombine.low %v9476_v41, %v9479_v39  ;;  %v12044_v39 = vld [vmem:[#allocation59_spill] sm:$0xff]  ;;  %v12046_v41 = vld [vmem:[#allocation69_spill] sm:$0xff] }
 0x136   : > { %v9494_v28 = vrot.slane %v2651_v33, %v7799_v6  ;;  %v9512_v57 = vrot.slane %v2652_v13, %v7799_v6  ;;  %v2685_v33 = vcombine.low %v12029_v26, %v12032_v18  ;;  %v9535_v13 = vrot.slane %v2041_v17, %v7799_v6 }
 0x137   : > { %6680 = vmatmul.mubr.msk.f32.gmra.mrb[48].mxu1 %vm1524_vm9, %v1989_v37  ;;  %v2650_v37 = vcombine.low %v9464_v32, %v9473_v48  ;;  %v9515_v47 = vrot.slane %v2024_v19, %v7799_v6  ;;  %v6128_v19 = vcombine.high %v12032_v18, %v12031_v1  ;;  %v12043_v32 = vld [vmem:[#allocation58_spill] sm:$0xff]  ;;  %v12059_v1 = vld [vmem:[#allocation40_spill] sm:$0xff] }
 0x138   : > { %6751 = vmatmul.mubr.msk.f32.gmra.mrb[46].mxu0 %vm1524_vm9, %v2616_v45  ;;  %6682 = vmatprep.mubr.msk.f32.mxu1 %vm7574_vm0, %v11795_v0  ;;  %v2669_v45 = vcombine.low %v12022_v3, %v12030_v5  ;;  %12037 = vst [vmem:[#allocation19_spill] sm:$0xff] %v9512_v57  ;;  %v9518_v5 = vrot.slane %v2025_v7, %v7799_v6  ;;  %12041 = vst [vmem:[#allocation55_spill] sm:$0xff] %v9535_v13  ;;  %v12052_v18 = vld [vmem:[#allocation74_spill] sm:$0xff] }
 0x139   : > { %6753 = vmatprep.mubr.msk.f32.mxu0 %vm7574_vm0, %v11795_v0  ;;  %12038 = vst [vmem:[#allocation36_spill] sm:$0xff] %v9515_v47  ;;  %v9525_v3 = vrot.slane %v2668_v21, %v7799_v6  ;;  %v9538_v7 = vrot.slane %v2042_v27, %v7799_v6  ;;  %v12045_v21 = vld [vmem:[#allocation76_spill] sm:$0xff]  ;;  %v2667_v26 = vcombine.low %v9494_v28, %v9512_v57 }
 0x13a   : > { %12039 = vst [vmem:[#allocation28_spill] sm:$0xff] %v9518_v5  ;;  %v2059_v52 = vcombine.low %v12046_v41, %v12045_v21  ;;  %v2040_v17 = vcombine.low %v9515_v47, %v9518_v5  ;;  %v2702_v47 = vcombine.low %v12033_v44, %v12036_v23  ;;  %v12054_v41 = vld [vmem:[#allocation88_spill] sm:$0xff]  ;;  %v2720_v44 = vcombine.low %v12045_v21, %v12052_v18 }
 0x13b   : > { %6683 = vmatmul.mubr.msk.f32.gmra.mrb[50].mxu1 %vm1524_vm9, %v9470_v49  ;;  %12040 = vst [vmem:[#allocation57_spill] sm:$0xff] %v9525_v3  ;;  %12042 = vst [vmem:[#allocation61_spill] sm:$0xff] %v9538_v7  ;;  %v2058_v49 = vcombine.low %v12044_v39, %v12043_v32  ;;  %v12055_v23 = vld [vmem:[#allocation72_spill] sm:$0xff] }
 0x13c   : > { %6754 = vmatmul.mubr.msk.f32.gmra.mrb[48].mxu0 %vm1524_vm9, %v2633_v25  ;;  %6685 = vmatprep.mubr.msk.f32.mxu1 %vm7574_vm0, %v11795_v0  ;;  %v9528_v25 = vrot.slane %v2669_v45, %v7799_v6  ;;  %v9557_v45 = vrot.slane %v2685_v33, %v7799_v6  ;;  %v9570_v5 = vrot.slane %v2059_v52, %v7799_v6 }
 0x13d   : > { %6756 = vmatprep.mubr.msk.f32.mxu0 %vm7574_vm0, %v11795_v0  ;;  %v9567_v57 = vrot.slane %v2058_v49, %v7799_v6  ;;  %v2703_v33 = vcombine.low %v12035_v50, %v12044_v39  ;;  %v2719_v52 = vcombine.low %v12043_v32, %v12055_v23  ;;  %v12056_v50 = vld [vmem:[#allocation26_spill] sm:$0xff]  ;;  %v9609_v21 = vrot.slane %v2702_v47, %v7799_v6 }
 0x13e   : > { %v2684_v27 = vcombine.low %v9525_v3, %v9528_v25  ;;  %12050 = vst [vmem:[#allocation242_spill] sm:$0xff] %v9570_v5  ;;  %v12057_v39 = vld [vmem:[#allocation38_spill] sm:$0xff]  ;;  %v12060_v3 = vld [vmem:[#allocation43_spill] sm:$0xff] }
 0x13f   : > { %6686 = vmatmul.mubr.msk.f32.gmra.mrb[52].mxu1 %vm1524_vm9, %v2023_v51  ;;  %v9564_v51 = vcombine.low %v9535_v13, %v9538_v7  ;;  %12049 = vst [vmem:[#allocation241_spill] sm:$0xff] %v9567_v57  ;;  %v12053_v13 = vld [vmem:[#allocation92_spill] sm:$0xff]  ;;  %v12061_v38 = vcombine.low %v12059_v1, %v12060_v3  ;;  %v9630_v47 = vrot.slane %v2719_v52, %v7799_v6 }
 0x140   : > { %6757 = vmatmul.mubr.msk.f32.gmra.mrb[50].mxu0 %vm1524_vm9, %v2650_v37  ;;  %6688 = vmatprep.mubr.msk.f32.mxu1 %vm7574_vm0, %v11795_v0  ;;  %v9560_v37 = vrot.slane %v6128_v19, %v7799_v6  ;;  %v12051_v19 = vld [vmem:[#allocation87_spill] sm:$0xff]  ;;  %v2076_v49 = vcombine.low %v12054_v41, %v12053_v13  ;;  %v12075_v52 = vld [vmem:[#allocation124_spill] sm:$0xff] }
 0x141   : > { %6759 = vmatprep.mubr.msk.f32.mxu0 %vm7574_vm0, %v11795_v0  ;;  %12048 = vst [vmem:[#allocation76_spill] sm:$0xff] %v9564_v51  ;;  %v2075_v7 = vcombine.low %v12052_v18, %v12051_v19  ;;  %v9600_v29 = vrot.slane %v12061_v38, %v7799_v6  ;;  %v2074_v18 = vcombine.low %v9567_v57, %v9570_v5  ;;  %12064 = vst [vmem:[#allocation87_spill] sm:$0xff] %v9609_v21  ;;  %v12073_v5 = vld [vmem:[#allocation107_spill] sm:$0xff] }
 0x142   : > { %12047 = vst [vmem:[#allocation59_spill] sm:$0xff] %v9560_v37  ;;  %v2701_v23 = vcombine.low %v9557_v45, %v9560_v37  ;;  %v9617_v38 = vrot.slane %v2703_v33, %v7799_v6  ;;  %v9623_v3 = vrot.slane %v2076_v49, %v7799_v6  ;;  %12070 = vst [vmem:[#allocation72_spill] sm:$0xff] %v9630_v47  ;;  %v12072_v37 = vld [vmem:[#allocation122_spill] sm:$0xff] }
 0x143   : > { %6689 = vmatmul.mubr.msk.f32.gmra.mrb[54].mxu1 %vm1524_vm9, %v2040_v17  ;;  %v9620_v1 = vrot.slane %v2075_v7, %v7799_v6  ;;  %v9636_v33 = vrot.slane %v2092_v2, %v7799_v6  ;;  %v2736_v7 = vcombine.low %v12051_v19, %v12054_v41  ;;  %v2737_v49 = vcombine.low %v12053_v13, %v12063_v60 }
 0x144   : > { %6760 = vmatmul.mubr.msk.f32.gmra.mrb[52].mxu0 %vm1524_vm9, %v2667_v26  ;;  %6691 = vmatprep.mubr.msk.f32.mxu1 %vm7574_vm0, %v11795_v0  ;;  %v12058_v26 = vcombine.low %v12056_v50, %v12057_v39  ;;  %v12065_v50 = vld [vmem:[#allocation103_spill] sm:$0xff]  ;;  %v12066_v39 = vld [vmem:[#allocation106_spill] sm:$0xff]  ;;  %12067 = vst [vmem:[#allocation74_spill] sm:$0xff] %v9617_v38  ;;  %12069 = vst [vmem:[#allocation88_spill] sm:$0xff] %v9623_v3  ;;  %v9653_v2 = vcombine.low %v9183_v42, %v9218_v53 }
 0x145   : > { %6762 = vmatprep.mubr.msk.f32.mxu0 %vm7574_vm0, %v11795_v0  ;;  %12068 = vst [vmem:[#allocation92_spill] sm:$0xff] %v9620_v1  ;;  %12071 = vst [vmem:[#allocation26_spill] sm:$0xff] %v9636_v33  ;;  %v2718_v41 = vcombine.low %v9609_v21, %v9617_v38  ;;  %v9661_v13 = vcombine.low %v9620_v1, %v9623_v3  ;;  %v9668_v42 = vrot.slane %v2736_v7, %v7799_v6  ;;  %v12085_v3 = vld [vmem:[#allocation151_spill] sm:$0xff]  ;;  %v12093_v38 = vld [vmem:[#allocation149_spill] sm:$0xff] }
 0x146   : > { %v9594_v17 = vrot.slane %v12058_v26, %v7799_v6  ;;  %v2093_v26 = vcombine.low %v12066_v39, %v12065_v50  ;;  %v12076_v39 = vld [vmem:[#allocation126_spill] sm:$0xff]  ;;  %12077 = vst [vmem:[#allocation40_spill] sm:$0xff] %v9653_v2  ;;  %v9671_v53 = vrot.slane %v2737_v49, %v7799_v6  ;;  %v6129_v19 = vcombine.high %v12063_v60, %v12062_v46  ;;  %v12084_v49 = vld [vmem:[#allocation141_spill] sm:$0xff]  ;;  %v12086_v1 = vld [vmem:[#allocation147_spill] sm:$0xff] }
 0x147   : > { %6692 = vmatmul.mubr.msk.f32.gmra.mrb[56].mxu1 %vm1524_vm9, %v9564_v51  ;;  %v2109_v51 = vcombine.low %v12073_v5, %v12072_v37  ;;  %v2110_v32 = vcombine.low %v12076_v39, %v12075_v52  ;;  %12078 = vst [vmem:[#allocation43_spill] sm:$0xff] %v9661_v13  ;;  %v12091_v60 = vld [vmem:[#allocation144_spill] sm:$0xff] }
 0x148   : > { %6763 = vmatmul.mubr.msk.f32.gmra.mrb[54].mxu0 %vm1524_vm9, %v2684_v27  ;;  %6694 = vmatprep.mubr.msk.f32.mxu1 %vm7574_vm0, %v11795_v0  ;;  %v9633_v27 = vrot.slane %v2720_v44, %v7799_v6  ;;  %v9645_v57 = vrot.slane %v2093_v26, %v7799_v6  ;;  %12079 = vst [vmem:[#allocation103_spill] sm:$0xff] %v9671_v53  ;;  %v12092_v46 = vld [vmem:[#allocation164_spill] sm:$0xff] }
 0x149   : > { %6765 = vmatprep.mubr.msk.f32.mxu0 %vm7574_vm0, %v11795_v0  ;;  %v9684_v44 = vrot.slane %v2109_v51, %v7799_v6  ;;  %v9687_v7 = vrot.slane %v2110_v32, %v7799_v6  ;;  %v2752_v32 = vcombine.low %v9668_v42, %v9671_v53  ;;  %v9705_v51 = vrot.slane %v6129_v19, %v7799_v6 }
 0x14a   : > { %12074 = vst [vmem:[#allocation38_spill] sm:$0xff] %v9645_v57  ;;  %v2108_v26 = vcombine.low %v9636_v33, %v9645_v57  ;;  %v2127_v57 = vcombine.low %v12086_v1, %v12085_v3  ;;  %v12090_v33 = vld [vmem:[#allocation163_spill] sm:$0xff]  ;;  %v2144_v21 = vcombine.low %v12093_v38, %v12092_v46  ;;  %v9721_v19 = vcombine.low %v9317_v30, %v9340_v43 }
 0x14b   : > { %6695 = vmatmul.mubr.msk.f32.gmra.mrb[58].mxu1 %vm1524_vm9, %v2074_v18  ;;  %v2735_v18 = vcombine.low %v9630_v47, %v9633_v27  ;;  %12081 = vst [vmem:[#allocation107_spill] sm:$0xff] %v9684_v44  ;;  %12082 = vst [vmem:[#allocation124_spill] sm:$0xff] %v9687_v7 }
 0x14c   : > { %6766 = vmatmul.mubr.msk.f32.gmra.mrb[56].mxu0 %vm1524_vm9, %v2701_v23  ;;  %6697 = vmatprep.mubr.msk.f32.mxu1 %vm7574_vm0, %v11795_v0  ;;  %v9677_v23 = vcombine.low %v9246_v20, %v9277_v58  ;;  %v2754_v20 = vcombine.low %v12065_v50, %v12073_v5  ;;  %v12083_v58 = vld [vmem:[#allocation148_spill] sm:$0xff]  ;;  %12087 = vst [vmem:[#allocation126_spill] sm:$0xff] %v9705_v51  ;;  %12094 = vst [vmem:[#allocation151_spill] sm:$0xff] %v9721_v19 }
 0x14d   : > { %6768 = vmatprep.mubr.msk.f32.mxu0 %vm7574_vm0, %v11795_v0  ;;  %v2126_v47 = vcombine.low %v12084_v49, %v12083_v58  ;;  %v2770_v5 = vcombine.low %v12072_v37, %v12076_v39  ;;  %v12088_v50 = vld [vmem:[#allocation128_spill] sm:$0xff]  ;;  %v2143_v49 = vcombine.low %v12091_v60, %v12090_v33 }
 0x14e   : > { %12080 = vst [vmem:[#allocation122_spill] sm:$0xff] %v9677_v23  ;;  %v9726_v37 = vrot.slane %v2754_v20, %v7799_v6  ;;  %v12099_v20 = vld [vmem:[#allocation183_spill] sm:$0xff] }
 0x14f   : > { %6698 = vmatmul.mubr.msk.f32.gmra.mrb[60].mxu1 %vm1524_vm9, %v9661_v13  ;;  %v9713_v13 = vcombine.low %v9684_v44, %v9687_v7  ;;  %v9729_v39 = vrot.slane %v2126_v47, %v7799_v6  ;;  %v9739_v30 = vrot.slane %v2770_v5, %v7799_v6  ;;  %v9747_v47 = vrot.slane %v2143_v49, %v7799_v6  ;;  %v12100_v7 = vld [vmem:[#allocation169_spill] sm:$0xff]  ;;  %v12101_v49 = vld [vmem:[#allocation184_spill] sm:$0xff] }
 0x150   : > { %6769 = vmatmul.mubr.msk.f32.gmra.mrb[58].mxu0 %vm1524_vm9, %v2718_v41  ;;  %6700 = vmatprep.mubr.msk.f32.mxu1 %vm7574_vm0, %v11795_v0  ;;  %v2771_v41 = vcombine.low %v12075_v52, %v12088_v50  ;;  %v9732_v50 = vrot.slane %v2127_v57, %v7799_v6  ;;  %v9750_v57 = vrot.slane %v2144_v21, %v7799_v6  ;;  %v12102_v21 = vld [vmem:[#allocation188_spill] sm:$0xff] }
 0x151   : > { %6771 = vmatprep.mubr.msk.f32.mxu0 %vm7574_vm0, %v11795_v0  ;;  %12089 = vst [vmem:[#allocation148_spill] sm:$0xff] %v9713_v13  ;;  %12097 = vst [vmem:[#allocation163_spill] sm:$0xff] %v9747_v47  ;;  %v2160_v44 = vcombine.low %v12100_v7, %v12099_v20  ;;  %v2161_v5 = vcombine.low %v12102_v21, %v12101_v49 }
 0x152   : > { %12095 = vst [vmem:[#allocation147_spill] sm:$0xff] %v9732_v50  ;;  %v9742_v43 = vrot.slane %v2771_v41, %v7799_v6  ;;  %12098 = vst [vmem:[#allocation144_spill] sm:$0xff] %v9750_v57  ;;  %v2159_v41 = vcombine.low %v9747_v47, %v9750_v57  ;;  %v2821_v47 = vcombine.low %v12099_v20, %v12102_v21 }
 0x153   : > { %6701 = vmatmul.mubr.msk.f32.gmra.mrb[62].mxu1 %vm1524_vm9, %v2108_v26  ;;  %v2788_v26 = vcombine.low %v12085_v3, %v12091_v60 }
 0x154   : > { %6772 = vmatmul.mubr.msk.f32.gmra.mrb[60].mxu0 %vm1524_vm9, %v2735_v18  ;;  %6703 = vmatprep.mubr.msk.f32.mxu1 %vm7574_vm0, %v11795_v0  ;;  %12096 = vst [vmem:[#allocation128_spill] sm:$0xff] %v9742_v43  ;;  %v2787_v18 = vcombine.low %v12083_v58, %v12086_v1  ;;  %v2769_v1 = vcombine.low %v9705_v51, %v9726_v37 }
 0x155   : > { %6774 = vmatprep.mubr.msk.f32.mxu0 %vm7574_vm0, %v11795_v0  ;;  %v2142_v58 = vcombine.low %v9729_v39, %v9732_v50  ;;  %v2786_v60 = vcombine.low %v9739_v30, %v9742_v43  ;;  %v9781_v51 = vrot.slane %v2788_v26, %v7799_v6  ;;  %v9784_v50 = vrot.slane %v2160_v44, %v7799_v6  ;;  %v12109_v43 = vld [vmem:[#allocation189_spill] sm:$0xff] }
 0x156   : > { %v9772_v3 = vrot.slane %v2787_v18, %v7799_v6  ;;  %v9791_v18 = vrot.slane %v2161_v5, %v7799_v6 }
 0x157   : > { %6704 = vmatmul.mubr.msk.f32.gmra.mrb[64].mxu1 %vm1524_vm9, %v9713_v13  ;;  %12105 = vst [vmem:[#allocation183_spill] sm:$0xff] %v9784_v50  ;;  %v2804_v13 = vcombine.low %v12090_v33, %v12093_v38 }
 0x158   : > { %6775 = vmatmul.mubr.msk.f32.gmra.mrb[62].mxu0 %vm1524_vm9, %v2752_v32  ;;  %6706 = vmatprep.mubr.msk.f32.mxu1 %vm7574_vm0, %v11795_v0  ;;  %12103 = vst [vmem:[#allocation164_spill] sm:$0xff] %v9772_v3  ;;  %v9776_v32 = vcombine.low %v9410_v34, %v9431_v12  ;;  %12106 = vst [vmem:[#allocation169_spill] sm:$0xff] %v9791_v18  ;;  %v6130_v34 = vcombine.high %v12093_v38, %v12092_v46 }
 0x159   : > { %6777 = vmatprep.mubr.msk.f32.mxu0 %vm7574_vm0, %v11795_v0  ;;  %v9797_v12 = vcombine.low %v9473_v48, %v9494_v28  ;;  %v9799_v26 = vpop.f32.mrb[0].mxu0  ;;  %v2803_v5 = vcombine.low %v9772_v3, %v9781_v51  ;;  %v2812_v48 = vrot.slane %v2804_v13, %v7799_v6  ;;  %v12108_v28 = vld [vmem:[#allocation187_spill] sm:$0xff]  ;;  %v9833_v13 = vcombine.low %v9528_v25, %v9557_v45 }
 0x15a   : > { %12104 = vst [vmem:[#allocation149_spill] sm:$0xff] %v9776_v32  ;;  %v6568_v33 = vpop.f32.mrb[1].mxu0  ;;  %v9805_v44 = vpop.f32.mrb[0].mxu1  ;;  %v2177_v57 = vcombine.low %v12109_v43, %v12108_v28  ;;  %v3160_v45 = vcombine.low %v8057_v9, %v8093_v8 }
 0x15b   : > { %6707 = vmatmul.mubr.msk.f32.gmra.mrb[66].mxu1 %vm1524_vm9, %v2142_v58  ;;  %12107 = vst [vmem:[#allocation184_spill] sm:$0xff] %v9797_v12  ;;  %v6607_v58 = vpop.f32.mrb[1].mxu1  ;;  %v9820_v33 = vcombine.low %v9784_v50, %v9791_v18  ;;  %12112 = vst [vmem:[#allocation189_spill] sm:$0xff] %v9833_v13 }
 0x15c   : > { %6778 = vmatmul.mubr.msk.f32.gmra.mrb[64].mxu0 %vm1524_vm9, %v2769_v1  ;;  %6709 = vmatprep.mubr.msk.f32.mxu1 %vm7574_vm0, %v11795_v0  ;;  %v3151_v1 = vcombine.low %v7895_v56, %v7908_v62  ;;  %v9823_v56 = vrot.slane %v6130_v34, %v7799_v6  ;;  %v2822_v62 = vcombine.low %v12101_v49, %v12109_v43 }
 0x15d   : > { %6780 = vmatprep.mubr.msk.f32.mxu0 %vm7574_vm0, %v11795_v0  ;;  %12110 = vst [vmem:[#allocation188_spill] sm:$0xff] %v9820_v33  ;;  %v9837_v21 = vrot.slane %v2177_v57, %v7799_v6  ;;  %v9860_v49 = vcombine.low %v9633_v27, %v9668_v42  ;;  %v12117_v27 = vld [vmem:[#allocation51_spill] sm:$0xff]  ;;  %v12118_v42 = vld [vmem:[#allocation44_spill] sm:$0xff] }
 0x15e   : > { %12111 = vst [vmem:[#allocation187_spill] sm:$0xff] %v9823_v56  ;;  %v3158_v20 = vrot.slane %v3151_v1, %v7799_v6  ;;  %v2820_v43 = vcombine.low %v2812_v48, %v9823_v56  ;;  %v9849_v25 = vrot.slane %v2822_v62, %v7799_v6  ;;  %v12116_v1 = vld [vmem:[#allocation201_spill] sm:$0xff]  ;;  %v3621_v62 = vcombine.low %v12118_v42, %v12117_v27  ;;  %v12127_v42 = vld [vmem:[#allocation71_spill] sm:$0xff] }
 0x15f   : > { %6710 = vmatmul.mubr.msk.f32.gmra.mrb[68].mxu1 %vm1524_vm9, %v2159_v41  ;;  %12113 = vst [vmem:[#allocation243_spill] sm:$0xff] %v9837_v21  ;;  %12115 = vst [vmem:[#allocation245_spill] sm:$0xff] %v9860_v49  ;;  %v2838_v58 = vcombine.low %v12108_v28, %v12116_v1  ;;  %v9880_v56 = vcombine.low %v9726_v37, %v9739_v30 }
 0x160   : > { %6781 = vmatmul.mubr.msk.f32.gmra.mrb[66].mxu0 %vm1524_vm9, %v2786_v60  ;;  %6712 = vmatprep.mubr.msk.f32.mxu1 %vm7574_vm0, %v11795_v0  ;;  %v9840_v60 = vrot.slane %v2821_v47, %v7799_v6  ;;  %v9842_v41 = vpop.f32.mrb[2].mxu0  ;;  %v3159_v47 = vcombine.low %v3158_v20, %v9146_v10  ;;  %v4289_v10 = vld [vmem:[#allocation5 + $0x14] sm:$0xf]  ;;  %v12119_v20 = vld [vmem:[#allocation56_spill] sm:$0xff]  ;;  %v3629_v30 = vrot.slane %v3621_v62, %v7799_v6 }
 0x161   : > { %6783 = vmatprep.mubr.msk.f32.mxu0 %vm7574_vm0, %v11795_v0  ;;  %v6571_v57 = vpop.f32.mrb[3].mxu0  ;;  %12121 = vst [vmem:[#allocation201_spill] sm:$0xff] %v9880_v56 }
 0x162   : > { %12114 = vst [vmem:[#allocation244_spill] sm:$0xff] %v9840_v60  ;;  %v2837_v34 = vcombine.low %v9840_v60, %v9849_v25 }
 0x163   : > { %6713 = vmatmul.mubr.msk.f32.gmra.mrb[70].mxu1 %vm1524_vm9, %v9820_v33  ;;  %v3170_v33 = vcombine.low %v8295_v61, %v8316_v4  ;;  %v12124_v4 = vld [vmem:[#allocation67_spill] sm:$0xff] }
 0x164   : > { %6784 = vmatmul.mubr.msk.f32.gmra.mrb[68].mxu0 %vm1524_vm9, %v2803_v5  ;;  %6715 = vmatprep.mubr.msk.f32.mxu1 %vm7574_vm0, %v11795_v0  ;;  %v3167_v5 = vrot.slane %v3160_v45, %v7799_v6  ;;  %v9884_v45 = vrot.slane %v2838_v58, %v7799_v6  ;;  %v12125_v58 = vld [vmem:[#allocation60_spill] sm:$0xff] }
 0x165   : > { %6786 = vmatprep.mubr.msk.f32.mxu0 %vm7574_vm0, %v11795_v0  ;;  %v3177_v61 = vrot.slane %v3170_v33, %v7799_v6  ;;  %v12131_v33 = vld [vmem:[#allocation90_spill] sm:$0xff] }
 0x166   : > { %12122 = vst [vmem:[#allocation51_spill] sm:$0xff] %v9884_v45  ;;  %v3168_v1 = vcombine.low %v9149_v54, %v3167_v5  ;;  %v9902_v54 = vcombine.low %v9781_v51, %v2812_v48  ;;  %v3638_v5 = vcombine.low %v12125_v58, %v12124_v4  ;;  %v4716_v51 = vld [vmem:[#allocation5 + $0x18] sm:$0xf]  ;;  %v3180_v4 = vcombine.low %v8406_v22, %v8510_v24 }
 0x167   : > { %6716 = vmatmul.mubr.msk.f32.gmra.mrb[72].mxu1 %vm1524_vm9, %v9837_v21  ;;  %v12132_v58 = vcombine.low %v9594_v17, %v9600_v29 }
 0x168   : > { %6787 = vmatmul.mubr.msk.f32.gmra.mrb[70].mxu0 %vm1524_vm9, %v2820_v43  ;;  %6797 = vmatprep.mubr.msk.f32.mxu1 %vm7574_vm0, %v11795_v0  ;;  %v12120_v43 = vld [vmem:[#allocation54_spill] sm:$0xff]  ;;  %12123 = vst [vmem:[#allocation44_spill] sm:$0xff] %v9902_v54 }
 0x169   : > { %6789 = vmatprep.mubr.msk.f32.mxu0 %vm7574_vm0, %v11795_v0  ;;  %v3622_v57 = vcombine.low %v12120_v43, %v12119_v20  ;;  %v12128_v43 = vld [vmem:[#allocation86_spill] sm:$0xff] }
 0x16a   : > { %v9890_v27 = vpop.f32.mrb[2].mxu1 }
 0x16b   : > { %6798 = vmatmul.mubr.msk.f32.vlgmr.msra.gmra.mrb[74].mxu1 %vm1524_vm9, %v3159_v47  ;;  %v6610_v37 = vpop.f32.mrb[3].mxu1  ;;  %v3636_v47 = vrot.slane %v3622_v57, %v7799_v6  ;;  %v12129_v57 = vld [vmem:[#allocation77_spill] sm:$0xff] }
 0x16c   : > { %6790 = vmatmul.mubr.msk.f32.gmra.mrb[72].mxu0 %vm1524_vm9, %v2837_v34  ;;  %6950 = vmatpush3.msk.msra.mxu1 %vm1575_vm3, %v4289_v10  ;;  %v12126_v10 = vld [vmem:[#allocation73_spill] sm:$0xff] }
 0x16d   : > { %6792 = vmatprep.mubr.msk.f32.mxu0 %vm7574_vm0, %v11795_v0  ;;  %6800 = vmatprep.mubr.msk.f32.mxu1 %vm7574_vm0, %v11795_v0  ;;  %v9899_v34 = vpop.f32.mrb[4].mxu0  ;;  %v3639_v62 = vcombine.low %v12127_v42, %v12126_v10  ;;  %v3637_v48 = vcombine.low %v3629_v30, %v3636_v47  ;;  %v12130_v37 = vld [vmem:[#allocation93_spill] sm:$0xff]  ;;  %v3178_v10 = vcombine.low %v9221_v63, %v3177_v61  ;;  %v12193_v63 = vld [vmem:[#allocation102_spill] sm:$0xff] }
 0x16e   : > { %7103 = vmatprep.subr.mxu1 %v11795_v0  ;;  %v6574_v20 = vpop.f32.mrb[5].mxu0  ;;  %v3646_v30 = vrot.slane %v3638_v5, %v7799_v6  ;;  %v3187_v61 = vrot.slane %v3180_v4, %v7799_v6  ;;  %v12137_v4 = vld [vmem:[#allocation123_spill] sm:$0xff] }
 0x16f   : > { %6801 = vmatmul.mubr.msk.f32.gmra.mrb[76].mxu1 %vm1524_vm9, %v3168_v1  ;;  %v3655_v1 = vcombine.low %v12129_v57, %v12128_v43  ;;  %v3653_v47 = vrot.slane %v3639_v62, %v7799_v6  ;;  %v12133_v62 = vld [vmem:[#allocation105_spill] sm:$0xff]  ;;  %v12135_v57 = vld [vmem:[#allocation111_spill] sm:$0xff] }
 0x170   : > { %6793 = vmatmul.mubr.msk.f32.gmra.mrb[74].mxu0 %vm1524_vm9, %v9884_v45  ;;  %6803 = vmatprep.mubr.msk.f32.mxu1 %vm7574_vm0, %v11795_v0  ;;  %v3656_v45 = vcombine.low %v12131_v33, %v12130_v37  ;;  %v12136_v37 = vld [vmem:[#allocation108_spill] sm:$0xff] }
 0x171   : > { %6874 = vmatprep.mubr.msk.f32.mxu0 %vm7574_vm0, %v11795_v0  ;;  %v3663_v17 = vrot.slane %v3655_v1, %v7799_v6  ;;  %v3654_v5 = vcombine.low %v3646_v30, %v3653_v47  ;;  %v3673_v33 = vcombine.low %v12136_v37, %v12135_v57  ;;  %v3188_v1 = vcombine.low %v3187_v61, %v9310_v35  ;;  %v12140_v30 = vld [vmem:[#allocation127_spill] sm:$0xff]  ;;  %v12142_v57 = vld [vmem:[#allocation129_spill] sm:$0xff] }
 0x172   : > { %v3670_v42 = vrot.slane %v3656_v45, %v7799_v6  ;;  %v12186_v35 = vld [vmem:[#allocation87_spill] sm:$0xff] }
 0x173   : > { %6804 = vmatmul.mubr.msk.f32.gmra.mrb[78].mxu1 %vm1524_vm9, %v9653_v2  ;;  %v9937_v29 = vpop.f32.mrb[4].mxu1 }
 0x174   : > { %6875 = vmatmul.mubr.msk.f32.vlgmr.msra.gmra.mrb[76].mxu0 %vm1524_vm9, %v12132_v58  ;;  %6806 = vmatprep.mubr.msk.f32.mxu1 %vm7574_vm0, %v11795_v0  ;;  %v6613_v20 = vpop.f32.mrb[5].mxu1  ;;  %v3671_v45 = vcombine.low %v3663_v17, %v3670_v42  ;;  %v3190_v17 = vcombine.low %v11984_v40, %v11989_v15  ;;  %v3199_v15 = vcombine.low %v8738_v59, %v11995_v14 }
 0x175   : > { %7027 = vmatpush3.msk.msra.mxu0 %vm1575_vm3, %v4716_v51  ;;  %6877 = vmatprep.mubr.msk.f32.mxu0 %vm7574_vm0, %v11795_v0  ;;  %v12134_v51 = vld [vmem:[#allocation94_spill] sm:$0xff] }
 0x176   : > { %7180 = vmatprep.subr.mxu0 %v11795_v0  ;;  %v3672_v43 = vcombine.low %v12134_v51, %v12133_v62  ;;  %v3687_v62 = vrot.slane %v3673_v33, %v7799_v6  ;;  %v12141_v51 = vld [vmem:[#allocation140_spill] sm:$0xff] }
 0x177   : > { %6807 = vmatmul.mubr.msk.f32.gmra.mrb[80].mxu1 %vm1524_vm9, %v3178_v10  ;;  %v12139_v10 = vld [vmem:[#allocation125_spill] sm:$0xff]  ;;  %v3706_v37 = vcombine.low %v12142_v57, %v12141_v51 }
 0x178   : > { %6878 = vmatmul.mubr.msk.f32.gmra.mrb[78].mxu0 %vm1524_vm9, %v3637_v48  ;;  %6809 = vmatprep.mubr.msk.f32.mxu1 %vm7574_vm0, %v11795_v0  ;;  %v12138_v48 = vld [vmem:[#allocation110_spill] sm:$0xff]  ;;  %v3690_v47 = vcombine.low %v12140_v30, %v12139_v10  ;;  %v3680_v20 = vrot.slane %v3672_v43, %v7799_v6  ;;  %v12143_v43 = vld [vmem:[#allocation145_spill] sm:$0xff]  ;;  %v3197_v10 = vrot.slane %v3190_v17, %v7799_v6 }
 0x179   : > { %6880 = vmatprep.mubr.msk.f32.mxu0 %vm7574_vm0, %v11795_v0  ;;  %v3689_v58 = vcombine.low %v12138_v48, %v12137_v4  ;;  %v12144_v4 = vld [vmem:[#allocation143_spill] sm:$0xff]  ;;  %v12146_v30 = vld [vmem:[#allocation146_spill] sm:$0xff]  ;;  %v3714_v51 = vrot.slane %v3706_v37, %v7799_v6 }
 0x17a   : > { %v9969_v42 = vpop.f32.mrb[6].mxu0  ;;  %v3707_v33 = vcombine.low %v12144_v4, %v12143_v43  ;;  %v3688_v40 = vcombine.low %v3680_v20, %v3687_v62  ;;  %v3704_v48 = vrot.slane %v3690_v47, %v7799_v6  ;;  %v12147_v20 = vld [vmem:[#allocation170_spill] sm:$0xff]  ;;  %v3198_v57 = vcombine.low %v3197_v10, %v9372_v36 }
 0x17b   : > { %6810 = vmatmul.mubr.msk.f32.gmra.mrb[82].mxu1 %vm1524_vm9, %v9677_v23  ;;  %v6577_v61 = vpop.f32.mrb[7].mxu0  ;;  %v12148_v62 = vld [vmem:[#allocation166_spill] sm:$0xff] }
 0x17c   : > { %6881 = vmatmul.mubr.msk.f32.gmra.mrb[80].mxu0 %vm1524_vm9, %v3654_v5  ;;  %6812 = vmatprep.mubr.msk.f32.mxu1 %vm7574_vm0, %v11795_v0  ;;  %v3697_v5 = vrot.slane %v3689_v58, %v7799_v6  ;;  %v12145_v58 = vld [vmem:[#allocation161_spill] sm:$0xff]  ;;  %v3724_v47 = vcombine.low %v12148_v62, %v12147_v20  ;;  %v3209_v62 = vcombine.low %v9001_v31, %v12009_v55 }
 0x17d   : > { %6883 = vmatprep.mubr.msk.f32.mxu0 %vm7574_vm0, %v11795_v0  ;;  %v3723_v61 = vcombine.low %v12146_v30, %v12145_v58  ;;  %v12151_v58 = vld [vmem:[#allocation186_spill] sm:$0xff]  ;;  %v12152_v30 = vld [vmem:[#allocation185_spill] sm:$0xff] }
 0x17e   : > { %v3705_v17 = vcombine.low %v3697_v5, %v3704_v48  ;;  %v12149_v5 = vld [vmem:[#allocation182_spill] sm:$0xff]  ;;  %v12150_v48 = vld [vmem:[#allocation168_spill] sm:$0xff]  ;;  %v3741_v20 = vcombine.low %v12152_v30, %v12151_v58  ;;  %v12160_v30 = vld [vmem:[#allocation213_spill] sm:$0xff] }
 0x17f   : > { %6813 = vmatmul.mubr.msk.f32.gmra.mrb[84].mxu1 %vm1524_vm9, %v3188_v1  ;;  %v3206_v1 = vrot.slane %v3199_v15, %v7799_v6  ;;  %v3731_v15 = vrot.slane %v3723_v61, %v7799_v6  ;;  %v3740_v10 = vcombine.low %v12150_v48, %v12149_v5  ;;  %v3216_v48 = vrot.slane %v3209_v62, %v7799_v6 }
 0x180   : > { %6884 = vmatmul.mubr.msk.f32.gmra.mrb[82].mxu0 %vm1524_vm9, %v3671_v45  ;;  %6815 = vmatprep.mubr.msk.f32.mxu1 %vm7574_vm0, %v11795_v0  ;;  %v3721_v45 = vrot.slane %v3707_v33, %v7799_v6  ;;  %v3755_v55 = vrot.slane %v3741_v20, %v7799_v6 }
 0x181   : > { %6886 = vmatprep.mubr.msk.f32.mxu0 %vm7574_vm0, %v11795_v0  ;;  %v9997_v43 = vpop.f32.mrb[6].mxu1  ;;  %v3207_v33 = vcombine.low %v9377_v16, %v3206_v1  ;;  %v12153_v1 = vld [vmem:[#allocation198_spill] sm:$0xff]  ;;  %v3748_v31 = vrot.slane %v3740_v10, %v7799_v6  ;;  %v12174_v16 = vld [vmem:[#allocation41_spill] sm:$0xff] }
 0x182   : > { %v6616_v37 = vpop.f32.mrb[7].mxu1  ;;  %v3722_v4 = vcombine.low %v3714_v51, %v3721_v45  ;;  %v12159_v10 = vld [vmem:[#allocation214_spill] sm:$0xff] }
 0x183   : > { %6816 = vmatmul.mubr.msk.f32.gmra.mrb[86].mxu1 %vm1524_vm9, %v9721_v19  ;;  %v12156_v37 = vld [vmem:[#allocation202_spill] sm:$0xff]  ;;  %v3775_v20 = vcombine.low %v12160_v30, %v12159_v10  ;;  %v3756_v62 = vcombine.low %v3748_v31, %v3755_v55  ;;  %v12167_v30 = vld [vmem:[#allocation20_spill] sm:$0xff] }
 0x184   : > { %6887 = vmatmul.mubr.msk.f32.gmra.mrb[84].mxu0 %vm1524_vm9, %v3688_v40  ;;  %6818 = vmatprep.mubr.msk.f32.mxu1 %vm7574_vm0, %v11795_v0  ;;  %v3738_v40 = vrot.slane %v3724_v47, %v7799_v6  ;;  %v12154_v47 = vld [vmem:[#allocation190_spill] sm:$0xff] }
 0x185   : > { %6889 = vmatprep.mubr.msk.f32.mxu0 %vm7574_vm0, %v11795_v0  ;;  %v10014_v51 = vpop.f32.mrb[8].mxu0  ;;  %v3789_v55 = vrot.slane %v3775_v20, %v7799_v6 }
 0x186   : > { %v6580_v61 = vpop.f32.mrb[9].mxu0  ;;  %v3739_v45 = vcombine.low %v3731_v15, %v3738_v40 }
 0x187   : > { %6819 = vmatmul.mubr.msk.f32.gmra.mrb[88].mxu1 %vm1524_vm9, %v3198_v57  ;;  %v12155_v57 = vld [vmem:[#allocation204_spill] sm:$0xff] }
 0x188   : > { %6890 = vmatmul.mubr.msk.f32.gmra.mrb[86].mxu0 %vm1524_vm9, %v3705_v17  ;;  %6821 = vmatprep.mubr.msk.f32.mxu1 %vm7574_vm0, %v11795_v0  ;;  %v3757_v17 = vcombine.low %v12154_v47, %v12153_v1  ;;  %v3758_v5 = vcombine.low %v12156_v37, %v12155_v57  ;;  %v12161_v1 = vld [vmem:[#allocation237_spill] sm:$0xff]  ;;  %v12162_v57 = vld [vmem:[#allocation27_spill] sm:$0xff] }
 0x189   : > { %6892 = vmatprep.mubr.msk.f32.mxu0 %vm7574_vm0, %v11795_v0  ;;  %v3217_v47 = vcombine.low %v12161_v1, %v3216_v48  ;;  %v12163_v37 = vld [vmem:[#allocation17_spill] sm:$0xff] }
 0x18a   : > { %v3765_v40 = vrot.slane %v3757_v17, %v7799_v6  ;;  %v3219_v17 = vcombine.low %v12163_v37, %v12162_v57 }
 0x18b   : > { %6822 = vmatmul.mubr.msk.f32.gmra.mrb[90].mxu1 %vm1524_vm9, %v3207_v33  ;;  %v10033_v15 = vpop.f32.mrb[8].mxu1  ;;  %v12158_v33 = vld [vmem:[#allocation205_spill] sm:$0xff] }
 0x18c   : > { %6893 = vmatmul.mubr.msk.f32.gmra.mrb[88].mxu0 %vm1524_vm9, %v3722_v4  ;;  %6824 = vmatprep.mubr.msk.f32.mxu1 %vm7574_vm0, %v11795_v0  ;;  %12157 = vst [vmem:[#allocation56_spill] sm:$0xff] %v10033_v15  ;;  %v3772_v4 = vrot.slane %v3758_v5, %v7799_v6  ;;  %v3774_v58 = vcombine.low %v12158_v33, %v9063_v11  ;;  %v6619_v61 = vpop.f32.mrb[9].mxu1  ;;  %v12164_v5 = vld [vmem:[#allocation23_spill] sm:$0xff] }
 0x18d   : > { %6895 = vmatprep.mubr.msk.f32.mxu0 %vm7574_vm0, %v11795_v0  ;;  %v12165_v33 = vld [vmem:[#allocation215_spill] sm:$0xff]  ;;  %v3226_v48 = vrot.slane %v3219_v17, %v7799_v6  ;;  %v12172_v17 = vld [vmem:[#allocation57_spill] sm:$0xff] }
 0x18e   : > { %v3773_v11 = vcombine.low %v3765_v40, %v3772_v4  ;;  %v3791_v10 = vcombine.low %v12165_v33, %v12164_v5  ;;  %v3782_v31 = vrot.slane %v3774_v58, %v7799_v6  ;;  %v12170_v58 = vld [vmem:[#allocation34_spill] sm:$0xff]  ;;  %v12171_v33 = vld [vmem:[#allocation35_spill] sm:$0xff] }
 0x18f   : > { %6825 = vmatmul.mubr.msk.f32.gmra.mrb[92].mxu1 %vm1524_vm9, %v9776_v32  ;;  %v3809_v20 = vcombine.low %v12171_v33, %v12170_v58  ;;  %v12179_v33 = vld [vmem:[#allocation49_spill] sm:$0xff] }
 0x190   : > { %6896 = vmatmul.mubr.msk.f32.gmra.mrb[90].mxu0 %vm1524_vm9, %v3739_v45  ;;  %6827 = vmatprep.mubr.msk.f32.mxu1 %vm7574_vm0, %v11795_v0  ;;  %v12166_v45 = vld [vmem:[#allocation21_spill] sm:$0xff]  ;;  %v3799_v40 = vrot.slane %v3791_v10, %v7799_v6 }
 0x191   : > { %6898 = vmatprep.mubr.msk.f32.mxu0 %vm7574_vm0, %v11795_v0  ;;  %v3792_v61 = vcombine.low %v12167_v30, %v12166_v45  ;;  %v10055_v32 = vpop.f32.mrb[10].mxu0  ;;  %v3227_v45 = vcombine.low %v3226_v48, %v12172_v17  ;;  %v12173_v30 = vld [vmem:[#allocation45_spill] sm:$0xff]  ;;  %v12178_v48 = vld [vmem:[#allocation50_spill] sm:$0xff] }
 0x192   : > { %v6583_v1 = vpop.f32.mrb[11].mxu0  ;;  %v3229_v19 = vcombine.low %v12174_v16, %v12173_v30  ;;  %v3826_v16 = vcombine.low %v12179_v33, %v12178_v48  ;;  %v12180_v30 = vld [vmem:[#allocation69_spill] sm:$0xff]  ;;  %v12185_v48 = vld [vmem:[#allocation66_spill] sm:$0xff] }
 0x193   : > { %6828 = vmatmul.mubr.msk.f32.gmra.mrb[94].mxu1 %vm1524_vm9, %v3217_v47  ;;  %v3806_v4 = vrot.slane %v3792_v61, %v7799_v6  ;;  %v12169_v47 = vld [vmem:[#allocation22_spill] sm:$0xff]  ;;  %v3790_v1 = vcombine.low %v3782_v31, %v3789_v55  ;;  %v3823_v55 = vrot.slane %v3809_v20, %v7799_v6  ;;  %v12183_v20 = vld [vmem:[#allocation48_spill] sm:$0xff] }
 0x194   : > { %6899 = vmatmul.mubr.msk.f32.gmra.mrb[92].mxu0 %vm1524_vm9, %v3756_v62  ;;  %6830 = vmatprep.mubr.msk.f32.mxu1 %vm7574_vm0, %v11795_v0  ;;  %v12168_v62 = vld [vmem:[#allocation33_spill] sm:$0xff] }
 0x195   : > { %6901 = vmatprep.mubr.msk.f32.mxu0 %vm7574_vm0, %v11795_v0  ;;  %v3808_v5 = vcombine.low %v12169_v47, %v12168_v62  ;;  %v282_v62 = vld [vmem:[%s7782_s11 + $0xe0] sm:$0xff]  ;;  %v12177_v47 = vld [vmem:[#allocation37_spill] sm:$0xff]  ;;  %v3807_v36 = vcombine.low %v3799_v40, %v3806_v4  ;;  %v3840_v40 = vrot.slane %v3826_v16, %v7799_v6 }
 0x196   : > { %v10078_v10 = vpop.f32.mrb[10].mxu1  ;;  %v3116_v23 = vcombine.high %v282_v62, %v282_v62  ;;  %v12188_v16 = vld [vmem:[#allocation65_spill] sm:$0xff] }
 0x197   : > { %6831 = vmatmul.mubr.msk.f32.gmra.mrb[96].mxu1 %vm1524_vm9, %v9797_v12  ;;  %12175 = vst [vmem:[#allocation54_spill] sm:$0xff] %v10078_v10  ;;  %v6622_v61 = vpop.f32.mrb[11].mxu1  ;;  %v3816_v31 = vrot.slane %v3808_v5, %v7799_v6  ;;  %v12181_v12 = vld [vmem:[#allocation58_spill] sm:$0xff]  ;;  %v12182_v5 = vld [vmem:[#allocation64_spill] sm:$0xff] }
 0x198   : > { %6902 = vmatmul.mubr.msk.f32.gmra.mrb[94].mxu0 %vm1524_vm9, %v3773_v11  ;;  %6833 = vmatprep.mubr.msk.f32.mxu1 %vm7574_vm0, %v11795_v0  ;;  %v12176_v11 = vld [vmem:[#allocation47_spill] sm:$0xff]  ;;  %v3238_v17 = vcombine.low %v12181_v12, %v12180_v30  ;;  %v3236_v61 = vrot.slane %v3229_v19, %v7799_v6 }
 0x199   : > { %6904 = vmatprep.mubr.msk.f32.mxu0 %vm7574_vm0, %v11795_v0  ;;  %v3825_v58 = vcombine.low %v12177_v47, %v12176_v11  ;;  %v3842_v11 = vcombine.low %v12183_v20, %v12182_v5  ;;  %v12184_v47 = vld [vmem:[#allocation68_spill] sm:$0xff]  ;;  %v10114_v20 = vrot.slane %v282_v62, %v7799_v6 }
 0x19a   : > { %v3843_v33 = vcombine.low %v12185_v48, %v12184_v47  ;;  %v3245_v19 = vrot.slane %v3238_v17, %v7799_v6  ;;  %v3237_v2 = vcombine.low %v3236_v61, %v12186_v35  ;;  %v10124_v17 = vld [vmem:[%s7782_s11 + $0xe8] sm:$0xff]  ;;  %v12189_v47 = vld [vmem:[#allocation74_spill] sm:$0xff] }
 0x19b   : > { %6834 = vmatmul.mubr.msk.f32.gmra.mrb[98].mxu1 %vm1524_vm9, %v3227_v45  ;;  %v3833_v45 = vrot.slane %v3825_v58, %v7799_v6  ;;  %v12192_v35 = vld [vmem:[#allocation106_spill] sm:$0xff] }
 0x19c   : > { %6905 = vmatmul.mubr.msk.f32.gmra.mrb[96].mxu0 %vm1524_vm9, %v3790_v1  ;;  %6836 = vmatprep.mubr.msk.f32.mxu1 %vm7574_vm0, %v11795_v0  ;;  %v3824_v1 = vcombine.low %v3816_v31, %v3823_v55  ;;  %v10107_v4 = vpop.f32.mrb[12].mxu0  ;;  %v10117_v31 = vrot.slane %v3116_v23, %v7799_v6  ;;  %v3857_v58 = vrot.slane %v3843_v33, %v7799_v6  ;;  %v12187_v55 = vld [vmem:[#allocation79_spill] sm:$0xff] }
 0x19d   : > { %6907 = vmatprep.mubr.msk.f32.mxu0 %vm7574_vm0, %v11795_v0  ;;  %v6586_v5 = vpop.f32.mrb[13].mxu0  ;;  %v3859_v61 = vcombine.low %v12188_v16, %v12187_v55  ;;  %v3841_v62 = vcombine.low %v3833_v45, %v3840_v40  ;;  %v3246_v48 = vcombine.low %v12189_v47, %v3245_v19  ;;  %v12190_v23 = vld [vmem:[#allocation83_spill] sm:$0xff]  ;;  %v3248_v10 = vcombine.low %v12193_v63, %v12192_v35  ;;  %v12195_v16 = vld [vmem:[#allocation96_spill] sm:$0xff]  ;;  %v12198_v47 = vld [vmem:[#allocation98_spill] sm:$0xff] }
 0x19e   : > { %v12191_v5 = vld [vmem:[#allocation81_spill] sm:$0xff]  ;;  %v10141_v33 = vcombine.high %v10114_v20, %v10114_v20  ;;  %v10145_v45 = vcombine.high %v10117_v31, %v10117_v31  ;;  %v10149_v40 = vrot.slane %v10124_v17, %v7799_v6 }
 0x19f   : > { %6837 = vmatmul.mubr.msk.f32.gmra.mrb[100].mxu1 %vm1524_vm9, %v9833_v13  ;;  %v3860_v13 = vcombine.low %v12191_v5, %v12190_v23  ;;  %v3867_v35 = vrot.slane %v3859_v61, %v7799_v6  ;;  %v3255_v55 = vrot.slane %v3248_v10, %v7799_v6  ;;  %v12196_v23 = vld [vmem:[#allocation84_spill] sm:$0xff]  ;;  %v12201_v10 = vld [vmem:[#allocation113_spill] sm:$0xff] }
 0x1a0   : > { %6908 = vmatmul.mubr.msk.f32.gmra.mrb[98].mxu0 %vm1524_vm9, %v3807_v36  ;;  %6839 = vmatprep.mubr.msk.f32.mxu1 %vm7574_vm0, %v11795_v0  ;;  %v3850_v36 = vrot.slane %v3842_v11, %v7799_v6  ;;  %v3876_v5 = vcombine.low %v12196_v23, %v12195_v16  ;;  %v12202_v61 = vld [vmem:[#allocation100_spill] sm:$0xff] }
 0x1a1   : > { %6910 = vmatprep.mubr.msk.f32.mxu0 %vm7574_vm0, %v11795_v0  ;;  %v10135_v18 = vpop.f32.mrb[12].mxu1  ;;  %v3874_v19 = vrot.slane %v3860_v13, %v7799_v6  ;;  %v12203_v23 = vld [vmem:[#allocation116_spill] sm:$0xff] }
 0x1a2   : > { %12194 = vst [vmem:[#allocation67_spill] sm:$0xff] %v10135_v18  ;;  %v6625_v11 = vpop.f32.mrb[13].mxu1  ;;  %v3858_v63 = vcombine.low %v3850_v36, %v3857_v58  ;;  %v10170_v36 = vcombine.high %v10149_v40, %v10149_v40  ;;  %v3884_v16 = vrot.slane %v3876_v5, %v7799_v6 }
 0x1a3   : > { %6840 = vmatmul.mubr.msk.f32.gmra.mrb[102].mxu1 %vm1524_vm9, %v3237_v2  ;;  %v4407_v2 = vcombine.low %v10117_v31, %v10145_v45  ;;  %v12197_v11 = vld [vmem:[#allocation99_spill] sm:$0xff] }
 0x1a4   : > { %6911 = vmatmul.mubr.msk.f32.gmra.mrb[100].mxu0 %vm1524_vm9, %v3824_v1  ;;  %6842 = vmatprep.mubr.msk.f32.mxu1 %vm7574_vm0, %v11795_v0  ;;  %v4738_v1 = vcombine.low %v10114_v20, %v10141_v33  ;;  %v3877_v18 = vcombine.low %v12198_v47, %v12197_v11  ;;  %v12204_v11 = vld [vmem:[#allocation114_spill] sm:$0xff] }
 0x1a5   : > { %6913 = vmatprep.mubr.msk.f32.mxu0 %vm7574_vm0, %v11795_v0  ;;  %v10173_v58 = vrot.slane %v4407_v2, %v7799_v6  ;;  %v3875_v2 = vcombine.low %v3867_v35, %v3874_v19  ;;  %v3894_v21 = vcombine.low %v12204_v11, %v12203_v23  ;;  %v12207_v23 = vld [vmem:[#allocation130_spill] sm:$0xff]  ;;  %v12208_v11 = vld [vmem:[#allocation117_spill] sm:$0xff] }
 0x1a6   : > { %v10176_v13 = vrot.slane %v4738_v1, %v7799_v6  ;;  %v3891_v1 = vrot.slane %v3877_v18, %v7799_v6 }
 0x1a7   : > { %6843 = vmatmul.mubr.msk.f32.gmra.mrb[104].mxu1 %vm1524_vm9, %v3246_v48  ;;  %12199 = vst [vmem:[#allocation60_spill] sm:$0xff] %v10173_v58  ;;  %v4408_v48 = vcombine.low %v10149_v40, %v10170_v36 }
 0x1a8   : > { %6914 = vmatmul.mubr.msk.f32.gmra.mrb[102].mxu0 %vm1524_vm9, %v3841_v62  ;;  %12200 = vst [vmem:[#allocation73_spill] sm:$0xff] %v10176_v13  ;;  %6845 = vmatprep.mubr.msk.f32.mxu1 %vm7574_vm0, %v11795_v0  ;;  %v3893_v62 = vcombine.low %v12202_v61, %v12201_v10  ;;  %v3256_v10 = vcombine.low %v9671_v53, %v3255_v55  ;;  %v12205_v61 = vld [vmem:[#allocation141_spill] sm:$0xff]  ;;  %v12210_v53 = vld [vmem:[#allocation135_spill] sm:$0xff] }
 0x1a9   : > { %6916 = vmatprep.mubr.msk.f32.mxu0 %vm7574_vm0, %v11795_v0  ;;  %v10192_v15 = vpop.f32.mrb[14].mxu0  ;;  %v3258_v47 = vcombine.low %v12075_v52, %v12205_v61  ;;  %v10201_v19 = vrot.slane %v4408_v48, %v7799_v6  ;;  %v3908_v55 = vrot.slane %v3894_v21, %v7799_v6 }
 0x1aa   : > { %v6589_v35 = vpop.f32.mrb[15].mxu0  ;;  %v3901_v5 = vrot.slane %v3893_v62, %v7799_v6 }
 0x1ab   : > { %6846 = vmatmul.mubr.msk.f32.gmra.mrb[106].mxu1 %vm1524_vm9, %v9860_v49  ;;  %12206 = vst [vmem:[#allocation71_spill] sm:$0xff] %v10201_v19  ;;  %v3265_v48 = vrot.slane %v3258_v47, %v7799_v6  ;;  %v3910_v35 = vcombine.low %v12208_v11, %v12207_v23  ;;  %v12209_v49 = vld [vmem:[#allocation138_spill] sm:$0xff]  ;;  %v12214_v47 = vld [vmem:[#allocation156_spill] sm:$0xff]  ;;  %v3268_v23 = vcombine.low %v12092_v46, %v12100_v7 }
 0x1ac   : > { %6917 = vmatmul.mubr.msk.f32.gmra.mrb[104].mxu0 %vm1524_vm9, %v3858_v63  ;;  %6848 = vmatprep.mubr.msk.f32.mxu1 %vm7574_vm0, %v11795_v0  ;;  %v3892_v63 = vcombine.low %v3884_v16, %v3891_v1  ;;  %v3911_v13 = vcombine.low %v12210_v53, %v12209_v49  ;;  %v3909_v62 = vcombine.low %v3901_v5, %v3908_v55  ;;  %v12213_v16 = vld [vmem:[#allocation136_spill] sm:$0xff] }
 0x1ad   : > { %6919 = vmatprep.mubr.msk.f32.mxu0 %vm7574_vm0, %v11795_v0  ;;  %v3266_v53 = vcombine.low %v3265_v48, %v9772_v3  ;;  %v3918_v49 = vrot.slane %v3910_v35, %v7799_v6  ;;  %v12216_v7 = vld [vmem:[#allocation172_spill] sm:$0xff]  ;;  %v3286_v19 = vcombine.low %v10141_v33, %v10117_v31 }
 0x1ae   : > { %v10218_v50 = vpop.f32.mrb[14].mxu1  ;;  %v3925_v5 = vrot.slane %v3911_v13, %v7799_v6  ;;  %v3275_v13 = vrot.slane %v3268_v23, %v7799_v6 }
 0x1af   : > { %6849 = vmatmul.mubr.msk.f32.gmra.mrb[108].mxu1 %vm1524_vm9, %v3256_v10  ;;  %12211 = vst [vmem:[#allocation86_spill] sm:$0xff] %v10218_v50  ;;  %v6628_v21 = vpop.f32.mrb[15].mxu1  ;;  %v12215_v10 = vld [vmem:[#allocation158_spill] sm:$0xff] }
 0x1b0   : > { %6920 = vmatmul.mubr.msk.f32.gmra.mrb[106].mxu0 %vm1524_vm9, %v3875_v2  ;;  %6851 = vmatprep.mubr.msk.f32.mxu1 %vm7574_vm0, %v11795_v0  ;;  %v12212_v2 = vld [vmem:[#allocation154_spill] sm:$0xff]  ;;  %v3928_v18 = vcombine.low %v12215_v10, %v12214_v47  ;;  %v12218_v21 = vld [vmem:[#allocation177_spill] sm:$0xff]  ;;  %v3277_v47 = vcombine.low %v12108_v28, %v10114_v20  ;;  %v3926_v10 = vcombine.low %v3918_v49, %v3925_v5 }
 0x1b1   : > { %6922 = vmatprep.mubr.msk.f32.mxu0 %vm7574_vm0, %v11795_v0  ;;  %v3927_v1 = vcombine.low %v12213_v16, %v12212_v2  ;;  %v12219_v2 = vld [vmem:[#allocation176_spill] sm:$0xff]  ;;  %v12221_v49 = vld [vmem:[#allocation178_spill] sm:$0xff]  ;;  %v3276_v50 = vcombine.low %v3275_v13, %v9840_v60  ;;  %v12228_v60 = vld [vmem:[#allocation209_spill] sm:$0xff] }
 0x1b2   : > { %v10236_v55 = vpop.f32.mrb[16].mxu0  ;;  %v3945_v16 = vcombine.low %v12219_v2, %v12218_v21  ;;  %v3942_v35 = vrot.slane %v3928_v18, %v7799_v6  ;;  %v3585_v18 = vrot.slane %v10117_v31, 7  ;;  %v12222_v21 = vld [vmem:[#allocation199_spill] sm:$0xff]  ;;  %v12223_v2 = vld [vmem:[#allocation196_spill] sm:$0xff]  ;;  %v3284_v58 = vrot.slane %v3277_v47, %v7799_v6 }
 0x1b3   : > { %6852 = vmatmul.mubr.msk.f32.gmra.mrb[110].mxu1 %vm1524_vm9, %v9880_v56  ;;  %v6592_v46 = vpop.f32.mrb[17].mxu0  ;;  %v3935_v48 = vrot.slane %v3927_v1, %v7799_v6  ;;  %v3591_v1 = vrot.slane %v10149_v40, 7  ;;  %v3962_v56 = vcombine.low %v12223_v2, %v12222_v21  ;;  %v12226_v21 = vld [vmem:[#allocation206_spill] sm:$0xff]  ;;  %v12227_v2 = vld [vmem:[#allocation197_spill] sm:$0xff] }
 0x1b4   : > { %6923 = vmatmul.mubr.msk.f32.gmra.mrb[108].mxu0 %vm1524_vm9, %v3892_v63  ;;  %6854 = vmatprep.mubr.msk.f32.mxu1 %vm7574_vm0, %v11795_v0  ;;  %v12217_v63 = vld [vmem:[#allocation160_spill] sm:$0xff]  ;;  %v3133_v46 = vcombine.high %v10124_v17, %v10124_v17  ;;  %v3959_v17 = vrot.slane %v3945_v16, %v7799_v6  ;;  %v3287_v16 = vcombine.low %v10145_v45, %v10149_v40  ;;  %v3587_v31 = vrot.slane %v3585_v18, 2 }
 0x1b5   : > { %6925 = vmatprep.mubr.msk.f32.mxu0 %vm7574_vm0, %v11795_v0  ;;  %v3944_v11 = vcombine.low %v12217_v63, %v12216_v7  ;;  %v6183_v7 = vrot.slane %v10114_v20, 9  ;;  %v3582_v63 = vrot.slane %v10141_v33, 7  ;;  %v3943_v3 = vcombine.low %v3935_v48, %v3942_v35 }
 0x1b6   : > { %v3593_v47 = vrot.slane %v3591_v1, 2 }
 0x1b7   : > { %6855 = vmatmul.mubr.msk.f32.gmra.mrb[112].mxu1 %vm1524_vm9, %v3266_v53  ;;  %v3952_v23 = vrot.slane %v3944_v11, %v7799_v6  ;;  %v12220_v53 = vld [vmem:[#allocation193_spill] sm:$0xff]  ;;  %v10278_v11 = vrot.slane %v3133_v46, %v7799_v6  ;;  %v10284_v48 = vsel %vm7829_vm8, %v6183_v7, %v3582_v63  ;;  %v3584_v13 = vrot.slane %v3582_v63, 2 }
 0x1b8   : > { %6926 = vmatmul.mubr.msk.f32.gmra.mrb[110].mxu0 %vm1524_vm9, %v3909_v62  ;;  %6857 = vmatprep.mubr.msk.f32.mxu1 %vm7574_vm0, %v11795_v0  ;;  %v3588_v62 = vrot.slane %v10145_v45, 7  ;;  %v3961_v5 = vcombine.low %v12221_v49, %v12220_v53  ;;  %v3976_v7 = vrot.slane %v3962_v56, %v7799_v6  ;;  %v3285_v49 = vcombine.low %v9849_v25, %v3284_v58 }
 0x1b9   : > { %6928 = vmatprep.mubr.msk.f32.mxu0 %vm7574_vm0, %v11795_v0  ;;  %v3960_v45 = vcombine.low %v3952_v23, %v3959_v17  ;;  %v3294_v63 = vrot.slane %v3286_v19, %v7799_v6  ;;  %v3301_v23 = vrot.slane %v3287_v16, %v7799_v6  ;;  %v10306_v17 = vsel %vm7829_vm8, %v3584_v13, %v3585_v18 }
 0x1ba   : > { %v10286_v35 = vpop.f32.mrb[16].mxu1  ;;  %v3590_v33 = vrot.slane %v3588_v62, 2  ;;  %v3969_v40 = vrot.slane %v3961_v5, %v7799_v6  ;;  %v10310_v56 = vcombine.high %v10278_v11, %v10278_v11  ;;  %v3597_v19 = vrot.slane %v10278_v11, 7 }
 0x1bb   : > { %6858 = vmatmul.mubr.msk.f32.gmra.mrb[114].mxu1 %vm1524_vm9, %v9902_v54  ;;  %12225 = vst [vmem:[#allocation77_spill] sm:$0xff] %v10286_v35  ;;  %v6631_v46 = vpop.f32.mrb[17].mxu1  ;;  %v3978_v54 = vcombine.low %v12227_v2, %v12226_v21  ;;  %v3979_v35 = vcombine.low %v12228_v60, %v10284_v48 }
 0x1bc   : > { %6929 = vmatmul.mubr.msk.f32.gmra.mrb[112].mxu0 %vm1524_vm9, %v3926_v10  ;;  %6860 = vmatprep.mubr.msk.f32.mxu1 %vm7574_vm0, %v11795_v0  ;;  %v3594_v10 = vrot.slane %v10170_v36, 7  ;;  %v3977_v5 = vcombine.low %v3969_v40, %v3976_v7  ;;  %v6210_v40 = vcombine.high %v8057_v9, %v8093_v8 }
 0x1bd   : > { %6931 = vmatprep.mubr.msk.f32.mxu0 %vm7574_vm0, %v11795_v0  ;;  %v3986_v16 = vrot.slane %v3978_v54, %v7799_v6  ;;  %v3993_v13 = vrot.slane %v3979_v35, %v7799_v6  ;;  %v3599_v35 = vrot.slane %v3597_v19, 2 }
 0x1be   : > { %v10326_v60 = vsel %vm7829_vm8, %v3593_v47, %v3594_v10  ;;  %v3600_v47 = vrot.slane %v10310_v56, 7  ;;  %v4297_v2 = vrot.slane %v6210_v40, %v7799_v6 }
 0x1bf   : > { %6861 = vmatmul.mubr.msk.f32.gmra.mrb[116].mxu1 %vm1524_vm9, %v3276_v50  ;;  %v10322_v50 = vsel %vm7829_vm8, %v3590_v33, %v3591_v1  ;;  %v10328_v58 = vpop.f32.mrb[18].mxu0  ;;  %v10337_v1 = vcombine.low %v3294_v63, %v3301_v23 }
 0x1c0   : > { %6932 = vmatmul.mubr.msk.f32.gmra.mrb[114].mxu0 %vm1524_vm9, %v3943_v3  ;;  %6863 = vmatprep.mubr.msk.f32.mxu1 %vm7574_vm0, %v11795_v0  ;;  %v10318_v3 = vsel %vm7829_vm8, %v3587_v31, %v3588_v62  ;;  %v6595_v18 = vpop.f32.mrb[19].mxu0  ;;  %v3303_v62 = vcombine.low %v10170_v36, %v10278_v11  ;;  %v3996_v33 = vcombine.low %v10322_v50, %v10326_v60  ;;  %v3596_v36 = vrot.slane %v3594_v10, 2 }
 0x1c1   : > { %6934 = vmatprep.mubr.msk.f32.mxu0 %vm7574_vm0, %v11795_v0  ;;  %v3995_v31 = vcombine.low %v10306_v17, %v10318_v3  ;;  %v10370_v9 = vsel %vm7829_vm8, %v3599_v35, %v3600_v47 }
 0x1c2   : > { %v10356_v7 = vrot.slane %v3303_v62, %v7799_v6  ;;  %v4010_v10 = vrot.slane %v3996_v33, %v7799_v6  ;;  %v10366_v8 = vsel %vm7829_vm8, %v3596_v36, %v3597_v19  ;;  %v5073_v19 = vld [vmem:[#allocation5 + $0x1c] sm:$0xf]  ;;  %v12232_v33 = vld [vmem:[#allocation62_spill] sm:$0xff] }
 0x1c3   : > { %6864 = vmatmul.mubr.msk.f32.gmra.mrb[118].mxu1 %vm1524_vm9, %v3285_v49  ;;  %v10347_v54 = vpop.f32.mrb[18].mxu1  ;;  %v4003_v49 = vrot.slane %v3995_v31, %v7799_v6  ;;  %v4012_v21 = vcombine.low %v10366_v8, %v10370_v9  ;;  %v12231_v31 = vld [vmem:[#allocation82_spill] sm:$0xff] }
 0x1c4   : > { %6935 = vmatmul.mubr.msk.f32.gmra.mrb[116].mxu0 %vm1524_vm9, %v3960_v45  ;;  %6866 = vmatprep.mubr.msk.f32.mxu1 %vm7574_vm0, %v11795_v0  ;;  %v6634_v46 = vpop.f32.mrb[19].mxu1  ;;  %v3994_v45 = vcombine.low %v3986_v16, %v3993_v13  ;;  %v12229_v16 = vld [vmem:[#allocation218_spill] sm:$0xff]  ;;  %v12230_v13 = vld [vmem:[#allocation219_spill] sm:$0xff]  ;;  %v4299_v36 = vcombine.low %v12232_v33, %v12231_v31  ;;  %v6211_v33 = vcombine.high %v8406_v22, %v8510_v24  ;;  %v12241_v24 = vld [vmem:[#allocation133_spill] sm:$0xff] }
 0x1c5   : > { %6937 = vmatprep.mubr.msk.f32.mxu0 %vm7574_vm0, %v11795_v0  ;;  %v4011_v63 = vcombine.low %v4003_v49, %v4010_v10  ;;  %v4298_v62 = vcombine.low %v12230_v13, %v4297_v2  ;;  %v12233_v10 = vld [vmem:[#allocation220_spill] sm:$0xff] }
 0x1c6   : > { %v4306_v46 = vrot.slane %v4299_v36, %v7799_v6  ;;  %v4315_v22 = vrot.slane %v6211_v33, %v7799_v6  ;;  %v12246_v33 = vld [vmem:[#allocation231_spill] sm:$0xff] }
 0x1c7   : > { %6867 = vmatmul.mubr.msk.f32.gmra.mrb[120].mxu1 %vm1524_vm9, %v10337_v1 }
 0x1c8   : > { %6938 = vmatmul.mubr.msk.f32.gmra.mrb[118].mxu0 %vm1524_vm9, %v3977_v5  ;;  %6869 = vmatprep.mubr.msk.f32.mxu1 %vm7574_vm0, %v11795_v0  ;;  %v4019_v5 = vrot.slane %v4012_v21, %v7799_v6 }
 0x1c9   : > { %6940 = vmatprep.mubr.msk.f32.mxu0 %vm7574_vm0, %v11795_v0 }
 0x1cb   : > { %6870 = vmatmul.mubr.msk.f32.gmra.mrb[122].mxu1 %vm1524_vm9, %v10356_v7 }
 0x1cc   : > { %6941 = vmatmul.mubr.msk.f32.gmra.mrb[120].mxu0 %vm1524_vm9, %v3994_v45  ;;  %6951 = vmatprep.mubr.msk.f32.mxu1 %vm7574_vm0, %v11795_v0  ;;  %v10382_v23 = vpop.f32.mrb[20].mxu0  ;;  %v5423_v45 = vld [vmem:[#allocation5 + $0x20] sm:$0xf] }
 0x1cd   : > { %6943 = vmatprep.mubr.msk.f32.mxu0 %vm7574_vm0, %v11795_v0  ;;  %v6598_v18 = vpop.f32.mrb[21].mxu0 }
 0x1ce   : > { %v12237_v18 = vld [vmem:[#allocation224_spill] sm:$0xff] }
 0x1cf   : > { %6952 = vmatmul.mubr.msk.f32.vlgmr.msra.gmra.mrb[124].mxu1 %vm1524_vm9, %v12229_v16 }
 0x1d0   : > { %6944 = vmatmul.mubr.msk.f32.gmra.mrb[122].mxu0 %vm1524_vm9, %v4011_v63  ;;  %7104 = vmatpush3.msk.msra.mxu1 %vm1575_vm3, %v5073_v19  ;;  %v12234_v63 = vld [vmem:[#allocation221_spill] sm:$0xff]  ;;  %v12236_v19 = vld [vmem:[#allocation223_spill] sm:$0xff] }
 0x1d1   : > { %6946 = vmatprep.mubr.msk.f32.mxu0 %vm7574_vm0, %v11795_v0  ;;  %6954 = vmatprep.mubr.msk.f32.mxu1 %vm7574_vm0, %v11795_v0  ;;  %v12235_v21 = vcombine.low %v12233_v10, %v12234_v63 }
 0x1d2   : > { %v10396_v35 = vpop.f32.mrb[20].mxu1 }
 0x1d3   : > { %6955 = vmatmul.mubr.msk.f32.gmra.mrb[126].mxu1 %vm1524_vm9, %v4298_v62  ;;  %v6637_v47 = vpop.f32.mrb[21].mxu1  ;;  %v12239_v62 = vld [vmem:[#allocation225_spill] sm:$0xff] }
 0x1d4   : > { %6947 = vmatmul.mubr.msk.f32.gmra.mrb[124].mxu0 %vm1524_vm9, %v4019_v5  ;;  %6957 = vmatprep.mubr.msk.f32.mxu1 %vm7574_vm0, %v11795_v0  ;;  %v12238_v5 = vld [vmem:[#allocation222_spill] sm:$0xff]  ;;  %v4307_v31 = vcombine.low %v4306_v46, %v12239_v62  ;;  %v12240_v47 = vld [vmem:[#allocation227_spill] sm:$0xff] }
 0x1d5   : > { %7028 = vmatprep.mubr.msk.f32.mxu0 %vm7574_vm0, %v11795_v0  ;;  %v4718_v16 = vcombine.low %v12238_v5, %v12237_v18  ;;  %v4719_v10 = vcombine.low %v12239_v62, %v12240_v47  ;;  %v12243_v18 = vld [vmem:[#allocation230_spill] sm:$0xff]  ;;  %v12244_v5 = vld [vmem:[#allocation228_spill] sm:$0xff] }
 0x1d6   : > { %v10405_v40 = vpop.f32.mrb[22].mxu0  ;;  %v10407_v49 = vpop.f32.mrb[22].mxu1  ;;  %v12245_v62 = vld [vmem:[#allocation118_spill] sm:$0xff] }
 0x1d7   : > { %v6601_v2 = vpop.f32.mrb[23].mxu0  ;;  %6958 = vmatmul.mubr.msk.f32.gmra.mrb[128].mxu1 %vm1524_vm9, %v12236_v19  ;;  %v6640_v13 = vpop.f32.mrb[23].mxu1 }
 0x1d8   : > { %7029 = vmatmul.mubr.msk.f32.vlgmr.msra.gmra.mrb[126].mxu0 %vm1524_vm9, %v12235_v21  ;;  %6960 = vmatprep.mubr.msk.f32.mxu1 %vm7574_vm0, %v11795_v0 }
 0x1d9   : > { %7181 = vmatpush3.msk.msra.mxu0 %vm1575_vm3, %v5423_v45  ;;  %7031 = vmatprep.mubr.msk.f32.mxu0 %vm7574_vm0, %v11795_v0  ;;  %v12242_v45 = vld [vmem:[#allocation120_spill] sm:$0xff] }
 0x1da   : > { %v2304_v36 = vpop.f32.mrb[24].mxu1  ;;  %v4317_v21 = vcombine.low %v12242_v45, %v12241_v24  ;;  %v12247_v45 = vld [vmem:[#allocation232_spill] sm:$0xff] }
 0x1db   : > { %v2305_v63 = vadd.f32 %v2304_v36, %v9799_v26  ;;  %6961 = vmatmul.mubr.msk.f32.gmra.mrb[130].mxu1 %vm1524_vm9, %v4307_v31  ;;  %v6645_v46 = vpop.f32.mrb[25].mxu1  ;;  %v4720_v26 = vcombine.low %v12244_v5, %v12243_v18  ;;  %v4316_v36 = vcombine.low %v4315_v22, %v12246_v33 }
 0x1dc   : > { %7032 = vmatmul.mubr.msk.f32.gmra.mrb[128].mxu0 %vm1524_vm9, %v4718_v16  ;;  %6963 = vmatprep.mubr.msk.f32.mxu1 %vm7574_vm0, %v11795_v0  ;;  %v4324_v47 = vrot.slane %v4317_v21, %v7799_v6 }
 0x1dd   : > { %7034 = vmatprep.mubr.msk.f32.mxu0 %vm7574_vm0, %v11795_v0 }
 0x1de   : > { %v2309_v19 = vpop.f32.mrb[26].mxu1  ;;  %v4325_v5 = vcombine.low %v12247_v45, %v4324_v47 }
 0x1df   : > { %v10437_v2 = vpop.f32.mrb[24].mxu0  ;;  %v2310_v13 = vadd.f32 %v2309_v19, %v9842_v41  ;;  %6964 = vmatmul.mubr.msk.f32.gmra.mrb[132].mxu1 %vm1524_vm9, %v12245_v62  ;;  %v6648_v31 = vpop.f32.mrb[27].mxu1  ;;  %v6212_v41 = vcombine.high %v8738_v59, %v11995_v14  ;;  %v12248_v14 = vld [vmem:[#allocation153_spill] sm:$0xff] }
 0x1e0   : > { %v6604_v16 = vpop.f32.mrb[25].mxu0  ;;  %7035 = vmatmul.mubr.msk.f32.gmra.mrb[130].mxu0 %vm1524_vm9, %v4719_v10  ;;  %6966 = vmatprep.mubr.msk.f32.mxu1 %vm7574_vm0, %v11795_v0  ;;  %v4721_v10 = vcombine.low %v12246_v33, %v12247_v45 }
 0x1e1   : > { %7037 = vmatprep.mubr.msk.f32.mxu0 %vm7574_vm0, %v11795_v0 }
 0x1e2   : > { %v2314_v24 = vpop.f32.mrb[28].mxu1 }
 0x1e3   : > { %v2965_v46 = vpop.f32.mrb[26].mxu0  ;;  %v2315_v22 = vadd.f32 %v2314_v24, %v9899_v34  ;;  %6967 = vmatmul.mubr.msk.f32.gmra.mrb[134].mxu1 %vm1524_vm9, %v4316_v36  ;;  %v6651_v21 = vpop.f32.mrb[29].mxu1  ;;  %v4333_v36 = vrot.slane %v6212_v41, %v7799_v6  ;;  %v12251_v24 = vld [vmem:[#allocation159_spill] sm:$0xff] }
 0x1e4   : > { %v10455_v19 = vadd.f32 %v2965_v46, %v2305_v63  ;;  %v6722_v18 = vpop.f32.mrb[27].mxu0  ;;  %7038 = vmatmul.mubr.msk.f32.gmra.mrb[132].mxu0 %vm1524_vm9, %v4720_v26  ;;  %6969 = vmatprep.mubr.msk.f32.mxu1 %vm7574_vm0, %v11795_v0  ;;  %v12249_v63 = vld [vmem:[#allocation155_spill] sm:$0xff] }
 0x1e5   : > { %7040 = vmatprep.mubr.msk.f32.mxu0 %vm7574_vm0, %v11795_v0  ;;  %v4722_v62 = vcombine.low %v12249_v63, %v12248_v14  ;;  %v12252_v18 = vld [vmem:[#allocation210_spill] sm:$0xff] }
 0x1e6   : > { %v2319_v59 = vpop.f32.mrb[30].mxu1 }
 0x1e7   : > { %v2970_v16 = vpop.f32.mrb[28].mxu0  ;;  %v2320_v34 = vadd.f32 %v2319_v59, %v9969_v42  ;;  %6970 = vmatmul.mubr.msk.f32.gmra.mrb[136].mxu1 %vm1524_vm9, %v4325_v5  ;;  %v6654_v33 = vpop.f32.mrb[31].mxu1 }
 0x1e8   : > { %v10467_v31 = vadd.f32 %v2970_v16, %v2310_v13  ;;  %v6725_v26 = vpop.f32.mrb[29].mxu0  ;;  %7041 = vmatmul.mubr.msk.f32.gmra.mrb[134].mxu0 %vm1524_vm9, %v4721_v10  ;;  %6972 = vmatprep.mubr.msk.f32.mxu1 %vm7574_vm0, %v11795_v0  ;;  %v12250_v13 = vld [vmem:[#allocation174_spill] sm:$0xff]  ;;  %v12253_v10 = vld [vmem:[#allocation195_spill] sm:$0xff] }
 0x1e9   : > { %7043 = vmatprep.mubr.msk.f32.mxu0 %vm7574_vm0, %v11795_v0  ;;  %v4723_v45 = vcombine.low %v12251_v24, %v12250_v13  ;;  %v4335_v21 = vcombine.low %v12253_v10, %v12252_v18  ;;  %v12254_v16 = vld [vmem:[#allocation191_spill] sm:$0xff]  ;;  %v4334_v14 = vcombine.low %v12250_v13, %v4333_v36 }
 0x1ea   : > { %v2324_v46 = vpop.f32.mrb[32].mxu1  ;;  %v12255_v26 = vld [vmem:[#allocation235_spill] sm:$0xff] }
 0x1eb   : > { %v2975_v47 = vpop.f32.mrb[30].mxu0  ;;  %v2325_v41 = vadd.f32 %v2324_v46, %v10014_v51  ;;  %6973 = vmatmul.mubr.msk.f32.gmra.mrb[138].mxu1 %vm1524_vm9, %v12254_v16  ;;  %v6657_v59 = vpop.f32.mrb[33].mxu1  ;;  %v12256_v33 = vld [vmem:[#allocation179_spill] sm:$0xff]  ;;  %v4342_v13 = vrot.slane %v4335_v21, %v7799_v6 }
 0x1ec   : > { %v10481_v42 = vadd.f32 %v2975_v47, %v2315_v22  ;;  %v6728_v5 = vpop.f32.mrb[31].mxu0  ;;  %7044 = vmatmul.mubr.msk.f32.gmra.mrb[136].mxu0 %vm1524_vm9, %v4722_v62  ;;  %6975 = vmatprep.mubr.msk.f32.mxu1 %vm7574_vm0, %v11795_v0  ;;  %v4724_v47 = vcombine.low %v12256_v33, %v12255_v26  ;;  %v12258_v10 = vld [vmem:[#allocation175_spill] sm:$0xff]  ;;  %v12262_v33 = vld [vmem:[#allocation46_spill] sm:$0xff] }
 0x1ed   : > { %7046 = vmatprep.mubr.msk.f32.mxu0 %vm7574_vm0, %v11795_v0  ;;  %v12259_v59 = vld [vmem:[#allocation15_spill] sm:$0xff] }
 0x1ee   : > { %v2329_v22 = vpop.f32.mrb[34].mxu1 }
 0x1ef   : > { %v2980_v63 = vpop.f32.mrb[32].mxu0  ;;  %v2330_v46 = vadd.f32 %v2329_v22, %v10055_v32  ;;  %6976 = vmatmul.mubr.msk.f32.gmra.mrb[140].mxu1 %vm1524_vm9, %v4334_v14  ;;  %v6660_v36 = vpop.f32.mrb[35].mxu1 }
 0x1f0   : > { %v10494_v62 = vadd.f32 %v2980_v63, %v2320_v34  ;;  %v6731_v51 = vpop.f32.mrb[33].mxu0  ;;  %7047 = vmatmul.mubr.msk.f32.gmra.mrb[138].mxu0 %vm1524_vm9, %v4723_v45  ;;  %6978 = vmatprep.mubr.msk.f32.mxu1 %vm7574_vm0, %v11795_v0  ;;  %v12257_v34 = vld [vmem:[#allocation18_spill] sm:$0xff]  ;;  %v6213_v45 = vcombine.high %v12163_v37, %v12162_v57  ;;  %v12260_v63 = vld [vmem:[#allocation236_spill] sm:$0xff] }
 0x1f1   : > { %7049 = vmatprep.mubr.msk.f32.mxu0 %vm7574_vm0, %v11795_v0  ;;  %v4725_v5 = vcombine.low %v12258_v10, %v12257_v34  ;;  %v4343_v22 = vcombine.low %v4342_v13, %v12260_v63 }
 0x1f2   : > { %v2334_v18 = vpop.f32.mrb[36].mxu1 }
 0x1f3   : > { %v2985_v24 = vpop.f32.mrb[34].mxu0  ;;  %v2335_v21 = vadd.f32 %v2334_v18, %v10107_v4  ;;  %6979 = vmatmul.mubr.msk.f32.gmra.mrb[142].mxu1 %vm1524_vm9, %v12259_v59  ;;  %v6663_v14 = vpop.f32.mrb[37].mxu1  ;;  %v4351_v18 = vrot.slane %v6213_v45, %v7799_v6 }
 0x1f4   : > { %v10508_v32 = vadd.f32 %v2985_v24, %v2325_v41  ;;  %v6734_v16 = vpop.f32.mrb[35].mxu0  ;;  %7050 = vmatmul.mubr.msk.f32.gmra.mrb[140].mxu0 %vm1524_vm9, %v4724_v47  ;;  %6981 = vmatprep.mubr.msk.f32.mxu1 %vm7574_vm0, %v11795_v0  ;;  %v12261_v41 = vld [vmem:[#allocation238_spill] sm:$0xff]  ;;  %v12263_v47 = vld [vmem:[#allocation31_spill] sm:$0xff] }
 0x1f5   : > { %7052 = vmatprep.mubr.msk.f32.mxu0 %vm7574_vm0, %v11795_v0  ;;  %v4726_v26 = vcombine.low %v12260_v63, %v12261_v41  ;;  %v4353_v4 = vcombine.low %v12263_v47, %v12262_v33  ;;  %v12265_v16 = vld [vmem:[#allocation239_spill] sm:$0xff]  ;;  %v12266_v63 = vld [vmem:[#allocation32_spill] sm:$0xff] }
 0x1f6   : > { %v2339_v37 = vpop.f32.mrb[38].mxu1  ;;  %v12268_v33 = vld [vmem:[#allocation36_spill] sm:$0xff] }
 0x1f7   : > { %v2990_v57 = vpop.f32.mrb[36].mxu0  ;;  %v2340_v13 = vadd.f32 %v2339_v37, %v10192_v15  ;;  %6982 = vmatmul.mubr.msk.f32.gmra.mrb[144].mxu1 %vm1524_vm9, %v4343_v22  ;;  %v6666_v24 = vpop.f32.mrb[39].mxu1 }
 0x1f8   : > { %v10523_v51 = vadd.f32 %v2990_v57, %v2330_v46  ;;  %v6737_v36 = vpop.f32.mrb[37].mxu0  ;;  %7053 = vmatmul.mubr.msk.f32.gmra.mrb[142].mxu0 %vm1524_vm9, %v4725_v5  ;;  %6984 = vmatprep.mubr.msk.f32.mxu1 %vm7574_vm0, %v11795_v0  ;;  %v12264_v46 = vld [vmem:[#allocation29_spill] sm:$0xff]  ;;  %v4360_v5 = vrot.slane %v4353_v4, %v7799_v6  ;;  %v12267_v57 = vld [vmem:[#allocation240_spill] sm:$0xff] }
 0x1f9   : > { %7055 = vmatprep.mubr.msk.f32.mxu0 %vm7574_vm0, %v11795_v0  ;;  %v4727_v59 = vcombine.low %v12265_v16, %v12264_v46  ;;  %v4352_v37 = vcombine.low %v4351_v18, %v12267_v57  ;;  %v4728_v47 = vcombine.low %v12267_v57, %v12268_v33 }
 0x1fa   : > { %v2344_v10 = vpop.f32.mrb[40].mxu1  ;;  %v4361_v18 = vcombine.low %v12268_v33, %v4360_v5 }
 0x1fb   : > { %v2995_v34 = vpop.f32.mrb[38].mxu0  ;;  %v2345_v45 = vadd.f32 %v2344_v10, %v10236_v55  ;;  %6985 = vmatmul.mubr.msk.f32.gmra.mrb[146].mxu1 %vm1524_vm9, %v12266_v63  ;;  %v6669_v22 = vpop.f32.mrb[41].mxu1  ;;  %v6214_v55 = vcombine.high %v12181_v12, %v12180_v30  ;;  %v12269_v30 = vld [vmem:[#allocation55_spill] sm:$0xff] }
 0x1fc   : > { %v10536_v14 = vadd.f32 %v2995_v34, %v2335_v21  ;;  %v6740_v15 = vpop.f32.mrb[39].mxu0  ;;  %7056 = vmatmul.mubr.msk.f32.gmra.mrb[144].mxu0 %vm1524_vm9, %v4726_v26  ;;  %6987 = vmatprep.mubr.msk.f32.mxu1 %vm7574_vm0, %v11795_v0  ;;  %v12272_v22 = vld [vmem:[#allocation61_spill] sm:$0xff] }
 0x1fd   : > { %7058 = vmatprep.mubr.msk.f32.mxu0 %vm7574_vm0, %v11795_v0  ;;  %v4369_v5 = vrot.slane %v6214_v55, %v7799_v6  ;;  %v12275_v55 = vld [vmem:[#allocation76_spill] sm:$0xff] }
 0x1fe   : > { %v2349_v21 = vpop.f32.mrb[42].mxu1 }
 0x1ff   : > { %v3000_v41 = vpop.f32.mrb[40].mxu0  ;;  %v2350_v36 = vadd.f32 %v2349_v21, %v10328_v58  ;;  %6988 = vmatmul.mubr.msk.f32.gmra.mrb[148].mxu1 %vm1524_vm9, %v4352_v37  ;;  %v6672_v24 = vpop.f32.mrb[43].mxu1  ;;  %v12273_v37 = vld [vmem:[#allocation109_spill] sm:$0xff] }
 0x200   : > { %v10551_v26 = vadd.f32 %v3000_v41, %v2340_v13  ;;  %v6743_v4 = vpop.f32.mrb[41].mxu0  ;;  %7059 = vmatmul.mubr.msk.f32.gmra.mrb[146].mxu0 %vm1524_vm9, %v4727_v59  ;;  %6990 = vmatprep.mubr.msk.f32.mxu1 %vm7574_vm0, %v11795_v0  ;;  %v12270_v13 = vld [vmem:[#allocation28_spill] sm:$0xff]  ;;  %v12274_v41 = vld [vmem:[#allocation91_spill] sm:$0xff] }
 0x201   : > { %7061 = vmatprep.mubr.msk.f32.mxu0 %vm7574_vm0, %v11795_v0  ;;  %v4729_v10 = vcombine.low %v12270_v13, %v12269_v30  ;;  %v4371_v21 = vcombine.low %v12274_v41, %v12273_v37  ;;  %v12276_v13 = vld [vmem:[#allocation92_spill] sm:$0xff] }
 0x202   : > { %v2354_v12 = vpop.f32.mrb[44].mxu1 }
 0x203   : > { %v3005_v34 = vpop.f32.mrb[42].mxu0  ;;  %v2355_v58 = vadd.f32 %v2354_v12, %v10382_v23  ;;  %6991 = vmatmul.mubr.msk.f32.gmra.mrb[150].mxu1 %vm1524_vm9, %v4361_v18  ;;  %v6675_v59 = vpop.f32.mrb[45].mxu1 }
 0x204   : > { %v10563_v46 = vadd.f32 %v3005_v34, %v2345_v45  ;;  %v6746_v16 = vpop.f32.mrb[43].mxu0  ;;  %7062 = vmatmul.mubr.msk.f32.gmra.mrb[148].mxu0 %vm1524_vm9, %v4728_v47  ;;  %6993 = vmatprep.mubr.msk.f32.mxu1 %vm7574_vm0, %v11795_v0  ;;  %v12271_v45 = vld [vmem:[#allocation241_spill] sm:$0xff]  ;;  %v4378_v34 = vrot.slane %v4371_v21, %v7799_v6  ;;  %v12281_v21 = vld [vmem:[#allocation43_spill] sm:$0xff] }
 0x205   : > { %7064 = vmatprep.mubr.msk.f32.mxu0 %vm7574_vm0, %v11795_v0  ;;  %v4730_v57 = vcombine.low %v12272_v22, %v12271_v45  ;;  %v4370_v24 = vcombine.low %v12271_v45, %v4369_v5  ;;  %v12280_v22 = vld [vmem:[#allocation38_spill] sm:$0xff] }
 0x206   : > { %v2359_v63 = vpop.f32.mrb[46].mxu1 }
 0x207   : > { %v3010_v15 = vpop.f32.mrb[44].mxu0  ;;  %v2360_v47 = vadd.f32 %v2359_v63, %v10405_v40  ;;  %6994 = vmatmul.mubr.msk.f32.gmra.mrb[152].mxu1 %vm1524_vm9, %v12275_v55  ;;  %v6678_v4 = vpop.f32.mrb[47].mxu1  ;;  %v12279_v63 = vld [vmem:[#allocation88_spill] sm:$0xff]  ;;  %v6215_v55 = vcombine.high %v12075_v52, %v12205_v61 }
 0x208   : > { %v10577_v23 = vadd.f32 %v3010_v15, %v2350_v36  ;;  %v6749_v33 = vpop.f32.mrb[45].mxu0  ;;  %7065 = vmatmul.mubr.msk.f32.gmra.mrb[150].mxu0 %vm1524_vm9, %v4729_v10  ;;  %6996 = vmatprep.mubr.msk.f32.mxu1 %vm7574_vm0, %v11795_v0  ;;  %v12277_v10 = vld [vmem:[#allocation242_spill] sm:$0xff] }
 0x209   : > { %7067 = vmatprep.mubr.msk.f32.mxu0 %vm7574_vm0, %v11795_v0  ;;  %v4731_v16 = vcombine.low %v12277_v10, %v12276_v13  ;;  %v12278_v15 = vld [vmem:[#allocation26_spill] sm:$0xff]  ;;  %v4387_v13 = vrot.slane %v6215_v55, %v7799_v6  ;;  %v12284_v10 = vld [vmem:[#allocation124_spill] sm:$0xff] }
 0x20a   : > { %v2364_v36 = vpop.f32.mrb[48].mxu1  ;;  %v4732_v45 = vcombine.low %v12279_v63, %v12278_v15  ;;  %v12285_v15 = vld [vmem:[#allocation148_spill] sm:$0xff] }
 0x20b   : > { %v3015_v18 = vpop.f32.mrb[46].mxu0  ;;  %v2365_v40 = vadd.f32 %v2364_v36, %v10437_v2  ;;  %6997 = vmatmul.mubr.msk.f32.gmra.mrb[154].mxu1 %vm1524_vm9, %v4370_v24  ;;  %v6681_v59 = vpop.f32.mrb[49].mxu1  ;;  %v12282_v24 = vld [vmem:[#allocation107_spill] sm:$0xff] }
 0x20c   : > { %v10589_v12 = vadd.f32 %v3015_v18, %v2355_v58  ;;  %v6752_v30 = vpop.f32.mrb[47].mxu0  ;;  %7068 = vmatmul.mubr.msk.f32.gmra.mrb[152].mxu0 %vm1524_vm9, %v4730_v57  ;;  %6999 = vmatprep.mubr.msk.f32.mxu1 %vm7574_vm0, %v11795_v0  ;;  %v4379_v57 = vcombine.low %v4378_v34, %v12280_v22  ;;  %v4733_v18 = vcombine.low %v12280_v22, %v12282_v24  ;;  %v12283_v36 = vld [vmem:[#allocation167_spill] sm:$0xff] }
 0x20d   : > { %7070 = vmatprep.mubr.msk.f32.mxu0 %vm7574_vm0, %v11795_v0 }
 0x20e   : > { %v2369_v58 = vpop.f32.mrb[50].mxu1 }
 0x20f   : > { %v3020_v5 = vpop.f32.mrb[48].mxu0  ;;  %v2370_v41 = vadd.f32 %v2369_v58, %v9805_v44  ;;  %7000 = vmatmul.mubr.msk.f32.gmra.mrb[156].mxu1 %vm1524_vm9, %v12281_v21  ;;  %v6684_v33 = vpop.f32.mrb[51].mxu1  ;;  %v4389_v44 = vcombine.low %v12093_v38, %v12283_v36 }
 0x210   : > { %v10603_v2 = vadd.f32 %v3020_v5, %v2360_v47  ;;  %v6755_v37 = vpop.f32.mrb[49].mxu0  ;;  %7071 = vmatmul.mubr.msk.f32.gmra.mrb[154].mxu0 %vm1524_vm9, %v4731_v16  ;;  %7002 = vmatprep.mubr.msk.f32.mxu1 %vm7574_vm0, %v11795_v0  ;;  %v4734_v16 = vcombine.low %v12284_v10, %v9729_v39 }
 0x211   : > { %7073 = vmatprep.mubr.msk.f32.mxu0 %vm7574_vm0, %v11795_v0  ;;  %v4396_v59 = vrot.slane %v4389_v44, %v7799_v6 }
 0x212   : > { %v2374_v4 = vpop.f32.mrb[52].mxu1 }
 0x213   : > { %v3025_v47 = vpop.f32.mrb[50].mxu0  ;;  %v2375_v52 = vadd.f32 %v2374_v4, %v9890_v27  ;;  %7003 = vmatmul.mubr.msk.f32.gmra.mrb[158].mxu1 %vm1524_vm9, %v4379_v57  ;;  %v6687_v61 = vpop.f32.mrb[53].mxu1  ;;  %v284_v57 = vld [vmem:[%s7782_s11 + $0xf0] sm:$0xff] }
 0x214   : > { %v10619_v34 = vadd.f32 %v3025_v47, %v2365_v40  ;;  %v6758_v30 = vpop.f32.mrb[51].mxu0  ;;  %7074 = vmatmul.mubr.msk.f32.gmra.mrb[156].mxu0 %vm1524_vm9, %v4732_v45  ;;  %7005 = vmatprep.mubr.msk.f32.mxu1 %vm7574_vm0, %v11795_v0  ;;  %v12286_v45 = vld [vmem:[#allocation147_spill] sm:$0xff]  ;;  %v4682_v33 = vcombine.high %v284_v57, %v284_v57  ;;  %v10659_v36 = vrot.slane %v284_v57, %v7799_v6 }
 0x215   : > { %7076 = vmatprep.mubr.msk.f32.mxu0 %vm7574_vm0, %v11795_v0  ;;  %v4388_v22 = vcombine.low %v4387_v13, %v12286_v45 }
 0x216   : > { %v2379_v40 = vpop.f32.mrb[54].mxu1  ;;  %v10664_v13 = vrot.slane %v4682_v33, %v7799_v6  ;;  %v10683_v57 = vcombine.high %v10659_v36, %v10659_v36 }
 0x217   : > { %v3030_v38 = vpop.f32.mrb[52].mxu0  ;;  %v2380_v58 = vadd.f32 %v2379_v40, %v9937_v29  ;;  %7006 = vmatmul.mubr.msk.f32.gmra.mrb[160].mxu1 %vm1524_vm9, %v12285_v15  ;;  %v6690_v63 = vpop.f32.mrb[55].mxu1 }
 0x218   : > { %v10632_v27 = vadd.f32 %v3030_v38, %v2370_v41  ;;  %v6761_v5 = vpop.f32.mrb[53].mxu0  ;;  %7077 = vmatmul.mubr.msk.f32.gmra.mrb[158].mxu0 %vm1524_vm9, %v4733_v18  ;;  %7008 = vmatprep.mubr.msk.f32.mxu1 %vm7574_vm0, %v11795_v0  ;;  %v12287_v41 = vld [vmem:[#allocation163_spill] sm:$0xff]  ;;  %v6216_v18 = vcombine.high %v12108_v28, %v10114_v20  ;;  %v12290_v20 = vld [vmem:[#allocation56_spill] sm:$0xff] }
 0x219   : > { %7079 = vmatprep.mubr.msk.f32.mxu0 %vm7574_vm0, %v11795_v0  ;;  %v4735_v21 = vcombine.low %v12286_v45, %v12287_v41  ;;  %v4397_v29 = vcombine.low %v12287_v41, %v4396_v59  ;;  %v285_v59 = vld [vmem:[%s7782_s11 + $0xf8] sm:$0xff]  ;;  %v4747_v5 = vcombine.low %v10278_v11, %v10659_v36  ;;  %v12292_v45 = vld [vmem:[#allocation169_spill] sm:$0xff] }
 0x21a   : > { %v2384_v37 = vpop.f32.mrb[56].mxu1  ;;  %v12291_v63 = vld [vmem:[#allocation243_spill] sm:$0xff] }
 0x21b   : > { %v3035_v39 = vpop.f32.mrb[54].mxu0  ;;  %v2385_v4 = vadd.f32 %v2384_v37, %v9997_v43  ;;  %7009 = vmatmul.mubr.msk.f32.gmra.mrb[162].mxu1 %vm1524_vm9, %v4388_v22  ;;  %v6693_v24 = vpop.f32.mrb[57].mxu1  ;;  %v12289_v43 = vld [vmem:[#allocation144_spill] sm:$0xff]  ;;  %v4737_v22 = vcombine.low %v12292_v45, %v12291_v63  ;;  %v10690_v37 = vrot.slane %v285_v59, %v7799_v6 }
 0x21c   : > { %v10647_v55 = vadd.f32 %v3035_v39, %v2375_v52  ;;  %v6764_v47 = vpop.f32.mrb[55].mxu0  ;;  %7080 = vmatmul.mubr.msk.f32.gmra.mrb[160].mxu0 %vm1524_vm9, %v4734_v16  ;;  %7011 = vmatprep.mubr.msk.f32.mxu1 %vm7574_vm0, %v11795_v0  ;;  %v12288_v52 = vld [vmem:[#allocation183_spill] sm:$0xff]  ;;  %v4405_v16 = vrot.slane %v6216_v18, %v7799_v6  ;;  %v10687_v39 = vcombine.high %v10664_v13, %v10664_v13 }
 0x21d   : > { %7082 = vmatprep.mubr.msk.f32.mxu0 %vm7574_vm0, %v11795_v0  ;;  %v4736_v61 = vcombine.low %v12289_v43, %v12288_v52  ;;  %v12294_v47 = vld [vmem:[#allocation188_spill] sm:$0xff]  ;;  %v4756_v52 = vcombine.low %v10683_v57, %v10664_v13 }
 0x21e   : > { %v2389_v30 = vpop.f32.mrb[58].mxu1  ;;  %v4406_v18 = vcombine.low %v12291_v63, %v4405_v16  ;;  %v4757_v43 = vcombine.low %v10687_v39, %v10690_v37 }
 0x21f   : > { %v3040_v44 = vpop.f32.mrb[56].mxu0  ;;  %v2390_v40 = vadd.f32 %v2389_v30, %v12290_v20  ;;  %7012 = vmatmul.mubr.msk.f32.gmra.mrb[164].mxu1 %vm1524_vm9, %v4397_v29  ;;  %v6696_v10 = vpop.f32.mrb[59].mxu1  ;;  %v12293_v29 = vld [vmem:[#allocation54_spill] sm:$0xff]  ;;  %v4764_v45 = vrot.slane %v4756_v52, %v7799_v6 }
 0x220   : > { %v10666_v38 = vadd.f32 %v3040_v44, %v2380_v58  ;;  %v6767_v28 = vpop.f32.mrb[57].mxu0  ;;  %7083 = vmatmul.mubr.msk.f32.gmra.mrb[162].mxu0 %vm1524_vm9, %v4735_v21  ;;  %7014 = vmatprep.mubr.msk.f32.mxu1 %vm7574_vm0, %v11795_v0  ;;  %v12295_v10 = vld [vmem:[#allocation67_spill] sm:$0xff] }
 0x221   : > { %7085 = vmatprep.mubr.msk.f32.mxu0 %vm7574_vm0, %v11795_v0 }
 0x222   : > { %v2394_v15 = vpop.f32.mrb[60].mxu1 }
 0x223   : > { %v3045_v58 = vpop.f32.mrb[58].mxu0  ;;  %v2395_v33 = vadd.f32 %v2394_v15, %v12293_v29  ;;  %7015 = vmatmul.mubr.msk.f32.gmra.mrb[166].mxu1 %vm1524_vm9, %v12294_v47  ;;  %v6699_v24 = vpop.f32.mrb[61].mxu1 }
 0x224   : > { %v10692_v41 = vadd.f32 %v3045_v58, %v2385_v4  ;;  %v6770_v21 = vpop.f32.mrb[59].mxu0  ;;  %7086 = vmatmul.mubr.msk.f32.gmra.mrb[164].mxu0 %vm1524_vm9, %v4736_v61  ;;  %7017 = vmatprep.mubr.msk.f32.mxu1 %vm7574_vm0, %v11795_v0  ;;  %v4754_v4 = vrot.slane %v4747_v5, %v7799_v6  ;;  %v4699_v61 = vcombine.high %v285_v59, %v285_v59  ;;  %v12296_v59 = vld [vmem:[#allocation71_spill] sm:$0xff]  ;;  %v12297_v24 = vld [vmem:[#allocation73_spill] sm:$0xff] }
 0x225   : > { %7088 = vmatprep.mubr.msk.f32.mxu0 %vm7574_vm0, %v11795_v0  ;;  %v4424_v5 = vcombine.low %v10278_v11, %v10310_v56  ;;  %v10727_v56 = vcombine.high %v10690_v37, %v10690_v37 }
 0x226   : > { %v2399_v30 = vpop.f32.mrb[62].mxu1  ;;  %v10723_v21 = vrot.slane %v4699_v61, %v7799_v6 }
 0x227   : > { %v3050_v44 = vpop.f32.mrb[60].mxu0  ;;  %v2400_v16 = vadd.f32 %v2399_v30, %v12295_v10  ;;  %7018 = vmatmul.mubr.msk.f32.gmra.mrb[168].mxu1 %vm1524_vm9, %v4406_v18  ;;  %v6702_v58 = vpop.f32.mrb[63].mxu1  ;;  %v12298_v18 = vld [vmem:[#allocation60_spill] sm:$0xff]  ;;  %v4431_v61 = vrot.slane %v4424_v5, %v7799_v6 }
 0x228   : > { %v10708_v28 = vadd.f32 %v3050_v44, %v2390_v40  ;;  %v6773_v20 = vpop.f32.mrb[61].mxu0  ;;  %7089 = vmatmul.mubr.msk.f32.gmra.mrb[166].mxu0 %vm1524_vm9, %v4737_v22  ;;  %7020 = vmatprep.mubr.msk.f32.mxu1 %vm7574_vm0, %v11795_v0  ;;  %v4755_v40 = vcombine.low %v12296_v59, %v4754_v4  ;;  %v4771_v22 = vrot.slane %v4757_v43, %v7799_v6  ;;  %v12300_v4 = vld [vmem:[#allocation86_spill] sm:$0xff] }
 0x229   : > { %7091 = vmatprep.mubr.msk.f32.mxu0 %vm7574_vm0, %v11795_v0  ;;  %v12299_v44 = vcombine.low %v12297_v24, %v12298_v18  ;;  %v12301_v52 = vcombine.low %v12298_v18, %v12296_v59  ;;  %v4773_v10 = vcombine.low %v10727_v56, %v10723_v21  ;;  %v12302_v59 = vld [vmem:[#allocation77_spill] sm:$0xff] }
 0x22a   : > { %v2404_v63 = vpop.f32.mrb[64].mxu1  ;;  %v4772_v5 = vcombine.low %v4764_v45, %v4771_v22  ;;  %v12304_v45 = vld [vmem:[#allocation78_spill] sm:$0xff] }
 0x22b   : > { %v3055_v15 = vpop.f32.mrb[62].mxu0  ;;  %v2405_v30 = vadd.f32 %v2404_v63, %v12300_v4  ;;  %7021 = vmatmul.mubr.msk.f32.gmra.mrb[170].mxu1 %vm1524_vm9, %v12301_v52  ;;  %v6705_v43 = vpop.f32.mrb[65].mxu1  ;;  %v12303_v52 = vld [vmem:[#allocation63_spill] sm:$0xff] }
 0x22c   : > { %v10729_v29 = vadd.f32 %v3055_v15, %v2395_v33  ;;  %v6776_v47 = vpop.f32.mrb[63].mxu0  ;;  %7092 = vmatmul.mubr.msk.f32.gmra.mrb[168].mxu0 %vm1524_vm9, %v12299_v44  ;;  %7023 = vmatprep.mubr.msk.f32.mxu1 %vm7574_vm0, %v11795_v0  ;;  %v12305_v22 = vcombine.low %v12303_v52, %v12304_v45  ;;  %v12310_v52 = vld [vmem:[#allocation229_spill] sm:$0xff]  ;;  %v12311_v45 = vld [vmem:[#allocation226_spill] sm:$0xff] }
 0x22d   : > { %7094 = vmatprep.mubr.msk.f32.mxu0 %vm7574_vm0, %v11795_v0 }
 0x22e   : > { %v2409_v20 = vpop.f32.mrb[66].mxu1 }
 0x22f   : > { %v3060_v33 = vpop.f32.mrb[64].mxu0  ;;  %v2410_v63 = vadd.f32 %v2409_v20, %v12302_v59  ;;  %7024 = vmatmul.mubr.msk.f32.gmra.mrb[172].mxu1 %vm1524_vm9, %v4431_v61  ;;  %v6708_v47 = vpop.f32.mrb[67].mxu1  ;;  %v12306_v61 = vld [vmem:[#allocation95_spill] sm:$0xff] }
 0x230   : > { %v10747_v58 = vadd.f32 %v3060_v33, %v2400_v16  ;;  %v6779_v15 = vpop.f32.mrb[65].mxu0  ;;  %7095 = vmatmul.mubr.msk.f32.gmra.mrb[170].mxu0 %vm1524_vm9, %v4755_v40  ;;  %7105 = vmatprep.mubr.msk.f32.mxu1 %vm7574_vm0, %v11795_v0  ;;  %v4780_v16 = vrot.slane %v4773_v10, %v7799_v6  ;;  %v12307_v33 = vld [vmem:[#allocation80_spill] sm:$0xff] }
 0x231   : > { %7097 = vmatprep.mubr.msk.f32.mxu0 %vm7574_vm0, %v11795_v0  ;;  %v5075_v20 = vcombine.low %v12307_v33, %v12306_v61  ;;  %v12308_v47 = vld [vmem:[#allocation112_spill] sm:$0xff] }
 0x232   : > { %v2414_v18 = vpop.f32.mrb[68].mxu1 }
 0x233   : > { %v3065_v24 = vpop.f32.mrb[66].mxu0  ;;  %v2415_v40 = vadd.f32 %v2414_v18, %v10347_v54  ;;  %7106 = vmatmul.mubr.msk.f32.vlgmr.msra.gmra.mrb[174].mxu1 %vm1524_vm9, %v12305_v22  ;;  %v6711_v43 = vpop.f32.mrb[69].mxu1  ;;  %v5424_v22 = vcombine.low %v12311_v45, %v12310_v52  ;;  %v12317_v45 = vld [vmem:[#allocation137_spill] sm:$0xff] }
 0x234   : > { %v10757_v44 = vadd.f32 %v3065_v24, %v2405_v30  ;;  %v6782_v4 = vpop.f32.mrb[67].mxu0  ;;  %7098 = vmatmul.mubr.msk.f32.gmra.mrb[172].mxu0 %vm1524_vm9, %v4772_v5  ;;  %7108 = vmatprep.mubr.msk.f32.mxu1 %vm7574_vm0, %v11795_v0  ;;  %v12309_v24 = vld [vmem:[#allocation97_spill] sm:$0xff]  ;;  %v12312_v43 = vld [vmem:[#allocation40_spill] sm:$0xff] }
 0x235   : > { %7100 = vmatprep.mubr.msk.f32.mxu0 %vm7574_vm0, %v11795_v0  ;;  %v5076_v18 = vcombine.low %v12309_v24, %v12308_v47 }
 0x236   : > { %v2419_v10 = vpop.f32.mrb[70].mxu1 }
 0x237   : > { %v3070_v30 = vpop.f32.mrb[68].mxu0  ;;  %v2420_v59 = vadd.f32 %v2419_v10, %v10396_v35  ;;  %7109 = vmatmul.mubr.msk.f32.gmra.mrb[176].mxu1 %vm1524_vm9, %v5075_v20  ;;  %v6714_v5 = vpop.f32.mrb[71].mxu1  ;;  %v12313_v20 = vld [vmem:[#allocation131_spill] sm:$0xff] }
 0x238   : > { %v10771_v15 = vadd.f32 %v3070_v30, %v2410_v63  ;;  %v6785_v54 = vpop.f32.mrb[69].mxu0  ;;  %7101 = vmatmul.mubr.msk.f32.gmra.mrb[174].mxu0 %vm1524_vm9, %v4780_v16  ;;  %7111 = vmatprep.mubr.msk.f32.mxu1 %vm7574_vm0, %v11795_v0  ;;  %v12314_v30 = vld [vmem:[#allocation115_spill] sm:$0xff] }
 0x239   : > { %7182 = vmatprep.mubr.msk.f32.mxu0 %vm7574_vm0, %v11795_v0  ;;  %v5077_v10 = vcombine.low %v12314_v30, %v12313_v20 }
 0x23a   : > { %v2424_v63 = vpop.f32.mrb[72].mxu1 }
 0x23b   : > { %v3075_v4 = vpop.f32.mrb[70].mxu0  ;;  %v2425_v61 = vadd.f32 %v2424_v63, %v10407_v49  ;;  %7112 = vmatmul.mubr.msk.f32.gmra.mrb[178].mxu1 %vm1524_vm9, %v5076_v18  ;;  %v6717_v33 = vpop.f32.mrb[73].mxu1  ;;  %v12315_v18 = vld [vmem:[#allocation150_spill] sm:$0xff] }
 0x23c   : > { %v10784_v16 = vadd.f32 %v3075_v4, %v2415_v40  ;;  %v6788_v35 = vpop.f32.mrb[71].mxu0  ;;  %7183 = vmatmul.mubr.msk.f32.vlgmr.msra.gmra.mrb[176].mxu0 %vm1524_vm9, %v12312_v43  ;;  %7114 = vmatprep.mubr.msk.f32.mxu1 %vm7574_vm0, %v11795_v0  ;;  %v12316_v4 = vld [vmem:[#allocation134_spill] sm:$0xff] }
 0x23d   : > { %7185 = vmatprep.mubr.msk.f32.mxu0 %vm7574_vm0, %v11795_v0  ;;  %v5078_v63 = vcombine.low %v12316_v4, %v12315_v18  ;;  %v12318_v35 = vld [vmem:[#allocation132_spill] sm:$0xff]  ;;  %v12319_v33 = vld [vmem:[#allocation122_spill] sm:$0xff] }
 0x23e   : > { %v3430_v54 = vpop.f32.mrb[74].mxu1  ;;  %v5425_v43 = vcombine.low %v12318_v35, %v12317_v45  ;;  %v12324_v35 = vld [vmem:[#allocation233_spill] sm:$0xff] }
 0x23f   : > { %v3080_v40 = vpop.f32.mrb[72].mxu0  ;;  %v3554_v49 = vadd.f32 %v3430_v54, %v10455_v19  ;;  %7115 = vmatmul.mubr.msk.f32.gmra.mrb[180].mxu1 %vm1524_vm9, %v5077_v10  ;;  %v6799_v24 = vpop.f32.mrb[75].mxu1  ;;  %v12320_v10 = vld [vmem:[#allocation171_spill] sm:$0xff] }
 0x240   : > { %v10796_v5 = vadd.f32 %v3080_v40, %v2420_v59  ;;  %v6791_v47 = vpop.f32.mrb[73].mxu0  ;;  %7186 = vmatmul.mubr.msk.f32.gmra.mrb[178].mxu0 %vm1524_vm9, %v5424_v22  ;;  %7117 = vmatprep.mubr.msk.f32.mxu1 %vm7574_vm0, %v11795_v0  ;;  %v12321_v40 = vld [vmem:[#allocation152_spill] sm:$0xff] }
 0x241   : > { %7188 = vmatprep.mubr.msk.f32.mxu0 %vm7574_vm0, %v11795_v0  ;;  %v5079_v54 = vcombine.low %v12321_v40, %v12320_v10 }
 0x242   : > { %v3435_v59 = vpop.f32.mrb[76].mxu1 }
 0x243   : > { %v3085_v52 = vpop.f32.mrb[74].mxu0  ;;  %v3555_v20 = vadd.f32 %v3435_v59, %v10467_v31  ;;  %7118 = vmatmul.mubr.msk.f32.gmra.mrb[182].mxu1 %vm1524_vm9, %v5078_v63  ;;  %v6802_v30 = vpop.f32.mrb[77].mxu1  ;;  %v12322_v63 = vld [vmem:[#allocation192_spill] sm:$0xff] }
 0x244   : > { %v10809_v22 = vadd.f32 %v3085_v52, %v2425_v61  ;;  %v6794_v19 = vpop.f32.mrb[75].mxu0  ;;  %7189 = vmatmul.mubr.msk.f32.gmra.mrb[180].mxu0 %vm1524_vm9, %v12319_v33  ;;  %7120 = vmatprep.mubr.msk.f32.mxu1 %vm7574_vm0, %v11795_v0  ;;  %v12323_v52 = vld [vmem:[#allocation173_spill] sm:$0xff]  ;;  %v12326_v30 = vld [vmem:[#allocation151_spill] sm:$0xff] }
 0x245   : > { %7191 = vmatprep.mubr.msk.f32.mxu0 %vm7574_vm0, %v11795_v0  ;;  %v5080_v59 = vcombine.low %v12323_v52, %v12322_v63  ;;  %v12325_v19 = vld [vmem:[#allocation157_spill] sm:$0xff]  ;;  %v12330_v63 = vld [vmem:[#allocation234_spill] sm:$0xff] }
 0x246   : > { %v3440_v47 = vpop.f32.mrb[78].mxu1  ;;  %v5426_v33 = vcombine.low %v12325_v19, %v12324_v35  ;;  %v12331_v35 = vld [vmem:[#allocation216_spill] sm:$0xff]  ;;  %v12332_v19 = vld [vmem:[#allocation211_spill] sm:$0xff] }
 0x247   : > { %v4139_v61 = vpop.f32.mrb[76].mxu0  ;;  %v3556_v31 = vadd.f32 %v3440_v47, %v10481_v42  ;;  %7121 = vmatmul.mubr.msk.f32.gmra.mrb[184].mxu1 %vm1524_vm9, %v5079_v54  ;;  %v6805_v4 = vpop.f32.mrb[79].mxu1  ;;  %v12327_v54 = vld [vmem:[#allocation207_spill] sm:$0xff] }
 0x248   : > { %v10821_v24 = vadd.f32 %v4139_v61, %v3554_v49  ;;  %v6876_v18 = vpop.f32.mrb[77].mxu0  ;;  %7192 = vmatmul.mubr.msk.f32.gmra.mrb[182].mxu0 %vm1524_vm9, %v5425_v43  ;;  %7123 = vmatprep.mubr.msk.f32.mxu1 %vm7574_vm0, %v11795_v0  ;;  %v12328_v61 = vld [vmem:[#allocation194_spill] sm:$0xff]  ;;  %v12329_v4 = vld [vmem:[#allocation208_spill] sm:$0xff] }
 0x249   : > { %7194 = vmatprep.mubr.msk.f32.mxu0 %vm7574_vm0, %v11795_v0  ;;  %v5081_v47 = vcombine.low %v12328_v61, %v12327_v54  ;;  %v5427_v52 = vcombine.low %v12330_v63, %v12329_v4  ;;  %v12333_v61 = vld [vmem:[#allocation25_spill] sm:$0xff]  ;;  %v12335_v4 = vld [vmem:[#allocation30_spill] sm:$0xff] }
 0x24a   : > { %v3445_v49 = vpop.f32.mrb[80].mxu1  ;;  %v12336_v63 = vld [vmem:[#allocation237_spill] sm:$0xff] }
 0x24b   : > { %v4144_v45 = vpop.f32.mrb[78].mxu0  ;;  %v3557_v10 = vadd.f32 %v3445_v49, %v10494_v62  ;;  %7124 = vmatmul.mubr.msk.f32.gmra.mrb[186].mxu1 %vm1524_vm9, %v5080_v59  ;;  %v6808_v40 = vpop.f32.mrb[81].mxu1 }
 0x24c   : > { %v10834_v43 = vadd.f32 %v4144_v45, %v3555_v20  ;;  %v6879_v42 = vpop.f32.mrb[79].mxu0  ;;  %7195 = vmatmul.mubr.msk.f32.gmra.mrb[184].mxu0 %vm1524_vm9, %v12326_v30  ;;  %7126 = vmatprep.mubr.msk.f32.mxu1 %vm7574_vm0, %v11795_v0 }
 0x24d   : > { %7197 = vmatprep.mubr.msk.f32.mxu0 %vm7574_vm0, %v11795_v0  ;;  %v5082_v42 = vcombine.low %v12332_v19, %v12331_v35 }
 0x24e   : > { %v3450_v18 = vpop.f32.mrb[82].mxu1 }
 0x24f   : > { %v4149_v20 = vpop.f32.mrb[80].mxu0  ;;  %v3558_v59 = vadd.f32 %v3450_v18, %v10508_v32  ;;  %7127 = vmatmul.mubr.msk.f32.gmra.mrb[188].mxu1 %vm1524_vm9, %v5081_v47  ;;  %v6811_v49 = vpop.f32.mrb[83].mxu1  ;;  %v12334_v47 = vld [vmem:[#allocation217_spill] sm:$0xff] }
 0x250   : > { %v10848_v45 = vadd.f32 %v4149_v20, %v3556_v31  ;;  %v6882_v62 = vpop.f32.mrb[81].mxu0  ;;  %7198 = vmatmul.mubr.msk.f32.gmra.mrb[186].mxu0 %vm1524_vm9, %v5426_v33  ;;  %7129 = vmatprep.mubr.msk.f32.mxu1 %vm7574_vm0, %v11795_v0  ;;  %v5083_v20 = vcombine.low %v12334_v47, %v12333_v61  ;;  %v12337_v49 = vld [vmem:[#allocation149_spill] sm:$0xff] }
 0x251   : > { %7200 = vmatprep.mubr.msk.f32.mxu0 %vm7574_vm0, %v11795_v0  ;;  %v5428_v62 = vcombine.low %v12336_v63, %v12335_v4  ;;  %v12342_v63 = vld [vmem:[#allocation57_spill] sm:$0xff] }
 0x252   : > { %v3455_v31 = vpop.f32.mrb[84].mxu1 }
 0x253   : > { %v4154_v30 = vpop.f32.mrb[82].mxu0  ;;  %v3559_v32 = vadd.f32 %v3455_v31, %v10523_v51  ;;  %7130 = vmatmul.mubr.msk.f32.gmra.mrb[190].mxu1 %vm1524_vm9, %v5082_v42  ;;  %v6814_v33 = vpop.f32.mrb[85].mxu1  ;;  %v12338_v42 = vld [vmem:[#allocation39_spill] sm:$0xff] }
 0x254   : > { %v10859_v40 = vadd.f32 %v4154_v30, %v3557_v10  ;;  %v6885_v54 = vpop.f32.mrb[83].mxu0  ;;  %7201 = vmatmul.mubr.msk.f32.gmra.mrb[188].mxu0 %vm1524_vm9, %v5427_v52  ;;  %7132 = vmatprep.mubr.msk.f32.mxu1 %vm7574_vm0, %v11795_v0  ;;  %v12339_v30 = vld [vmem:[#allocation24_spill] sm:$0xff] }
 0x255   : > { %7203 = vmatprep.mubr.msk.f32.mxu0 %vm7574_vm0, %v11795_v0  ;;  %v5084_v31 = vcombine.low %v12339_v30, %v12338_v42 }
 0x256   : > { %v3460_v10 = vpop.f32.mrb[86].mxu1 }
 0x257   : > { %v4159_v18 = vpop.f32.mrb[84].mxu0  ;;  %v3560_v35 = vadd.f32 %v3460_v10, %v10536_v14  ;;  %7133 = vmatmul.mubr.msk.f32.gmra.mrb[192].mxu1 %vm1524_vm9, %v5083_v20  ;;  %v6817_v19 = vpop.f32.mrb[87].mxu1  ;;  %v12340_v20 = vld [vmem:[#allocation52_spill] sm:$0xff] }
 0x258   : > { %v10872_v52 = vadd.f32 %v4159_v18, %v3558_v59  ;;  %v6888_v51 = vpop.f32.mrb[85].mxu0  ;;  %7204 = vmatmul.mubr.msk.f32.gmra.mrb[190].mxu0 %vm1524_vm9, %v12337_v49  ;;  %7135 = vmatprep.mubr.msk.f32.mxu1 %vm7574_vm0, %v11795_v0  ;;  %v12341_v18 = vld [vmem:[#allocation42_spill] sm:$0xff]  ;;  %v12344_v19 = vld [vmem:[#allocation184_spill] sm:$0xff] }
 0x259   : > { %7206 = vmatprep.mubr.msk.f32.mxu0 %vm7574_vm0, %v11795_v0  ;;  %v5085_v10 = vcombine.low %v12341_v18, %v12340_v20  ;;  %v12343_v51 = vld [vmem:[#allocation19_spill] sm:$0xff] }
 0x25a   : > { %v3465_v54 = vpop.f32.mrb[88].mxu1  ;;  %v5429_v49 = vcombine.low %v12343_v51, %v12342_v63  ;;  %v12349_v51 = vld [vmem:[#allocation87_spill] sm:$0xff] }
 0x25b   : > { %v4164_v59 = vpop.f32.mrb[86].mxu0  ;;  %v3561_v14 = vadd.f32 %v3465_v54, %v10551_v26  ;;  %7136 = vmatmul.mubr.msk.f32.gmra.mrb[194].mxu1 %vm1524_vm9, %v5084_v31  ;;  %v6820_v47 = vpop.f32.mrb[89].mxu1  ;;  %v12345_v31 = vld [vmem:[#allocation70_spill] sm:$0xff] }
 0x25c   : > { %v10884_v33 = vadd.f32 %v4164_v59, %v3559_v32  ;;  %v6891_v61 = vpop.f32.mrb[87].mxu0  ;;  %7207 = vmatmul.mubr.msk.f32.gmra.mrb[192].mxu0 %vm1524_vm9, %v5428_v62  ;;  %7138 = vmatprep.mubr.msk.f32.mxu1 %vm7574_vm0, %v11795_v0  ;;  %v12346_v59 = vld [vmem:[#allocation53_spill] sm:$0xff] }
 0x25d   : > { %7209 = vmatprep.mubr.msk.f32.mxu0 %vm7574_vm0, %v11795_v0  ;;  %v5086_v54 = vcombine.low %v12346_v59, %v12345_v31 }
 0x25e   : > { %v3470_v32 = vpop.f32.mrb[90].mxu1 }
 0x25f   : > { %v4169_v4 = vpop.f32.mrb[88].mxu0  ;;  %v3562_v42 = vadd.f32 %v3470_v32, %v10563_v46  ;;  %7139 = vmatmul.mubr.msk.f32.gmra.mrb[196].mxu1 %vm1524_vm9, %v5085_v10  ;;  %v6823_v30 = vpop.f32.mrb[91].mxu1  ;;  %v12347_v10 = vld [vmem:[#allocation85_spill] sm:$0xff] }
 0x260   : > { %v10897_v62 = vadd.f32 %v4169_v4, %v3560_v35  ;;  %v6894_v26 = vpop.f32.mrb[89].mxu0  ;;  %7210 = vmatmul.mubr.msk.f32.gmra.mrb[194].mxu0 %vm1524_vm9, %v12344_v19  ;;  %7141 = vmatprep.mubr.msk.f32.mxu1 %vm7574_vm0, %v11795_v0  ;;  %v12348_v4 = vld [vmem:[#allocation75_spill] sm:$0xff]  ;;  %v12351_v30 = vld [vmem:[#allocation189_spill] sm:$0xff] }
 0x261   : > { %7212 = vmatprep.mubr.msk.f32.mxu0 %vm7574_vm0, %v11795_v0  ;;  %v5087_v32 = vcombine.low %v12348_v4, %v12347_v10  ;;  %v12350_v26 = vld [vmem:[#allocation59_spill] sm:$0xff]  ;;  %v12355_v10 = vld [vmem:[#allocation74_spill] sm:$0xff] }
 0x262   : > { %v3475_v61 = vpop.f32.mrb[92].mxu1  ;;  %v5430_v19 = vcombine.low %v12350_v26, %v12349_v51  ;;  %v12356_v51 = vld [vmem:[#allocation119_spill] sm:$0xff]  ;;  %v12357_v26 = vld [vmem:[#allocation104_spill] sm:$0xff] }
 0x263   : > { %v4174_v35 = vpop.f32.mrb[90].mxu0  ;;  %v3563_v46 = vadd.f32 %v3475_v61, %v10577_v23  ;;  %7142 = vmatmul.mubr.msk.f32.gmra.mrb[198].mxu1 %vm1524_vm9, %v5086_v54  ;;  %v6826_v18 = vpop.f32.mrb[93].mxu1  ;;  %v12352_v54 = vld [vmem:[#allocation101_spill] sm:$0xff] }
 0x264   : > { %v10909_v47 = vadd.f32 %v4174_v35, %v3561_v14  ;;  %v6897_v20 = vpop.f32.mrb[91].mxu0  ;;  %7213 = vmatmul.mubr.msk.f32.gmra.mrb[196].mxu0 %vm1524_vm9, %v5429_v49  ;;  %7144 = vmatprep.mubr.msk.f32.mxu1 %vm7574_vm0, %v11795_v0  ;;  %v12353_v35 = vld [vmem:[#allocation89_spill] sm:$0xff]  ;;  %v12354_v18 = vld [vmem:[#allocation72_spill] sm:$0xff] }
 0x265   : > { %7215 = vmatprep.mubr.msk.f32.mxu0 %vm7574_vm0, %v11795_v0  ;;  %v5088_v61 = vcombine.low %v12353_v35, %v12352_v54  ;;  %v5431_v4 = vcombine.low %v12355_v10, %v12354_v18  ;;  %v12358_v35 = vld [vmem:[#allocation139_spill] sm:$0xff]  ;;  %v12360_v18 = vld [vmem:[#allocation126_spill] sm:$0xff] }
 0x266   : > { %v3480_v14 = vpop.f32.mrb[94].mxu1  ;;  %v12361_v10 = vld [vmem:[#allocation103_spill] sm:$0xff] }
 0x267   : > { %v4179_v63 = vpop.f32.mrb[92].mxu0  ;;  %v3564_v31 = vadd.f32 %v3480_v14, %v10589_v12  ;;  %7145 = vmatmul.mubr.msk.f32.gmra.mrb[200].mxu1 %vm1524_vm9, %v5087_v32  ;;  %v6829_v59 = vpop.f32.mrb[95].mxu1 }
 0x268   : > { %v10922_v49 = vadd.f32 %v4179_v63, %v3562_v42  ;;  %v6900_v23 = vpop.f32.mrb[93].mxu0  ;;  %7216 = vmatmul.mubr.msk.f32.gmra.mrb[198].mxu0 %vm1524_vm9, %v12351_v30  ;;  %7147 = vmatprep.mubr.msk.f32.mxu1 %vm7574_vm0, %v11795_v0 }
 0x269   : > { %7218 = vmatprep.mubr.msk.f32.mxu0 %vm7574_vm0, %v11795_v0  ;;  %v5089_v23 = vcombine.low %v12357_v26, %v12356_v51 }
 0x26a   : > { %v3485_v20 = vpop.f32.mrb[96].mxu1 }
 0x26b   : > { %v4184_v42 = vpop.f32.mrb[94].mxu0  ;;  %v3565_v32 = vadd.f32 %v3485_v20, %v10603_v2  ;;  %7148 = vmatmul.mubr.msk.f32.gmra.mrb[202].mxu1 %vm1524_vm9, %v5088_v61  ;;  %v6832_v14 = vpop.f32.mrb[97].mxu1  ;;  %v12359_v61 = vld [vmem:[#allocation121_spill] sm:$0xff] }
 0x26c   : > { %v10936_v63 = vadd.f32 %v4184_v42, %v3563_v46  ;;  %v6903_v12 = vpop.f32.mrb[95].mxu0  ;;  %7219 = vmatmul.mubr.msk.f32.gmra.mrb[200].mxu0 %vm1524_vm9, %v5430_v19  ;;  %7150 = vmatprep.mubr.msk.f32.mxu1 %vm7574_vm0, %v11795_v0  ;;  %v5090_v42 = vcombine.low %v12359_v61, %v12358_v35  ;;  %v12363_v14 = vld [vmem:[#allocation245_spill] sm:$0xff]  ;;  %v6269_v35 = vrot.slane %v10659_v36, 9  ;;  %v5058_v61 = vrot.slane %v10687_v39, 7 }
 0x26d   : > { %7221 = vmatprep.mubr.msk.f32.mxu0 %vm7574_vm0, %v11795_v0  ;;  %v5432_v12 = vcombine.low %v12361_v10, %v12360_v18  ;;  %v12367_v10 = vld [vmem:[#allocation180_spill] sm:$0xff] }
 0x26e   : > { %v3490_v46 = vpop.f32.mrb[98].mxu1 }
 0x26f   : > { %v4189_v30 = vpop.f32.mrb[96].mxu0  ;;  %v3566_v2 = vadd.f32 %v3490_v46, %v10619_v34  ;;  %7151 = vmatmul.mubr.msk.f32.gmra.mrb[204].mxu1 %vm1524_vm9, %v5089_v23  ;;  %v6835_v19 = vpop.f32.mrb[99].mxu1  ;;  %v12364_v23 = vld [vmem:[#allocation162_spill] sm:$0xff] }
 0x270   : > { %v10947_v59 = vadd.f32 %v4189_v30, %v3564_v31  ;;  %v6906_v54 = vpop.f32.mrb[97].mxu0  ;;  %7222 = vmatmul.mubr.msk.f32.gmra.mrb[202].mxu0 %vm1524_vm9, %v5431_v4  ;;  %7153 = vmatprep.mubr.msk.f32.mxu1 %vm7574_vm0, %v11795_v0  ;;  %v12365_v30 = vld [vmem:[#allocation142_spill] sm:$0xff] }
 0x271   : > { %7224 = vmatprep.mubr.msk.f32.mxu0 %vm7574_vm0, %v11795_v0  ;;  %v5091_v46 = vcombine.low %v12365_v30, %v12364_v23  ;;  %v12372_v30 = vld [vmem:[#allocation181_spill] sm:$0xff] }
 0x272   : > { %v3495_v31 = vpop.f32.mrb[100].mxu1 }
 0x273   : > { %v4194_v20 = vpop.f32.mrb[98].mxu0  ;;  %v3567_v51 = vadd.f32 %v3495_v31, %v10632_v27  ;;  %7154 = vmatmul.mubr.msk.f32.gmra.mrb[206].mxu1 %vm1524_vm9, %v5090_v42  ;;  %v6838_v26 = vpop.f32.mrb[101].mxu1  ;;  %v5055_v27 = vrot.slane %v10664_v13, 7 }
 0x274   : > { %v10960_v4 = vadd.f32 %v4194_v20, %v3565_v32  ;;  %v6909_v34 = vpop.f32.mrb[99].mxu0  ;;  %7225 = vmatmul.mubr.msk.f32.gmra.mrb[204].mxu0 %vm1524_vm9, %v12363_v14  ;;  %7156 = vmatprep.mubr.msk.f32.mxu1 %vm7574_vm0, %v11795_v0  ;;  %v5052_v32 = vrot.slane %v10683_v57, 7  ;;  %v12368_v57 = vld [vmem:[#allocation165_spill] sm:$0xff]  ;;  %v5061_v14 = vrot.slane %v10690_v37, 7  ;;  %v12370_v26 = vld [vmem:[#allocation128_spill] sm:$0xff] }
 0x275   : > { %7227 = vmatprep.mubr.msk.f32.mxu0 %vm7574_vm0, %v11795_v0  ;;  %v5092_v34 = vcombine.low %v12368_v57, %v12367_v10  ;;  %v5057_v57 = vrot.slane %v5055_v27, 2 }
 0x276   : > { %12362 = vst [vmem:[#allocation93_spill] sm:$0xff] %v10960_v4  ;;  %v3500_v19 = vpop.f32.mrb[102].mxu1  ;;  %v5054_v10 = vrot.slane %v5052_v32, 2 }
 0x277   : > { %v4199_v54 = vpop.f32.mrb[100].mxu0  ;;  %v3568_v31 = vadd.f32 %v3500_v19, %v10647_v55  ;;  %7157 = vmatmul.mubr.msk.f32.gmra.mrb[208].mxu1 %vm1524_vm9, %v5091_v46  ;;  %v6841_v18 = vpop.f32.mrb[103].mxu1  ;;  %v5095_v46 = vcombine.low %v10284_v48, %v10306_v17  ;;  %v5063_v17 = vrot.slane %v5061_v14, 2 }
 0x278   : > { %v10976_v42 = vadd.f32 %v4199_v54, %v3566_v2  ;;  %v6912_v20 = vpop.f32.mrb[101].mxu0  ;;  %7228 = vmatmul.mubr.msk.f32.gmra.mrb[206].mxu0 %vm1524_vm9, %v5432_v12  ;;  %7159 = vmatprep.mubr.msk.f32.mxu1 %vm7574_vm0, %v11795_v0  ;;  %v12369_v2 = vld [vmem:[#allocation164_spill] sm:$0xff]  ;;  %v5096_v54 = vcombine.low %v10318_v3, %v10322_v50  ;;  %v5053_v18 = vsel %vm7829_vm8, %v6269_v35, %v5052_v32  ;;  %v5064_v3 = vrot.slane %v10727_v56, 7 }
 0x279   : > { %7230 = vmatprep.mubr.msk.f32.mxu0 %vm7574_vm0, %v11795_v0  ;;  %v5433_v23 = vcombine.low %v12370_v26, %v12369_v2  ;;  %v12371_v12 = vld [vmem:[#allocation200_spill] sm:$0xff]  ;;  %v12373_v26 = vld [vmem:[#allocation201_spill] sm:$0xff]  ;;  %v5103_v35 = vrot.slane %v5095_v46, %v7799_v6 }
 0x27a   : > { %12366 = vst [vmem:[#allocation90_spill] sm:$0xff] %v10976_v42  ;;  %v5093_v55 = vcombine.low %v12372_v30, %v12371_v12  ;;  %v3505_v20 = vpop.f32.mrb[104].mxu1  ;;  %v5060_v42 = vrot.slane %v5058_v61, 2  ;;  %v12374_v50 = vld [vmem:[#allocation212_spill] sm:$0xff]  ;;  %v5110_v30 = vrot.slane %v5096_v54, %v7799_v6 }
 0x27b   : > { %v4204_v19 = vpop.f32.mrb[102].mxu0  ;;  %v3569_v12 = vadd.f32 %v3505_v20, %v10666_v38  ;;  %7160 = vmatmul.mubr.msk.f32.gmra.mrb[210].mxu1 %vm1524_vm9, %v5092_v34  ;;  %v6844_v48 = vpop.f32.mrb[105].mxu1  ;;  %v5112_v38 = vcombine.low %v10326_v60, %v10366_v8  ;;  %v5113_v20 = vcombine.low %v10370_v9, %v5053_v18  ;;  %v5065_v9 = vsel %vm7829_vm8, %v5063_v17, %v5064_v3 }
 0x27c   : > { %v10998_v4 = vadd.f32 %v4204_v19, %v3567_v51  ;;  %v6915_v2 = vpop.f32.mrb[103].mxu0  ;;  %7231 = vmatmul.mubr.msk.f32.gmra.mrb[208].mxu0 %vm1524_vm9, %v12373_v26  ;;  %7162 = vmatprep.mubr.msk.f32.mxu1 %vm7574_vm0, %v11795_v0  ;;  %v12375_v51 = vld [vmem:[#allocation203_spill] sm:$0xff]  ;;  %v5059_v26 = vsel %vm7829_vm8, %v5057_v57, %v5058_v61  ;;  %v5062_v48 = vsel %vm7829_vm8, %v5060_v42, %v5061_v14  ;;  %v5067_v61 = vrot.slane %v10723_v21, 7  ;;  %v12376_v42 = vld [vmem:[#allocation244_spill] sm:$0xff] }
 0x27d   : > { %7233 = vmatprep.mubr.msk.f32.mxu0 %vm7574_vm0, %v11795_v0  ;;  %v5094_v32 = vcombine.low %v12375_v51, %v12374_v50  ;;  %v5056_v2 = vsel %vm7829_vm8, %v5054_v10, %v5055_v27  ;;  %v11035_v27 = vcombine.high %v10723_v21, %v10723_v21  ;;  %v5120_v54 = vrot.slane %v5112_v38, %v7799_v6  ;;  %v12378_v51 = vld [vmem:[#allocation44_spill] sm:$0xff] }
 0x27e   : > { %v3510_v19 = vpop.f32.mrb[106].mxu1  ;;  %v5129_v18 = vcombine.low %v5056_v2, %v5059_v26  ;;  %v5130_v10 = vcombine.low %v5062_v48, %v5065_v9  ;;  %v12379_v26 = vld [vmem:[#allocation51_spill] sm:$0xff] }
 0x27f   : > { %v4209_v34 = vpop.f32.mrb[104].mxu0  ;;  %v3570_v60 = vadd.f32 %v3510_v19, %v10692_v41  ;;  %7163 = vmatmul.mubr.msk.f32.gmra.mrb[212].mxu1 %vm1524_vm9, %v5093_v55  ;;  %v6847_v8 = vpop.f32.mrb[107].mxu1  ;;  %v12377_v41 = vld [vmem:[#allocation187_spill] sm:$0xff]  ;;  %v5111_v55 = vcombine.low %v5103_v35, %v5110_v30  ;;  %v5066_v35 = vrot.slane %v5064_v3, 2  ;;  %v5070_v30 = vrot.slane %v11035_v27, 7 }
 0x280   : > { %v11022_v50 = vadd.f32 %v4209_v34, %v3568_v31  ;;  %v6918_v46 = vpop.f32.mrb[105].mxu0  ;;  %7234 = vmatmul.mubr.msk.f32.gmra.mrb[210].mxu0 %vm1524_vm9, %v5433_v23  ;;  %7165 = vmatprep.mubr.msk.f32.mxu1 %vm7574_vm0, %v11795_v0  ;;  %v5434_v31 = vcombine.low %v12377_v41, %v12376_v42  ;;  %v5144_v48 = vrot.slane %v5130_v10, %v7799_v6 }
 0x281   : > { %7236 = vmatprep.mubr.msk.f32.mxu0 %vm7574_vm0, %v11795_v0  ;;  %v5127_v46 = vrot.slane %v5113_v20, %v7799_v6  ;;  %v6296_v20 = vcombine.high %v10278_v11, %v10659_v36 }
 0x282   : > { %v3515_v23 = vpop.f32.mrb[108].mxu1 }
 0x283   : > { %v4214_v14 = vpop.f32.mrb[106].mxu0  ;;  %v3571_v34 = vadd.f32 %v3515_v23, %v10708_v28  ;;  %7166 = vmatmul.mubr.msk.f32.gmra.mrb[214].mxu1 %vm1524_vm9, %v5094_v32  ;;  %v6850_v19 = vpop.f32.mrb[109].mxu1  ;;  %v5435_v28 = vcombine.low %v9849_v25, %v12379_v26  ;;  %v5137_v32 = vrot.slane %v5129_v18, %v7799_v6  ;;  %v5128_v41 = vcombine.low %v5120_v54, %v5127_v46 }
 0x284   : > { %v11041_v57 = vadd.f32 %v4214_v14, %v3569_v12  ;;  %v6921_v17 = vpop.f32.mrb[107].mxu0  ;;  %7237 = vmatmul.mubr.msk.f32.gmra.mrb[212].mxu0 %vm1524_vm9, %v12378_v51  ;;  %7168 = vmatprep.mubr.msk.f32.mxu1 %vm7574_vm0, %v11795_v0  ;;  %v5069_v12 = vrot.slane %v5067_v61, 2  ;;  %v5068_v25 = vsel %vm7829_vm8, %v5066_v35, %v5067_v61  ;;  %v5445_v14 = vcombine.low %v10664_v13, %v10687_v39 }
 0x285   : > { %7239 = vmatprep.mubr.msk.f32.mxu0 %vm7574_vm0, %v11795_v0  ;;  %v5446_v23 = vcombine.low %v10690_v37, %v10727_v56 }
 0x286   : > { %v3520_v2 = vpop.f32.mrb[110].mxu1  ;;  %v5071_v11 = vsel %vm7829_vm8, %v5069_v12, %v5070_v30  ;;  %v5453_v56 = vrot.slane %v5445_v14, %v7799_v6 }
 0x287   : > { %v4219_v38 = vpop.f32.mrb[108].mxu0  ;;  %v3572_v3 = vadd.f32 %v3520_v2, %v10729_v29  ;;  %7169 = vmatmul.mubr.msk.f32.gmra.mrb[216].mxu1 %vm1524_vm9, %v5111_v55  ;;  %v6853_v42 = vpop.f32.mrb[111].mxu1  ;;  %v5443_v29 = vrot.slane %v6296_v20, %v7799_v6  ;;  %v5146_v18 = vcombine.low %v5068_v25, %v5071_v11  ;;  %v5460_v10 = vrot.slane %v5446_v23, %v7799_v6 }
 0x288   : > { %v11059_v8 = vadd.f32 %v4219_v38, %v3570_v60  ;;  %v6924_v9 = vpop.f32.mrb[109].mxu0  ;;  %7240 = vmatmul.mubr.msk.f32.gmra.mrb[214].mxu0 %vm1524_vm9, %v5434_v31  ;;  %7171 = vmatprep.mubr.msk.f32.mxu1 %vm7574_vm0, %v11795_v0  ;;  %v5145_v31 = vcombine.low %v5137_v32, %v5144_v48  ;;  %v5462_v38 = vcombine.low %v10723_v21, %v11035_v27 }
 0x289   : > { %7242 = vmatprep.mubr.msk.f32.mxu0 %vm7574_vm0, %v11795_v0  ;;  %v5444_v37 = vcombine.low %v10356_v7, %v5443_v29  ;;  %v5153_v19 = vrot.slane %v5146_v18, %v7799_v6  ;;  %v5461_v35 = vcombine.low %v5453_v56, %v5460_v10 }
 0x28a   : > { %v3525_v60 = vpop.f32.mrb[112].mxu1 }
 0x28b   : > { %v4224_v36 = vpop.f32.mrb[110].mxu0  ;;  %v3573_v61 = vadd.f32 %v3525_v60, %v10747_v58  ;;  %7172 = vmatmul.mubr.msk.f32.gmra.mrb[218].mxu1 %vm1524_vm9, %v5128_v41  ;;  %v6856_v53 = vpop.f32.mrb[113].mxu1 }
 0x28c   : > { %v11077_v55 = vadd.f32 %v4224_v36, %v3571_v34  ;;  %v6927_v54 = vpop.f32.mrb[111].mxu0  ;;  %7243 = vmatmul.mubr.msk.f32.gmra.mrb[216].mxu0 %vm1524_vm9, %v5435_v28  ;;  %7174 = vmatprep.mubr.msk.f32.mxu1 %vm7574_vm0, %v11795_v0 }
 0x28d   : > { %7245 = vmatprep.mubr.msk.f32.mxu0 %vm7574_vm0, %v11795_v0 }
 0x28e   : > { %v3530_v39 = vpop.f32.mrb[114].mxu1 }
 0x28f   : > { %v4229_v13 = vpop.f32.mrb[112].mxu0  ;;  %v3574_v51 = vadd.f32 %v3530_v39, %v10757_v44  ;;  %7175 = vmatmul.mubr.msk.f32.gmra.mrb[220].mxu1 %vm1524_vm9, %v5145_v31  ;;  %v6859_v34 = vpop.f32.mrb[115].mxu1 }
 0x290   : > { %v11089_v17 = vadd.f32 %v4229_v13, %v3572_v3  ;;  %v6930_v58 = vpop.f32.mrb[113].mxu0  ;;  %7246 = vmatmul.mubr.msk.f32.gmra.mrb[218].mxu0 %vm1524_vm9, %v10337_v1  ;;  %7177 = vmatprep.mubr.msk.f32.mxu1 %vm7574_vm0, %v11795_v0 }
 0x291   : > { %7248 = vmatprep.mubr.msk.f32.mxu0 %vm7574_vm0, %v11795_v0 }
 0x292   : > { %v3535_v46 = vpop.f32.mrb[116].mxu1 }
 0x293   : > { %v4234_v7 = vpop.f32.mrb[114].mxu0  ;;  %v3575_v1 = vadd.f32 %v3535_v46, %v10771_v15  ;;  %7178 = vmatmul.mubr.msk.f32.gmra.mrb[222].mxu1 %vm1524_vm9, %v5153_v19  ;;  %v6862_v44 = vpop.f32.mrb[117].mxu1  ;;  %v5469_v15 = vrot.slane %v5462_v38, %v7799_v6 }
 0x294   : > { %v11100_v12 = vadd.f32 %v4234_v7, %v3573_v61  ;;  %v6933_v30 = vpop.f32.mrb[115].mxu0  ;;  %7249 = vmatmul.mubr.msk.f32.gmra.mrb[220].mxu0 %vm1524_vm9, %v5444_v37 }
 0x295   : > { %7251 = vmatprep.mubr.msk.f32.mxu0 %vm7574_vm0, %v11795_v0 }
 0x296   : > { %v3540_v26 = vpop.f32.mrb[118].mxu1 }
 0x297   : > { %v4239_v2 = vpop.f32.mrb[116].mxu0  ;;  %v3576_v48 = vadd.f32 %v3540_v26, %v10784_v16  ;;  %v6865_v20 = vpop.f32.mrb[119].mxu1 }
 0x298   : > { %v11109_v28 = vadd.f32 %v4239_v2, %v3574_v51  ;;  %v6936_v32 = vpop.f32.mrb[117].mxu0  ;;  %7252 = vmatmul.mubr.msk.f32.gmra.mrb[222].mxu0 %vm1524_vm9, %v5461_v35 }
 0x299   : > { %7254 = vmatprep.mubr.msk.f32.mxu0 %vm7574_vm0, %v11795_v0 }
 0x29a   : > { %v3545_v21 = vpop.f32.mrb[120].mxu1 }
 0x29b   : > { %v4244_v9 = vpop.f32.mrb[118].mxu0  ;;  %v3577_v42 = vadd.f32 %v3545_v21, %v10796_v5  ;;  %v6868_v41 = vpop.f32.mrb[121].mxu1 }
 0x29c   : > { %v11116_v27 = vadd.f32 %v4244_v9, %v3575_v1  ;;  %v6939_v3 = vpop.f32.mrb[119].mxu0  ;;  %7255 = vmatmul.mubr.msk.f32.gmra.mrb[224].mxu0 %vm1524_vm9, %v5469_v15 }
 0x29e   : > { %v3550_v11 = vpop.f32.mrb[122].mxu1 }
 0x29f   : > { %v4249_v25 = vpop.f32.mrb[120].mxu0  ;;  %v3578_v6 = vadd.f32 %v3550_v11, %v10809_v22  ;;  %v6871_v60 = vpop.f32.mrb[123].mxu1 }
 0x2a0   : > { %v11120_v36 = vadd.f32 %v4249_v25, %v3576_v48  ;;  %v6942_v16 = vpop.f32.mrb[121].mxu0 }
 0x2a2   : > { %v4531_v0 = vpop.f32.mrb[124].mxu1 }
 0x2a3   : > { %v4254_v31 = vpop.f32.mrb[122].mxu0  ;;  %v4655_v23 = vadd.f32 %v4531_v0, %v10821_v24  ;;  %v6953_v54 = vpop.f32.mrb[125].mxu1 }
 0x2a4   : > { %v11123_v29 = vadd.f32 %v4254_v31, %v3577_v42  ;;  %v6945_v14 = vpop.f32.mrb[123].mxu0 }
 0x2a6   : > { %v4536_v53 = vpop.f32.mrb[126].mxu1 }
 0x2a7   : > { %v4259_v61 = vpop.f32.mrb[124].mxu0  ;;  %v4656_v13 = vadd.f32 %v4536_v53, %v10834_v43  ;;  %v6956_v39 = vpop.f32.mrb[127].mxu1 }
 0x2a8   : > { %v11126_v5 = vadd.f32 %v4259_v61, %v3578_v6  ;;  %v6948_v18 = vpop.f32.mrb[125].mxu0 }
 0x2aa   : > { %v4541_v56 = vpop.f32.mrb[128].mxu1 }
 0x2ab   : > { %v4900_v37 = vpop.f32.mrb[126].mxu0  ;;  %v4657_v58 = vadd.f32 %v4541_v56, %v10848_v45  ;;  %v6959_v51 = vpop.f32.mrb[129].mxu1 }
 0x2ac   : > { %v11129_v22 = vadd.f32 %v4900_v37, %v4655_v23  ;;  %v7030_v10 = vpop.f32.mrb[127].mxu0 }
 0x2ae   : > { %v4546_v19 = vpop.f32.mrb[130].mxu1 }
 0x2af   : > { %v4905_v34 = vpop.f32.mrb[128].mxu0  ;;  %v4658_v46 = vadd.f32 %v4546_v19, %v10859_v40  ;;  %v6962_v35 = vpop.f32.mrb[131].mxu1 }
 0x2b0   : > { %v11132_v24 = vadd.f32 %v4905_v34, %v4656_v13  ;;  %v7033_v7 = vpop.f32.mrb[129].mxu0 }
 0x2b2   : > { %v4551_v1 = vpop.f32.mrb[132].mxu1 }
 0x2b3   : > { %v4910_v30 = vpop.f32.mrb[130].mxu0  ;;  %v4659_v38 = vadd.f32 %v4551_v1, %v10872_v52  ;;  %v6965_v2 = vpop.f32.mrb[133].mxu1 }
 0x2b4   : > { %v11135_v43 = vadd.f32 %v4910_v30, %v4657_v58  ;;  %v7036_v44 = vpop.f32.mrb[131].mxu0  ;;  %v12381_v2 = vld [vmem:[#allocation90_spill] sm:$0xff] }
 0x2b6   : > { %v4556_v32 = vpop.f32.mrb[134].mxu1 }
 0x2b7   : > { %v4915_v26 = vpop.f32.mrb[132].mxu0  ;;  %v4660_v15 = vadd.f32 %v4556_v32, %v10884_v33  ;;  %v6968_v20 = vpop.f32.mrb[135].mxu1 }
 0x2b8   : > { %v11138_v45 = vadd.f32 %v4915_v26, %v4658_v46  ;;  %v7039_v48 = vpop.f32.mrb[133].mxu0  ;;  %v12380_v46 = vld [vmem:[#allocation93_spill] sm:$0xff] }
 0x2ba   : > { %v4561_v21 = vpop.f32.mrb[136].mxu1 }
 0x2bb   : > { %v4920_v9 = vpop.f32.mrb[134].mxu0  ;;  %v4661_v42 = vadd.f32 %v4561_v21, %v10897_v62  ;;  %v6971_v41 = vpop.f32.mrb[137].mxu1 }
 0x2bc   : > { %v11141_v40 = vadd.f32 %v4920_v9, %v4659_v38  ;;  %v7042_v3 = vpop.f32.mrb[135].mxu0 }
 0x2be   : > { %v4566_v11 = vpop.f32.mrb[138].mxu1 }
 0x2bf   : > { %v4925_v25 = vpop.f32.mrb[136].mxu0  ;;  %v4662_v6 = vadd.f32 %v4566_v11, %v10909_v47  ;;  %v6974_v60 = vpop.f32.mrb[139].mxu1 }
 0x2c0   : > { %v11144_v52 = vadd.f32 %v4925_v25, %v4660_v15  ;;  %v7045_v16 = vpop.f32.mrb[137].mxu0 }
 0x2c2   : > { %v4571_v0 = vpop.f32.mrb[140].mxu1 }
 0x2c3   : > { %v4930_v31 = vpop.f32.mrb[138].mxu0  ;;  %v4663_v23 = vadd.f32 %v4571_v0, %v10922_v49  ;;  %v6977_v54 = vpop.f32.mrb[141].mxu1 }
 0x2c4   : > { %v11147_v33 = vadd.f32 %v4930_v31, %v4661_v42  ;;  %v7048_v14 = vpop.f32.mrb[139].mxu0 }
 0x2c6   : > { %v4576_v53 = vpop.f32.mrb[142].mxu1 }
 0x2c7   : > { %v4935_v61 = vpop.f32.mrb[140].mxu0  ;;  %v4664_v13 = vadd.f32 %v4576_v53, %v10936_v63  ;;  %v6980_v39 = vpop.f32.mrb[143].mxu1 }
 0x2c8   : > { %v11150_v62 = vadd.f32 %v4935_v61, %v4662_v6  ;;  %v7051_v18 = vpop.f32.mrb[141].mxu0 }
 0x2ca   : > { %v4581_v56 = vpop.f32.mrb[144].mxu1 }
 0x2cb   : > { %v4940_v37 = vpop.f32.mrb[142].mxu0  ;;  %v4665_v58 = vadd.f32 %v4581_v56, %v10947_v59  ;;  %v6983_v51 = vpop.f32.mrb[145].mxu1 }
 0x2cc   : > { %v11153_v47 = vadd.f32 %v4940_v37, %v4663_v23  ;;  %v7054_v10 = vpop.f32.mrb[143].mxu0 }
 0x2ce   : > { %v4586_v19 = vpop.f32.mrb[146].mxu1 }
 0x2cf   : > { %v4945_v34 = vpop.f32.mrb[144].mxu0  ;;  %v4666_v35 = vadd.f32 %v4586_v19, %v12380_v46  ;;  %v6986_v30 = vpop.f32.mrb[147].mxu1 }
 0x2d0   : > { %v11156_v49 = vadd.f32 %v4945_v34, %v4664_v13  ;;  %v7057_v7 = vpop.f32.mrb[145].mxu0 }
 0x2d2   : > { %v4591_v44 = vpop.f32.mrb[148].mxu1 }
 0x2d3   : > { %v4950_v1 = vpop.f32.mrb[146].mxu0  ;;  %v4667_v26 = vadd.f32 %v4591_v44, %v12381_v2  ;;  %v6989_v32 = vpop.f32.mrb[149].mxu1 }
 0x2d4   : > { %v11159_v63 = vadd.f32 %v4950_v1, %v4665_v58  ;;  %v7060_v38 = vpop.f32.mrb[147].mxu0 }
 0x2d6   : > { %v4596_v15 = vpop.f32.mrb[150].mxu1 }
 0x2d7   : > { %v4955_v48 = vpop.f32.mrb[148].mxu0  ;;  %v4668_v9 = vadd.f32 %v4596_v15, %v10998_v4  ;;  %v6992_v21 = vpop.f32.mrb[151].mxu1 }
 0x2d8   : > { %v11162_v59 = vadd.f32 %v4955_v48, %v4666_v35  ;;  %v7063_v20 = vpop.f32.mrb[149].mxu0 }
 0x2da   : > { %v4601_v42 = vpop.f32.mrb[152].mxu1 }
 0x2db   : > { %v4960_v3 = vpop.f32.mrb[150].mxu0  ;;  %v4669_v11 = vadd.f32 %v4601_v42, %v11022_v50  ;;  %v6995_v16 = vpop.f32.mrb[153].mxu1 }
 0x2dc   : > { %v11165_v41 = vadd.f32 %v4960_v3, %v4667_v26  ;;  %v7066_v25 = vpop.f32.mrb[151].mxu0 }
 0x2de   : > { %v4606_v60 = vpop.f32.mrb[154].mxu1 }
 0x2df   : > { %v4965_v6 = vpop.f32.mrb[152].mxu0  ;;  %v4670_v14 = vadd.f32 %v4606_v60, %v11041_v57  ;;  %v6998_v23 = vpop.f32.mrb[155].mxu1 }
 0x2e0   : > { %v11168_v31 = vadd.f32 %v4965_v6, %v4668_v9  ;;  %v7069_v0 = vpop.f32.mrb[153].mxu0 }
 0x2e2   : > { %v4611_v61 = vpop.f32.mrb[156].mxu1 }
 0x2e3   : > { %v4970_v54 = vpop.f32.mrb[154].mxu0  ;;  %v4671_v18 = vadd.f32 %v4611_v61, %v11059_v8  ;;  %v7001_v13 = vpop.f32.mrb[157].mxu1 }
 0x2e4   : > { %v11171_v4 = vadd.f32 %v4970_v54, %v4669_v11  ;;  %v7072_v53 = vpop.f32.mrb[155].mxu0 }
 0x2e6   : > { %v4616_v37 = vpop.f32.mrb[158].mxu1 }
 0x2e7   : > { %v4975_v39 = vpop.f32.mrb[156].mxu0  ;;  %v4672_v10 = vadd.f32 %v4616_v37, %v11077_v55  ;;  %v7004_v58 = vpop.f32.mrb[159].mxu1 }
 0x2e8   : > { %v11174_v50 = vadd.f32 %v4975_v39, %v4670_v14  ;;  %v7075_v56 = vpop.f32.mrb[157].mxu0 }
 0x2ea   : > { %v4621_v34 = vpop.f32.mrb[160].mxu1 }
 0x2eb   : > { %v4980_v51 = vpop.f32.mrb[158].mxu0  ;;  %v4673_v7 = vadd.f32 %v4621_v34, %v11089_v17  ;;  %v7007_v46 = vpop.f32.mrb[161].mxu1 }
 0x2ec   : > { %v11177_v57 = vadd.f32 %v4980_v51, %v4671_v18  ;;  %v7078_v19 = vpop.f32.mrb[159].mxu0 }
 0x2ee   : > { %v4626_v30 = vpop.f32.mrb[162].mxu1 }
 0x2ef   : > { %v4985_v35 = vpop.f32.mrb[160].mxu0  ;;  %v4674_v44 = vadd.f32 %v4626_v30, %v11100_v12  ;;  %v7010_v38 = vpop.f32.mrb[163].mxu1 }
 0x2f0   : > { %v11180_v8 = vadd.f32 %v4985_v35, %v4672_v10  ;;  %v7081_v1 = vpop.f32.mrb[161].mxu0 }
 0x2f2   : > { %v4631_v26 = vpop.f32.mrb[164].mxu1 }
 0x2f3   : > { %v4990_v2 = vpop.f32.mrb[162].mxu0  ;;  %v4675_v48 = vadd.f32 %v4631_v26, %v11109_v28  ;;  %v7013_v15 = vpop.f32.mrb[165].mxu1 }
 0x2f4   : > { %v11183_v55 = vadd.f32 %v4990_v2, %v4673_v7  ;;  %v7084_v32 = vpop.f32.mrb[163].mxu0 }
 0x2f6   : > { %v4636_v9 = vpop.f32.mrb[166].mxu1 }
 0x2f7   : > { %v4995_v20 = vpop.f32.mrb[164].mxu0  ;;  %v4676_v3 = vadd.f32 %v4636_v9, %v11116_v27  ;;  %v7016_v42 = vpop.f32.mrb[167].mxu1 }
 0x2f8   : > { %v11186_v17 = vadd.f32 %v4995_v20, %v4674_v44  ;;  %v7087_v21 = vpop.f32.mrb[165].mxu0 }
 0x2fa   : > { %v4641_v11 = vpop.f32.mrb[168].mxu1 }
 0x2fb   : > { %v5000_v25 = vpop.f32.mrb[166].mxu0  ;;  %v4677_v6 = vadd.f32 %v4641_v11, %v11120_v36  ;;  %v7019_v60 = vpop.f32.mrb[169].mxu1 }
 0x2fc   : > { %v11189_v12 = vadd.f32 %v5000_v25, %v4675_v48  ;;  %v7090_v16 = vpop.f32.mrb[167].mxu0 }
 0x2fe   : > { %v4646_v14 = vpop.f32.mrb[170].mxu1 }
 0x2ff   : > { %v5005_v0 = vpop.f32.mrb[168].mxu0  ;;  %v4678_v54 = vadd.f32 %v4646_v14, %v11123_v29  ;;  %v7022_v61 = vpop.f32.mrb[171].mxu1 }
 0x300   : > { %v11192_v28 = vadd.f32 %v5005_v0, %v4676_v3  ;;  %v7093_v23 = vpop.f32.mrb[169].mxu0 }
 0x302   : > { %v4651_v18 = vpop.f32.mrb[172].mxu1 }
 0x303   : > { %v5010_v53 = vpop.f32.mrb[170].mxu0  ;;  %v4679_v39 = vadd.f32 %v4651_v18, %v11126_v5  ;;  %v7025_v37 = vpop.f32.mrb[173].mxu1  ;;  %v11205_v5 = vld [vmem:[#allocation7] ss:$0 sm:$0xff] }
 0x304   : > { %v11195_v27 = vadd.f32 %v5010_v53, %v4677_v6  ;;  %v7096_v13 = vpop.f32.mrb[171].mxu0 }
 0x306   : > { %v5273_v36 = vpop.f32.mrb[174].mxu1 }
 0x307   : > { %v5015_v56 = vpop.f32.mrb[172].mxu0  ;;  %v5397_v51 = vadd.f32 %v5273_v36, %v11129_v22  ;;  %v7107_v34 = vpop.f32.mrb[175].mxu1 }
 0x308   : > { %v11198_v10 = vadd.f32 %v5015_v56, %v4678_v54  ;;  %v7099_v58 = vpop.f32.mrb[173].mxu0 }
 0x30a   : > { %v5278_v29 = vpop.f32.mrb[176].mxu1 }
 0x30b   : > { %v5020_v19 = vpop.f32.mrb[174].mxu0  ;;  %v5398_v35 = vadd.f32 %v5278_v29, %v11132_v24  ;;  %v7110_v30 = vpop.f32.mrb[177].mxu1 }
 0x30c   : > { %v11201_v7 = vadd.f32 %v5020_v19, %v4679_v39  ;;  %v7102_v46 = vpop.f32.mrb[175].mxu0 }
 0x30e   : > { %v5283_v44 = vpop.f32.mrb[178].mxu1 }
 0x30f   : > { %v5569_v1 = vpop.f32.mrb[176].mxu0  ;;  %v5399_v26 = vadd.f32 %v5283_v44, %v11135_v43  ;;  %v7113_v32 = vpop.f32.mrb[179].mxu1 }
 0x310   : > { %v5693_v38 = vadd.f32 %v5569_v1, %v5397_v51  ;;  %v7184_v2 = vpop.f32.mrb[177].mxu0 }
 0x312   : > { %v5725_v22 = vadd.f32 %v11205_v5, %v5693_v38  ;;  %v5288_v15 = vpop.f32.mrb[180].mxu1 }
 0x313   : > { %v5574_v48 = vpop.f32.mrb[178].mxu0  ;;  %v5400_v24 = vadd.f32 %v5288_v15, %v11138_v45  ;;  %v7116_v3 = vpop.f32.mrb[181].mxu1 }
 0x314   : > { %v5750_v20 = vmax.f32 %v5725_v22, 0.0  ;;  %v5694_v9 = vadd.f32 %v5574_v48, %v5398_v35  ;;  %v7187_v21 = vpop.f32.mrb[179].mxu0 }
 0x316   : > { %5775 = vst [vmem:[%s11210_s23] sm:$0xff] %v5750_v20  ;;  %v5726_v42 = vadd.f32 %v11205_v5, %v5694_v9  ;;  %v5293_v43 = vpop.f32.mrb[182].mxu1  ;;  %v5831_v14 = vmul.f32 %v5750_v20, %v5750_v20 }
 0x317   : > { %v5579_v25 = vpop.f32.mrb[180].mxu0  ;;  %v5401_v60 = vadd.f32 %v5293_v43, %v11141_v40  ;;  %v7119_v0 = vpop.f32.mrb[183].mxu1 }
 0x318   : > { %v5751_v11 = vmax.f32 %v5726_v42, 0.0  ;;  %v5695_v16 = vadd.f32 %v5579_v25, %v5399_v26  ;;  %v7190_v6 = vpop.f32.mrb[181].mxu0 }
 0x31a   : > { %5776 = vst [vmem:[%s11210_s23 + $0x8] sm:$0xff] %v5751_v11  ;;  %v5800_v45 = vadd.f32 %v5751_v11, %v5750_v20  ;;  %v5832_v23 = vmul.f32 %v5751_v11, %v5751_v11  ;;  %v5727_v54 = vadd.f32 %v11205_v5, %v5695_v16  ;;  %v5298_v53 = vpop.f32.mrb[184].mxu1 }
 0x31b   : > { %v5584_v61 = vpop.f32.mrb[182].mxu0  ;;  %v5402_v56 = vadd.f32 %v5298_v53, %v11144_v52  ;;  %v7122_v36 = vpop.f32.mrb[185].mxu1 }
 0x31c   : > { %v5856_v18 = vadd.f32 %v5832_v23, %v5831_v14  ;;  %v5752_v13 = vmax.f32 %v5727_v54, 0.0  ;;  %v5696_v39 = vadd.f32 %v5584_v61, %v5400_v24  ;;  %v7193_v37 = vpop.f32.mrb[183].mxu0 }
 0x31e   : > { %5777 = vst [vmem:[%s11210_s23 + $0x10] sm:$0xff] %v5752_v13  ;;  %v5801_v58 = vadd.f32 %v5800_v45, %v5752_v13  ;;  %v5833_v40 = vmul.f32 %v5752_v13, %v5752_v13  ;;  %v5728_v51 = vadd.f32 %v11205_v5, %v5696_v39  ;;  %v5303_v19 = vpop.f32.mrb[186].mxu1 }
 0x31f   : > { %v5589_v34 = vpop.f32.mrb[184].mxu0  ;;  %v5403_v1 = vadd.f32 %v5303_v19, %v11147_v33  ;;  %v7125_v44 = vpop.f32.mrb[187].mxu1 }
 0x320   : > { %v5857_v29 = vadd.f32 %v5856_v18, %v5833_v40  ;;  %v5753_v46 = vmax.f32 %v5728_v51, 0.0  ;;  %v5697_v35 = vadd.f32 %v5589_v34, %v5401_v60  ;;  %v7196_v30 = vpop.f32.mrb[185].mxu0 }
 0x322   : > { %5778 = vst [vmem:[%s11210_s23 + $0x18] sm:$0xff] %v5753_v46  ;;  %v5802_v38 = vadd.f32 %v5801_v58, %v5753_v46  ;;  %v5834_v2 = vmul.f32 %v5753_v46, %v5753_v46  ;;  %v5729_v52 = vadd.f32 %v11205_v5, %v5697_v35  ;;  %v5308_v32 = vpop.f32.mrb[188].mxu1 }
 0x323   : > { %v5594_v26 = vpop.f32.mrb[186].mxu0  ;;  %v5404_v9 = vadd.f32 %v5308_v32, %v11150_v62  ;;  %v7128_v21 = vpop.f32.mrb[189].mxu1 }
 0x324   : > { %v5858_v22 = vadd.f32 %v5857_v29, %v5834_v2  ;;  %v5754_v48 = vmax.f32 %v5729_v52, 0.0  ;;  %v5698_v15 = vadd.f32 %v5594_v26, %v5402_v56  ;;  %v7199_v20 = vpop.f32.mrb[187].mxu0 }
 0x326   : > { %5779 = vst [vmem:[%s11210_s23 + $0x20] sm:$0xff] %v5754_v48  ;;  %v5803_v24 = vadd.f32 %v5802_v38, %v5754_v48  ;;  %v5835_v3 = vmul.f32 %v5754_v48, %v5754_v48  ;;  %v5730_v33 = vadd.f32 %v11205_v5, %v5698_v15  ;;  %v5313_v25 = vpop.f32.mrb[190].mxu1 }
 0x327   : > { %v5599_v42 = vpop.f32.mrb[188].mxu0  ;;  %v5405_v60 = vadd.f32 %v5313_v25, %v11153_v47  ;;  %v7131_v0 = vpop.f32.mrb[191].mxu1 }
 0x328   : > { %v5859_v43 = vadd.f32 %v5858_v22, %v5835_v3  ;;  %v5755_v11 = vmax.f32 %v5730_v33, 0.0  ;;  %v5699_v16 = vadd.f32 %v5599_v42, %v5403_v1  ;;  %v7202_v6 = vpop.f32.mrb[189].mxu0 }
 0x32a   : > { %5780 = vst [vmem:[%s11210_s23 + $0x28] sm:$0xff] %v5755_v11  ;;  %v5804_v14 = vadd.f32 %v5803_v24, %v5755_v11  ;;  %v5836_v45 = vmul.f32 %v5755_v11, %v5755_v11  ;;  %v5731_v62 = vadd.f32 %v11205_v5, %v5699_v16  ;;  %v5318_v54 = vpop.f32.mrb[192].mxu1 }
 0x32b   : > { %v5604_v23 = vpop.f32.mrb[190].mxu0  ;;  %v5406_v39 = vadd.f32 %v5318_v54, %v11156_v49  ;;  %v7134_v37 = vpop.f32.mrb[193].mxu1 }
 0x32c   : > { %v5860_v61 = vadd.f32 %v5859_v43, %v5836_v45  ;;  %v5756_v53 = vmax.f32 %v5731_v62, 0.0  ;;  %v5700_v18 = vadd.f32 %v5604_v23, %v5404_v9  ;;  %v7205_v13 = vpop.f32.mrb[191].mxu0 }
 0x32e   : > { %5781 = vst [vmem:[%s11210_s23 + $0x30] sm:$0xff] %v5756_v53  ;;  %v5805_v56 = vadd.f32 %v5804_v14, %v5756_v53  ;;  %v5837_v36 = vmul.f32 %v5756_v53, %v5756_v53  ;;  %v5732_v47 = vadd.f32 %v11205_v5, %v5700_v18  ;;  %v5323_v40 = vpop.f32.mrb[194].mxu1 }
 0x32f   : > { %v5609_v58 = vpop.f32.mrb[192].mxu0  ;;  %v5407_v46 = vadd.f32 %v5323_v40, %v11159_v63  ;;  %v7137_v35 = vpop.f32.mrb[195].mxu1 }
 0x330   : > { %v5861_v51 = vadd.f32 %v5860_v61, %v5837_v36  ;;  %v5757_v34 = vmax.f32 %v5732_v47, 0.0  ;;  %v5701_v19 = vadd.f32 %v5609_v58, %v5405_v60  ;;  %v7208_v29 = vpop.f32.mrb[193].mxu0 }
 0x332   : > { %5782 = vst [vmem:[%s11210_s23 + $0x38] sm:$0xff] %v5757_v34  ;;  %v5806_v30 = vadd.f32 %v5805_v56, %v5757_v34  ;;  %v5838_v1 = vmul.f32 %v5757_v34, %v5757_v34  ;;  %v5733_v49 = vadd.f32 %v11205_v5, %v5701_v19  ;;  %v5328_v38 = vpop.f32.mrb[196].mxu1 }
 0x333   : > { %v5614_v44 = vpop.f32.mrb[194].mxu0  ;;  %v5408_v22 = vadd.f32 %v5328_v38, %v11162_v59  ;;  %v7140_v48 = vpop.f32.mrb[197].mxu1 }
 0x334   : > { %v5862_v2 = vadd.f32 %v5861_v51, %v5838_v1  ;;  %v5758_v52 = vmax.f32 %v5733_v49, 0.0  ;;  %v5702_v26 = vadd.f32 %v5614_v44, %v5406_v39  ;;  %v7211_v32 = vpop.f32.mrb[195].mxu0 }
 0x336   : > { %5783 = vst [vmem:[%s11210_s23 + $0x40] sm:$0xff] %v5758_v52  ;;  %v5807_v15 = vadd.f32 %v5806_v30, %v5758_v52  ;;  %v5839_v20 = vmul.f32 %v5758_v52, %v5758_v52  ;;  %v5734_v63 = vadd.f32 %v11205_v5, %v5702_v26  ;;  %v5333_v21 = vpop.f32.mrb[198].mxu1 }
 0x337   : > { %v5619_v9 = vpop.f32.mrb[196].mxu0  ;;  %v5409_v25 = vadd.f32 %v5333_v21, %v11165_v41  ;;  %v7143_v43 = vpop.f32.mrb[199].mxu1 }
 0x338   : > { %v5863_v24 = vadd.f32 %v5862_v2, %v5839_v20  ;;  %v5759_v3 = vmax.f32 %v5734_v63, 0.0  ;;  %v5703_v33 = vadd.f32 %v5619_v9, %v5407_v46  ;;  %v7214_v42 = vpop.f32.mrb[197].mxu0 }
 0x33a   : > { %5784 = vst [vmem:[%s11210_s23 + $0x48] sm:$0xff] %v5759_v3  ;;  %v5808_v11 = vadd.f32 %v5807_v15, %v5759_v3  ;;  %v5840_v16 = vmul.f32 %v5759_v3, %v5759_v3  ;;  %v5735_v59 = vadd.f32 %v11205_v5, %v5703_v33  ;;  %v5338_v60 = vpop.f32.mrb[200].mxu1 }
 0x33b   : > { %v5624_v6 = vpop.f32.mrb[198].mxu0  ;;  %v5410_v23 = vadd.f32 %v5338_v60, %v11168_v31  ;;  %v7146_v54 = vpop.f32.mrb[201].mxu1 }
 0x33c   : > { %v5864_v0 = vadd.f32 %v5863_v24, %v5840_v16  ;;  %v5760_v14 = vmax.f32 %v5735_v59, 0.0  ;;  %v5704_v45 = vadd.f32 %v5624_v6, %v5408_v22  ;;  %v7217_v62 = vpop.f32.mrb[199].mxu0 }
 0x33e   : > { %5785 = vst [vmem:[%s11210_s23 + $0x50] sm:$0xff] %v5760_v14  ;;  %v5809_v61 = vadd.f32 %v5808_v11, %v5760_v14  ;;  %v5841_v53 = vmul.f32 %v5760_v14, %v5760_v14  ;;  %v5736_v41 = vadd.f32 %v11205_v5, %v5704_v45  ;;  %v5343_v13 = vpop.f32.mrb[202].mxu1 }
 0x33f   : > { %v5629_v18 = vpop.f32.mrb[200].mxu0  ;;  %v5411_v47 = vadd.f32 %v5343_v13, %v11171_v4  ;;  %v7149_v58 = vpop.f32.mrb[203].mxu1 }
 0x340   : > { %v5865_v39 = vadd.f32 %v5864_v0, %v5841_v53  ;;  %v5761_v37 = vmax.f32 %v5736_v41, 0.0  ;;  %v5705_v56 = vadd.f32 %v5629_v18, %v5409_v25  ;;  %v7220_v36 = vpop.f32.mrb[201].mxu0 }
 0x342   : > { %5786 = vst [vmem:[%s11210_s23 + $0x58] sm:$0xff] %v5761_v37  ;;  %v5810_v40 = vadd.f32 %v5809_v61, %v5761_v37  ;;  %v5842_v51 = vmul.f32 %v5761_v37, %v5761_v37  ;;  %v5737_v31 = vadd.f32 %v11205_v5, %v5705_v56  ;;  %v5348_v19 = vpop.f32.mrb[204].mxu1 }
 0x343   : > { %v5634_v34 = vpop.f32.mrb[202].mxu0  ;;  %v5412_v1 = vadd.f32 %v5348_v19, %v11174_v50  ;;  %v7152_v49 = vpop.f32.mrb[205].mxu1 }
 0x344   : > { %v5866_v29 = vadd.f32 %v5865_v39, %v5842_v51  ;;  %v5762_v46 = vmax.f32 %v5737_v31, 0.0  ;;  %v5706_v35 = vadd.f32 %v5634_v34, %v5410_v23  ;;  %v7223_v30 = vpop.f32.mrb[203].mxu0 }
 0x346   : > { %5787 = vst [vmem:[%s11210_s23 + $0x60] sm:$0xff] %v5762_v46  ;;  %v5811_v44 = vadd.f32 %v5810_v40, %v5762_v46  ;;  %v5843_v38 = vmul.f32 %v5762_v46, %v5762_v46  ;;  %v5738_v4 = vadd.f32 %v11205_v5, %v5706_v35  ;;  %v5353_v52 = vpop.f32.mrb[206].mxu1 }
 0x347   : > { %v5639_v2 = vpop.f32.mrb[204].mxu0  ;;  %v5413_v15 = vadd.f32 %v5353_v52, %v11177_v57  ;;  %v7155_v20 = vpop.f32.mrb[207].mxu1 }
 0x348   : > { %v5867_v26 = vadd.f32 %v5866_v29, %v5843_v38  ;;  %v5763_v32 = vmax.f32 %v5738_v4, 0.0  ;;  %v5707_v22 = vadd.f32 %v5639_v2, %v5411_v47  ;;  %v7226_v48 = vpop.f32.mrb[205].mxu0 }
 0x34a   : > { %5788 = vst [vmem:[%s11210_s23 + $0x68] sm:$0xff] %v5763_v32  ;;  %v5812_v63 = vadd.f32 %v5811_v44, %v5763_v32  ;;  %v5844_v9 = vmul.f32 %v5763_v32, %v5763_v32  ;;  %v5739_v50 = vadd.f32 %v11205_v5, %v5707_v22  ;;  %v5358_v24 = vpop.f32.mrb[208].mxu1 }
 0x34b   : > { %v5644_v21 = vpop.f32.mrb[206].mxu0  ;;  %v5414_v43 = vadd.f32 %v5358_v24, %v11180_v8  ;;  %v7158_v11 = vpop.f32.mrb[209].mxu1 }
 0x34c   : > { %v5868_v3 = vadd.f32 %v5867_v26, %v5844_v9  ;;  %v5764_v33 = vmax.f32 %v5739_v50, 0.0  ;;  %v5708_v42 = vadd.f32 %v5644_v21, %v5412_v1  ;;  %v7229_v25 = vpop.f32.mrb[207].mxu0 }
 0x34e   : > { %5789 = vst [vmem:[%s11210_s23 + $0x70] sm:$0xff] %v5764_v33  ;;  %v5813_v16 = vadd.f32 %v5812_v63, %v5764_v33  ;;  %v5845_v59 = vmul.f32 %v5764_v33, %v5764_v33  ;;  %v5740_v57 = vadd.f32 %v11205_v5, %v5708_v42  ;;  %v5363_v60 = vpop.f32.mrb[210].mxu1 }
 0x34f   : > { %v5649_v6 = vpop.f32.mrb[208].mxu0  ;;  %v5415_v23 = vadd.f32 %v5363_v60, %v11183_v55  ;;  %v7161_v54 = vpop.f32.mrb[211].mxu1 }
 0x350   : > { %v5869_v0 = vadd.f32 %v5868_v3, %v5845_v59  ;;  %v5765_v14 = vmax.f32 %v5740_v57, 0.0  ;;  %v5709_v45 = vadd.f32 %v5649_v6, %v5413_v15  ;;  %v7232_v62 = vpop.f32.mrb[209].mxu0 }
 0x352   : > { %5790 = vst [vmem:[%s11210_s23 + $0x78] sm:$0xff] %v5765_v14  ;;  %v5814_v61 = vadd.f32 %v5813_v16, %v5765_v14  ;;  %v5846_v53 = vmul.f32 %v5765_v14, %v5765_v14  ;;  %v5741_v8 = vadd.f32 %v11205_v5, %v5709_v45  ;;  %v5368_v18 = vpop.f32.mrb[212].mxu1 }
 0x353   : > { %v5654_v41 = vpop.f32.mrb[210].mxu0  ;;  %v5416_v36 = vadd.f32 %v5368_v18, %v11186_v17  ;;  %v7164_v47 = vpop.f32.mrb[213].mxu1 }
 0x354   : > { %v5870_v13 = vadd.f32 %v5869_v0, %v5846_v53  ;;  %v5766_v39 = vmax.f32 %v5741_v8, 0.0  ;;  %v5710_v37 = vadd.f32 %v5654_v41, %v5414_v43  ;;  %v7235_v56 = vpop.f32.mrb[211].mxu0 }
 0x356   : > { %5791 = vst [vmem:[%s11210_s23 + $0x80] sm:$0xff] %v5766_v39  ;;  %v5815_v58 = vadd.f32 %v5814_v61, %v5766_v39  ;;  %v5847_v40 = vmul.f32 %v5766_v39, %v5766_v39  ;;  %v5742_v55 = vadd.f32 %v11205_v5, %v5710_v37  ;;  %v5373_v31 = vpop.f32.mrb[214].mxu1 }
 0x357   : > { %v5659_v51 = vpop.f32.mrb[212].mxu0  ;;  %v5417_v35 = vadd.f32 %v5373_v31, %v11189_v12  ;;  %v7167_v30 = vpop.f32.mrb[215].mxu1 }
 0x358   : > { %v5871_v34 = vadd.f32 %v5870_v13, %v5847_v40  ;;  %v5767_v19 = vmax.f32 %v5742_v55, 0.0  ;;  %v5711_v29 = vadd.f32 %v5659_v51, %v5415_v23  ;;  %v7238_v46 = vpop.f32.mrb[213].mxu0 }
 0x35a   : > { %5792 = vst [vmem:[%s11210_s23 + $0x88] sm:$0xff] %v5767_v19  ;;  %v5816_v1 = vadd.f32 %v5815_v58, %v5767_v19  ;;  %v5848_v49 = vmul.f32 %v5767_v19, %v5767_v19  ;;  %v5743_v17 = vadd.f32 %v11205_v5, %v5711_v29  ;;  %v5378_v38 = vpop.f32.mrb[216].mxu1 }
 0x35b   : > { %v5664_v44 = vpop.f32.mrb[214].mxu0  ;;  %v5418_v32 = vadd.f32 %v5378_v38, %v11192_v28  ;;  %v7170_v22 = vpop.f32.mrb[217].mxu1 }
 0x35c   : > { %v5872_v4 = vadd.f32 %v5871_v34, %v5848_v49  ;;  %v5768_v2 = vmax.f32 %v5743_v17, 0.0  ;;  %v5712_v52 = vadd.f32 %v5664_v44, %v5416_v36  ;;  %v7241_v26 = vpop.f32.mrb[215].mxu0 }
 0x35e   : > { %5793 = vst [vmem:[%s11210_s23 + $0x90] sm:$0xff] %v5768_v2  ;;  %v5817_v48 = vadd.f32 %v5816_v1, %v5768_v2  ;;  %v5849_v15 = vmul.f32 %v5768_v2, %v5768_v2  ;;  %v5744_v12 = vadd.f32 %v11205_v5, %v5712_v52  ;;  %v5383_v63 = vpop.f32.mrb[218].mxu1 }
 0x35f   : > { %v5669_v20 = vpop.f32.mrb[216].mxu0  ;;  %v5419_v3 = vadd.f32 %v5383_v63, %v11195_v27  ;;  %v7173_v33 = vpop.f32.mrb[219].mxu1 }
 0x360   : > { %v5873_v9 = vadd.f32 %v5872_v4, %v5849_v15  ;;  %v5769_v50 = vmax.f32 %v5744_v12, 0.0  ;;  %v5713_v21 = vadd.f32 %v5669_v20, %v5417_v35  ;;  %v7244_v24 = vpop.f32.mrb[217].mxu0 }
 0x362   : > { %5794 = vst [vmem:[%s11210_s23 + $0x98] sm:$0xff] %v5769_v50  ;;  %v5818_v42 = vadd.f32 %v5817_v48, %v5769_v50  ;;  %v5850_v25 = vmul.f32 %v5769_v50, %v5769_v50  ;;  %v5745_v28 = vadd.f32 %v11205_v5, %v5713_v21  ;;  %v5388_v11 = vpop.f32.mrb[220].mxu1 }
 0x363   : > { %v5674_v43 = vpop.f32.mrb[218].mxu0  ;;  %v5420_v60 = vadd.f32 %v5388_v11, %v11198_v10  ;;  %v7176_v0 = vpop.f32.mrb[221].mxu1 }
 0x364   : > { %v5874_v16 = vadd.f32 %v5873_v9, %v5850_v25  ;;  %v5770_v59 = vmax.f32 %v5745_v28, 0.0  ;;  %v5714_v57 = vadd.f32 %v5674_v43, %v5418_v32  ;;  %v7247_v6 = vpop.f32.mrb[219].mxu0 }
 0x366   : > { %5795 = vst [vmem:[%s11210_s23 + $0xa0] sm:$0xff] %v5770_v59  ;;  %v5819_v14 = vadd.f32 %v5818_v42, %v5770_v59  ;;  %v5851_v45 = vmul.f32 %v5770_v59, %v5770_v59  ;;  %v5746_v27 = vadd.f32 %v11205_v5, %v5714_v57  ;;  %v5393_v23 = vpop.f32.mrb[222].mxu1 }
 0x367   : > { %v5679_v62 = vpop.f32.mrb[220].mxu0  ;;  %v5421_v41 = vadd.f32 %v5393_v23, %v11201_v7  ;;  %v7179_v18 = vpop.f32.mrb[223].mxu1 }
 0x368   : > { %v5875_v54 = vadd.f32 %v5874_v16, %v5851_v45  ;;  %v5771_v61 = vmax.f32 %v5746_v27, 0.0  ;;  %v5715_v53 = vadd.f32 %v5679_v62, %v5419_v3  ;;  %v7250_v8 = vpop.f32.mrb[221].mxu0 }
 0x36a   : > { %5796 = vst [vmem:[%s11210_s23 + $0xa8] sm:$0xff] %v5771_v61  ;;  %v5820_v13 = vadd.f32 %v5819_v14, %v5771_v61  ;;  %v5852_v10 = vmul.f32 %v5771_v61, %v5771_v61  ;;  %v5747_v39 = vadd.f32 %v11205_v5, %v5715_v53 }
 0x36b   : > { %v5684_v37 = vpop.f32.mrb[222].mxu0 }
 0x36c   : > { %v5876_v56 = vadd.f32 %v5875_v54, %v5852_v10  ;;  %v5772_v36 = vmax.f32 %v5747_v39, 0.0  ;;  %v5716_v47 = vadd.f32 %v5684_v37, %v5420_v60  ;;  %v7253_v58 = vpop.f32.mrb[223].mxu0 }
 0x36e   : > { %5797 = vst [vmem:[%s11210_s23 + $0xb0] sm:$0xff] %v5772_v36  ;;  %v5821_v40 = vadd.f32 %v5820_v13, %v5772_v36  ;;  %v5853_v55 = vmul.f32 %v5772_v36, %v5772_v36  ;;  %v5748_v51 = vadd.f32 %v11205_v5, %v5716_v47 }
 0x36f   : > { %v5689_v7 = vpop.f32.mrb[224].mxu0 }
 0x370   : > { %v5877_v31 = vadd.f32 %v5876_v56, %v5853_v55  ;;  %v5773_v34 = vmax.f32 %v5748_v51, 0.0  ;;  %v5717_v19 = vadd.f32 %v5689_v7, %v5421_v41  ;;  %v7256_v29 = vpop.f32.mrb[225].mxu0 }
 0x372   : > { %5798 = vst [vmem:[%s11210_s23 + $0xb8] sm:$0xff] %v5773_v34  ;;  %v5822_v46 = vadd.f32 %v5821_v40, %v5773_v34  ;;  %v5854_v35 = vmul.f32 %v5773_v34, %v5773_v34  ;;  %v5749_v30 = vadd.f32 %v11205_v5, %v5717_v19 }
 0x374   : > { %v5878_v1 = vadd.f32 %v5877_v31, %v5854_v35  ;;  %v5774_v49 = vmax.f32 %v5749_v30, 0.0 }
 0x376   : > { %5799 = vst [vmem:[%s11210_s23 + $0xc0] sm:$0xf] %v5774_v49  ;;  %v5823_v17 = vsel %vm1575_vm3, %v5774_v49, 0.0  ;;  %v5855_v44 = vmul.f32 %v5774_v49, %v5774_v49 }
 0x377   : > { %v5824_v38 = vadd.f32 %v5823_v17, %v5822_v46 }
 0x378   : > { %7475 = shalt.err (!%p7472_p2)
}
 0x379   : > { %s7476_s7 = scalar_lea.hbm %s11286_s20, 3200  ;;  %s7480_s11 = scalar_lea.hbm %s11370_s3, 6400 }
 0x37a   : > { %p7477_p13 = scmp.ne.s32.totalorder %s11286_s20, %s7476_s7  ;;  %p7481_p4 = scmp.lt.u32.totalorder %s11286_s20, %s11370_s3 }
 0x37b   : > { %p7482_p5 = scmp.lt.u32.totalorder %s7480_s11, %s7476_s7  ;;  %p7484_p11 = scmp.lt.u32.totalorder %s7476_s7, %s11286_s20 }
 0x37c   : > { %p7478_p6 = pnand %p7477_p13, %p12382_p0 }
 0x37d   : > { %p7483_p8 = por %p7482_p5, %p7481_p4 }
 0x37e   : > { %p7479_p10 = pneg %p7478_p6 }
 0x37f   : > { %p7485_p1 = por %p7484_p11, %p7483_p8 }
 0x381   : > { %p7486_p3 = pnand %p7485_p1, %p7479_p10 }
 0x383   : > { %7489 = shalt.err (!%p7486_p3)
}
 0x384   : > { %s7577_s29 = smov 128   ;;  %s7578_s6 = smov 8   ;;  %v5879_v5 = vsel %vm1575_vm3, %v5855_v44, 0.0  ;;  %v5825_v4 = vrot.slane %v5824_v38, 4 }
 0x385   : > { %7271 = dma.vmem_to_hbm [thread:$0]  (%p12382_p0), %s11288_s5, 3200, %s11286_s20, %s5890_s14, %s7577_s29, %s7577_s29, %s7578_s6   ;;  %v5880_v2 = vadd.f32 %v5879_v5, %v5878_v1 }
 0x386   : > { %v5826_v52 = vadd.f32 %v5825_v4, %v5824_v38  ;;  %s6057_s25 = sshll.u32 %s7778_s8, 1  ;;  %s6326_s28 = sshll.u32 %s7626_s19, 5 }
 0x387   : > { %v5881_v26 = vrot.slane %v5880_v2, 4  ;;  %s253_s24 = scalar_lea.vmem [#allocation9], %s6057_s25  ;;  %s11322_s14 = scalar_lea.hbm %s11371_s4, %s6326_s28 }
 0x388   : > { %v5827_v32 = vrot.slane %v5826_v52, 2  ;;  %s5924_s27 = sshll.u32 %s253_s24, 4  ;;  %s5895_s30 = scalar_lea.sflag [#allocation10], %s7778_s8  ;;  %s11324_s27 = int_to_ptr.vmem [resolvable:$true] %s5924_s27 }
 0x389   : > { %v5882_v22 = vadd.f32 %v5881_v26, %v5880_v2  ;;  %s7490_s7 = scalar_lea.vmem %s11324_s27, 32  ;;  %s7579_s19 = smov [#allocation9]  }
 0x38a   : > { %v5828_v48 = vadd.f32 %v5827_v32, %v5826_v52  ;;  %p7491_p7 = scmp.ne.s32.totalorder %s11324_s27, %s7490_s7  ;;  %s7494_s9 = sshll.u32 %s7579_s19, 4  ;;  %s7495_s9 = int_to_ptr.vmem [resolvable:$false] %s7494_s9 }
 0x38b   : > { %v5883_v15 = vrot.slane %v5882_v22, 2  ;;  %s7496_s26 = scalar_lea.vmem %s7495_s9, 64  ;;  %p7497_p2 = scmp.lt.s32.totalorder %s11324_s27, %s7495_s9 }
 0x38c   : > { %v5829_v12 = vrot.slane %v5828_v48, 1  ;;  %p7492_p9 = pnand %p7491_p7, %p12382_p0  ;;  %p7498_p13 = scmp.lt.s32.totalorder %s7496_s26, %s7490_s7 }
 0x38d   : > { %v5884_v20 = vadd.f32 %v5883_v15, %v5882_v22 }
 0x38e   : > { %v5830_v9 = vadd.f32 %v5829_v12, %v5828_v48  ;;  %p7493_p12 = pneg %p7492_p9  ;;  %p7499_p6 = por %p7498_p13, %p7497_p2 }
 0x38f   : > { %v5885_v63 = vrot.slane %v5884_v20, 1 }
 0x390   : > { %p7500_p10 = pnand %p7499_p6, %p7493_p12 }
 0x391   : > { %v5886_v50 = vadd.f32 %v5885_v63, %v5884_v20 }
 0x393   : > { %v5887_v21 = vsel %vm791_vm1, %v5830_v9, %v5886_v50 }
 0x394   : > { %5888 = vst [vmem:[%s253_s24] sm:$0x3] %v5887_v21 }
 0x395   : > { %7503 = shalt.err (!%p7500_p10)
}
 0x396   : > { %s7504_s8 = scalar_lea.hbm %s11322_s14, 32  ;;  %s7508_s23 = scalar_lea.hbm %s11371_s4, 64 }
 0x397   : > { %p7505_p4 = scmp.ne.s32.totalorder %s11322_s14, %s7504_s8  ;;  %p7509_p11 = scmp.lt.u32.totalorder %s11322_s14, %s11371_s4 }
 0x398   : > { %p7510_p1 = scmp.lt.u32.totalorder %s7508_s23, %s7504_s8  ;;  %p7512_p7 = scmp.lt.u32.totalorder %s7504_s8, %s11322_s14 }
 0x399   : > { %p7506_p5 = pnand %p7505_p4, %p12382_p0 }
 0x39a   : > { %p7511_p3 = por %p7510_p1, %p7509_p11 }
 0x39b   : > { %p7507_p8 = pneg %p7506_p5 }
 0x39c   : > { %p7513_p9 = por %p7512_p7, %p7511_p3 }
 0x39e   : > { %p7514_p12 = pnand %p7513_p9, %p7507_p8 }
 0x3a0   : > { %7517 = shalt.err (!%p7514_p12)
}
 0x3a1   : > { %7272 = dma.vmem_to_hbm [thread:$0]  (%p12382_p0), %s11324_s27, 32, %s11322_s14, %s5895_s30  }
 0x3a2 PF: > { %s5936_s25 = sand.u32 1, %s7552_s15   ;;  %p12383_p2 = scmp.ne.s32.totalorder %s11752_s22, 0 }
 0x3a3   : > { %p12384_p13 = scmp.ge.s32.totalorder %s7564_s18, 2  ;;  %s5937_s28 = scalar_lea.sflag [#allocation4], %s5936_s25 }
 0x3a5   : > { %p7287_p6 = pnand %p12384_p13, %p12383_p2 }
 0x3a7   : > { %7543 = dma.done.wait (!%p7287_p6), %s5937_s28, 3200  }
 0x3a8   : > { %7545 = vsyncadd (!%p7287_p6), %s5937_s28, 4294964096  ;;  %s5946_s24 = scalar_lea.sflag [#allocation10], %s5936_s25 }
 0x3a9   : > { %7547 = dma.done.wait (!%p7287_p6), %s5946_s24, 32  }
 0x3aa   : > { %7549 = vsyncadd (!%p7287_p6), %s5946_s24, 4294967264  ;;  %p22_p0 = scmp.ge.s32.totalorder %s7716_s10, 4   ;;  %s12385_s15 = smov %s7556_s16 }
 0x3ab   : > { %s12386_s16 = smov %s7560_s17  ;;  %s12387_s17 = smov %s7732_s13 }
 0x3ac   : > { %s12388_s18 = smov %s7716_s10  ;;  %24 = sbr.rel (!%p22_p0) target bundleno = 8 (0x8), region = 110 }
 0x3b3   :  { %5951 = vsyncpa [#allocation3], 1 }
 0x3b4   :  { %5953 = vsyncpa [#allocation3 + $0x1], 1 }
 0x3b5   :  { %5954 = vsyncpa [#allocation6], 1 }
 0x3b6   :  { %5955 = vsyncpa [#allocation4], 1 }
 0x3b7   :  { %5957 = vsyncpa [#allocation4 + $0x1], 1 }
 0x3b8   :  { %5958 = vsyncpa [#allocation10], 1 }
 0x3b9   :  { %5960 = vsyncpa [#allocation10 + $0x1], 1 }

</bundles_post_ra>
